<compile_context>
chip_gen: v5e
topology: v5e:2x2
jax: 0.10.0
libtpu: 0.0.40
codegen_flags: <defaults>
</compile_context>

<pallas_src>
import jax
import jax.numpy as jnp
from jax.experimental import pallas as pl
from jax.experimental.pallas import tpu as pltpu


# ----------------------------- Pallas kernels --------------------------------

def _conv_stack_kernel(taps_ref, w1_ref, b1_ref, w2_ref, b2_ref, out_ref, pp_ref):
    """Fused conv1(1->32,3x3,p1) + ReLU + maxpool2x2 + conv2(32->16,3x3,p1) + ReLU
    for a block of B images.

    taps_ref : (B, 1024, 9) bf16  conv1 taps; pixel axis = 4 pool-window blocks
                                  of 256 rows; row within a block is the PADDED
                                  pooled coordinate (i+1)*16+(j+1) (borders 0).
    w1_ref   : (9, 32)      bf16  conv1 weights [tap, cout]
    b1_ref   : (1, 32)      f32
    w2_ref   : (9, 32, 16)  bf16  conv2 weights [tap, cin, cout]
    b2_ref   : (1, 16)      f32
    out_ref  : (B, 256, 16) bf16  conv2 activation, row g=h*16+w (h,w<14 valid)
    pp_ref   : (B*256+64, 32) bf16 scratch: packed zero-padded pooled maps
    """
    B = out_ref.shape[0]
    M = B * 256

    # ---- conv1 on the MXU: one (B*1024, 9) x (9, 32) bf16 matmul -------------
    taps = taps_ref[...].reshape(B * 1024, 9)
    y = jnp.dot(taps, w1_ref[...], preferred_element_type=jnp.float32)
    y = y.reshape(B, 4, 256, 32)                                  # blk = pool pos

    # ---- maxpool 2x2 (3 elementwise maxes), bias, ReLU ------------------------
    # per-channel bias and ReLU commute with the window max.
    pooled = jnp.maximum(jnp.maximum(y[:, 0], y[:, 1]),
                         jnp.maximum(y[:, 2], y[:, 3]))           # (B, 256, 32)
    pooled = jnp.maximum(pooled + b1_ref[...], 0.0)

    # ---- zero the padding border via an iota validity mask -------------------
    # row p = a*16 + b is a valid pooled position iff 1 <= a,b <= 14; border
    # rows would otherwise hold relu(b1), but must be exact zeros for conv2.
    row = jax.lax.broadcasted_iota(jnp.int32, (256, 32), 0)
    ra, rb = row >> 4, row & 15
    valid = (ra >= 1) & (ra <= 14) & (rb >= 1) & (rb <= 14)       # (256, 32)
    pooled = jnp.where(valid[None], pooled, 0.0)

    # ---- one aligned store of the padded pooled maps; clear the 64-row tail --
    pp_ref[0:M, :] = pooled.reshape(M, 32).astype(pp_ref.dtype)
    pp_ref[M:M + 64, :] = jnp.zeros((64, 32), pp_ref.dtype)

    # ---- conv2 = 9 accumulating MXU matmuls over shifted slabs ----------------
    # Padded-row stride is 16, so tap (dy,dx) of every anchor g=h*16+w (for all
    # B images at once; per-image regions are 256 rows apart) is the contiguous
    # sublane window starting at dy*16+dx.  Invalid anchors (h>=14 or w>=14)
    # produce junk rows that are annihilated by zeroed fc1 weight rows.
    acc2 = jnp.zeros((M, 16), jnp.float32)
    for dy in range(3):
        for dx in range(3):
            t = dy * 3 + dx
            slab = pp_ref[dy * 16 + dx: dy * 16 + dx + M, :]      # (M, 32) bf16
            acc2 = acc2 + jnp.dot(slab, w2_ref[t],
                                  preferred_element_type=jnp.float32)
    out_ref[...] = jnp.maximum(acc2 + b2_ref[...], 0.0).reshape(
        B, 256, 16).astype(out_ref.dtype)


def _fc_stack_kernel(x_ref, w1_ref, b1_ref, w2_ref, b2_ref, w3_ref, b3_ref, o_ref):
    """fc1 -> ReLU -> fc2 -> ReLU -> fc3 for one M-tile; weights stay resident."""
    h = jnp.dot(x_ref[...], w1_ref[...],
                preferred_element_type=jnp.float32) + b1_ref[...]
    h = jnp.maximum(h, 0.0).astype(jnp.bfloat16)
    h = jnp.dot(h, w2_ref[...],
                preferred_element_type=jnp.float32) + b2_ref[...]
    h = jnp.maximum(h, 0.0).astype(jnp.bfloat16)
    o_ref[...] = (jnp.dot(h, w3_ref[...],
                          preferred_element_type=jnp.float32)
                  + b3_ref[...]).astype(o_ref.dtype)


# ----------------------------- pallas_call wrappers ---------------------------

def _pick_batch_block(n):
    """Largest block in {8,4,2,1} dividing n that still leaves >=2 grid steps
    (so both v7x TensorCores get work); otherwise any divisor."""
    for b in (8, 4, 2, 1):
        if n % b == 0 and n // b >= 2:
            return b
    for b in (8, 4, 2, 1):
        if n % b == 0:
            return b
    return 1


def conv_stack(taps, w1, b1, w2, b2, block_n):
    N = taps.shape[0]
    B = block_n
    return pl.pallas_call(
        _conv_stack_kernel,
        out_shape=jax.ShapeDtypeStruct((N, 256, 16), jnp.bfloat16),
        grid_spec=pltpu.PrefetchScalarGridSpec(
            num_scalar_prefetch=0,
            grid=(N // B,),
            in_specs=[
                pl.BlockSpec((B, 1024, 9), lambda n: (n, 0, 0)),
                pl.BlockSpec((9, 32), lambda n: (0, 0)),
                pl.BlockSpec((1, 32), lambda n: (0, 0)),
                pl.BlockSpec((9, 32, 16), lambda n: (0, 0, 0)),
                pl.BlockSpec((1, 16), lambda n: (0, 0)),
            ],
            out_specs=pl.BlockSpec((B, 256, 16), lambda n: (n, 0, 0)),
            scratch_shapes=[pltpu.VMEM((B * 256 + 64, 32), jnp.bfloat16)],
        ),
        compiler_params=pltpu.CompilerParams(
            dimension_semantics=("parallel",)),
    )(taps, w1, b1, w2, b2)


def fc_stack(x, w1, b1, w2, b2, w3, b3, *, block_m=256):
    M, K = x.shape
    TM = M if M <= block_m else block_m
    return pl.pallas_call(
        _fc_stack_kernel,
        out_shape=jax.ShapeDtypeStruct((M, 10), jnp.float32),
        grid_spec=pltpu.PrefetchScalarGridSpec(
            num_scalar_prefetch=0,
            grid=(pl.cdiv(M, TM),),
            in_specs=[
                pl.BlockSpec((TM, K), lambda m: (m, 0)),
                pl.BlockSpec((K, 512), lambda m: (0, 0)),    # weights: constant
                pl.BlockSpec((1, 512), lambda m: (0, 0)),    # index_map -> stay
                pl.BlockSpec((512, 128), lambda m: (0, 0)),  # VMEM resident
                pl.BlockSpec((1, 128), lambda m: (0, 0)),
                pl.BlockSpec((128, 10), lambda m: (0, 0)),
                pl.BlockSpec((1, 10), lambda m: (0, 0)),
            ],
            out_specs=pl.BlockSpec((TM, 10), lambda m: (m, 0)),
        ),
        compiler_params=pltpu.CompilerParams(
            dimension_semantics=("parallel",),
            vmem_limit_bytes=32 * 1024 * 1024),
    )(x, w1, b1, w2, b2, w3, b3)


# ----------------------------- params ----------------------------------------

def init_params(key):
    """Deterministic PyTorch-default-style (uniform +/- 1/sqrt(fan_in)) init."""
    ks = jax.random.split(key, 10)

    def u(k, shape, fan_in):
        bound = 1.0 / float(fan_in) ** 0.5
        return jax.random.uniform(k, shape, jnp.float32, -bound, bound)

    return {
        "conv1_w": u(ks[0], (32, 1, 3, 3), 1 * 9),
        "conv1_b": u(ks[1], (32,), 1 * 9),
        "conv2_w": u(ks[2], (16, 32, 3, 3), 32 * 9),
        "conv2_b": u(ks[3], (16,), 32 * 9),
        "fc1_w": u(ks[4], (512, 3136), 3136),   # PyTorch Linear: (out, in)
        "fc1_b": u(ks[5], (512,), 3136),
        "fc2_w": u(ks[6], (128, 512), 512),
        "fc2_b": u(ks[7], (128,), 512),
        "fc3_w": u(ks[8], (10, 128), 128),
        "fc3_b": u(ks[9], (10,), 128),
    }


def prepare_params(params):
    """One-time weight re-layout (outside the jitted forward).

    - conv weights go to tap-major bf16 layouts used by the fused conv kernel.
    - fc1 is permuted from NCHW-flatten order to the kernel's padded (h*16+w)*16+c
      order and zero-padded to K=4096 so kernel 1 can emit the full padded
      activation block (its junk rows hit zero weight rows).
    - fc weights are pre-transposed to (K, N) bf16; biases stay f32.
    """
    f32, bf16 = jnp.float32, jnp.bfloat16
    w1 = params["conv1_w"].reshape(32, 9).T.astype(bf16)               # (9, 32)
    w2 = jnp.transpose(params["conv2_w"], (2, 3, 1, 0)).reshape(9, 32, 16)
    fc1 = jnp.transpose(params["fc1_w"].reshape(512, 16, 14, 14),
                        (2, 3, 1, 0))                                  # [h,w,c,o]
    fc1 = jnp.pad(fc1, ((0, 2), (0, 2), (0, 0), (0, 0)))               # (16,16,16,512)
    return {
        "w1": w1,
        "b1": params["conv1_b"].reshape(1, 32).astype(f32),
        "w2": w2.astype(bf16),                                         # (9, 32, 16)
        "b2": params["conv2_b"].reshape(1, 16).astype(f32),
        "fc1_w": fc1.reshape(4096, 512).astype(bf16),                  # (4096, 512)
        "fc1_b": params["fc1_b"].reshape(1, 512).astype(f32),
        "fc2_w": params["fc2_w"].T.astype(bf16),                       # (512, 128)
        "fc2_b": params["fc2_b"].reshape(1, 128).astype(f32),
        "fc3_w": params["fc3_w"].T.astype(bf16),                       # (128, 10)
        "fc3_b": params["fc3_b"].reshape(1, 10).astype(f32),
    }


# ----------------------------- forward ----------------------------------------

def convnet_forward(x_nchw, prep):
    N, Cin, H, W = x_nchw.shape
    assert (Cin, H, W) == (1, 28, 28), "fc1 expects 3136 = 16*14*14 features"

    # Tiny XLA glue on the 28x28x1 input: build the 9 conv1 taps with the pixel
    # axis ordered as 4 pool-window blocks of 256, where the row inside a block
    # is already the PADDED pooled coordinate (i+1)*16+(j+1) (border rows 0), so
    # kernel 1 needs no in-kernel scatter.  Taps are bf16 (half the HBM read).
    # TODO(synk): form the taps in-kernel from the raw padded image (sublane
    # slices + pltpu.roll) to drop this per-forward XLA relayout entirely.
    ximg = x_nchw[:, 0].astype(jnp.float32)                      # (N, 28, 28)
    xpad = jnp.pad(ximg, ((0, 0), (1, 1), (1, 1)))               # (N, 30, 30)
    sh = jnp.stack([xpad[:, dy:dy + 28, dx:dx + 28]
                    for dy in range(3) for dx in range(3)], axis=-1)  # (N,28,28,9)
    t6 = sh.reshape(N, 14, 2, 14, 2, 9)                          # [n,i,r,j,s,t]
    t6 = jnp.transpose(t6, (0, 2, 4, 1, 3, 5))                   # [n,r,s,i,j,t]
    t6 = jnp.pad(t6, ((0, 0), (0, 0), (0, 0), (1, 1), (1, 1), (0, 0)))
    taps = t6.reshape(N, 1024, 9).astype(jnp.bfloat16)           # (N, 1024, 9)

    # Kernel 1: conv1+relu+pool+conv2+relu, padded bf16 activation per image.
    act = conv_stack(taps, prep["w1"], prep["b1"], prep["w2"], prep["b2"],
                     _pick_batch_block(N))                       # (N, 256, 16)
    flat = act.reshape(N, 4096)                                  # pure reshape

    # Kernel 2: fused fc1->relu->fc2->relu->fc3 (weights already (K,N) bf16).
    return fc_stack(flat, prep["fc1_w"], prep["fc1_b"],
                    prep["fc2_w"], prep["fc2_b"],
                    prep["fc3_w"], prep["fc3_b"])


# ----------------------------- reference (pure JAX) ----------------------------

def convnet_reference(x_nchw, params):
    def conv(x, w, b):
        y = jax.lax.conv_general_dilated(
            x, w, window_strides=(1, 1), padding="SAME",
            dimension_numbers=("NCHW", "OIHW", "NCHW"))
        return y + b[None, :, None, None]

    x = conv(x_nchw.astype(jnp.float32), params["conv1_w"], params["conv1_b"])
    x = jnp.maximum(x, 0.0)
    N, C, H, W = x.shape
    x = x.reshape(N, C, H // 2, 2, W // 2, 2).max(axis=(3, 5))
    x = conv(x, params["conv2_w"], params["conv2_b"])
    x = jnp.maximum(x, 0.0)
    x = x.reshape(N, -1)
    x = jnp.maximum(x @ params["fc1_w"].T + params["fc1_b"], 0.0)
    x = jnp.maximum(x @ params["fc2_w"].T + params["fc2_b"], 0.0)
    return x @ params["fc3_w"].T + params["fc3_b"]


# ----------------------------- main --------------------------------------------

if __name__ == "__main__":
    key = jax.random.PRNGKey(0)
    kx, kp = jax.random.split(key)

    # fc1 expects 3136 = 16*14*14 features -> input must be (N, 1, 28, 28)
    x = jax.random.normal(kx, (2, 1, 28, 28), dtype=jnp.float32)
    params = init_params(kp)
    prep = prepare_params(params)           # one-time weight re-layout + bf16 cast

    fwd = jax.jit(convnet_forward)
    out = jax.block_until_ready(fwd(x, prep))
    assert out.shape == (2, 10) and out.dtype == jnp.float32

    ref = jax.block_until_ready(convnet_reference(x, params))
    # bf16 taps/weights with f32 accumulation vs f32 reference.
    assert jnp.allclose(out, ref, rtol=3e-2, atol=3e-2), "mismatch vs reference"

    print("KERNEL_OK")
</pallas_src>

<mosaic_0001>
module attributes {stable_mosaic.version = 11 : i64} {
  func.func @_conv_stack_kernel(%arg0: i32, %arg1: memref<1x1024x9xbf16, #tpu.memory_space<vmem>>, %arg2: memref<9x32xbf16, #tpu.memory_space<vmem>>, %arg3: memref<1x32xf32, #tpu.memory_space<vmem>>, %arg4: memref<9x32x16xbf16, #tpu.memory_space<vmem>>, %arg5: memref<1x16xf32, #tpu.memory_space<vmem>>, %arg6: memref<1x256x16xbf16, #tpu.memory_space<vmem>>, %arg7: memref<320x32xbf16, #tpu.memory_space<vmem>>) attributes {dimension_semantics = [#tpu.dimension_semantics<parallel>], iteration_bounds = array<i64: 2>, scalar_prefetch = 0 : i64, scratch_operands = 1 : i64, tpu.core_type = #tpu.core_type<tc>, window_params = [{transform_indices = @transform_0, window_bounds = array<i64: 1, 1024, 9>}, {pipeline_mode = #tpu.pipeline_mode<synchronous>, transform_indices = @transform_1, window_bounds = array<i64: 9, 32>}, {pipeline_mode = #tpu.pipeline_mode<synchronous>, transform_indices = @transform_2, window_bounds = array<i64: 1, 32>}, {pipeline_mode = #tpu.pipeline_mode<synchronous>, transform_indices = @transform_3, window_bounds = array<i64: 9, 32, 16>}, {pipeline_mode = #tpu.pipeline_mode<synchronous>, transform_indices = @transform_4, window_bounds = array<i64: 1, 16>}, {transform_indices = @transform_5, window_bounds = array<i64: 1, 256, 16>}]} {
    %c0 = arith.constant 0 : index
    %c0_0 = arith.constant 0 : index
    %c0_1 = arith.constant 0 : index
    %0 = vector.load %arg1[%c0, %c0_0, %c0_1] : memref<1x1024x9xbf16, #tpu.memory_space<vmem>>, vector<1x1024x9xbf16>
    %1 = vector.shape_cast %0 : vector<1x1024x9xbf16> to vector<1024x9xbf16>
    %c0_2 = arith.constant 0 : index
    %c0_3 = arith.constant 0 : index
    %2 = vector.load %arg2[%c0_2, %c0_3] : memref<9x32xbf16, #tpu.memory_space<vmem>>, vector<9x32xbf16>
    %cst = arith.constant dense<0.000000e+00> : vector<1024x32xf32>
    %3 = tpu.matmul %1, %2, %cst {dimension_numbers = #tpu.dot_dimension_numbers<[1], [0], [0], [1], [0, 0, 1, 1], [], []>} : vector<1024x9xbf16>, vector<9x32xbf16>, vector<1024x32xf32> -> vector<1024x32xf32>
    %4 = vector.shape_cast %3 : vector<1024x32xf32> to vector<1x4x256x32xf32>
    %5 = vector.extract_strided_slice %4 {offsets = [0, 0, 0, 0], sizes = [1, 1, 256, 32], strides = [1, 1, 1, 1]} : vector<1x4x256x32xf32> to vector<1x1x256x32xf32>
    %6 = vector.shape_cast %5 : vector<1x1x256x32xf32> to vector<1x256x32xf32>
    %7 = vector.extract_strided_slice %4 {offsets = [0, 1, 0, 0], sizes = [1, 1, 256, 32], strides = [1, 1, 1, 1]} : vector<1x4x256x32xf32> to vector<1x1x256x32xf32>
    %8 = vector.shape_cast %7 : vector<1x1x256x32xf32> to vector<1x256x32xf32>
    %9 = arith.maximumf %6, %8 : vector<1x256x32xf32>
    %10 = vector.extract_strided_slice %4 {offsets = [0, 2, 0, 0], sizes = [1, 1, 256, 32], strides = [1, 1, 1, 1]} : vector<1x4x256x32xf32> to vector<1x1x256x32xf32>
    %11 = vector.shape_cast %10 : vector<1x1x256x32xf32> to vector<1x256x32xf32>
    %12 = vector.extract_strided_slice %4 {offsets = [0, 3, 0, 0], sizes = [1, 1, 256, 32], strides = [1, 1, 1, 1]} : vector<1x4x256x32xf32> to vector<1x1x256x32xf32>
    %13 = vector.shape_cast %12 : vector<1x1x256x32xf32> to vector<1x256x32xf32>
    %14 = arith.maximumf %11, %13 : vector<1x256x32xf32>
    %15 = arith.maximumf %9, %14 : vector<1x256x32xf32>
    %c0_4 = arith.constant 0 : index
    %c0_5 = arith.constant 0 : index
    %16 = vector.load %arg3[%c0_4, %c0_5] : memref<1x32xf32, #tpu.memory_space<vmem>>, vector<1x32xf32>
    %17 = vector.shape_cast %16 : vector<1x32xf32> to vector<1x1x32xf32>
    %18 = vector.broadcast %17 : vector<1x1x32xf32> to vector<1x256x32xf32>
    %19 = arith.addf %15, %18 : vector<1x256x32xf32>
    %cst_6 = arith.constant 0.000000e+00 : f32
    %20 = vector.broadcast %cst_6 : f32 to vector<1x256x32xf32>
    %21 = arith.maximumf %19, %20 : vector<1x256x32xf32>
    %22 = tpu.iota {dimensions = array<i32: 0>} : vector<256x32xi32>
    %c4_i32 = arith.constant 4 : i32
    %23 = vector.broadcast %c4_i32 : i32 to vector<256x32xi32>
    %24 = arith.shrsi %22, %23 : vector<256x32xi32>
    %c15_i32 = arith.constant 15 : i32
    %25 = vector.broadcast %c15_i32 : i32 to vector<256x32xi32>
    %26 = arith.andi %22, %25 : vector<256x32xi32>
    %c1_i32 = arith.constant 1 : i32
    %27 = vector.broadcast %c1_i32 : i32 to vector<256x32xi32>
    %28 = arith.cmpi sge, %24, %27 : vector<256x32xi32>
    %c14_i32 = arith.constant 14 : i32
    %29 = vector.broadcast %c14_i32 : i32 to vector<256x32xi32>
    %30 = arith.cmpi sle, %24, %29 : vector<256x32xi32>
    %31 = arith.andi %28, %30 : vector<256x32xi1>
    %c1_i32_7 = arith.constant 1 : i32
    %32 = vector.broadcast %c1_i32_7 : i32 to vector<256x32xi32>
    %33 = arith.cmpi sge, %26, %32 : vector<256x32xi32>
    %34 = arith.andi %31, %33 : vector<256x32xi1>
    %c14_i32_8 = arith.constant 14 : i32
    %35 = vector.broadcast %c14_i32_8 : i32 to vector<256x32xi32>
    %36 = arith.cmpi sle, %26, %35 : vector<256x32xi32>
    %37 = arith.andi %34, %36 : vector<256x32xi1>
    %38 = vector.shape_cast %37 : vector<256x32xi1> to vector<1x256x32xi1>
    %cst_9 = arith.constant 0.000000e+00 : f32
    %39 = vector.broadcast %cst_9 : f32 to vector<1x256x32xf32>
    %40 = arith.select %38, %21, %39 : vector<1x256x32xi1>, vector<1x256x32xf32>
    %41 = vector.shape_cast %40 : vector<1x256x32xf32> to vector<256x32xf32>
    %42 = arith.truncf %41 : vector<256x32xf32> to vector<256x32xbf16>
    %c0_10 = arith.constant 0 : index
    %c0_11 = arith.constant 0 : index
    %43 = vector.load %arg7[%c0_10, %c0_11] : memref<320x32xbf16, #tpu.memory_space<vmem>>, vector<256x32xbf16>
    tpu.vector_store %arg7[%c0_10, %c0_11], %42 {strides = array<i32>} : memref<320x32xbf16, #tpu.memory_space<vmem>>, vector<256x32xbf16>,
    %cst_12 = arith.constant 0.000000e+00 : bf16
    %44 = vector.broadcast %cst_12 : bf16 to vector<64x32xbf16>
    %c256 = arith.constant 256 : index
    %c0_13 = arith.constant 0 : index
    %45 = vector.load %arg7[%c256, %c0_13] : memref<320x32xbf16, #tpu.memory_space<vmem>>, vector<64x32xbf16>
    tpu.vector_store %arg7[%c256, %c0_13], %44 {strides = array<i32>} : memref<320x32xbf16, #tpu.memory_space<vmem>>, vector<64x32xbf16>,
    %cst_14 = arith.constant 0.000000e+00 : f32
    %46 = vector.broadcast %cst_14 : f32 to vector<256x16xf32>
    %c0_15 = arith.constant 0 : index
    %c0_16 = arith.constant 0 : index
    %47 = vector.load %arg7[%c0_15, %c0_16] : memref<320x32xbf16, #tpu.memory_space<vmem>>, vector<256x32xbf16>
    %c0_17 = arith.constant 0 : index
    %c0_18 = arith.constant 0 : index
    %c0_19 = arith.constant 0 : index
    %48 = vector.load %arg4[%c0_17, %c0_18, %c0_19] : memref<9x32x16xbf16, #tpu.memory_space<vmem>>, vector<1x32x16xbf16>
    %49 = vector.shape_cast %48 : vector<1x32x16xbf16> to vector<32x16xbf16>
    %cst_20 = arith.constant dense<0.000000e+00> : vector<256x16xf32>
    %50 = tpu.matmul %47, %49, %cst_20 {dimension_numbers = #tpu.dot_dimension_numbers<[1], [0], [0], [1], [0, 0, 1, 1], [], []>} : vector<256x32xbf16>, vector<32x16xbf16>, vector<256x16xf32> -> vector<256x16xf32>
    %51 = arith.addf %46, %50 : vector<256x16xf32>
    %c1 = arith.constant 1 : index
    %c0_21 = arith.constant 0 : index
    %52 = vector.load %arg7[%c1, %c0_21] : memref<320x32xbf16, #tpu.memory_space<vmem>>, vector<256x32xbf16>
    %c1_22 = arith.constant 1 : index
    %c0_23 = arith.constant 0 : index
    %c0_24 = arith.constant 0 : index
    %53 = vector.load %arg4[%c1_22, %c0_23, %c0_24] : memref<9x32x16xbf16, #tpu.memory_space<vmem>>, vector<1x32x16xbf16>
    %54 = vector.shape_cast %53 : vector<1x32x16xbf16> to vector<32x16xbf16>
    %cst_25 = arith.constant dense<0.000000e+00> : vector<256x16xf32>
    %55 = tpu.matmul %52, %54, %cst_25 {dimension_numbers = #tpu.dot_dimension_numbers<[1], [0], [0], [1], [0, 0, 1, 1], [], []>} : vector<256x32xbf16>, vector<32x16xbf16>, vector<256x16xf32> -> vector<256x16xf32>
    %56 = arith.addf %51, %55 : vector<256x16xf32>
    %c2 = arith.constant 2 : index
    %c0_26 = arith.constant 0 : index
    %57 = vector.load %arg7[%c2, %c0_26] : memref<320x32xbf16, #tpu.memory_space<vmem>>, vector<256x32xbf16>
    %c2_27 = arith.constant 2 : index
    %c0_28 = arith.constant 0 : index
    %c0_29 = arith.constant 0 : index
    %58 = vector.load %arg4[%c2_27, %c0_28, %c0_29] : memref<9x32x16xbf16, #tpu.memory_space<vmem>>, vector<1x32x16xbf16>
    %59 = vector.shape_cast %58 : vector<1x32x16xbf16> to vector<32x16xbf16>
    %cst_30 = arith.constant dense<0.000000e+00> : vector<256x16xf32>
    %60 = tpu.matmul %57, %59, %cst_30 {dimension_numbers = #tpu.dot_dimension_numbers<[1], [0], [0], [1], [0, 0, 1, 1], [], []>} : vector<256x32xbf16>, vector<32x16xbf16>, vector<256x16xf32> -> vector<256x16xf32>
    %61 = arith.addf %56, %60 : vector<256x16xf32>
    %c16 = arith.constant 16 : index
    %c0_31 = arith.constant 0 : index
    %62 = vector.load %arg7[%c16, %c0_31] : memref<320x32xbf16, #tpu.memory_space<vmem>>, vector<256x32xbf16>
    %c3 = arith.constant 3 : index
    %c0_32 = arith.constant 0 : index
    %c0_33 = arith.constant 0 : index
    %63 = vector.load %arg4[%c3, %c0_32, %c0_33] : memref<9x32x16xbf16, #tpu.memory_space<vmem>>, vector<1x32x16xbf16>
    %64 = vector.shape_cast %63 : vector<1x32x16xbf16> to vector<32x16xbf16>
    %cst_34 = arith.constant dense<0.000000e+00> : vector<256x16xf32>
    %65 = tpu.matmul %62, %64, %cst_34 {dimension_numbers = #tpu.dot_dimension_numbers<[1], [0], [0], [1], [0, 0, 1, 1], [], []>} : vector<256x32xbf16>, vector<32x16xbf16>, vector<256x16xf32> -> vector<256x16xf32>
    %66 = arith.addf %61, %65 : vector<256x16xf32>
    %c17 = arith.constant 17 : index
    %c0_35 = arith.constant 0 : index
    %67 = vector.load %arg7[%c17, %c0_35] : memref<320x32xbf16, #tpu.memory_space<vmem>>, vector<256x32xbf16>
    %c4 = arith.constant 4 : index
    %c0_36 = arith.constant 0 : index
    %c0_37 = arith.constant 0 : index
    %68 = vector.load %arg4[%c4, %c0_36, %c0_37] : memref<9x32x16xbf16, #tpu.memory_space<vmem>>, vector<1x32x16xbf16>
    %69 = vector.shape_cast %68 : vector<1x32x16xbf16> to vector<32x16xbf16>
    %cst_38 = arith.constant dense<0.000000e+00> : vector<256x16xf32>
    %70 = tpu.matmul %67, %69, %cst_38 {dimension_numbers = #tpu.dot_dimension_numbers<[1], [0], [0], [1], [0, 0, 1, 1], [], []>} : vector<256x32xbf16>, vector<32x16xbf16>, vector<256x16xf32> -> vector<256x16xf32>
    %71 = arith.addf %66, %70 : vector<256x16xf32>
    %c18 = arith.constant 18 : index
    %c0_39 = arith.constant 0 : index
    %72 = vector.load %arg7[%c18, %c0_39] : memref<320x32xbf16, #tpu.memory_space<vmem>>, vector<256x32xbf16>
    %c5 = arith.constant 5 : index
    %c0_40 = arith.constant 0 : index
    %c0_41 = arith.constant 0 : index
    %73 = vector.load %arg4[%c5, %c0_40, %c0_41] : memref<9x32x16xbf16, #tpu.memory_space<vmem>>, vector<1x32x16xbf16>
    %74 = vector.shape_cast %73 : vector<1x32x16xbf16> to vector<32x16xbf16>
    %cst_42 = arith.constant dense<0.000000e+00> : vector<256x16xf32>
    %75 = tpu.matmul %72, %74, %cst_42 {dimension_numbers = #tpu.dot_dimension_numbers<[1], [0], [0], [1], [0, 0, 1, 1], [], []>} : vector<256x32xbf16>, vector<32x16xbf16>, vector<256x16xf32> -> vector<256x16xf32>
    %76 = arith.addf %71, %75 : vector<256x16xf32>
    %c32 = arith.constant 32 : index
    %c0_43 = arith.constant 0 : index
    %77 = vector.load %arg7[%c32, %c0_43] : memref<320x32xbf16, #tpu.memory_space<vmem>>, vector<256x32xbf16>
    %c6 = arith.constant 6 : index
    %c0_44 = arith.constant 0 : index
    %c0_45 = arith.constant 0 : index
    %78 = vector.load %arg4[%c6, %c0_44, %c0_45] : memref<9x32x16xbf16, #tpu.memory_space<vmem>>, vector<1x32x16xbf16>
    %79 = vector.shape_cast %78 : vector<1x32x16xbf16> to vector<32x16xbf16>
    %cst_46 = arith.constant dense<0.000000e+00> : vector<256x16xf32>
    %80 = tpu.matmul %77, %79, %cst_46 {dimension_numbers = #tpu.dot_dimension_numbers<[1], [0], [0], [1], [0, 0, 1, 1], [], []>} : vector<256x32xbf16>, vector<32x16xbf16>, vector<256x16xf32> -> vector<256x16xf32>
    %81 = arith.addf %76, %80 : vector<256x16xf32>
    %c33 = arith.constant 33 : index
    %c0_47 = arith.constant 0 : index
    %82 = vector.load %arg7[%c33, %c0_47] : memref<320x32xbf16, #tpu.memory_space<vmem>>, vector<256x32xbf16>
    %c7 = arith.constant 7 : index
    %c0_48 = arith.constant 0 : index
    %c0_49 = arith.constant 0 : index
    %83 = vector.load %arg4[%c7, %c0_48, %c0_49] : memref<9x32x16xbf16, #tpu.memory_space<vmem>>, vector<1x32x16xbf16>
    %84 = vector.shape_cast %83 : vector<1x32x16xbf16> to vector<32x16xbf16>
    %cst_50 = arith.constant dense<0.000000e+00> : vector<256x16xf32>
    %85 = tpu.matmul %82, %84, %cst_50 {dimension_numbers = #tpu.dot_dimension_numbers<[1], [0], [0], [1], [0, 0, 1, 1], [], []>} : vector<256x32xbf16>, vector<32x16xbf16>, vector<256x16xf32> -> vector<256x16xf32>
    %86 = arith.addf %81, %85 : vector<256x16xf32>
    %c34 = arith.constant 34 : index
    %c0_51 = arith.constant 0 : index
    %87 = vector.load %arg7[%c34, %c0_51] : memref<320x32xbf16, #tpu.memory_space<vmem>>, vector<256x32xbf16>
    %c8 = arith.constant 8 : index
    %c0_52 = arith.constant 0 : index
    %c0_53 = arith.constant 0 : index
    %88 = vector.load %arg4[%c8, %c0_52, %c0_53] : memref<9x32x16xbf16, #tpu.memory_space<vmem>>, vector<1x32x16xbf16>
    %89 = vector.shape_cast %88 : vector<1x32x16xbf16> to vector<32x16xbf16>
    %cst_54 = arith.constant dense<0.000000e+00> : vector<256x16xf32>
    %90 = tpu.matmul %87, %89, %cst_54 {dimension_numbers = #tpu.dot_dimension_numbers<[1], [0], [0], [1], [0, 0, 1, 1], [], []>} : vector<256x32xbf16>, vector<32x16xbf16>, vector<256x16xf32> -> vector<256x16xf32>
    %91 = arith.addf %86, %90 : vector<256x16xf32>
    %c0_55 = arith.constant 0 : index
    %c0_56 = arith.constant 0 : index
    %92 = vector.load %arg5[%c0_55, %c0_56] : memref<1x16xf32, #tpu.memory_space<vmem>>, vector<1x16xf32>
    %93 = vector.broadcast %92 : vector<1x16xf32> to vector<256x16xf32>
    %94 = arith.addf %91, %93 : vector<256x16xf32>
    %cst_57 = arith.constant 0.000000e+00 : f32
    %95 = vector.broadcast %cst_57 : f32 to vector<256x16xf32>
    %96 = arith.maximumf %94, %95 : vector<256x16xf32>
    %97 = vector.shape_cast %96 : vector<256x16xf32> to vector<1x256x16xf32>
    %98 = arith.truncf %97 : vector<1x256x16xf32> to vector<1x256x16xbf16>
    %c0_58 = arith.constant 0 : index
    %c0_59 = arith.constant 0 : index
    %c0_60 = arith.constant 0 : index
    %99 = vector.load %arg6[%c0_58, %c0_59, %c0_60] : memref<1x256x16xbf16, #tpu.memory_space<vmem>>, vector<1x256x16xbf16>
    tpu.vector_store %arg6[%c0_58, %c0_59, %c0_60], %98 {strides = array<i32>} : memref<1x256x16xbf16, #tpu.memory_space<vmem>>, vector<1x256x16xbf16>,
    return
  }
  func.func @transform_0(%arg0: i32) -> (i32, i32, i32) {
    %c0_i32 = arith.constant 0 : i32
    %c0_i32_0 = arith.constant 0 : i32
    %c0_i32_1 = arith.constant 0 : i32
    return %arg0, %c0_i32, %c0_i32_0 : i32, i32, i32
  }
  func.func @transform_1(%arg0: i32) -> (i32, i32) {
    %c0_i32 = arith.constant 0 : i32
    %c0_i32_0 = arith.constant 0 : i32
    %c0_i32_1 = arith.constant 0 : i32
    return %c0_i32, %c0_i32_0 : i32, i32
  }
  func.func @transform_2(%arg0: i32) -> (i32, i32) {
    %c0_i32 = arith.constant 0 : i32
    %c0_i32_0 = arith.constant 0 : i32
    %c0_i32_1 = arith.constant 0 : i32
    return %c0_i32, %c0_i32_0 : i32, i32
  }
  func.func @transform_3(%arg0: i32) -> (i32, i32, i32) {
    %c0_i32 = arith.constant 0 : i32
    %c0_i32_0 = arith.constant 0 : i32
    %c0_i32_1 = arith.constant 0 : i32
    %c0_i32_2 = arith.constant 0 : i32
    return %c0_i32, %c0_i32_0, %c0_i32_1 : i32, i32, i32
  }
  func.func @transform_4(%arg0: i32) -> (i32, i32) {
    %c0_i32 = arith.constant 0 : i32
    %c0_i32_0 = arith.constant 0 : i32
    %c0_i32_1 = arith.constant 0 : i32
    return %c0_i32, %c0_i32_0 : i32, i32
  }
  func.func @transform_5(%arg0: i32) -> (i32, i32, i32) {
    %c0_i32 = arith.constant 0 : i32
    %c0_i32_0 = arith.constant 0 : i32
    %c0_i32_1 = arith.constant 0 : i32
    return %arg0, %c0_i32, %c0_i32_0 : i32, i32, i32
  }
}

module attributes {stable_mosaic.version = 11 : i64} {
  func.func @_fc_stack_kernel(%arg0: i32, %arg1: memref<2x4096xbf16, #tpu.memory_space<vmem>>, %arg2: memref<4096x512xbf16, #tpu.memory_space<vmem>>, %arg3: memref<1x512xf32, #tpu.memory_space<vmem>>, %arg4: memref<512x128xbf16, #tpu.memory_space<vmem>>, %arg5: memref<1x128xf32, #tpu.memory_space<vmem>>, %arg6: memref<128x10xbf16, #tpu.memory_space<vmem>>, %arg7: memref<1x10xf32, #tpu.memory_space<vmem>>, %arg8: memref<2x10xf32, #tpu.memory_space<vmem>>) attributes {dimension_semantics = [#tpu.dimension_semantics<parallel>], iteration_bounds = array<i64: 1>, scalar_prefetch = 0 : i64, scratch_operands = 0 : i64, tpu.core_type = #tpu.core_type<tc>, window_params = [{transform_indices = @transform_0, window_bounds = array<i64: 2, 4096>}, {pipeline_mode = #tpu.pipeline_mode<synchronous>, transform_indices = @transform_1, window_bounds = array<i64: 4096, 512>}, {pipeline_mode = #tpu.pipeline_mode<synchronous>, transform_indices = @transform_2, window_bounds = array<i64: 1, 512>}, {pipeline_mode = #tpu.pipeline_mode<synchronous>, transform_indices = @transform_3, window_bounds = array<i64: 512, 128>}, {pipeline_mode = #tpu.pipeline_mode<synchronous>, transform_indices = @transform_4, window_bounds = array<i64: 1, 128>}, {pipeline_mode = #tpu.pipeline_mode<synchronous>, transform_indices = @transform_5, window_bounds = array<i64: 128, 10>}, {pipeline_mode = #tpu.pipeline_mode<synchronous>, transform_indices = @transform_6, window_bounds = array<i64: 1, 10>}, {transform_indices = @transform_7, window_bounds = array<i64: 2, 10>}]} {
    %c0 = arith.constant 0 : index
    %c0_0 = arith.constant 0 : index
    %0 = vector.load %arg1[%c0, %c0_0] : memref<2x4096xbf16, #tpu.memory_space<vmem>>, vector<2x4096xbf16>
    %c0_1 = arith.constant 0 : index
    %c0_2 = arith.constant 0 : index
    %1 = vector.load %arg2[%c0_1, %c0_2] : memref<4096x512xbf16, #tpu.memory_space<vmem>>, vector<4096x512xbf16>
    %cst = arith.constant dense<0.000000e+00> : vector<2x512xf32>
    %2 = tpu.matmul %0, %1, %cst {dimension_numbers = #tpu.dot_dimension_numbers<[1], [0], [0], [1], [0, 0, 1, 1], [], []>} : vector<2x4096xbf16>, vector<4096x512xbf16>, vector<2x512xf32> -> vector<2x512xf32>
    %c0_3 = arith.constant 0 : index
    %c0_4 = arith.constant 0 : index
    %3 = vector.load %arg3[%c0_3, %c0_4] : memref<1x512xf32, #tpu.memory_space<vmem>>, vector<1x512xf32>
    %4 = vector.broadcast %3 : vector<1x512xf32> to vector<2x512xf32>
    %5 = arith.addf %2, %4 : vector<2x512xf32>
    %cst_5 = arith.constant 0.000000e+00 : f32
    %6 = vector.broadcast %cst_5 : f32 to vector<2x512xf32>
    %7 = arith.maximumf %5, %6 : vector<2x512xf32>
    %8 = arith.truncf %7 : vector<2x512xf32> to vector<2x512xbf16>
    %c0_6 = arith.constant 0 : index
    %c0_7 = arith.constant 0 : index
    %9 = vector.load %arg4[%c0_6, %c0_7] : memref<512x128xbf16, #tpu.memory_space<vmem>>, vector<512x128xbf16>
    %cst_8 = arith.constant dense<0.000000e+00> : vector<2x128xf32>
    %10 = tpu.matmul %8, %9, %cst_8 {dimension_numbers = #tpu.dot_dimension_numbers<[1], [0], [0], [1], [0, 0, 1, 1], [], []>} : vector<2x512xbf16>, vector<512x128xbf16>, vector<2x128xf32> -> vector<2x128xf32>
    %c0_9 = arith.constant 0 : index
    %c0_10 = arith.constant 0 : index
    %11 = vector.load %arg5[%c0_9, %c0_10] : memref<1x128xf32, #tpu.memory_space<vmem>>, vector<1x128xf32>
    %12 = vector.broadcast %11 : vector<1x128xf32> to vector<2x128xf32>
    %13 = arith.addf %10, %12 : vector<2x128xf32>
    %cst_11 = arith.constant 0.000000e+00 : f32
    %14 = vector.broadcast %cst_11 : f32 to vector<2x128xf32>
    %15 = arith.maximumf %13, %14 : vector<2x128xf32>
    %16 = arith.truncf %15 : vector<2x128xf32> to vector<2x128xbf16>
    %c0_12 = arith.constant 0 : index
    %c0_13 = arith.constant 0 : index
    %17 = vector.load %arg6[%c0_12, %c0_13] : memref<128x10xbf16, #tpu.memory_space<vmem>>, vector<128x10xbf16>
    %cst_14 = arith.constant dense<0.000000e+00> : vector<2x10xf32>
    %18 = tpu.matmul %16, %17, %cst_14 {dimension_numbers = #tpu.dot_dimension_numbers<[1], [0], [0], [1], [0, 0, 1, 1], [], []>} : vector<2x128xbf16>, vector<128x10xbf16>, vector<2x10xf32> -> vector<2x10xf32>
    %c0_15 = arith.constant 0 : index
    %c0_16 = arith.constant 0 : index
    %19 = vector.load %arg7[%c0_15, %c0_16] : memref<1x10xf32, #tpu.memory_space<vmem>>, vector<1x10xf32>
    %20 = vector.broadcast %19 : vector<1x10xf32> to vector<2x10xf32>
    %21 = arith.addf %18, %20 : vector<2x10xf32>
    %c0_17 = arith.constant 0 : index
    %c0_18 = arith.constant 0 : index
    %22 = vector.load %arg8[%c0_17, %c0_18] : memref<2x10xf32, #tpu.memory_space<vmem>>, vector<2x10xf32>
    tpu.vector_store %arg8[%c0_17, %c0_18], %21 {strides = array<i32>} : memref<2x10xf32, #tpu.memory_space<vmem>>, vector<2x10xf32>,
    return
  }
  func.func @transform_0(%arg0: i32) -> (i32, i32) {
    %c0_i32 = arith.constant 0 : i32
    %c0_i32_0 = arith.constant 0 : i32
    return %arg0, %c0_i32 : i32, i32
  }
  func.func @transform_1(%arg0: i32) -> (i32, i32) {
    %c0_i32 = arith.constant 0 : i32
    %c0_i32_0 = arith.constant 0 : i32
    %c0_i32_1 = arith.constant 0 : i32
    return %c0_i32, %c0_i32_0 : i32, i32
  }
  func.func @transform_2(%arg0: i32) -> (i32, i32) {
    %c0_i32 = arith.constant 0 : i32
    %c0_i32_0 = arith.constant 0 : i32
    %c0_i32_1 = arith.constant 0 : i32
    return %c0_i32, %c0_i32_0 : i32, i32
  }
  func.func @transform_3(%arg0: i32) -> (i32, i32) {
    %c0_i32 = arith.constant 0 : i32
    %c0_i32_0 = arith.constant 0 : i32
    %c0_i32_1 = arith.constant 0 : i32
    return %c0_i32, %c0_i32_0 : i32, i32
  }
  func.func @transform_4(%arg0: i32) -> (i32, i32) {
    %c0_i32 = arith.constant 0 : i32
    %c0_i32_0 = arith.constant 0 : i32
    %c0_i32_1 = arith.constant 0 : i32
    return %c0_i32, %c0_i32_0 : i32, i32
  }
  func.func @transform_5(%arg0: i32) -> (i32, i32) {
    %c0_i32 = arith.constant 0 : i32
    %c0_i32_0 = arith.constant 0 : i32
    %c0_i32_1 = arith.constant 0 : i32
    return %c0_i32, %c0_i32_0 : i32, i32
  }
  func.func @transform_6(%arg0: i32) -> (i32, i32) {
    %c0_i32 = arith.constant 0 : i32
    %c0_i32_0 = arith.constant 0 : i32
    %c0_i32_1 = arith.constant 0 : i32
    return %c0_i32, %c0_i32_0 : i32, i32
  }
  func.func @transform_7(%arg0: i32) -> (i32, i32) {
    %c0_i32 = arith.constant 0 : i32
    %c0_i32_0 = arith.constant 0 : i32
    return %arg0, %c0_i32 : i32, i32
  }
}

</mosaic_0001>

<bundles_post_ra>
// kernel: convnet_forward.2
= control target key start
LH: loop header
LB: loop body
LE: loop exit
PB: predicated region body
PF: predicated region fallthrough
CT: control target
= control target key end

     0   :  { %s5795_s18 = smov 0   ;;  %s7250_s0 = inlined_call_operand.vmem [shape: bf16[2,1024,9], index: 0, kind: input, shape index: {}]   ;;  %s7251_s1 = inlined_call_operand.vmem [shape: bf16[9,32], index: 1, kind: input, shape index: {}]   ;;  %s7252_s2 = inlined_call_operand.vmem [shape: f32[1,32], index: 2, kind: input, shape index: {}]   ;;  %s7253_s3 = inlined_call_operand.vmem [shape: bf16[9,32,16], index: 3, kind: input, shape index: {}]   ;;  %s7254_s4 = inlined_call_operand.vmem [shape: f32[1,16], index: 4, kind: input, shape index: {}]   ;;  %s7255_s5 = inlined_call_operand.vmem [shape: bf16[2,256,16], index: 5, kind: output, shape index: {}]  }
   0x1 LB: > { %s4663_s19 = sadd.s32 4294967295, %s5761_s18   ;;  %p4667_p0 = scmp.ge.s32.totalorder %s5761_s18, 1  ;;  %s5761_s18 = sphi %s5795_s18, %s15_s18  }
   0x2   : > { %p187_p1 = scmp.lt.s32.totalorder %s5761_s18, 3 }
   0x4   : > { %p188_p2 = pnand %p4667_p0, %p187_p1 }
   0x6   : > { %191 = sbr.rel (%p188_p2) target bundleno = 1861 (0x745), region = 40 }
   0xb   : > { %v4930_v0 = vld [vmem:[%s7251_s1] sm:$0xf]  ;;  %v5620_v1 = vld [vmem:[%s7251_s1] sm:$0x10]  ;;  %vm874_vm0 = vcmask 1043456   ;;  %vm875_vm1 = vcmask 1044480  }
   0xc   : > { %v4931_v2 = vor.u32 %v5620_v1, %v4930_v0  ;;  %p215_p3 = scmp.lt.s32.totalorder %s4663_s19, 1  ;;  %v5763_v3 = vmov 65535   ;;  %vm681_vm2 = vcmask 72704   ;;  %vm1759_vm10 = vcmask 257024  }
   0xd   : > { %v876_v4 = vsel %vm874_vm0, 4294967295, %v5763_v3 }
   0xe   : > { %v877_v5 = vsel %vm875_vm1, %v876_v4, 0  ;;  %s7383_s19 = smov (!%p215_p3, %s4663_s19), 1 }
   0xf   : > { %v879_v6 = vand.u32 %v4931_v2, %v877_v5  ;;  %s5554_s24 = sshll.u32 %s7383_s19, 9 }
  0x10   : > { %s5815_s27 = scalar_lea.vmem %s7250_s0, %s5554_s24  ;;  %s5555_s24 = sshll.u32 %s7383_s19, 7 }
  0x11   : > { %888 = vmatpush.bf16.msra.mxu0 %v879_v6  ;;  %5739 = vmatpush.bf16.msra.mxu1 %v879_v6  ;;  %v5556_v7 = vld [vmem:[%s5815_s27] sm:$0xff]  ;;  %v5557_v8 = vld [vmem:[%s5815_s27 + $0x8] sm:$0xff]  ;;  %v5558_v9 = vld [vmem:[%s5815_s27 + $0x10] sm:$0xff] }
  0x12   : > { %5740 = vmatpush.bf16.msra.mxu2 %v879_v6  ;;  %5741 = vmatpush.bf16.msra.mxu3 %v879_v6  ;;  %v5559_v10 = vld [vmem:[%s5815_s27 + $0x18] sm:$0xff]  ;;  %v5560_v11 = vld [vmem:[%s5815_s27 + $0x20] sm:$0xff]  ;;  %v5561_v12 = vld [vmem:[%s5815_s27 + $0x28] sm:$0xff] }
  0x13   : > { %v5562_v13 = vld [vmem:[%s5815_s27 + $0x30] sm:$0xff]  ;;  %v5563_v14 = vld [vmem:[%s5815_s27 + $0x38] sm:$0xff]  ;;  %v5564_v15 = vld [vmem:[%s5815_s27 + $0x40] sm:$0xff] }
  0x14   : > { %4932 = vmatmul.msk.bf16.vlgmr.msra.gmra.mxu0 %vm681_vm2, %v5556_v7  ;;  %v5565_v18 = vld [vmem:[%s5815_s27 + $0x48] sm:$0xff]  ;;  %v5566_v21 = vld [vmem:[%s5815_s27 + $0x50] sm:$0xff]  ;;  %v5567_v24 = vld [vmem:[%s5815_s27 + $0x58] sm:$0xff] }
  0x15   : > { %v5568_v27 = vld [vmem:[%s5815_s27 + $0x60] sm:$0xff]  ;;  %v5569_v30 = vld [vmem:[%s5815_s27 + $0x68] sm:$0xff]  ;;  %v5570_v33 = vld [vmem:[%s5815_s27 + $0x70] sm:$0xff] }
  0x16   : > { %v5571_v36 = vld [vmem:[%s5815_s27 + $0x78] sm:$0xff]  ;;  %v5572_v39 = vld [vmem:[%s5815_s27 + $0x80] sm:$0xff]  ;;  %v5573_v42 = vld [vmem:[%s5815_s27 + $0x88] sm:$0xff] }
  0x17   : > { %v5574_v45 = vld [vmem:[%s5815_s27 + $0x90] sm:$0xff]  ;;  %v5575_v48 = vld [vmem:[%s5815_s27 + $0x98] sm:$0xff]  ;;  %v5576_v51 = vld [vmem:[%s5815_s27 + $0xa0] sm:$0xff] }
  0x18   : > { %v5577_v54 = vld [vmem:[%s5815_s27 + $0xa8] sm:$0xff]  ;;  %v5578_v57 = vld [vmem:[%s5815_s27 + $0xb0] sm:$0xff]  ;;  %v5579_v60 = vld [vmem:[%s5815_s27 + $0xb8] sm:$0xff] }
  0x19   : > { %v5580_v63 = vld [vmem:[%s5815_s27 + $0xc0] sm:$0xff]  ;;  %v5581_v2 = vld [vmem:[%s5815_s27 + $0xc8] sm:$0xff]  ;;  %v5582_v5 = vld [vmem:[%s5815_s27 + $0xd0] sm:$0xff] }
  0x24   : > { %4933 = vmatmul.msk.bf16.gmra.mxu0 %vm681_vm2, %v5557_v8  ;;  %v5583_v8 = vld [vmem:[%s5815_s27 + $0xd8] sm:$0xff] }
  0x34   : > { %4934 = vmatmul.msk.bf16.gmra.mxu0 %vm681_vm2, %v5558_v9 }
  0x44   : > { %4935 = vmatmul.msk.bf16.gmra.mxu0 %vm681_vm2, %v5559_v10 }
  0x54   : > { %4936 = vmatmul.msk.bf16.gmra.mxu0 %vm681_vm2, %v5560_v11  ;;  %v5584_v11 = vld [vmem:[%s5815_s27 + $0xe0] sm:$0xff] }
  0x64   : > { %4937 = vmatmul.msk.bf16.gmra.mxu0 %vm681_vm2, %v5561_v12 }
  0x74   : > { %4938 = vmatmul.msk.bf16.gmra.mxu0 %vm681_vm2, %v5562_v13 }
  0x84   : > { %4939 = vmatmul.msk.bf16.gmra.mxu0 %vm681_vm2, %v5563_v14  ;;  %v5585_v14 = vld [vmem:[%s5815_s27 + $0xe8] sm:$0xff] }
  0x91   : > { %v5834_v16 = vpop.f32.mrf.mxu0 }
  0x92   : > { %7256 = vst [vmem:[#allocation3_spill] sm:$0xff] %v5834_v16 }
  0x94   : > { %4940 = vmatmul.msk.bf16.gmra.mxu0 %vm681_vm2, %v5564_v15 }
  0x99   : > { %v5837_v17 = vpop.f32.mrf.mxu0 }
  0x9a   : > { %7257 = vst [vmem:[#allocation4_spill] sm:$0xff] %v5837_v17 }
  0xa1   : > { %v5840_v19 = vpop.f32.mrf.mxu0 }
  0xa2   : > { %7258 = vst [vmem:[#allocation5_spill] sm:$0xff] %v5840_v19 }
  0xa4   : > { %4941 = vmatmul.msk.bf16.gmra.mxu0 %vm681_vm2, %v5565_v18 }
  0xa9   : > { %v5843_v20 = vpop.f32.mrf.mxu0 }
  0xaa   : > { %7259 = vst [vmem:[#allocation6_spill] sm:$0xff] %v5843_v20  ;;  %v5598_v20 = vld [vmem:[%s5815_s27 + $0x150] sm:$0xff] }
  0xb1   : > { %v5846_v22 = vpop.f32.mrf.mxu0 }
  0xb2   : > { %7260 = vst [vmem:[#allocation7_spill] sm:$0xff] %v5846_v22  ;;  %v5597_v22 = vld [vmem:[%s5815_s27 + $0x148] sm:$0xff] }
  0xb4   : > { %4942 = vmatmul.msk.bf16.gmra.mxu0 %vm681_vm2, %v5566_v21  ;;  %v5586_v21 = vld [vmem:[%s5815_s27 + $0xf0] sm:$0xff] }
  0xb9   : > { %v5849_v23 = vpop.f32.mrf.mxu0 }
  0xba   : > { %7261 = vst [vmem:[#allocation8_spill] sm:$0xff] %v5849_v23  ;;  %v5596_v23 = vld [vmem:[%s5815_s27 + $0x140] sm:$0xff] }
  0xc1   : > { %v5852_v25 = vpop.f32.mrf.mxu0 }
  0xc2   : > { %7262 = vst [vmem:[#allocation9_spill] sm:$0xff] %v5852_v25  ;;  %v5613_v25 = vld [vmem:[%s5815_s27 + $0x1c8] sm:$0xff] }
  0xc4   : > { %4943 = vmatmul.msk.bf16.gmra.mxu0 %vm681_vm2, %v5567_v24 }
  0xc9   : > { %v5855_v26 = vpop.f32.mrf.mxu0 }
  0xca   : > { %7263 = vst [vmem:[#allocation10_spill] sm:$0xff] %v5855_v26  ;;  %v5612_v26 = vld [vmem:[%s5815_s27 + $0x1c0] sm:$0xff] }
  0xcb   : > { %4988 = vmatmul.msk.bf16.vlgmr.msra.gmra.mxu2 %vm681_vm2, %v5612_v26 }
  0xd1   : > { %v5858_v28 = vpop.f32.mrf.mxu0 }
  0xd4   : > { %4944 = vmatmul.msk.bf16.gmra.mxu0 %vm681_vm2, %v5568_v27 }
  0xd9   : > { %v5861_v29 = vpop.f32.mrf.mxu0 }
  0xdb   : > { %4989 = vmatmul.msk.bf16.gmra.mxu2 %vm681_vm2, %v5613_v25 }
  0xe1   : > { %v5864_v31 = vpop.f32.mrf.mxu0 }
  0xe4   : > { %4945 = vmatmul.msk.bf16.gmra.mxu0 %vm681_vm2, %v5569_v30  ;;  %v5587_v30 = vld [vmem:[%s5815_s27 + $0xf8] sm:$0xff] }
  0xe9   : > { %v5867_v32 = vpop.f32.mrf.mxu0 }
  0xf1   : > { %v5870_v34 = vpop.f32.mrf.mxu0 }
  0xf4   : > { %4946 = vmatmul.msk.bf16.gmra.mxu0 %vm681_vm2, %v5570_v33 }
  0xf9   : > { %v5873_v35 = vpop.f32.mrf.mxu0 }
 0x101   : > { %v5876_v37 = vpop.f32.mrf.mxu0 }
 0x104   : > { %4947 = vmatmul.msk.bf16.gmra.mxu0 %vm681_vm2, %v5571_v36 }
 0x109   : > { %v5879_v38 = vpop.f32.mrf.mxu0 }
 0x111   : > { %v5882_v40 = vpop.f32.mrf.mxu0 }
 0x114   : > { %4948 = vmatmul.msk.bf16.gmra.mxu0 %vm681_vm2, %v5572_v39  ;;  %v5588_v39 = vld [vmem:[%s5815_s27 + $0x100] sm:$0xff] }
 0x119   : > { %v5885_v41 = vpop.f32.mrf.mxu0 }
 0x121   : > { %v5888_v43 = vpop.f32.mrf.mxu0 }
 0x124   : > { %4949 = vmatmul.msk.bf16.gmra.mxu0 %vm681_vm2, %v5573_v42 }
 0x129   : > { %v5891_v44 = vpop.f32.mrf.mxu0 }
 0x131   : > { %v5894_v46 = vpop.f32.mrf.mxu0 }
 0x134   : > { %4950 = vmatmul.msk.bf16.gmra.mxu0 %vm681_vm2, %v5574_v45 }
 0x139   : > { %v5897_v47 = vpop.f32.mrf.mxu0 }
 0x141   : > { %v5900_v49 = vpop.f32.mrf.mxu0 }
 0x144   : > { %4951 = vmatmul.msk.bf16.gmra.mxu0 %vm681_vm2, %v5575_v48  ;;  %v5589_v48 = vld [vmem:[%s5815_s27 + $0x108] sm:$0xff] }
 0x149   : > { %v5903_v50 = vpop.f32.mrf.mxu0 }
 0x151   : > { %v5906_v52 = vpop.f32.mrf.mxu0 }
 0x154   : > { %4952 = vmatmul.msk.bf16.gmra.mxu0 %vm681_vm2, %v5576_v51 }
 0x159   : > { %v5909_v53 = vpop.f32.mrf.mxu0 }
 0x161   : > { %v5912_v55 = vpop.f32.mrf.mxu0 }
 0x164   : > { %4953 = vmatmul.msk.bf16.gmra.mxu0 %vm681_vm2, %v5577_v54 }
 0x169   : > { %v5915_v56 = vpop.f32.mrf.mxu0 }
 0x171   : > { %v5918_v58 = vpop.f32.mrf.mxu0 }
 0x174   : > { %4954 = vmatmul.msk.bf16.gmra.mxu0 %vm681_vm2, %v5578_v57  ;;  %v5590_v57 = vld [vmem:[%s5815_s27 + $0x110] sm:$0xff] }
 0x179   : > { %v5921_v59 = vpop.f32.mrf.mxu0 }
 0x181   : > { %v5924_v61 = vpop.f32.mrf.mxu0 }
 0x184   : > { %4955 = vmatmul.msk.bf16.gmra.mxu0 %vm681_vm2, %v5579_v60 }
 0x189   : > { %v5927_v62 = vpop.f32.mrf.mxu0 }
 0x191   : > { %v5930_v0 = vpop.f32.mrf.mxu0 }
 0x192   : > { %7264 = vst [vmem:[#allocation11_spill] sm:$0xff] %v5930_v0 }
 0x194   : > { %4956 = vmatmul.msk.bf16.gmra.mxu0 %vm681_vm2, %v5580_v63  ;;  %v5608_v63 = vld [vmem:[%s5815_s27 + $0x1a0] sm:$0xff] }
 0x195   : > { %4984 = vmatmul.msk.bf16.vlgmr.msra.gmra.mxu1 %vm681_vm2, %v5608_v63 }
 0x199   : > { %v5933_v1 = vpop.f32.mrf.mxu0 }
 0x19a   : > { %7265 = vst [vmem:[#allocation12_spill] sm:$0xff] %v5933_v1 }
 0x1a1   : > { %v5936_v3 = vpop.f32.mrf.mxu0 }
 0x1a2   : > { %7266 = vst [vmem:[#allocation13_spill] sm:$0xff] %v5936_v3 }
 0x1a4   : > { %4957 = vmatmul.msk.bf16.gmra.mxu0 %vm681_vm2, %v5581_v2 }
 0x1a9   : > { %v5939_v4 = vpop.f32.mrf.mxu0 }
 0x1aa   : > { %7267 = vst [vmem:[#allocation14_spill] sm:$0xff] %v5939_v4 }
 0x1b1   : > { %v5942_v6 = vpop.f32.mrf.mxu0 }
 0x1b2   : > { %7268 = vst [vmem:[#allocation15_spill] sm:$0xff] %v5942_v6 }
 0x1b4   : > { %4958 = vmatmul.msk.bf16.gmra.mxu0 %vm681_vm2, %v5582_v5  ;;  %v5591_v5 = vld [vmem:[%s5815_s27 + $0x118] sm:$0xff] }
 0x1b9   : > { %v5945_v7 = vpop.f32.mrf.mxu0 }
 0x1ba   : > { %7269 = vst [vmem:[#allocation16_spill] sm:$0xff] %v5945_v7  ;;  %v5615_v7 = vld [vmem:[%s5815_s27 + $0x1d8] sm:$0xff] }
 0x1c1   : > { %v5948_v9 = vpop.f32.mrf.mxu0 }
 0x1c2   : > { %7270 = vst [vmem:[#allocation17_spill] sm:$0xff] %v5948_v9  ;;  %v5614_v9 = vld [vmem:[%s5815_s27 + $0x1d0] sm:$0xff] }
 0x1c3   : > { %4990 = vmatmul.msk.bf16.gmra.mxu2 %vm681_vm2, %v5614_v9  ;;  %v5616_v9 = vld [vmem:[%s5815_s27 + $0x1e0] sm:$0xff] }
 0x1c4   : > { %4959 = vmatmul.msk.bf16.gmra.mxu0 %vm681_vm2, %v5583_v8  ;;  %4992 = vmatmul.msk.bf16.vlgmr.msra.gmra.mxu3 %vm681_vm2, %v5616_v9 }
 0x1c9   : > { %v5951_v10 = vpop.f32.mrf.mxu0 }
 0x1ca   : > { %7271 = vst [vmem:[#allocation18_spill] sm:$0xff] %v5951_v10 }
 0x1d1   : > { %v5954_v12 = vpop.f32.mrf.mxu0 }
 0x1d3   : > { %4991 = vmatmul.msk.bf16.gmra.mxu2 %vm681_vm2, %v5615_v7  ;;  %v5617_v7 = vld [vmem:[%s5815_s27 + $0x1e8] sm:$0xff] }
 0x1d4   : > { %4960 = vmatmul.msk.bf16.gmra.mxu0 %vm681_vm2, %v5584_v11  ;;  %v5609_v11 = vld [vmem:[%s5815_s27 + $0x1a8] sm:$0xff]  ;;  %4993 = vmatmul.msk.bf16.gmra.mxu3 %vm681_vm2, %v5617_v7  ;;  %v5600_v7 = vld [vmem:[%s5815_s27 + $0x160] sm:$0xff] }
 0x1d5   : > { %4985 = vmatmul.msk.bf16.gmra.mxu1 %vm681_vm2, %v5609_v11 }
 0x1d9   : > { %v5957_v13 = vpop.f32.mrf.mxu0 }
 0x1e1   : > { %v5960_v15 = vpop.f32.mrf.mxu0 }
 0x1e4   : > { %4961 = vmatmul.msk.bf16.gmra.mxu0 %vm681_vm2, %v5585_v14 }
 0x1e9   : > { %v5963_v18 = vpop.f32.mrf.mxu0 }
 0x1f1   : > { %v5966_v24 = vpop.f32.mrf.mxu0 }
 0x1f4   : > { %4962 = vmatmul.msk.bf16.gmra.mxu0 %vm681_vm2, %v5586_v21  ;;  %v5592_v21 = vld [vmem:[%s5815_s27 + $0x120] sm:$0xff] }
 0x1f9   : > { %v5969_v27 = vpop.f32.mrf.mxu0 }
 0x201   : > { %v5972_v33 = vpop.f32.mrf.mxu0 }
 0x204   : > { %4963 = vmatmul.msk.bf16.gmra.mxu0 %vm681_vm2, %v5587_v30 }
 0x209   : > { %v5975_v36 = vpop.f32.mrf.mxu0 }
 0x211   : > { %v5978_v42 = vpop.f32.mrf.mxu0 }
 0x214   : > { %4964 = vmatmul.msk.bf16.gmra.mxu0 %vm681_vm2, %v5588_v39  ;;  %v5610_v39 = vld [vmem:[%s5815_s27 + $0x1b0] sm:$0xff] }
 0x215   : > { %4986 = vmatmul.msk.bf16.gmra.mxu1 %vm681_vm2, %v5610_v39 }
 0x219   : > { %v5981_v45 = vpop.f32.mrf.mxu0 }
 0x221   : > { %v5984_v51 = vpop.f32.mrf.mxu0 }
 0x224   : > { %4965 = vmatmul.msk.bf16.gmra.mxu0 %vm681_vm2, %v5589_v48 }
 0x229   : > { %v5987_v54 = vpop.f32.mrf.mxu0 }
 0x231   : > { %v5990_v60 = vpop.f32.mrf.mxu0 }
 0x234   : > { %4966 = vmatmul.msk.bf16.gmra.mxu0 %vm681_vm2, %v5590_v57  ;;  %v5593_v57 = vld [vmem:[%s5815_s27 + $0x128] sm:$0xff] }
 0x239   : > { %v5995_v2 = vpop.f32.mrf.mxu0 }
 0x241   : > { %v5998_v8 = vpop.f32.mrf.mxu0 }
 0x244   : > { %4967 = vmatmul.msk.bf16.gmra.mxu0 %vm681_vm2, %v5591_v5  ;;  %v5611_v5 = vld [vmem:[%s5815_s27 + $0x1b8] sm:$0xff] }
 0x245   : > { %4987 = vmatmul.msk.bf16.gmra.mxu1 %vm681_vm2, %v5611_v5 }
 0x249   : > { %v6003_v14 = vpop.f32.mrf.mxu0 }
 0x251   : > { %v6006_v30 = vpop.f32.mrf.mxu0 }
 0x254   : > { %4968 = vmatmul.msk.bf16.gmra.mxu0 %vm681_vm2, %v5592_v21  ;;  %v5594_v21 = vld [vmem:[%s5815_s27 + $0x130] sm:$0xff] }
 0x259   : > { %v6011_v48 = vpop.f32.mrf.mxu0 }
 0x261   : > { %v6014_v63 = vpop.f32.mrf.mxu0 }
 0x264   : > { %4969 = vmatmul.msk.bf16.gmra.mxu0 %vm681_vm2, %v5593_v57  ;;  %v5595_v57 = vld [vmem:[%s5815_s27 + $0x138] sm:$0xff] }
 0x269   : > { %v6019_v11 = vpop.f32.mrf.mxu0 }
 0x271   : > { %v6024_v39 = vpop.f32.mrf.mxu0 }
 0x274   : > { %4970 = vmatmul.msk.bf16.gmra.mxu0 %vm681_vm2, %v5594_v21 }
 0x279   : > { %v6027_v10 = vpop.f32.mrf.mxu0 }
 0x281   : > { %v6032_v5 = vpop.f32.mrf.mxu0 }
 0x284   : > { %4971 = vmatmul.msk.bf16.gmra.mxu0 %vm681_vm2, %v5595_v57 }
 0x289   : > { %v6035_v26 = vpop.f32.mrf.mxu0 }
 0x291   : > { %v6040_v21 = vpop.f32.mrf.mxu0 }
 0x292   : > { %7272 = vst [vmem:[#allocation19_spill] sm:$0xff] %v6040_v21 }
 0x294   : > { %4972 = vmatmul.msk.bf16.gmra.mxu0 %vm681_vm2, %v5596_v23 }
 0x299   : > { %v6043_v25 = vpop.f32.mrf.mxu0 }
 0x29a   : > { %7273 = vst [vmem:[#allocation20_spill] sm:$0xff] %v6043_v25  ;;  %v5618_v25 = vld [vmem:[%s5815_s27 + $0x1f0] sm:$0xff] }
 0x29b   : > { %4994 = vmatmul.msk.bf16.gmra.mxu3 %vm681_vm2, %v5618_v25 }
 0x2a1   : > { %v6048_v57 = vpop.f32.mrf.mxu0 }
 0x2a2   : > { %7274 = vst [vmem:[#allocation21_spill] sm:$0xff] %v6048_v57  ;;  %v5599_v57 = vld [vmem:[%s5815_s27 + $0x158] sm:$0xff] }
 0x2a4   : > { %4973 = vmatmul.msk.bf16.gmra.mxu0 %vm681_vm2, %v5597_v22  ;;  %v1150_v22 = vpop.f32.mrf.mxu1 }
 0x2a9   : > { %v6051_v6 = vpop.f32.mrf.mxu0 }
 0x2aa   : > { %7275 = vst [vmem:[#allocation22_spill] sm:$0xff] %v6051_v6  ;;  %v1374_v6 = vlaneseq }
 0x2ac   : > { %v6067_v9 = vshrl.u32 %v1374_v6, 7  ;;  %v1218_v6 = vmax.f32 %v5858_v28, %v5954_v12 }
 0x2b1   : > { %v6056_v4 = vpop.f32.mrf.mxu0 }
 0x2b2   : > { %7276 = vst [vmem:[#allocation23_spill] sm:$0xff] %v6056_v4  ;;  %v1383_v4 = vadd.s32 64, %v6067_v9 }
 0x2b4   : > { %4974 = vmatmul.msk.bf16.gmra.mxu0 %vm681_vm2, %v5598_v20  ;;  %v1152_v20 = vpop.f32.mrf.mxu1  ;;  %v1447_v17 = vand.u32 15, %v1383_v4 }
 0x2b6   : > { %vm1575_vm6 = vcmp.ge.s32.totalorder %v1447_v17, 1  ;;  %v1385_v17 = vadd.s32 80, %v6067_v9 }
 0x2b9   : > { %v6059_v23 = vpop.f32.mrf.mxu0 }
 0x2ba   : > { %7277 = vst [vmem:[#allocation24_spill] sm:$0xff] %v6059_v23  ;;  %v1415_v23 = vshra.s32 %v1383_v4, 4 }
 0x2bc   : > { %vm1479_vm3 = vcmp.ge.s32.totalorder %v1415_v23, 1  ;;  %vm1511_vm4 = vcmp.le.s32.totalorder %v1415_v23, 14  ;;  %v1155_v25 = vpop.f32.mrf.mxu1 }
 0x2bd   : > { %vm1543_vm5 = vmand %vm1479_vm3, %vm1511_vm4 }
 0x2be   : > { %vm1607_vm7 = vmand %vm1543_vm5, %vm1575_vm6 }
 0x2c1   : > { %v6064_v19 = vpop.f32.mrf.mxu0 }
 0x2c2   : > { %7278 = vst [vmem:[#allocation25_spill] sm:$0xff] %v6064_v19  ;;  %v1384_v19 = vadd.s32 72, %v6067_v9 }
 0x2c4   : > { %4975 = vmatmul.msk.bf16.gmra.mxu0 %vm681_vm2, %v5599_v57  ;;  %v1416_v4 = vshra.s32 %v1384_v19, 4  ;;  %v1448_v0 = vand.u32 15, %v1384_v19 }
 0x2c6   : > { %vm6085_vm8 = vcmp.ge.s32.totalorder %v1416_v4, 1  ;;  %vm6089_vm9 = vcmp.le.s32.totalorder %v1416_v4, 14  ;;  %vm1640_vm12 = vcmp.le.s32.totalorder %v1448_v0, 14  ;;  %v1417_v4 = vshra.s32 %v1385_v17, 4 }
 0x2c7   : > { %vm1544_vm11 = vmand %vm6085_vm8, %vm6089_vm9  ;;  %v1386_v0 = vadd.s32 88, %v6067_v9 }
 0x2c8   : > { %vm1672_vm13 = vmand %vm1544_vm11, %vm1640_vm12  ;;  %vm6105_vm14 = vcmp.ge.s32.totalorder %v1417_v4, 1  ;;  %vm1513_vm15 = vcmp.le.s32.totalorder %v1417_v4, 14 }
 0x2c9   : > { %v6069_v3 = vpop.f32.mrf.mxu0  ;;  %vm1545_vm0 = vmand %vm6105_vm14, %vm1513_vm15  ;;  %v1450_v4 = vand.u32 15, %v1386_v0 }
 0x2ca   : > { %7279 = vst [vmem:[#allocation26_spill] sm:$0xff] %v6069_v3  ;;  %v6081_v3 = vld [vmem:[%s7252_s2] ss:$0 sm:$0xff] }
 0x2d1   : > { %v1070_v1 = vpop.f32.mrf.mxu0 }
 0x2d2   : > { %v1250_v57 = vmax.f32 %v1070_v1, %v1150_v22  ;;  %v1219_v22 = vmax.f32 %v5861_v29, %v5957_v13  ;;  %v1449_v13 = vand.u32 15, %v1385_v17  ;;  %v1220_v1 = vmax.f32 %v5864_v31, %v5960_v15 }
 0x2d3   : > { %v1418_v17 = vshra.s32 %v1386_v0, 4 }
 0x2d4   : > { %v1282_v21 = vmax.f32 %v1218_v6, %v1250_v57  ;;  %4976 = vmatmul.msk.bf16.gmra.mxu0 %vm681_vm2, %v5600_v7  ;;  %v5619_v57 = vld [vmem:[%s5815_s27 + $0x1f8] sm:$0xff]  ;;  %vm1577_vm1 = vcmp.ge.s32.totalorder %v1449_v13, 1 }
 0x2d5   : > { %4995 = vmatmul.msk.bf16.gmra.mxu3 %vm681_vm2, %v5619_v57  ;;  %vm1609_vm3 = vmand %vm1545_vm0, %vm1577_vm1  ;;  %vm6117_vm4 = vcmp.ge.s32.totalorder %v1418_v17, 1  ;;  %vm1514_vm5 = vcmp.le.s32.totalorder %v1418_v17, 14  ;;  %v1222_v17 = vmax.f32 %v5870_v34, %v5966_v24 }
 0x2d6   : > { %v1318_v23 = vadd.f32 %v6081_v3, %v1282_v21  ;;  %vm1546_vm6 = vmand %vm6117_vm4, %vm1514_vm5 }
 0x2d8   : > { %v1350_v16 = vmax.f32 %v1318_v23, 0.0 }
 0x2d9   : > { %v1072_v28 = vpop.f32.mrf.mxu0 }
 0x2da   : > { %v1703_v7 = vsel %vm1607_vm7, %v1350_v16, 0.0  ;;  %v1251_v21 = vmax.f32 %v1072_v28, %v1152_v20  ;;  %v1157_v16 = vpop.f32.mrf.mxu1  ;;  %v5601_v20 = vld [vmem:[%s5815_s27 + $0x168] sm:$0xff]  ;;  %vm1642_vm7 = vcmp.le.s32.totalorder %v1450_v4, 14 }
 0x2db   : > { %v1735_v6 = vpack.c.bf16 %v1703_v7, %v1703_v7  ;;  %vm1674_vm8 = vmand %vm1546_vm6, %vm1642_vm7 }
 0x2dc   : > { %v1283_v19 = vmax.f32 %v1219_v22, %v1251_v21 }
 0x2dd   : > { %1768 = vst.msk [vmem:[#allocation2 + $0x20] sm:$0xf] %vm1759_vm10, %v1735_v6 }
 0x2de   : > { %v1319_v23 = vadd.f32 %v6081_v3, %v1283_v19 }
 0x2e0   : > { %v1351_v29 = vmax.f32 %v1319_v23, 0.0 }
 0x2e1   : > { %v1075_v28 = vpop.f32.mrf.mxu0 }
 0x2e2   : > { %v1704_v22 = vsel %vm1672_vm13, %v1351_v29, 0.0  ;;  %v1252_v7 = vmax.f32 %v1075_v28, %v1155_v25  ;;  %v1160_v15 = vpop.f32.mrf.mxu1  ;;  %v1387_v25 = vadd.s32 96, %v6067_v9  ;;  %v1221_v29 = vmax.f32 %v5867_v32, %v5963_v18 }
 0x2e3   : > { %v1736_v21 = vpack.c.bf16 %v1704_v22, %v1704_v22 }
 0x2e4   : > { %v1284_v6 = vmax.f32 %v1220_v1, %v1252_v7  ;;  %4977 = vmatmul.msk.bf16.gmra.mxu0 %vm681_vm2, %v5601_v20  ;;  %v1419_v0 = vshra.s32 %v1387_v25, 4  ;;  %v1451_v7 = vand.u32 15, %v1387_v25 }
 0x2e5   : > { %1769 = vst.msk [vmem:[#allocation2 + $0x24] sm:$0xf] %vm1759_vm10, %v1736_v21  ;;  %v5602_v21 = vld [vmem:[%s5815_s27 + $0x170] sm:$0xff] }
 0x2e6   : > { %v1320_v19 = vadd.f32 %v6081_v3, %v1284_v6  ;;  %vm6129_vm9 = vcmp.ge.s32.totalorder %v1419_v0, 1  ;;  %vm6133_vm11 = vcmp.le.s32.totalorder %v1419_v0, 14  ;;  %vm1579_vm13 = vcmp.ge.s32.totalorder %v1451_v7, 1 }
 0x2e7   : > { %vm1547_vm12 = vmand %vm6129_vm9, %vm6133_vm11 }
 0x2e8   : > { %v1352_v57 = vmax.f32 %v1320_v19, 0.0  ;;  %vm1611_vm14 = vmand %vm1547_vm12, %vm1579_vm13 }
 0x2e9   : > { %v1077_v23 = vpop.f32.mrf.mxu0 }
 0x2ea   : > { %v1705_v13 = vsel %vm1609_vm3, %v1352_v57, 0.0  ;;  %v1253_v20 = vmax.f32 %v1077_v23, %v1157_v16  ;;  %v1388_v16 = vadd.s32 104, %v6067_v9  ;;  %v1162_v23 = vpop.f32.mrf.mxu1 }
 0x2eb   : > { %v1737_v28 = vpack.c.bf16 %v1705_v13, %v1705_v13 }
 0x2ec   : > { %v1285_v12 = vmax.f32 %v1221_v29, %v1253_v20  ;;  %v1420_v25 = vshra.s32 %v1388_v16, 4  ;;  %v1452_v24 = vand.u32 15, %v1388_v16  ;;  %v1389_v20 = vadd.s32 112, %v6067_v9  ;;  %v5603_v16 = vld [vmem:[%s5815_s27 + $0x178] sm:$0xff] }
 0x2ed   : > { %1770 = vst.msk [vmem:[#allocation2 + $0x28] sm:$0xf] %vm1759_vm10, %v1737_v28  ;;  %v1223_v28 = vmax.f32 %v5873_v35, %v5969_v27  ;;  %v1392_v27 = vadd.s32 136, %v6067_v9 }
 0x2ee   : > { %v1321_v1 = vadd.f32 %v6081_v3, %v1285_v12  ;;  %vm6147_vm15 = vcmp.ge.s32.totalorder %v1420_v25, 1  ;;  %vm1516_vm0 = vcmp.le.s32.totalorder %v1420_v25, 14  ;;  %vm1644_vm3 = vcmp.le.s32.totalorder %v1452_v24, 14 }
 0x2ef   : > { %vm1548_vm1 = vmand %vm6147_vm15, %vm1516_vm0  ;;  %v1453_v18 = vand.u32 15, %v1389_v20 }
 0x2f0   : > { %v1353_v22 = vmax.f32 %v1321_v1, 0.0  ;;  %vm1676_vm4 = vmand %vm1548_vm1, %vm1644_vm3 }
 0x2f1   : > { %v1080_v6 = vpop.f32.mrf.mxu0 }
 0x2f2   : > { %v1706_v19 = vsel %vm1674_vm8, %v1353_v22, 0.0  ;;  %v1254_v57 = vmax.f32 %v1080_v6, %v1160_v15  ;;  %v1165_v7 = vpop.f32.mrf.mxu1  ;;  %vm1581_vm8 = vcmp.ge.s32.totalorder %v1453_v18, 1 }
 0x2f3   : > { %v1738_v4 = vpack.c.bf16 %v1706_v19, %v1706_v19  ;;  %v1390_v19 = vadd.s32 120, %v6067_v9 }
 0x2f4   : > { %v1286_v31 = vmax.f32 %v1222_v17, %v1254_v57  ;;  %4978 = vmatmul.msk.bf16.gmra.mxu0 %vm681_vm2, %v5602_v21  ;;  %v1421_v21 = vshra.s32 %v1389_v20, 4  ;;  %v1170_v57 = vpop.f32.mrf.mxu2 }
 0x2f5   : > { %1771 = vst.msk [vmem:[#allocation2 + $0x2c] sm:$0xf] %vm1759_vm10, %v1738_v4  ;;  %v1224_v4 = vmax.f32 %v5876_v37, %v5972_v33  ;;  %v1454_v33 = vand.u32 15, %v1390_v19 }
 0x2f6   : > { %v1322_v29 = vadd.f32 %v6081_v3, %v1286_v31  ;;  %vm6159_vm5 = vcmp.ge.s32.totalorder %v1421_v21, 1  ;;  %vm6163_vm6 = vcmp.le.s32.totalorder %v1421_v21, 14 }
 0x2f7   : > { %vm1549_vm7 = vmand %vm6159_vm5, %vm6163_vm6 }
 0x2f8   : > { %v1354_v34 = vmax.f32 %v1322_v29, 0.0  ;;  %vm1613_vm9 = vmand %vm1549_vm7, %vm1581_vm8 }
 0x2f9   : > { %v1082_v15 = vpop.f32.mrf.mxu0 }
 0x2fa   : > { %v1707_v12 = vsel %vm1611_vm14, %v1354_v34, 0.0  ;;  %v1255_v0 = vmax.f32 %v1082_v15, %v1162_v23  ;;  %v1422_v34 = vshra.s32 %v1390_v19, 4  ;;  %v1167_v15 = vpop.f32.mrf.mxu1  ;;  %vm1646_vm14 = vcmp.le.s32.totalorder %v1454_v33, 14 }
 0x2fb   : > { %v1739_v1 = vpack.c.bf16 %v1707_v12, %v1707_v12  ;;  %v1225_v12 = vmax.f32 %v5879_v38, %v5975_v36  ;;  %v1226_v19 = vmax.f32 %v5882_v40, %v5978_v42  ;;  %v1456_v42 = vand.u32 15, %v1392_v27 }
 0x2fc   : > { %v1287_v22 = vmax.f32 %v1223_v28, %v1255_v0  ;;  %vm6177_vm11 = vcmp.ge.s32.totalorder %v1422_v34, 1  ;;  %vm1518_vm12 = vcmp.le.s32.totalorder %v1422_v34, 14  ;;  %v1391_v28 = vadd.s32 128, %v6067_v9 }
 0x2fd   : > { %1772 = vst.msk [vmem:[#allocation2 + $0x30] sm:$0xf] %vm1759_vm10, %v1739_v1  ;;  %vm1550_vm13 = vmand %vm6177_vm11, %vm1518_vm12 }
 0x2fe   : > { %v1323_v6 = vadd.f32 %v6081_v3, %v1287_v22  ;;  %vm1678_vm15 = vmand %vm1550_vm13, %vm1646_vm14 }
 0x300   : > { %v1355_v32 = vmax.f32 %v1323_v6, 0.0  ;;  %v1423_v6 = vshra.s32 %v1391_v28, 4 }
 0x301   : > { %v1085_v17 = vpop.f32.mrf.mxu0 }
 0x302   : > { %v1708_v23 = vsel %vm1676_vm4, %v1355_v32, 0.0  ;;  %v1256_v31 = vmax.f32 %v1085_v17, %v1165_v7  ;;  %v1172_v7 = vpop.f32.mrf.mxu2  ;;  %v5604_v17 = vld [vmem:[%s5815_s27 + $0x180] sm:$0xff]  ;;  %vm6189_vm0 = vcmp.ge.s32.totalorder %v1423_v6, 1  ;;  %vm6193_vm1 = vcmp.le.s32.totalorder %v1423_v6, 14  ;;  %v5605_v6 = vld [vmem:[%s5815_s27 + $0x188] sm:$0xff] }
 0x303   : > { %v1740_v25 = vpack.c.bf16 %v1708_v23, %v1708_v23  ;;  %vm1551_vm3 = vmand %vm6189_vm0, %vm6193_vm1 }
 0x304   : > { %v1288_v29 = vmax.f32 %v1224_v4, %v1256_v31  ;;  %4979 = vmatmul.msk.bf16.gmra.mxu0 %vm681_vm2, %v5603_v16  ;;  %v1455_v16 = vand.u32 15, %v1391_v28 }
 0x305   : > { %1773 = vst.msk [vmem:[#allocation2 + $0x34] sm:$0xf] %vm1759_vm10, %v1740_v25 }
 0x306   : > { %v1324_v24 = vadd.f32 %v6081_v3, %v1288_v29  ;;  %vm1583_vm4 = vcmp.ge.s32.totalorder %v1455_v16, 1  ;;  %v1424_v29 = vshra.s32 %v1392_v27, 4 }
 0x307   : > { %vm1615_vm5 = vmand %vm1551_vm3, %vm1583_vm4 }
 0x308   : > { %v1356_v37 = vmax.f32 %v1324_v24, 0.0  ;;  %vm1488_vm6 = vcmp.ge.s32.totalorder %v1424_v29, 1  ;;  %vm1520_vm7 = vcmp.le.s32.totalorder %v1424_v29, 14 }
 0x309   : > { %v1087_v13 = vpop.f32.mrf.mxu0  ;;  %vm1552_vm8 = vmand %vm1488_vm6, %vm1520_vm7 }
 0x30a   : > { %v1709_v0 = vsel %vm1613_vm9, %v1356_v37, 0.0  ;;  %v1257_v1 = vmax.f32 %v1087_v13, %v1167_v15  ;;  %v1175_v34 = vpop.f32.mrf.mxu2  ;;  %v1393_v15 = vadd.s32 144, %v6067_v9  ;;  %v1227_v37 = vmax.f32 %v5885_v41, %v5981_v45 }
 0x30b   : > { %v1741_v22 = vpack.c.bf16 %v1709_v0, %v1709_v0  ;;  %vm1648_vm9 = vcmp.le.s32.totalorder %v1456_v42, 14  ;;  %v1394_v41 = vadd.s32 152, %v6067_v9  ;;  %v1228_v45 = vmax.f32 %v5888_v43, %v5984_v51  ;;  %v5607_v43 = vld [vmem:[%s5815_s27 + $0x198] sm:$0xff] }
 0x30c   : > { %v1289_v21 = vmax.f32 %v1225_v12, %v1257_v1  ;;  %v1425_v12 = vshra.s32 %v1393_v15, 4  ;;  %vm1680_vm11 = vmand %vm1552_vm8, %vm1648_vm9 }
 0x30d   : > { %1774 = vst.msk [vmem:[#allocation2 + $0x38] sm:$0xf] %vm1759_vm10, %v1741_v22  ;;  %v1426_v38 = vshra.s32 %v1394_v41, 4 }
 0x30e   : > { %v1325_v32 = vadd.f32 %v6081_v3, %v1289_v21  ;;  %v1457_v21 = vand.u32 15, %v1393_v15  ;;  %vm6213_vm12 = vcmp.ge.s32.totalorder %v1425_v12, 1  ;;  %vm1521_vm13 = vcmp.le.s32.totalorder %v1425_v12, 14 }
 0x30f   : > { %vm1553_vm14 = vmand %vm6213_vm12, %vm1521_vm13  ;;  %vm6225_vm1 = vcmp.ge.s32.totalorder %v1426_v38, 1  ;;  %vm1522_vm3 = vcmp.le.s32.totalorder %v1426_v38, 14 }
 0x310   : > { %v1357_v18 = vmax.f32 %v1325_v32, 0.0  ;;  %vm1554_vm4 = vmand %vm6225_vm1, %vm1522_vm3 }
 0x311   : > { %v1090_v35 = vpop.f32.mrf.mxu0 }
 0x312   : > { %v1710_v4 = vsel %vm1678_vm15, %v1357_v18, 0.0  ;;  %v1258_v23 = vmax.f32 %v1090_v35, %v1170_v57  ;;  %v1177_v1 = vpop.f32.mrf.mxu2  ;;  %vm1585_vm15 = vcmp.ge.s32.totalorder %v1457_v21, 1 }
 0x313   : > { %v1742_v31 = vpack.c.bf16 %v1710_v4, %v1710_v4  ;;  %vm1617_vm0 = vmand %vm1553_vm14, %vm1585_vm15 }
 0x314   : > { %v1290_v25 = vmax.f32 %v1226_v19, %v1258_v23  ;;  %4980 = vmatmul.msk.bf16.gmra.mxu0 %vm681_vm2, %v5604_v17  ;;  %v1458_v19 = vand.u32 15, %v1394_v41  ;;  %v1395_v23 = vadd.s32 160, %v6067_v9  ;;  %v1397_v41 = vadd.s32 176, %v6067_v9 }
 0x315   : > { %1775 = vst.msk [vmem:[#allocation2 + $0x3c] sm:$0xf] %vm1759_vm10, %v1742_v31  ;;  %v1229_v31 = vmax.f32 %v5891_v44, %v5987_v54  ;;  %v1399_v44 = vadd.s32 192, %v6067_v9  ;;  %v1233_v54 = vmax.f32 %v5903_v50, %v6003_v14  ;;  %v1400_v14 = vadd.s32 200, %v6067_v9 }
 0x316   : > { %v1326_v24 = vadd.f32 %v6081_v3, %v1290_v25  ;;  %v1459_v15 = vand.u32 15, %v1395_v23 }
 0x318   : > { %v1358_v40 = vmax.f32 %v1326_v24, 0.0 }
 0x319   : > { %v1092_v57 = vpop.f32.mrf.mxu0 }
 0x31a   : > { %v1711_v33 = vsel %vm1615_vm5, %v1358_v40, 0.0  ;;  %v1259_v13 = vmax.f32 %v1092_v57, %v1172_v7  ;;  %v1180_v51 = vpop.f32.mrf.mxu2  ;;  %vm1650_vm5 = vcmp.le.s32.totalorder %v1458_v19, 14  ;;  %v1427_v40 = vshra.s32 %v1395_v23, 4 }
 0x31b   : > { %v1743_v20 = vpack.c.bf16 %v1711_v33, %v1711_v33  ;;  %vm1682_vm6 = vmand %vm1554_vm4, %vm1650_vm5  ;;  %v1398_v23 = vadd.s32 184, %v6067_v9 }
 0x31c   : > { %v1291_v28 = vmax.f32 %v1227_v37, %v1259_v13  ;;  %v5606_v37 = vld [vmem:[%s5815_s27 + $0x190] sm:$0xff]  ;;  %vm6237_vm7 = vcmp.ge.s32.totalorder %v1427_v40, 1  ;;  %vm6241_vm8 = vcmp.le.s32.totalorder %v1427_v40, 14  ;;  %v1396_v13 = vadd.s32 168, %v6067_v9  ;;  %s7064_s27 = scalar_lea.vmem %s7255_s5, %s5555_s24 }
 0x31d   : > { %1776 = vst.msk [vmem:[#allocation2 + $0x40] sm:$0xf] %vm1759_vm10, %v1743_v20  ;;  %v1230_v20 = vmax.f32 %v5894_v46, %v5990_v60  ;;  %vm1555_vm9 = vmand %vm6237_vm7, %vm6241_vm8 }
 0x31e   : > { %v1327_v0 = vadd.f32 %v6081_v3, %v1291_v28  ;;  %v1428_v21 = vshra.s32 %v1396_v13, 4  ;;  %v1460_v60 = vand.u32 15, %v1396_v13 }
 0x320   : > { %v1359_v22 = vmax.f32 %v1327_v0, 0.0  ;;  %vm6255_vm13 = vcmp.ge.s32.totalorder %v1428_v21, 1  ;;  %vm1524_vm14 = vcmp.le.s32.totalorder %v1428_v21, 14 }
 0x321   : > { %v1095_v32 = vpop.f32.mrf.mxu0  ;;  %vm1556_vm15 = vmand %vm6255_vm13, %vm1524_vm14 }
 0x322   : > { %v1712_v7 = vsel %vm1680_vm11, %v1359_v22, 0.0  ;;  %v1260_v16 = vmax.f32 %v1095_v32, %v1175_v34  ;;  %vm1587_vm11 = vcmp.ge.s32.totalorder %v1459_v15, 1 }
 0x323   : > { %v1744_v17 = vpack.c.bf16 %v1712_v7, %v1712_v7  ;;  %vm1619_vm12 = vmand %vm1555_vm9, %vm1587_vm11 }
 0x324   : > { %v1292_v35 = vmax.f32 %v1228_v45, %v1260_v16  ;;  %4981 = vmatmul.msk.bf16.gmra.mxu0 %vm681_vm2, %v5605_v6  ;;  %v1231_v45 = vmax.f32 %v5897_v47, %v5995_v2 }
 0x325   : > { %1777 = vst.msk [vmem:[#allocation2 + $0x44] sm:$0xf] %vm1759_vm10, %v1744_v17 }
 0x326   : > { %v1328_v36 = vadd.f32 %v6081_v3, %v1292_v35 }
 0x328   : > { %v1360_v27 = vmax.f32 %v1328_v36, 0.0  ;;  %v1429_v36 = vshra.s32 %v1397_v41, 4 }
 0x329   : > { %v1097_v4 = vpop.f32.mrf.mxu0 }
 0x32a   : > { %v1713_v25 = vsel %vm1617_vm0, %v1360_v27, 0.0  ;;  %v1261_v29 = vmax.f32 %v1097_v4, %v1177_v1  ;;  %v1182_v1 = vpop.f32.mrf.mxu2  ;;  %vm1652_vm0 = vcmp.le.s32.totalorder %v1460_v60, 14  ;;  %v1461_v4 = vand.u32 15, %v1397_v41 }
 0x32b   : > { %v1745_v34 = vpack.c.bf16 %v1713_v25, %v1713_v25  ;;  %vm1684_vm1 = vmand %vm1556_vm15, %vm1652_vm0  ;;  %vm6267_vm3 = vcmp.ge.s32.totalorder %v1429_v36, 1  ;;  %vm6271_vm4 = vcmp.le.s32.totalorder %v1429_v36, 14  ;;  %v1232_v25 = vmax.f32 %v5900_v49, %v5998_v8 }
 0x32c   : > { %v1293_v24 = vmax.f32 %v1229_v31, %v1261_v29  ;;  %v1190_v31 = vpop.f32.mrf.mxu3  ;;  %vm1557_vm5 = vmand %vm6267_vm3, %vm6271_vm4  ;;  %v1462_v8 = vand.u32 15, %v1398_v23  ;;  %v1234_v60 = vmax.f32 %v5906_v52, %v6006_v30  ;;  %v1401_v52 = vadd.s32 208, %v6067_v9 }
 0x32d   : > { %1778 = vst.msk [vmem:[#allocation2 + $0x48] sm:$0xf] %vm1759_vm10, %v1745_v34  ;;  %v1235_v30 = vmax.f32 %v5909_v53, %v6011_v48  ;;  %v1402_v53 = vadd.s32 216, %v6067_v9  ;;  %v1236_v48 = vmax.f32 %v5912_v55, %v6014_v63 }
 0x32e   : > { %v1329_v42 = vadd.f32 %v6081_v3, %v1293_v24  ;;  %vm1654_vm11 = vcmp.le.s32.totalorder %v1462_v8, 14 }
 0x32f   : > { %v1466_v63 = vand.u32 15, %v1402_v53 }
 0x330   : > { %v1361_v57 = vmax.f32 %v1329_v42, 0.0  ;;  %v1430_v42 = vshra.s32 %v1398_v23, 4 }
 0x331   : > { %v1100_v33 = vpop.f32.mrf.mxu0 }
 0x332   : > { %v1714_v28 = vsel %vm1682_vm6, %v1361_v57, 0.0  ;;  %v1262_v12 = vmax.f32 %v1100_v33, %v1180_v51  ;;  %v1185_v38 = vpop.f32.mrf.mxu2  ;;  %vm1589_vm6 = vcmp.ge.s32.totalorder %v1461_v4, 1  ;;  %vm6285_vm8 = vcmp.ge.s32.totalorder %v1430_v42, 1 }
 0x333   : > { %v1746_v0 = vpack.c.bf16 %v1714_v28, %v1714_v28  ;;  %vm1621_vm7 = vmand %vm1557_vm5, %vm1589_vm6  ;;  %vm1526_vm9 = vcmp.le.s32.totalorder %v1430_v42, 14 }
 0x334   : > { %v1294_v22 = vmax.f32 %v1230_v20, %v1262_v12  ;;  %4982 = vmatmul.msk.bf16.gmra.mxu0 %vm681_vm2, %v5606_v37  ;;  %v1192_v12 = vpop.f32.mrf.mxu3 }
 0x335   : > { %1779 = vst.msk [vmem:[#allocation2 + $0x4c] sm:$0xf] %vm1759_vm10, %v1746_v0 }
 0x336   : > { %v1330_v6 = vadd.f32 %v6081_v3, %v1294_v22 }
 0x338   : > { %v1362_v46 = vmax.f32 %v1330_v6, 0.0  ;;  %v1463_v6 = vand.u32 15, %v1399_v44 }
 0x339   : > { %v1102_v32 = vpop.f32.mrf.mxu0 }
 0x33a   : > { %v1715_v7 = vsel %vm1619_vm12, %v1362_v46, 0.0  ;;  %v1263_v16 = vmax.f32 %v1102_v32, %v1182_v1  ;;  %v1187_v15 = vpop.f32.mrf.mxu2  ;;  %v1431_v1 = vshra.s32 %v1399_v44, 4  ;;  %vm1591_vm0 = vcmp.ge.s32.totalorder %v1463_v6, 1 }
 0x33b   : > { %v1747_v17 = vpack.c.bf16 %v1715_v7, %v1715_v7  ;;  %v1432_v7 = vshra.s32 %v1400_v14, 4 }
 0x33c   : > { %v1295_v35 = vmax.f32 %v1231_v45, %v1263_v16  ;;  %vm6296_vm13 = vcmp.ge.s32.totalorder %v1431_v1, 1  ;;  %vm1527_vm14 = vcmp.le.s32.totalorder %v1431_v1, 14  ;;  %v1195_v16 = vpop.f32.mrf.mxu3 }
 0x33d   : > { %1780 = vst.msk [vmem:[#allocation2 + $0x50] sm:$0xf] %vm1759_vm10, %v1747_v17  ;;  %vm1559_vm15 = vmand %vm6296_vm13, %vm1527_vm14  ;;  %vm1496_vm3 = vcmp.ge.s32.totalorder %v1432_v7, 1  ;;  %vm1528_vm4 = vcmp.le.s32.totalorder %v1432_v7, 14 }
 0x33e   : > { %v1331_v27 = vadd.f32 %v6081_v3, %v1295_v35  ;;  %vm1560_vm5 = vmand %vm1496_vm3, %vm1528_vm4 }
 0x340   : > { %v1363_v19 = vmax.f32 %v1331_v27, 0.0 }
 0x341   : > { %v1105_v51 = vpop.f32.mrf.mxu0 }
 0x342   : > { %v1716_v29 = vsel %vm1684_vm1, %v1363_v19, 0.0  ;;  %v1264_v34 = vmax.f32 %v1105_v51, %v1185_v38  ;;  %vm1623_vm1 = vmand %vm1559_vm15, %vm1591_vm0  ;;  %v1464_v38 = vand.u32 15, %v1400_v14  ;;  %v1433_v51 = vshra.s32 %v1401_v52, 4 }
 0x343   : > { %v1748_v24 = vpack.c.bf16 %v1716_v29, %v1716_v29  ;;  %vm1658_vm0 = vcmp.le.s32.totalorder %v1466_v63, 14 }
 0x344   : > { %v1296_v40 = vmax.f32 %v1232_v25, %v1264_v34  ;;  %4983 = vmatmul.msk.bf16.gmra.mxu0 %vm681_vm2, %v5607_v43  ;;  %vm1558_vm2 = vmand %vm6285_vm8, %vm1526_vm9  ;;  %vm1656_vm6 = vcmp.le.s32.totalorder %v1464_v38, 14  ;;  %v1197_v2 = vpop.f32.mrf.mxu3  ;;  %vm6312_vm8 = vcmp.ge.s32.totalorder %v1433_v51, 1  ;;  %vm1529_vm9 = vcmp.le.s32.totalorder %v1433_v51, 14 }
 0x345   : > { %1781 = vst.msk [vmem:[#allocation2 + $0x54] sm:$0xf] %vm1759_vm10, %v1748_v24  ;;  %vm1686_vm12 = vmand %vm1558_vm2, %vm1654_vm11 }
 0x346   : > { %v1332_v57 = vadd.f32 %v6081_v3, %v1296_v40  ;;  %vm1561_vm2 = vmand %vm6312_vm8, %vm1529_vm9 }
 0x348   : > { %v1364_v49 = vmax.f32 %v1332_v57, 0.0  ;;  %v1434_v57 = vshra.s32 %v1402_v53, 4  ;;  %v1406_v53 = vadd.s32 248, %v6067_v9 }
 0x349   : > { %v1107_v37 = vpop.f32.mrf.mxu0 }
 0x34a   : > { %v1717_v13 = vsel %vm1621_vm7, %v1364_v49, 0.0  ;;  %v1265_v20 = vmax.f32 %v1107_v37, %v1187_v15  ;;  %vm1688_vm7 = vmand %vm1560_vm5, %vm1656_vm6  ;;  %v5637_v15 = vld [vmem:[%s7253_s3 + $0x8] sm:$0xff]  ;;  %vm6326_vm13 = vcmp.ge.s32.totalorder %v1434_v57, 1  ;;  %vm6330_vm14 = vcmp.le.s32.totalorder %v1434_v57, 14 }
 0x34b   : > { %v1749_v28 = vpack.c.bf16 %v1717_v13, %v1717_v13  ;;  %2258 = vmatpush.bf16.msrb.mxu2 %v5637_v15  ;;  %v1237_v13 = vmax.f32 %v5915_v56, %v6019_v11  ;;  %vm1562_vm15 = vmand %vm6326_vm13, %vm6330_vm14  ;;  %v5639_v56 = vld [vmem:[%s7253_s3 + $0x18] sm:$0xff]  ;;  %v1438_v57 = vshra.s32 %v1406_v53, 4  ;;  %v5636_v15 = vld [vmem:[%s7253_s3] sm:$0xff]  ;;  %v1241_v37 = vmax.f32 %v5927_v62, %v6035_v26 }
 0x34c   : > { %v1297_v0 = vmax.f32 %v1233_v54, %v1265_v20  ;;  %v1200_v44 = vpop.f32.mrf.mxu3  ;;  %v1403_v54 = vadd.s32 224, %v6067_v9  ;;  %2125 = vmatpush.bf16.msrb.mxu1 %v5639_v56  ;;  %v5638_v62 = vld [vmem:[%s7253_s3 + $0x10] sm:$0xff]  ;;  %v7340_v56 = vld [vmem:[#allocation11_spill] sm:$0xff] }
 0x34d   : > { %1782 = vst.msk [vmem:[#allocation2 + $0x58] sm:$0xf] %vm1759_vm10, %v1749_v28 }
 0x34e   : > { %v1333_v22 = vadd.f32 %v6081_v3, %v1297_v0  ;;  %v1435_v1 = vshra.s32 %v1403_v54, 4  ;;  %v1467_v6 = vand.u32 15, %v1403_v54 }
 0x34f   : > { %2259 = vmatpush.bf16.msrb.mxu2 %v5636_v15 }
 0x350   : > { %v1365_v21 = vmax.f32 %v1333_v22, 0.0  ;;  %v5641_v22 = vld [vmem:[%s7253_s3 + $0x28] sm:$0xff]  ;;  %vm6349_vm3 = vcmp.ge.s32.totalorder %v1435_v1, 1  ;;  %vm6353_vm4 = vcmp.le.s32.totalorder %v1435_v1, 14  ;;  %vm1595_vm6 = vcmp.ge.s32.totalorder %v1467_v6, 1  ;;  %2126 = vmatpush.bf16.msrb.mxu1 %v5638_v62  ;;  %v5659_v62 = vld [vmem:[%s7253_s3 + $0x38] sm:$0xff] }
 0x351   : > { %v1110_v46 = vpop.f32.mrf.mxu0  ;;  %2450 = vmatpush.bf16.msrb.mxu3 %v5641_v22  ;;  %vm1563_vm5 = vmand %vm6349_vm3, %vm6353_vm4  ;;  %vm6402_vm3 = vcmp.ge.s32.totalorder %v1438_v57, 1  ;;  %vm1534_vm4 = vcmp.le.s32.totalorder %v1438_v57, 14  ;;  %v1376_v22 = vadd.s32 8, %v6067_v9 }
 0x352   : > { %v1718_v32 = vsel %vm1686_vm12, %v1365_v21, 0.0  ;;  %v1266_v18 = vmax.f32 %v1110_v46, %v1190_v31  ;;  %v1465_v31 = vand.u32 15, %v1401_v52 }
 0x353   : > { %v1750_v41 = vpack.c.bf16 %v1718_v32, %v1718_v32  ;;  %v1238_v32 = vmax.f32 %v5918_v58, %v6024_v39 }
 0x354   : > { %v1298_v45 = vmax.f32 %v1234_v60, %v1266_v18  ;;  %vm1593_vm11 = vcmp.ge.s32.totalorder %v1465_v31, 1  ;;  %v1404_v60 = vadd.s32 232, %v6067_v9  ;;  %v1202_v7 = vpop.f32.mrf.mxu3  ;;  %2748 = vmatpush.bf16.msra.mxu1 %v5659_v62 }
 0x355   : > { %1783 = vst.msk [vmem:[#allocation2 + $0x5c] sm:$0xf] %vm1759_vm10, %v1750_v41  ;;  %vm1625_vm12 = vmand %vm1561_vm2, %vm1593_vm11 }
 0x356   : > { %v1334_v17 = vadd.f32 %v6081_v3, %v1298_v45  ;;  %v1468_v39 = vand.u32 15, %v1404_v60 }
 0x358   : > { %v1366_v35 = vmax.f32 %v1334_v17, 0.0  ;;  %v5764_v17 = vmov 0   ;;  %vm1660_vm11 = vcmp.le.s32.totalorder %v1468_v39, 14  ;;  %v7345_v39 = vld [vmem:[#allocation20_spill] sm:$0xff] }
 0x359   : > { %v1112_v36 = vpop.f32.mrf.mxu0  ;;  %1792 = vst.msk [vmem:[#allocation2 + $0x80] sm:$0xf] %vm1759_vm10, %v5764_v17 }
 0x35a   : > { %v1719_v27 = vsel %vm1623_vm1, %v1366_v35, 0.0  ;;  %v1267_v19 = vmax.f32 %v1112_v36, %v1192_v12  ;;  %vm1690_vm1 = vmand %vm1562_vm15, %vm1658_vm0  ;;  %v1436_v35 = vshra.s32 %v1404_v60, 4  ;;  %1793 = vst.msk [vmem:[#allocation2 + $0x84] sm:$0xf] %vm1759_vm10, %v5764_v17 }
 0x35b   : > { %v1751_v4 = vpack.c.bf16 %v1719_v27, %v1719_v27  ;;  %v1405_v27 = vadd.s32 240, %v6067_v9  ;;  %1794 = vst.msk [vmem:[#allocation2 + $0x88] sm:$0xf] %vm1759_vm10, %v5764_v17 }
 0x35c   : > { %v1299_v43 = vmax.f32 %v1235_v30, %v1267_v19  ;;  %vm6367_vm8 = vcmp.ge.s32.totalorder %v1436_v35, 1  ;;  %vm6371_vm9 = vcmp.le.s32.totalorder %v1436_v35, 14  ;;  %v1239_v19 = vmax.f32 %v5921_v59, %v6027_v10  ;;  %1795 = vst.msk [vmem:[#allocation2 + $0x8c] sm:$0xf] %vm1759_vm10, %v5764_v17  ;;  %v7344_v35 = vld [vmem:[#allocation4_spill] sm:$0xff] }
 0x35d   : > { %1784 = vst.msk [vmem:[#allocation2 + $0x60] sm:$0xf] %vm1759_vm10, %v1751_v4  ;;  %vm1564_vm2 = vmand %vm6367_vm8, %vm6371_vm9  ;;  %v1437_v59 = vshra.s32 %v1405_v27, 4  ;;  %v1469_v31 = vand.u32 15, %v1405_v27 }
 0x35e   : > { %v1335_v47 = vadd.f32 %v6081_v3, %v1299_v43  ;;  %1796 = vst.msk [vmem:[#allocation2 + $0x90] sm:$0xf] %vm1759_vm10, %v5764_v17  ;;  %v7343_v17 = vld [vmem:[#allocation12_spill] sm:$0xff] }
 0x35f   : > { %vm6388_vm13 = vcmp.ge.s32.totalorder %v1437_v59, 1  ;;  %vm1533_vm14 = vcmp.le.s32.totalorder %v1437_v59, 14  ;;  %vm1597_vm0 = vcmp.ge.s32.totalorder %v1469_v31, 1  ;;  %v7348_v59 = vld [vmem:[#allocation13_spill] sm:$0xff] }
 0x360   : > { %v1367_v23 = vmax.f32 %v1335_v47, 0.0  ;;  %vm1565_vm15 = vmand %vm6388_vm13, %vm1533_vm14 }
 0x361   : > { %v1115_v25 = vpop.f32.mrf.mxu0 }
 0x362   : > { %v1720_v34 = vsel %vm1688_vm7, %v1367_v23, 0.0  ;;  %v1268_v24 = vmax.f32 %v1115_v25, %v1195_v16  ;;  %vm1627_vm7 = vmand %vm1563_vm5, %vm1595_vm6 }
 0x363   : > { %v1752_v40 = vpack.c.bf16 %v1720_v34, %v1720_v34  ;;  %vm1566_vm5 = vmand %vm6402_vm3, %vm1534_vm4 }
 0x364   : > { %v1300_v42 = vmax.f32 %v1236_v48, %v1268_v24  ;;  %v1240_v48 = vmax.f32 %v5924_v61, %v6032_v5  ;;  %v1470_v5 = vand.u32 15, %v1406_v53 }
 0x365   : > { %1785 = vst.msk [vmem:[#allocation2 + $0x64] sm:$0xf] %vm1759_vm10, %v1752_v40 }
 0x366   : > { %v1336_v49 = vadd.f32 %v6081_v3, %v1300_v42  ;;  %vm1662_vm6 = vcmp.le.s32.totalorder %v1470_v5, 14  ;;  %v7355_v5 = vld [vmem:[#allocation14_spill] sm:$0xff] }
 0x368   : > { %v1368_v55 = vmax.f32 %v1336_v49, 0.0 }
 0x369   : > { %v1117_v8 = vpop.f32.mrf.mxu0 }
 0x36a   : > { %v1721_v20 = vsel %vm1625_vm12, %v1368_v55, 0.0  ;;  %v1269_v28 = vmax.f32 %v1117_v8, %v1197_v2  ;;  %v1205_v2 = vpop.f32.mrf.mxu3  ;;  %vm1692_vm12 = vmand %vm1564_vm2, %vm1660_vm11 }
 0x36b   : > { %v1753_v12 = vpack.c.bf16 %v1721_v20, %v1721_v20  ;;  %v1407_v20 = vshra.s32 %v6067_v9, 4 }
 0x36c   : > { %v1301_v0 = vmax.f32 %v1237_v13, %v1269_v28  ;;  %v5640_v28 = vld [vmem:[%s7253_s3 + $0x20] sm:$0xff] }
 0x36d   : > { %1786 = vst.msk [vmem:[#allocation2 + $0x68] sm:$0xf] %vm1759_vm10, %v1753_v12  ;;  %2451 = vmatpush.bf16.msrb.mxu3 %v5640_v28  ;;  %vm1471_vm8 = vcmp.ge.s32.totalorder %v1407_v20, 1  ;;  %vm1503_vm9 = vcmp.le.s32.totalorder %v1407_v20, 14  ;;  %v5678_v28 = vld [vmem:[%s7253_s3 + $0x58] sm:$0xff] }
 0x36e   : > { %v1337_v11 = vadd.f32 %v6081_v3, %v1301_v0  ;;  %v1439_v0 = vand.u32 15, %v6067_v9  ;;  %vm1535_vm2 = vmand %vm1471_vm8, %vm1503_vm9 }
 0x370   : > { %v1369_v21 = vmax.f32 %v1337_v11, 0.0  ;;  %v7341_v11 = vld [vmem:[#allocation3_spill] sm:$0xff]  ;;  %vm1567_vm11 = vcmp.ge.s32.totalorder %v1439_v0, 1 }
 0x371   : > { %v1120_v46 = vpop.f32.mrf.mxu0  ;;  %3405 = vmatpush.bf16.msra.mxu3 %v5678_v28 }
 0x372   : > { %v1722_v18 = vsel %vm1690_vm1, %v1369_v21, 0.0  ;;  %v1270_v41 = vmax.f32 %v1120_v46, %v1200_v44  ;;  %vm1629_vm1 = vmand %vm1565_vm15, %vm1597_vm0  ;;  %v1207_v55 = vpop.f32.mrf.mxu3  ;;  %v1210_v21 = vmax.f32 %v7341_v11, %v7340_v56  ;;  %v7342_v46 = vld [vmem:[#allocation19_spill] sm:$0xff]  ;;  %v1380_v56 = vadd.s32 40, %v6067_v9 }
 0x373   : > { %v1754_v45 = vpack.c.bf16 %v1722_v18, %v1722_v18  ;;  %v7358_v11 = vld [vmem:[#allocation15_spill] sm:$0xff] }
 0x374   : > { %v1302_v16 = vmax.f32 %v1238_v32, %v1270_v41  ;;  %v1408_v32 = vshra.s32 %v1376_v22, 4 }
 0x375   : > { %1787 = vst.msk [vmem:[#allocation2 + $0x6c] sm:$0xf] %vm1759_vm10, %v1754_v45  ;;  %v1440_v45 = vand.u32 15, %v1376_v22 }
 0x376   : > { %v1338_v38 = vadd.f32 %v6081_v3, %v1302_v16  ;;  %vm1472_vm13 = vcmp.ge.s32.totalorder %v1408_v32, 1  ;;  %vm1504_vm14 = vcmp.le.s32.totalorder %v1408_v32, 14  ;;  %v1377_v16 = vadd.s32 16, %v6067_v9 }
 0x377   : > { %vm1536_vm15 = vmand %vm1472_vm13, %vm1504_vm14  ;;  %vm1632_vm0 = vcmp.le.s32.totalorder %v1440_v45, 14 }
 0x378   : > { %v1370_v58 = vmax.f32 %v1338_v38, 0.0  ;;  %v1211_v38 = vmax.f32 %v7344_v35, %v7343_v17  ;;  %v1409_v27 = vshra.s32 %v1377_v16, 4  ;;  %v1444_v17 = vand.u32 15, %v1380_v56 }
 0x379   : > { %v1122_v36 = vpop.f32.mrf.mxu0 }
 0x37a   : > { %v1723_v4 = vsel %vm1627_vm7, %v1370_v58, 0.0  ;;  %v1271_v43 = vmax.f32 %v1122_v36, %v1202_v7  ;;  %vm1694_vm7 = vmand %vm1566_vm5, %vm1662_vm6  ;;  %vm6432_vm3 = vcmp.ge.s32.totalorder %v1409_v27, 1  ;;  %vm1505_vm4 = vcmp.le.s32.totalorder %v1409_v27, 14 }
 0x37b   : > { %v1755_v51 = vpack.c.bf16 %v1723_v4, %v1723_v4  ;;  %vm1537_vm5 = vmand %vm6432_vm3, %vm1505_vm4 }
 0x37c   : > { %v1303_v47 = vmax.f32 %v1239_v19, %v1271_v43  ;;  %v1441_v43 = vand.u32 15, %v1377_v16 }
 0x37d   : > { %1788 = vst.msk [vmem:[#allocation2 + $0x70] sm:$0xf] %vm1759_vm10, %v1755_v51 }
 0x37e   : > { %v1339_v10 = vadd.f32 %v6081_v3, %v1303_v47  ;;  %vm1569_vm6 = vcmp.ge.s32.totalorder %v1441_v43, 1 }
 0x380   : > { %v1371_v23 = vmax.f32 %v1339_v10, 0.0  ;;  %v7349_v10 = vld [vmem:[#allocation5_spill] sm:$0xff] }
 0x381   : > { %v1125_v25 = vpop.f32.mrf.mxu0 }
 0x382   : > { %v1724_v34 = vsel %vm1692_vm12, %v1371_v23, 0.0  ;;  %v1272_v24 = vmax.f32 %v1125_v25, %v1205_v2  ;;  %vm1599_vm12 = vmand %vm1535_vm2, %vm1567_vm11  ;;  %v1378_v2 = vadd.s32 24, %v6067_v9  ;;  %v1212_v23 = vmax.f32 %v7349_v10, %v7348_v59  ;;  %v7350_v25 = vld [vmem:[#allocation21_spill] sm:$0xff] }
 0x383   : > { %v1756_v40 = vpack.c.bf16 %v1724_v34, %v1724_v34  ;;  %vm2070_vm2 = vcmask 261120  }
 0x384   : > { %v1304_v42 = vmax.f32 %v1240_v48, %v1272_v24  ;;  %v1410_v34 = vshra.s32 %v1378_v2, 4  ;;  %v5676_v24 = vld [vmem:[%s7253_s3 + $0x48] sm:$0xff]  ;;  %v1442_v57 = vand.u32 15, %v1378_v2 }
 0x385   : > { %1789 = vst.msk [vmem:[#allocation2 + $0x74] sm:$0xf] %vm1759_vm10, %v1756_v40  ;;  %3182 = vmatpush.bf16.msra.mxu2 %v5676_v24 }
 0x386   : > { %v1340_v49 = vadd.f32 %v6081_v3, %v1304_v42  ;;  %vm6447_vm8 = vcmp.ge.s32.totalorder %v1410_v34, 1  ;;  %vm6451_vm9 = vcmp.le.s32.totalorder %v1410_v34, 14 }
 0x387   : > { %vm1538_vm11 = vmand %vm6447_vm8, %vm6451_vm9  ;;  %vm2350_vm9 = vcmask 1046528  }
 0x388   : > { %v1372_v61 = vmax.f32 %v1340_v49, 0.0 }
 0x389   : > { %v1127_v63 = vpop.f32.mrf.mxu0 }
 0x38a   : > { %v1725_v33 = vsel %vm1629_vm1, %v1372_v61, 0.0  ;;  %v1273_v44 = vmax.f32 %v1127_v63, %v1207_v55  ;;  %vm1664_vm1 = vmand %vm1536_vm15, %vm1632_vm0  ;;  %v1379_v61 = vadd.s32 32, %v6067_v9  ;;  %v7356_v63 = vld [vmem:[#allocation6_spill] sm:$0xff] }
 0x38b   : > { %v1757_v54 = vpack.c.bf16 %v1725_v33, %v1725_v33  ;;  %v1213_v8 = vmax.f32 %v7356_v63, %v7355_v5  ;;  %v7372_v5 = vld [vmem:[#allocation17_spill] sm:$0xff] }
 0x38c   : > { %v1305_v13 = vmax.f32 %v1241_v37, %v1273_v44  ;;  %v1411_v20 = vshra.s32 %v1379_v61, 4  ;;  %v7373_v63 = vld [vmem:[#allocation9_spill] sm:$0xff] }
 0x38d   : > { %1790 = vst.msk [vmem:[#allocation2 + $0x78] sm:$0xf] %vm1759_vm10, %v1757_v54 }
 0x38e   : > { %v1341_v26 = vadd.f32 %v6081_v3, %v1305_v13  ;;  %vm1475_vm14 = vcmp.ge.s32.totalorder %v1411_v20, 1  ;;  %vm1507_vm15 = vcmp.le.s32.totalorder %v1411_v20, 14 }
 0x38f   : > { %vm1539_vm0 = vmand %vm1475_vm14, %vm1507_vm15 }
 0x390   : > { %v1373_v12 = vmax.f32 %v1341_v26, 0.0  ;;  %v6474_v26 = vld [vmem:[%s7252_s2] ss:$0 sm:$0xff] }
 0x391   : > { %v1130_v1 = vpop.f32.mrf.mxu0 }
 0x392   : > { %v1726_v6 = vsel %vm1694_vm7, %v1373_v12, 0.0  ;;  %v1242_v50 = vmax.f32 %v7342_v46, %v1130_v1  ;;  %vm1601_vm7 = vmand %vm1537_vm5, %vm1569_vm6  ;;  %v1443_v1 = vand.u32 15, %v1379_v61  ;;  %v1382_v61 = vadd.s32 56, %v6067_v9 }
 0x393   : > { %v1758_v14 = vpack.c.bf16 %v1726_v6, %v1726_v6 }
 0x394   : > { %v1274_v60 = vmax.f32 %v1210_v21, %v1242_v50  ;;  %v7359_v21 = vld [vmem:[#allocation7_spill] sm:$0xff]  ;;  %v1446_v62 = vand.u32 15, %v1382_v61 }
 0x395   : > { %1791 = vst.msk [vmem:[#allocation2 + $0x7c] sm:$0xf] %vm1759_vm10, %v1758_v14  ;;  %v1214_v6 = vmax.f32 %v7359_v21, %v7358_v11  ;;  %v7360_v50 = vld [vmem:[#allocation23_spill] sm:$0xff] }
 0x396   : > { %v1310_v18 = vadd.f32 %v6081_v3, %v1274_v60 }
 0x398   : > { %v1342_v41 = vmax.f32 %v1310_v18, 0.0  ;;  %v1412_v18 = vshra.s32 %v1380_v56, 4  ;;  %v7380_v56 = vld [vmem:[#allocation10_spill] sm:$0xff] }
 0x399   : > { %v1132_v7 = vpop.f32.mrf.mxu0 }
 0x39a   : > { %v1695_v58 = vsel %vm1599_vm12, %v1342_v41, 0.0  ;;  %v1243_v36 = vmax.f32 %v7345_v39, %v1132_v7  ;;  %vm1634_vm12 = vcmp.le.s32.totalorder %v1442_v57, 14  ;;  %vm6483_vm4 = vcmp.ge.s32.totalorder %v1412_v18, 1 }
 0x39b   : > { %v1727_v52 = vpack.c.bf16 %v1695_v58, %v1695_v58  ;;  %vm1666_vm13 = vmand %vm1538_vm11, %vm1634_vm12  ;;  %vm6487_vm5 = vcmp.le.s32.totalorder %v1412_v18, 14  ;;  %v1381_v39 = vadd.s32 48, %v6067_v9  ;;  %v1414_v9 = vshra.s32 %v1382_v61, 4 }
 0x39c   : > { %v1275_v30 = vmax.f32 %v1211_v38, %v1243_v36  ;;  %vm1540_vm6 = vmand %vm6483_vm4, %vm6487_vm5  ;;  %vm1638_vm5 = vcmp.le.s32.totalorder %v1446_v62, 14  ;;  %v5677_v62 = vld [vmem:[%s7253_s3 + $0x50] sm:$0xff] }
 0x39d   : > { %1760 = vst.msk [vmem:[#allocation2] sm:$0xf] %vm1759_vm10, %v1727_v52  ;;  %v7365_v52 = vld [vmem:[#allocation16_spill] sm:$0xff]  ;;  %v1445_v34 = vand.u32 15, %v1381_v39  ;;  %3406 = vmatpush.bf16.msra.mxu3 %v5677_v62 }
 0x39e   : > { %v1311_v19 = vadd.f32 %v6081_v3, %v1275_v30  ;;  %v7366_v30 = vld [vmem:[#allocation8_spill] sm:$0xff] }
 0x39f   : > { %v1215_v27 = vmax.f32 %v7366_v30, %v7365_v52  ;;  %vm1573_vm15 = vcmp.ge.s32.totalorder %v1445_v34, 1 }
 0x3a0   : > { %v1343_v4 = vmax.f32 %v1311_v19, 0.0 }
 0x3a1   : > { %v1135_v51 = vpop.f32.mrf.mxu0 }
 0x3a2   : > { %v1696_v31 = vsel %vm1664_vm1, %v1343_v4, 0.0  ;;  %v1244_v29 = vmax.f32 %v7350_v25, %v1135_v51  ;;  %vm1571_vm1 = vcmp.ge.s32.totalorder %v1443_v1, 1  ;;  %v7367_v4 = vld [vmem:[#allocation24_spill] sm:$0xff]  ;;  %v5628_v1 = vld [vmem:[#allocation2 + $0x40] sm:$0xff] }
 0x3a3   : > { %v1728_v53 = vpack.c.bf16 %v1696_v31, %v1696_v31  ;;  %vm1603_vm3 = vmand %vm1539_vm0, %vm1571_vm1  ;;  %v1413_v31 = vshra.s32 %v1381_v39, 4  ;;  %vm6524_vm1 = vcmp.ge.s32.totalorder %v1414_v9, 1 }
 0x3a4   : > { %v1276_v48 = vmax.f32 %v1212_v23, %v1244_v29  ;;  %v5729_v36 = vld [vmem:[#allocation2] sm:$0xe] }
 0x3a5   : > { %1761 = vst.msk [vmem:[#allocation2 + $0x4] sm:$0xf] %vm1759_vm10, %v1728_v53  ;;  %vm6503_vm11 = vcmp.ge.s32.totalorder %v1413_v31, 1  ;;  %vm6507_vm12 = vcmp.le.s32.totalorder %v1413_v31, 14 }
 0x3a6   : > { %v1312_v40 = vadd.f32 %v6081_v3, %v1276_v48  ;;  %v7357_v3 = vld [vmem:[#allocation22_spill] sm:$0xff]  ;;  %vm1541_vm14 = vmand %vm6503_vm11, %vm6507_vm12 }
 0x3a7   : > { %vm1605_vm0 = vmand %vm1541_vm14, %vm1573_vm15 }
 0x3a8   : > { %v1344_v42 = vmax.f32 %v1312_v40, 0.0 }
 0x3a9   : > { %v1137_v15 = vpop.f32.mrf.mxu0 }
 0x3aa   : > { %v1697_v37 = vsel %vm1601_vm7, %v1344_v42, 0.0  ;;  %v1245_v33 = vmax.f32 %v7357_v3, %v1137_v15  ;;  %vm1636_vm7 = vcmp.le.s32.totalorder %v1444_v17, 14  ;;  %v7374_v3 = vld [vmem:[#allocation25_spill] sm:$0xff] }
 0x3ab   : > { %v1729_v44 = vpack.c.bf16 %v1697_v37, %v1697_v37  ;;  %vm1668_vm8 = vmand %vm1540_vm6, %vm1636_vm7 }
 0x3ac   : > { %v1277_v54 = vmax.f32 %v1213_v8, %v1245_v33  ;;  %v5717_v13 = vld [vmem:[#allocation2] sm:$0xff]   ;;  %v1216_v8 = vmax.f32 %v7373_v63, %v7372_v5 }
 0x3ad   : > { %1762 = vst.msk [vmem:[#allocation2 + $0x8] sm:$0xf] %vm1759_vm10, %v1729_v44  ;;  %5092 = vmatmul.msk.bf16.vlgmr.msrb.gmra.mxu2 %vm2070_vm2, %v5717_v13  ;;  %v5728_v45 = vld [vmem:[#allocation2] sm:$0xf0]  ;;  %v1929_v7 = vshll.u32 %v5717_v13, 16  ;;  %v1927_v23 = vshrl.u32 %v5717_v13, 16 }
 0x3ae   : > { %v1313_v12 = vadd.f32 %v6474_v26, %v1277_v54  ;;  %v5730_v51 = vor.u32 %v5729_v36, %v5728_v45 }
 0x3af   : > { %v1931_v2 = vrot.slane %v1929_v7, 1 }
 0x3b0   : > { %v1345_v0 = vmax.f32 %v1313_v12, 0.0  ;;  %v2351_v29 = vrot.slane %v5730_v51, 1  ;;  %v5624_v51 = vld [vmem:[#allocation2 + $0x20] sm:$0xff] }
 0x3b1   : > { %v1140_v22 = vpop.f32.mrf.mxu0  ;;  %v1932_v24 = vor.u32 %v1931_v2, %v1927_v23  ;;  %v1958_v2 = vshll.u32 %v5624_v51, 16  ;;  %v1962_v34 = vshrl.u32 %v5624_v51, 16 }
 0x3b2   : > { %v1698_v46 = vsel %vm1666_vm13, %v1345_v0, 0.0  ;;  %v1246_v14 = vmax.f32 %v7360_v50, %v1140_v22  ;;  %vm1925_vm13 = vsmask.f32 7424  ;;  %v7379_v22 = vld [vmem:[#allocation18_spill] sm:$0xff]  ;;  %v5658_v0 = vld [vmem:[%s7253_s3 + $0x30] sm:$0xff] }
 0x3b3   : > { %v1730_v60 = vpack.c.bf16 %v1698_v46, %v1698_v46  ;;  %v1217_v11 = vmax.f32 %v7380_v56, %v7379_v22  ;;  %v1960_v31 = vrot.slane %v1958_v2, 1  ;;  %2749 = vmatpush.bf16.msra.mxu1 %v5658_v0  ;;  %v1990_v22 = vshll.u32 %v5628_v1, 16 }
 0x3b4   : > { %v1278_v32 = vmax.f32 %v1214_v6, %v1246_v14  ;;  %v7381_v6 = vld [vmem:[#allocation26_spill] sm:$0xff]  ;;  %v2366_v56 = vrot.slane %v5628_v1, 1 }
 0x3b5   : > { %1763 = vst.msk [vmem:[#allocation2 + $0xc] sm:$0xf] %vm1759_vm10, %v1730_v60 }
 0x3b6   : > { %v1314_v41 = vadd.f32 %v6474_v26, %v1278_v32 }
 0x3b8   : > { %v1346_v16 = vmax.f32 %v1314_v41, 0.0 }
 0x3b9   : > { %v1142_v35 = vpop.f32.mrf.mxu0 }
 0x3ba   : > { %v1699_v19 = vsel %vm1603_vm3, %v1346_v16, 0.0  ;;  %v1247_v43 = vmax.f32 %v7367_v4, %v1142_v35  ;;  %vm6528_vm3 = vcmp.le.s32.totalorder %v1414_v9, 14  ;;  %v5675_v9 = vld [vmem:[%s7253_s3 + $0x40] sm:$0xff] }
 0x3bb   : > { %v1731_v47 = vpack.c.bf16 %v1699_v19, %v1699_v19  ;;  %vm1542_vm4 = vmand %vm6524_vm1, %vm6528_vm3  ;;  %3183 = vmatpush.bf16.msra.mxu2 %v5675_v9 }
 0x3bc   : > { %v1279_v59 = vmax.f32 %v1215_v27, %v1247_v43  ;;  %v5621_v10 = vld [vmem:[#allocation2 + $0x8] sm:$0xff]  ;;  %vm1670_vm6 = vmand %vm1542_vm4, %vm1638_vm5 }
 0x3bd   : > { %1764 = vst.msk [vmem:[#allocation2 + $0x10] sm:$0xf] %vm1759_vm10, %v1731_v47  ;;  %5093 = vmatmul.msk.bf16.gmra.mxu2 %vm2070_vm2, %v5621_v10  ;;  %v2352_v53 = vrot.slane %v5621_v10, 1  ;;  %v1934_v48 = vshll.u32 %v5621_v10, 16  ;;  %v1938_v41 = vshrl.u32 %v5621_v10, 16 }
 0x3be   : > { %v1315_v25 = vadd.f32 %v6474_v26, %v1279_v59  ;;  %v2358_v59 = vrot.slane %v5624_v51, 1 }
 0x3bf   : > { %v2353_v42 = vsel %vm2350_vm9, %v2351_v29, %v2352_v53  ;;  %v1936_v57 = vrot.slane %v1934_v48, 1  ;;  %v5625_v29 = vld [vmem:[#allocation2 + $0x28] sm:$0xff] }
 0x3c0   : > { %v1347_v40 = vmax.f32 %v1315_v25, 0.0  ;;  %5120 = vmatmul.msk.bf16.vlgmr.msrb.gmra.mxu3 %vm2070_vm2, %v2353_v42  ;;  %v2360_v48 = vrot.slane %v5625_v29, 1  ;;  %v1964_v42 = vor.u32 %v1962_v34, %v1960_v31  ;;  %v1970_v61 = vshrl.u32 %v5625_v29, 16 }
 0x3c1   : > { %v1145_v15 = vpop.f32.mrf.mxu0  ;;  %v1937_v44 = vsel %vm1925_vm13, %v1932_v24, %v1936_v57  ;;  %v1940_v17 = vor.u32 %v1938_v41, %v1936_v57 }
 0x3c2   : > { %v1700_v37 = vsel %vm1668_vm8, %v1347_v40, 0.0  ;;  %v1248_v33 = vmax.f32 %v7374_v3, %v1145_v15  ;;  %5068 = vmatmul.msk.bf16.vlgmr.msrb.gmra.mxu1 %vm2070_vm2, %v1937_v44  ;;  %v2361_v40 = vsel %vm2350_vm9, %v2358_v59, %v2360_v48  ;;  %v5626_v15 = vld [vmem:[#allocation2 + $0x30] sm:$0xff]  ;;  %v5627_v3 = vld [vmem:[#allocation2 + $0x38] sm:$0xff] }
 0x3c3   : > { %v1732_v54 = vpack.c.bf16 %v1700_v37, %v1700_v37  ;;  %v1974_v49 = vshll.u32 %v5626_v15, 16  ;;  %v2362_v55 = vrot.slane %v5626_v15, 1  ;;  %v2364_v44 = vrot.slane %v5627_v3, 1 }
 0x3c4   : > { %v1280_v13 = vmax.f32 %v1216_v8, %v1248_v33  ;;  %v1982_v33 = vshll.u32 %v5627_v3, 16 }
 0x3c5   : > { %1765 = vst.msk [vmem:[#allocation2 + $0x14] sm:$0xf] %vm1759_vm10, %v1732_v54  ;;  %v1976_v5 = vrot.slane %v1974_v49, 1  ;;  %v2363_v63 = vsel %vm2350_vm9, %v2360_v48, %v2362_v55  ;;  %v1978_v54 = vshrl.u32 %v5626_v15, 16 }
 0x3c6   : > { %v1316_v20 = vadd.f32 %v6474_v26, %v1280_v13  ;;  %v1984_v13 = vrot.slane %v1982_v33, 1 }
 0x3c8   : > { %v1348_v28 = vmax.f32 %v1316_v20, 0.0  ;;  %v2365_v20 = vsel %vm2350_vm9, %v2362_v55, %v2364_v44 }
 0x3c9   : > { %v1147_v12 = vpop.f32.mrf.mxu0 }
 0x3ca   : > { %v1701_v21 = vsel %vm1605_vm0, %v1348_v28, 0.0  ;;  %v1249_v46 = vmax.f32 %v7381_v6, %v1147_v12  ;;  %v1980_v28 = vor.u32 %v1978_v54, %v1976_v5 }
 0x3cb   : > { %v1733_v50 = vpack.c.bf16 %v1701_v21, %v1701_v21  ;;  %v1992_v21 = vrot.slane %v1990_v22, 1 }
 0x3cc   : > { %v1281_v14 = vmax.f32 %v1217_v11, %v1249_v46  ;;  %v5622_v60 = vld [vmem:[#allocation2 + $0x10] sm:$0xff]  ;;  %v1985_v12 = vsel %vm1925_vm13, %v1980_v28, %v1984_v13  ;;  %v1986_v11 = vshrl.u32 %v5627_v3, 16  ;;  %v2367_v46 = vsel %vm2350_vm9, %v2364_v44, %v2366_v56 }
 0x3cd   : > { %1766 = vst.msk [vmem:[#allocation2 + $0x18] sm:$0xf] %vm1759_vm10, %v1733_v50  ;;  %5094 = vmatmul.msk.bf16.gmra.mxu2 %vm2070_vm2, %v5622_v60  ;;  %v2354_v18 = vrot.slane %v5622_v60, 1  ;;  %v1942_v45 = vshll.u32 %v5622_v60, 16  ;;  %v1946_v52 = vshrl.u32 %v5622_v60, 16  ;;  %v5629_v60 = vld [vmem:[#allocation2 + $0x48] sm:$0xff] }
 0x3ce   : > { %v1317_v32 = vadd.f32 %v6474_v26, %v1281_v14  ;;  %v1988_v50 = vor.u32 %v1986_v11, %v1984_v13  ;;  %v2368_v41 = vrot.slane %v5629_v60, 1  ;;  %v2002_v2 = vshrl.u32 %v5629_v60, 16 }
 0x3cf   : > { %v2355_v16 = vsel %vm2350_vm9, %v2352_v53, %v2354_v18  ;;  %v1944_v35 = vrot.slane %v1942_v45, 1  ;;  %v1966_v53 = vshll.u32 %v5625_v29, 16  ;;  %v1994_v45 = vshrl.u32 %v5628_v1, 16 }
 0x3d0   : > { %v1349_v7 = vmax.f32 %v1317_v32, 0.0  ;;  %5121 = vmatmul.msk.bf16.gmra.mxu3 %vm2070_vm2, %v2355_v16  ;;  %v1993_v14 = vsel %vm1925_vm13, %v1988_v50, %v1992_v21 }
 0x3d1   : > { %v1945_v58 = vsel %vm1925_vm13, %v1940_v17, %v1944_v35  ;;  %v1948_v19 = vor.u32 %v1946_v52, %v1944_v35  ;;  %v1968_v24 = vrot.slane %v1966_v53, 1  ;;  %v2369_v17 = vsel %vm2350_vm9, %v2366_v56, %v2368_v41  ;;  %v5630_v52 = vld [vmem:[#allocation2 + $0x50] sm:$0xff] }
 0x3d2   : > { %v1702_v38 = vsel %vm1670_vm6, %v1349_v7, 0.0  ;;  %5069 = vmatmul.msk.bf16.gmra.mxu1 %vm2070_vm2, %v1945_v58  ;;  %v1996_v35 = vor.u32 %v1994_v45, %v1992_v21  ;;  %v5633_v45 = vld [vmem:[#allocation2 + $0x68] sm:$0xff] }
 0x3d3   : > { %v1734_v39 = vpack.c.bf16 %v1702_v38, %v1702_v38  ;;  %v1969_v57 = vsel %vm1925_vm13, %v1964_v42, %v1968_v24  ;;  %v1972_v8 = vor.u32 %v1970_v61, %v1968_v24  ;;  %v5631_v24 = vld [vmem:[#allocation2 + $0x58] sm:$0xff] }
 0x3d4   : > { %v2372_v55 = vrot.slane %v5631_v24, 1  ;;  %v2018_v11 = vshrl.u32 %v5631_v24, 16 }
 0x3d5   : > { %1767 = vst.msk [vmem:[#allocation2 + $0x1c] sm:$0xf] %vm1759_vm10, %v1734_v39  ;;  %v1977_v37 = vsel %vm1925_vm13, %v1972_v8, %v1976_v5  ;;  %v2010_v5 = vshrl.u32 %v5630_v52, 16  ;;  %vm4575_vm10 = vcmask 125952  }
 0x3dc   : > { %v5623_v26 = vld [vmem:[#allocation2 + $0x18] sm:$0xff] }
 0x3dd   : > { %5095 = vmatmul.msk.bf16.gmra.mxu2 %vm2070_vm2, %v5623_v26  ;;  %v2356_v36 = vrot.slane %v5623_v26, 1  ;;  %v1950_v30 = vshll.u32 %v5623_v26, 16  ;;  %v1954_v47 = vshrl.u32 %v5623_v26, 16 }
 0x3df   : > { %v2357_v27 = vsel %vm2350_vm9, %v2354_v18, %v2356_v36  ;;  %v1952_v4 = vrot.slane %v1950_v30, 1  ;;  %v2359_v23 = vsel %vm2350_vm9, %v2356_v36, %v2358_v59  ;;  %v1998_v18 = vshll.u32 %v5629_v60, 16 }
 0x3e0   : > { %5122 = vmatmul.msk.bf16.gmra.mxu3 %vm2070_vm2, %v2357_v27 }
 0x3e1   : > { %v1953_v43 = vsel %vm1925_vm13, %v1948_v19, %v1952_v4  ;;  %v1956_v10 = vor.u32 %v1954_v47, %v1952_v4  ;;  %v2000_v7 = vrot.slane %v1998_v18, 1  ;;  %v2006_v4 = vshll.u32 %v5630_v52, 16 }
 0x3e2   : > { %5070 = vmatmul.msk.bf16.gmra.mxu1 %vm2070_vm2, %v1953_v43 }
 0x3e3   : > { %v1961_v25 = vsel %vm1925_vm13, %v1956_v10, %v1960_v31  ;;  %v2001_v39 = vsel %vm1925_vm13, %v1996_v35, %v2000_v7  ;;  %v2008_v59 = vrot.slane %v2006_v4, 1  ;;  %v2004_v31 = vor.u32 %v2002_v2, %v2000_v7 }
 0x3e4   : > { %v2030_v35 = vshll.u32 %v5633_v45, 16 }
 0x3e5   : > { %v2009_v53 = vsel %vm1925_vm13, %v2004_v31, %v2008_v59 }
 0x3ed   : > { %5096 = vmatmul.msk.bf16.gmra.mxu2 %vm2070_vm2, %v5624_v51  ;;  %v2370_v51 = vrot.slane %v5630_v52, 1 }
 0x3f0   : > { %5123 = vmatmul.msk.bf16.gmra.mxu3 %vm2070_vm2, %v2359_v23  ;;  %v2371_v23 = vsel %vm2350_vm9, %v2368_v41, %v2370_v51 }
 0x3f2   : > { %5071 = vmatmul.msk.bf16.gmra.mxu1 %vm2070_vm2, %v1961_v25 }
 0x3fd   : > { %5097 = vmatmul.msk.bf16.gmra.mxu2 %vm2070_vm2, %v5625_v29 }
 0x400   : > { %5124 = vmatmul.msk.bf16.gmra.mxu3 %vm2070_vm2, %v2361_v40 }
 0x402   : > { %5072 = vmatmul.msk.bf16.gmra.mxu1 %vm2070_vm2, %v1969_v57 }
 0x40d   : > { %5098 = vmatmul.msk.bf16.gmra.mxu2 %vm2070_vm2, %v5626_v15  ;;  %v2014_v15 = vshll.u32 %v5631_v24, 16 }
 0x410   : > { %5125 = vmatmul.msk.bf16.gmra.mxu3 %vm2070_vm2, %v2363_v63  ;;  %v2016_v63 = vrot.slane %v2014_v15, 1 }
 0x412   : > { %5073 = vmatmul.msk.bf16.gmra.mxu1 %vm2070_vm2, %v1977_v37  ;;  %v2373_v37 = vsel %vm2350_vm9, %v2370_v51, %v2372_v55  ;;  %v2020_v50 = vor.u32 %v2018_v11, %v2016_v63 }
 0x41d   : > { %5099 = vmatmul.msk.bf16.gmra.mxu2 %vm2070_vm2, %v5627_v3  ;;  %v2012_v3 = vor.u32 %v2010_v5, %v2008_v59 }
 0x41f   : > { %v2017_v54 = vsel %vm1925_vm13, %v2012_v3, %v2016_v63  ;;  %v5635_v3 = vld [vmem:[#allocation2 + $0x78] sm:$0xff] }
 0x420   : > { %5126 = vmatmul.msk.bf16.gmra.mxu3 %vm2070_vm2, %v2365_v20  ;;  %v5632_v20 = vld [vmem:[#allocation2 + $0x60] sm:$0xff] }
 0x421   : > { %v2022_v0 = vshll.u32 %v5632_v20, 16  ;;  %v2374_v22 = vrot.slane %v5632_v20, 1 }
 0x422   : > { %5074 = vmatmul.msk.bf16.gmra.mxu1 %vm2070_vm2, %v1985_v12 }
 0x423   : > { %v2024_v21 = vrot.slane %v2022_v0, 1 }
 0x42d   : > { %5100 = vmatmul.msk.bf16.gmra.mxu2 %vm2070_vm2, %v5628_v1 }
 0x430   : > { %v2261_v6 = vpop.f32.mrf.mxu2  ;;  %5127 = vmatmul.msk.bf16.gmra.mxu3 %vm2070_vm2, %v2367_v46  ;;  %v2375_v46 = vsel %vm2350_vm9, %v2372_v55, %v2374_v22 }
 0x432   : > { %5075 = vmatmul.msk.bf16.gmra.mxu1 %vm2070_vm2, %v1993_v14 }
 0x438   : > { %v2263_v32 = vpop.f32.mrf.mxu2 }
 0x43d   : > { %5101 = vmatmul.msk.bf16.gmra.mxu2 %vm2070_vm2, %v5629_v60 }
 0x43f   : > { %v2128_v16 = vpop.f32.mrf.mxu1 }
 0x440   : > { %v2262_v38 = vadd.f32 %v2261_v6, %v2128_v16  ;;  %v2266_v58 = vpop.f32.mrf.mxu2  ;;  %5128 = vmatmul.msk.bf16.gmra.mxu3 %vm2070_vm2, %v2369_v17 }
 0x442   : > { %5076 = vmatmul.msk.bf16.gmra.mxu1 %vm2070_vm2, %v2001_v39 }
 0x443   : > { %v2453_v26 = vpop.f32.mrf.mxu3 }
 0x444   : > { %v6591_v36 = vadd.f32 %v2453_v26, %v2262_v38  ;;  %v2026_v26 = vshrl.u32 %v5632_v20, 16 }
 0x447   : > { %v2130_v30 = vpop.f32.mrf.mxu1 }
 0x448   : > { %v2264_v27 = vadd.f32 %v2263_v32, %v2130_v30  ;;  %v2268_v19 = vpop.f32.mrf.mxu2  ;;  %v2025_v32 = vsel %vm1925_vm13, %v2020_v50, %v2024_v21 }
 0x44b   : > { %v2455_v43 = vpop.f32.mrf.mxu3 }
 0x44c   : > { %v6593_v47 = vadd.f32 %v2455_v43, %v2264_v27 }
 0x44d   : > { %5102 = vmatmul.msk.bf16.gmra.mxu2 %vm2070_vm2, %v5630_v52  ;;  %v2032_v52 = vrot.slane %v2030_v35, 1 }
 0x44f   : > { %v2133_v10 = vpop.f32.mrf.mxu1 }
 0x450   : > { %v2267_v25 = vadd.f32 %v2266_v58, %v2133_v10  ;;  %v2271_v29 = vpop.f32.mrf.mxu2  ;;  %5129 = vmatmul.msk.bf16.gmra.mxu3 %vm2070_vm2, %v2371_v23  ;;  %v2376_v58 = vrot.slane %v5633_v45, 1  ;;  %v5634_v10 = vld [vmem:[#allocation2 + $0x70] sm:$0xff] }
 0x452   : > { %5077 = vmatmul.msk.bf16.gmra.mxu1 %vm2070_vm2, %v2009_v53  ;;  %v2377_v27 = vsel %vm2350_vm9, %v2374_v22, %v2376_v58 }
 0x453   : > { %v2458_v48 = vpop.f32.mrf.mxu3 }
 0x454   : > { %v6600_v34 = vadd.f32 %v2458_v48, %v2267_v25  ;;  %v2378_v48 = vrot.slane %v5634_v10, 1 }
 0x456   : > { %v2379_v15 = vsel %vm2350_vm9, %v2376_v58, %v2378_v48 }
 0x457   : > { %v2135_v40 = vpop.f32.mrf.mxu1 }
 0x458   : > { %v2269_v42 = vadd.f32 %v2268_v19, %v2135_v40  ;;  %v2273_v57 = vpop.f32.mrf.mxu2  ;;  %v2028_v19 = vor.u32 %v2026_v26, %v2024_v21  ;;  %v2034_v40 = vshrl.u32 %v5633_v45, 16 }
 0x45a   : > { %v2033_v51 = vsel %vm1925_vm13, %v2028_v19, %v2032_v52 }
 0x45b   : > { %v2460_v49 = vpop.f32.mrf.mxu3 }
 0x45c   : > { %v6602_v61 = vadd.f32 %v2460_v49, %v2269_v42  ;;  %v2036_v49 = vor.u32 %v2034_v40, %v2032_v52 }
 0x45d   : > { %5103 = vmatmul.msk.bf16.gmra.mxu2 %vm2070_vm2, %v5631_v24 }
 0x45f   : > { %v2138_v8 = vpop.f32.mrf.mxu1 }
 0x460   : > { %v2272_v33 = vadd.f32 %v2271_v29, %v2138_v8  ;;  %v2276_v44 = vpop.f32.mrf.mxu2  ;;  %5130 = vmatmul.msk.bf16.gmra.mxu3 %vm2070_vm2, %v2373_v37  ;;  %v2038_v29 = vshll.u32 %v5634_v10, 16 }
 0x462   : > { %5078 = vmatmul.msk.bf16.gmra.mxu1 %vm2070_vm2, %v2017_v54  ;;  %v2040_v42 = vrot.slane %v2038_v29, 1 }
 0x463   : > { %v2463_v13 = vpop.f32.mrf.mxu3 }
 0x464   : > { %v6609_v9 = vadd.f32 %v2463_v13, %v2272_v33  ;;  %v2041_v63 = vsel %vm1925_vm13, %v2036_v49, %v2040_v42  ;;  %v2046_v13 = vshll.u32 %v5635_v3, 16 }
 0x466   : > { %v2048_v0 = vrot.slane %v2046_v13, 1 }
 0x467   : > { %v2140_v28 = vpop.f32.mrf.mxu1 }
 0x468   : > { %v2274_v62 = vadd.f32 %v2273_v57, %v2140_v28  ;;  %v2278_v12 = vpop.f32.mrf.mxu2  ;;  %v2380_v28 = vrot.slane %v5635_v3, 1 }
 0x46a   : > { %v2381_v11 = vsel %vm2350_vm9, %v2378_v48, %v2380_v28 }
 0x46b   : > { %v2465_v1 = vpop.f32.mrf.mxu3 }
 0x46c   : > { %v6611_v56 = vadd.f32 %v2465_v1, %v2274_v62  ;;  %v5713_v1 = vld [vmem:[%s7253_s3 + $0x78] sm:$0xff] }
 0x46d   : > { %5104 = vmatmul.msk.bf16.gmra.mxu2 %vm2070_vm2, %v5632_v20 }
 0x46e   : > { %4137 = vmatpush.bf16.msrb.mxu2 %v5713_v1 }
 0x46f   : > { %v2143_v6 = vpop.f32.mrf.mxu1 }
 0x470   : > { %v2277_v14 = vadd.f32 %v2276_v44, %v2143_v6  ;;  %v2281_v60 = vpop.f32.mrf.mxu2  ;;  %5131 = vmatmul.msk.bf16.gmra.mxu3 %vm2070_vm2, %v2375_v46  ;;  %v5731_v6 = vld [vmem:[#allocation2 + $0x8] sm:$0xff]  }
 0x471   : > { %v2985_v19 = vshrl.u32 %v5731_v6, 16 }
 0x472   : > { %5079 = vmatmul.msk.bf16.gmra.mxu1 %vm2070_vm2, %v2025_v32  ;;  %v5715_v32 = vld [vmem:[%s7253_s3 + $0x88] sm:$0xff] }
 0x473   : > { %v2468_v18 = vpop.f32.mrf.mxu3  ;;  %4360 = vmatpush.bf16.msrb.mxu3 %v5715_v32  ;;  %v5642_v32 = vld [vmem:[#allocation2 + $0x8] sm:$0xff] }
 0x474   : > { %v6618_v41 = vadd.f32 %v2468_v18, %v2277_v14  ;;  %v6646_v14 = vld [vmem:[#allocation2 + $0x10] sm:$0xff] }
 0x475   : > { %v3307_v1 = vrot.slane %v6646_v14, 1 }
 0x477   : > { %v2145_v7 = vpop.f32.mrf.mxu1 }
 0x478   : > { %v2279_v16 = vadd.f32 %v2278_v12, %v2145_v7  ;;  %v2283_v17 = vpop.f32.mrf.mxu2  ;;  %v2042_v12 = vshrl.u32 %v5634_v10, 16  ;;  %v5696_v7 = vld [vmem:[%s7253_s3 + $0x68] sm:$0xff] }
 0x479   : > { %3703 = vmatpush.bf16.msrb.mxu1 %v5696_v7 }
 0x47a   : > { %v2044_v21 = vor.u32 %v2042_v12, %v2040_v42 }
 0x47b   : > { %v2470_v38 = vpop.f32.mrf.mxu3 }
 0x47c   : > { %v6620_v39 = vadd.f32 %v2470_v38, %v2279_v16  ;;  %v2049_v18 = vsel %vm1925_vm13, %v2044_v21, %v2048_v0  ;;  %v2992_v38 = vshll.u32 %v6646_v14, 16 }
 0x47d   : > { %5105 = vmatmul.msk.bf16.gmra.mxu2 %vm2070_vm2, %v5633_v45  ;;  %v2987_v45 = vshll.u32 %v5731_v6, 16 }
 0x47f   : > { %v2148_v30 = vpop.f32.mrf.mxu1  ;;  %v2989_v58 = vrot.slane %v2987_v45, 1 }
 0x480   : > { %v2282_v4 = vadd.f32 %v2281_v60, %v2148_v30  ;;  %v2286_v43 = vpop.f32.mrf.mxu2  ;;  %5132 = vmatmul.msk.bf16.gmra.mxu3 %vm2070_vm2, %v2377_v27  ;;  %v1836_v60 = vld [vmem:[#allocation2 + $0x80] sm:$0x1] }
 0x482   : > { %5080 = vmatmul.msk.bf16.gmra.mxu1 %vm2070_vm2, %v2033_v51  ;;  %v2990_v51 = vor.u32 %v2989_v58, %v2985_v19 }
 0x483   : > { %v2473_v2 = vpop.f32.mrf.mxu3 }
 0x484   : > { %v6627_v59 = vadd.f32 %v2473_v2, %v2282_v4  ;;  %v2994_v4 = vrot.slane %v2992_v38, 1 }
 0x487   : > { %v2150_v23 = vpop.f32.mrf.mxu1 }
 0x488   : > { %v2284_v31 = vadd.f32 %v2283_v17, %v2150_v23  ;;  %v2288_v25 = vpop.f32.mrf.mxu2  ;;  %v1907_v17 = vunpack.c.l.b16 %v1836_v60  ;;  %v2050_v23 = vshrl.u32 %v5635_v3, 16 }
 0x48a   : > { %v1924_v52 = vpack.c.b16 %v1907_v17, %v1907_v17  ;;  %v2052_v29 = vor.u32 %v2050_v23, %v2048_v0  ;;  %v5643_v23 = vld [vmem:[#allocation2 + $0x10] sm:$0xff] }
 0x48b   : > { %v2475_v53 = vpop.f32.mrf.mxu3 }
 0x48c   : > { %v6629_v24 = vadd.f32 %v2475_v53, %v2284_v31 }
 0x48d   : > { %5106 = vmatmul.msk.bf16.gmra.mxu2 %vm2070_vm2, %v5634_v10  ;;  %v2382_v10 = vrot.slane %v1924_v52, 1 }
 0x48f   : > { %v2153_v57 = vpop.f32.mrf.mxu1  ;;  %v2383_v40 = vsel %vm2350_vm9, %v2380_v28, %v2382_v10 }
 0x490   : > { %v2287_v55 = vadd.f32 %v2286_v43, %v2153_v57  ;;  %v2291_v5 = vpop.f32.mrf.mxu2  ;;  %5133 = vmatmul.msk.bf16.gmra.mxu3 %vm2070_vm2, %v2379_v15  ;;  %v2054_v43 = vshll.u32 %v1924_v52, 16  ;;  %v6665_v15 = vld [vmem:[#allocation2 + $0x18] sm:$0xff] }
 0x491   : > { %v3004_v7 = vshrl.u32 %v6665_v15, 16 }
 0x492   : > { %5081 = vmatmul.msk.bf16.gmra.mxu1 %vm2070_vm2, %v2041_v63  ;;  %v2056_v53 = vrot.slane %v2054_v43, 1  ;;  %v3000_v63 = vshll.u32 %v6665_v15, 16 }
 0x493   : > { %v2478_v8 = vpop.f32.mrf.mxu3 }
 0x494   : > { %v6636_v37 = vadd.f32 %v2478_v8, %v2287_v55  ;;  %v2057_v49 = vsel %vm1925_vm13, %v2052_v29, %v2056_v53  ;;  %v5732_v8 = vld [vmem:[#allocation2 + $0x8] sm:$0xf0]  ;;  %v3002_v13 = vrot.slane %v3000_v63, 1 }
 0x497   : > { %v2155_v33 = vpop.f32.mrf.mxu1 }
 0x498   : > { %v2289_v44 = vadd.f32 %v2288_v25, %v2155_v33  ;;  %v2293_v54 = vpop.f32.mrf.mxu2  ;;  %v2995_v25 = vsel %vm1925_vm13, %v2990_v51, %v2994_v4 }
 0x49b   : > { %v2480_v20 = vpop.f32.mrf.mxu3 }
 0x49c   : > { %v6638_v62 = vadd.f32 %v2480_v20, %v2289_v44  ;;  %v5733_v20 = vld [vmem:[#allocation2 + $0x8] sm:$0xe] }
 0x49d   : > { %5107 = vmatmul.msk.bf16.gmra.mxu2 %vm2070_vm2, %v5635_v3  ;;  %v5734_v28 = vor.u32 %v5733_v20, %v5732_v8 }
 0x49f   : > { %v2158_v22 = vpop.f32.mrf.mxu1  ;;  %v3306_v21 = vrot.slane %v5734_v28, 1  ;;  %v5644_v28 = vld [vmem:[#allocation2 + $0x18] sm:$0xff] }
 0x4a0   : > { %v2292_v46 = vadd.f32 %v2291_v5, %v2158_v22  ;;  %v2296_v50 = vpop.f32.mrf.mxu2  ;;  %5134 = vmatmul.msk.bf16.gmra.mxu3 %vm2070_vm2, %v2381_v11 }
 0x4a2   : > { %5082 = vmatmul.msk.bf16.gmra.mxu1 %vm2070_vm2, %v2049_v18  ;;  %v5662_v18 = vld [vmem:[#allocation2 + $0x20] sm:$0xff] }
 0x4a3   : > { %v2483_v16 = vpop.f32.mrf.mxu3 }
 0x4a4   : > { %v6656_v35 = vadd.f32 %v2483_v16, %v2292_v46  ;;  %v3308_v46 = vsel %vm2350_vm9, %v3306_v21, %v3307_v1  ;;  %v3008_v16 = vshll.u32 %v5662_v18, 16 }
 0x4a6   : > { %v3010_v52 = vrot.slane %v3008_v16, 1 }
 0x4a7   : > { %v2160_v26 = vpop.f32.mrf.mxu1 }
 0x4a8   : > { %v2294_v30 = vadd.f32 %v2293_v54, %v2160_v26  ;;  %v2298_v27 = vpop.f32.mrf.mxu2  ;;  %v2996_v54 = vshrl.u32 %v6646_v14, 16  ;;  %v3006_v26 = vor.u32 %v3004_v7, %v3002_v13 }
 0x4aa   : > { %v2998_v12 = vor.u32 %v2996_v54, %v2994_v4  ;;  %v3011_v4 = vsel %vm1925_vm13, %v3006_v26, %v3010_v52 }
 0x4ab   : > { %v2485_v2 = vpop.f32.mrf.mxu3 }
 0x4ac   : > { %v6659_v31 = vadd.f32 %v2485_v2, %v2294_v30  ;;  %v3003_v11 = vsel %vm1925_vm13, %v2998_v12, %v3002_v13  ;;  %v6703_v12 = vld [vmem:[#allocation2 + $0x30] sm:$0xff] }
 0x4ad   : > { %5300 = vmatmul.msk.bf16.vlgmr.msra.gmra.mxu2 %vm2070_vm2, %v2995_v25  ;;  %v6691_v25 = vld [vmem:[#allocation2 + $0x28] sm:$0xff] }
 0x4af   : > { %v2163_v48 = vpop.f32.mrf.mxu1 }
 0x4b0   : > { %v2297_v42 = vadd.f32 %v2296_v50, %v2163_v48  ;;  %v2301_v57 = vpop.f32.mrf.mxu2  ;;  %5135 = vmatmul.msk.bf16.gmra.mxu3 %vm2070_vm2, %v2383_v40  ;;  %v3016_v48 = vshll.u32 %v6691_v25, 16 }
 0x4b2   : > { %5083 = vmatmul.msk.bf16.gmra.mxu1 %vm2070_vm2, %v2057_v49  ;;  %v3018_v49 = vrot.slane %v3016_v48, 1 }
 0x4b3   : > { %v2488_v55 = vpop.f32.mrf.mxu3 }
 0x4b4   : > { %v6669_v5 = vadd.f32 %v2488_v55, %v2297_v42 }
 0x4b7   : > { %v2165_v3 = vpop.f32.mrf.mxu1 }
 0x4b8   : > { %v2299_v33 = vadd.f32 %v2298_v27, %v2165_v3  ;;  %v2303_v44 = vpop.f32.mrf.mxu2  ;;  %v3309_v27 = vrot.slane %v6665_v15, 1  ;;  %v3012_v15 = vshrl.u32 %v5662_v18, 16 }
 0x4ba   : > { %v3310_v51 = vsel %vm2350_vm9, %v3307_v1, %v3309_v27  ;;  %v3014_v55 = vor.u32 %v3012_v15, %v3010_v52  ;;  %v5645_v52 = vld [vmem:[#allocation2 + $0x20] sm:$0xff] }
 0x4bb   : > { %v2490_v0 = vpop.f32.mrf.mxu3 }
 0x4bc   : > { %v6674_v22 = vadd.f32 %v2490_v0, %v2299_v33  ;;  %v3019_v3 = vsel %vm1925_vm13, %v3014_v55, %v3018_v49  ;;  %v3311_v33 = vrot.slane %v5662_v18, 1 }
 0x4bd   : > { %5301 = vmatmul.msk.bf16.gmra.mxu2 %vm2070_vm2, %v3003_v11  ;;  %v3024_v11 = vshll.u32 %v6703_v12, 16 }
 0x4be   : > { %v3312_v54 = vsel %vm2350_vm9, %v3309_v27, %v3311_v33 }
 0x4bf   : > { %v2168_v6 = vpop.f32.mrf.mxu1 }
 0x4c0   : > { %v2302_v50 = vadd.f32 %v2301_v57, %v2168_v6  ;;  %v2306_v60 = vpop.f32.mrf.mxu2  ;;  %5328 = vmatmul.msk.bf16.vlgmr.msra.gmra.mxu3 %vm2070_vm2, %v3308_v46 }
 0x4c2   : > { %5212 = vmatmul.msk.bf16.vlgmr.msra.gmra.mxu1 %vm2070_vm2, %v5642_v32 }
 0x4c3   : > { %v2493_v45 = vpop.f32.mrf.mxu3 }
 0x4c4   : > { %v6681_v14 = vadd.f32 %v2493_v45, %v2302_v50  ;;  %v3020_v50 = vshrl.u32 %v6691_v25, 16  ;;  %v3313_v45 = vrot.slane %v6691_v25, 1 }
 0x4c6   : > { %v3022_v32 = vor.u32 %v3020_v50, %v3018_v49 }
 0x4c7   : > { %v2170_v17 = vpop.f32.mrf.mxu1 }
 0x4c8   : > { %v2304_v38 = vadd.f32 %v2303_v44, %v2170_v17  ;;  %v2308_v58 = vpop.f32.mrf.mxu2 }
 0x4cb   : > { %v2495_v30 = vpop.f32.mrf.mxu3 }
 0x4cc   : > { %v6685_v19 = vadd.f32 %v2495_v30, %v2304_v38  ;;  %v3314_v38 = vsel %vm2350_vm9, %v3311_v33, %v3313_v45  ;;  %v6717_v30 = vld [vmem:[#allocation2 + $0x38] sm:$0xff]  ;;  %v6731_v33 = vld [vmem:[#allocation2 + $0x40] sm:$0xff] }
 0x4cd   : > { %5302 = vmatmul.msk.bf16.gmra.mxu2 %vm2070_vm2, %v3011_v4 }
 0x4cf   : > { %v2173_v43 = vpop.f32.mrf.mxu1 }
 0x4d0   : > { %v2307_v2 = vadd.f32 %v2306_v60, %v2173_v43  ;;  %v2311_v10 = vpop.f32.mrf.mxu2  ;;  %5329 = vmatmul.msk.bf16.gmra.mxu3 %vm2070_vm2, %v3310_v51  ;;  %v3026_v60 = vrot.slane %v3024_v11, 1  ;;  %v3032_v43 = vshll.u32 %v6717_v30, 16 }
 0x4d2   : > { %5213 = vmatmul.msk.bf16.gmra.mxu1 %vm2070_vm2, %v5643_v23  ;;  %v3027_v16 = vsel %vm1925_vm13, %v3022_v32, %v3026_v60  ;;  %v3028_v23 = vshrl.u32 %v6703_v12, 16  ;;  %v3034_v25 = vrot.slane %v3032_v43, 1 }
 0x4d3   : > { %v2498_v29 = vpop.f32.mrf.mxu3 }
 0x4d4   : > { %v6694_v53 = vadd.f32 %v2498_v29, %v2307_v2  ;;  %v3030_v29 = vor.u32 %v3028_v23, %v3026_v60 }
 0x4d7   : > { %v2175_v40 = vpop.f32.mrf.mxu1 }
 0x4d8   : > { %v2309_v42 = vadd.f32 %v2308_v58, %v2175_v40  ;;  %v2313_v57 = vpop.f32.mrf.mxu2  ;;  %v3315_v40 = vrot.slane %v6703_v12, 1 }
 0x4da   : > { %v3316_v49 = vsel %vm2350_vm9, %v3313_v45, %v3315_v40 }
 0x4db   : > { %v2500_v63 = vpop.f32.mrf.mxu3 }
 0x4dc   : > { %v6697_v8 = vadd.f32 %v2500_v63, %v2309_v42 }
 0x4dd   : > { %5303 = vmatmul.msk.bf16.gmra.mxu2 %vm2070_vm2, %v3019_v3  ;;  %v5646_v3 = vld [vmem:[#allocation2 + $0x28] sm:$0xff] }
 0x4df   : > { %v2178_v44 = vpop.f32.mrf.mxu1 }
 0x4e0   : > { %v2312_v13 = vadd.f32 %v2311_v10, %v2178_v44  ;;  %v2316_v20 = vpop.f32.mrf.mxu2  ;;  %5330 = vmatmul.msk.bf16.gmra.mxu3 %vm2070_vm2, %v3312_v54 }
 0x4e2   : > { %5214 = vmatmul.msk.bf16.gmra.mxu1 %vm2070_vm2, %v5644_v28 }
 0x4e3   : > { %v2503_v0 = vpop.f32.mrf.mxu3 }
 0x4e4   : > { %v6706_v1 = vadd.f32 %v2503_v0, %v2312_v13  ;;  %v3040_v13 = vshll.u32 %v6731_v33, 16  ;;  %v3036_v0 = vshrl.u32 %v6717_v30, 16 }
 0x4e6   : > { %v3042_v11 = vrot.slane %v3040_v13, 1 }
 0x4e7   : > { %v2180_v21 = vpop.f32.mrf.mxu1 }
 0x4e8   : > { %v2314_v6 = vadd.f32 %v2313_v57, %v2180_v21  ;;  %v2318_v46 = vpop.f32.mrf.mxu2  ;;  %v3035_v57 = vsel %vm1925_vm13, %v3030_v29, %v3034_v25  ;;  %v3038_v21 = vor.u32 %v3036_v0, %v3034_v25  ;;  %v3319_v25 = vrot.slane %v6731_v33, 1 }
 0x4ea   : > { %v3043_v60 = vsel %vm1925_vm13, %v3038_v21, %v3042_v11 }
 0x4eb   : > { %v2505_v18 = vpop.f32.mrf.mxu3 }
 0x4ec   : > { %v6711_v7 = vadd.f32 %v2505_v18, %v2314_v6 }
 0x4ed   : > { %5304 = vmatmul.msk.bf16.gmra.mxu2 %vm2070_vm2, %v3027_v16 }
 0x4ef   : > { %v2183_v17 = vpop.f32.mrf.mxu1 }
 0x4f0   : > { %v2317_v58 = vadd.f32 %v2316_v20, %v2183_v17  ;;  %v2321_v26 = vpop.f32.mrf.mxu2  ;;  %5331 = vmatmul.msk.bf16.gmra.mxu3 %vm2070_vm2, %v3314_v38  ;;  %v5647_v17 = vld [vmem:[#allocation2 + $0x30] sm:$0xff]  ;;  %v6745_v38 = vld [vmem:[#allocation2 + $0x48] sm:$0xff] }
 0x4f1   : > { %v3052_v21 = vshrl.u32 %v6745_v38, 16 }
 0x4f2   : > { %5215 = vmatmul.msk.bf16.gmra.mxu1 %vm2070_vm2, %v5645_v52  ;;  %v3048_v52 = vshll.u32 %v6745_v38, 16 }
 0x4f3   : > { %v2508_v27 = vpop.f32.mrf.mxu3 }
 0x4f4   : > { %v6720_v4 = vadd.f32 %v2508_v27, %v2317_v58 }
 0x4f7   : > { %v2185_v51 = vpop.f32.mrf.mxu1 }
 0x4f8   : > { %v2319_v2 = vadd.f32 %v2318_v46, %v2185_v51  ;;  %v2323_v10 = vpop.f32.mrf.mxu2  ;;  %v3317_v46 = vrot.slane %v6717_v30, 1  ;;  %v3044_v51 = vshrl.u32 %v6731_v33, 16  ;;  %v5714_v33 = vld [vmem:[%s7253_s3 + $0x80] sm:$0xff] }
 0x4f9   : > { %4361 = vmatpush.bf16.msrb.mxu3 %v5714_v33 }
 0x4fa   : > { %v3318_v18 = vsel %vm2350_vm9, %v3315_v40, %v3317_v46  ;;  %v5712_v40 = vld [vmem:[%s7253_s3 + $0x70] sm:$0xff] }
 0x4fb   : > { %v2510_v48 = vpop.f32.mrf.mxu3  ;;  %4138 = vmatpush.bf16.msrb.mxu2 %v5712_v40 }
 0x4fc   : > { %v6725_v42 = vadd.f32 %v2510_v48, %v2319_v2  ;;  %v3050_v2 = vrot.slane %v3048_v52, 1 }
 0x4fd   : > { %5305 = vmatmul.msk.bf16.gmra.mxu2 %vm2070_vm2, %v3035_v57 }
 0x4ff   : > { %v2188_v15 = vpop.f32.mrf.mxu1 }
 0x500   : > { %v2322_v55 = vadd.f32 %v2321_v26, %v2188_v15  ;;  %v2326_v63 = vpop.f32.mrf.mxu2  ;;  %5332 = vmatmul.msk.bf16.gmra.mxu3 %vm2070_vm2, %v3316_v49  ;;  %v3320_v15 = vsel %vm2350_vm9, %v3317_v46, %v3319_v25  ;;  %v3054_v46 = vor.u32 %v3052_v21, %v3050_v2 }
 0x502   : > { %5216 = vmatmul.msk.bf16.gmra.mxu1 %vm2070_vm2, %v5646_v3  ;;  %v6762_v3 = vld [vmem:[#allocation2 + $0x50] sm:$0xff] }
 0x503   : > { %v2513_v44 = vpop.f32.mrf.mxu3 }
 0x504   : > { %v6734_v54 = vadd.f32 %v2513_v44, %v2322_v55  ;;  %v5695_v44 = vld [vmem:[%s7253_s3 + $0x60] sm:$0xff] }
 0x505   : > { %3704 = vmatpush.bf16.msrb.mxu1 %v5695_v44 }
 0x507   : > { %v2190_v20 = vpop.f32.mrf.mxu1 }
 0x508   : > { %v2324_v28 = vadd.f32 %v2323_v10, %v2190_v20  ;;  %v2328_v12 = vpop.f32.mrf.mxu2  ;;  %v3046_v10 = vor.u32 %v3044_v51, %v3042_v11 }
 0x50a   : > { %v3051_v48 = vsel %vm1925_vm13, %v3046_v10, %v3050_v2 }
 0x50b   : > { %v2515_v6 = vpop.f32.mrf.mxu3 }
 0x50c   : > { %v6739_v50 = vadd.f32 %v2515_v6, %v2324_v28  ;;  %v3056_v28 = vshll.u32 %v6762_v3, 16 }
 0x50d   : > { %5306 = vmatmul.msk.bf16.gmra.mxu2 %vm2070_vm2, %v3043_v60 }
 0x50e   : > { %v3058_v6 = vrot.slane %v3056_v28, 1  ;;  %v5650_v28 = vld [vmem:[#allocation2 + $0x48] sm:$0xff] }
 0x50f   : > { %v2193_v32 = vpop.f32.mrf.mxu1 }
 0x510   : > { %v2327_v45 = vadd.f32 %v2326_v63, %v2193_v32  ;;  %v2331_v16 = vpop.f32.mrf.mxu2  ;;  %5333 = vmatmul.msk.bf16.gmra.mxu3 %vm2070_vm2, %v3318_v18  ;;  %v5648_v63 = vld [vmem:[#allocation2 + $0x38] sm:$0xff]  ;;  %v3321_v32 = vrot.slane %v6745_v38, 1 }
 0x512   : > { %5217 = vmatmul.msk.bf16.gmra.mxu1 %vm2070_vm2, %v5647_v17  ;;  %v3322_v17 = vsel %vm2350_vm9, %v3319_v25, %v3321_v32 }
 0x513   : > { %v2518_v58 = vpop.f32.mrf.mxu3 }
 0x514   : > { %v6748_v26 = vadd.f32 %v2518_v58, %v2327_v45  ;;  %v3059_v45 = vsel %vm1925_vm13, %v3054_v46, %v3058_v6 }
 0x517   : > { %v2195_v30 = vpop.f32.mrf.mxu1 }
 0x518   : > { %v2329_v27 = vadd.f32 %v2328_v12, %v2195_v30  ;;  %v2333_v43 = vpop.f32.mrf.mxu2  ;;  %v5649_v30 = vld [vmem:[#allocation2 + $0x40] sm:$0xff] }
 0x51b   : > { %v2520_v23 = vpop.f32.mrf.mxu3 }
 0x51c   : > { %v6753_v29 = vadd.f32 %v2520_v23, %v2329_v27  ;;  %v6782_v27 = vld [vmem:[#allocation2 + $0x58] sm:$0xff] }
 0x51d   : > { %5307 = vmatmul.msk.bf16.gmra.mxu2 %vm2070_vm2, %v3051_v48  ;;  %v3064_v51 = vshll.u32 %v6782_v27, 16  ;;  %v3060_v48 = vshrl.u32 %v6762_v3, 16 }
 0x51f   : > { %v2198_v57 = vpop.f32.mrf.mxu1  ;;  %v3066_v25 = vrot.slane %v3064_v51, 1  ;;  %v3062_v40 = vor.u32 %v3060_v48, %v3058_v6 }
 0x520   : > { %v2332_v49 = vadd.f32 %v2331_v16, %v2198_v57  ;;  %v2336_v55 = vpop.f32.mrf.mxu2  ;;  %5334 = vmatmul.msk.bf16.gmra.mxu3 %vm2070_vm2, %v3320_v15  ;;  %v3323_v15 = vrot.slane %v6762_v3, 1 }
 0x522   : > { %5218 = vmatmul.msk.bf16.gmra.mxu1 %vm2070_vm2, %v5648_v63  ;;  %v3324_v33 = vsel %vm2350_vm9, %v3321_v32, %v3323_v15 }
 0x523   : > { %v2523_v13 = vpop.f32.mrf.mxu3 }
 0x524   : > { %v6771_v20 = vadd.f32 %v2523_v13, %v2332_v49 }
 0x527   : > { %v2200_v12 = vpop.f32.mrf.mxu1 }
 0x528   : > { %v2334_v0 = vadd.f32 %v2333_v43, %v2200_v12  ;;  %v2338_v11 = vpop.f32.mrf.mxu2  ;;  %v6797_v12 = vld [vmem:[#allocation2 + $0x60] sm:$0xff] }
 0x529   : > { %v3072_v21 = vshll.u32 %v6797_v12, 16 }
 0x52b   : > { %v2525_v60 = vpop.f32.mrf.mxu3  ;;  %v3074_v32 = vrot.slane %v3072_v21, 1 }
 0x52c   : > { %v6776_v18 = vadd.f32 %v2525_v60, %v2334_v0 }
 0x52d   : > { %5308 = vmatmul.msk.bf16.gmra.mxu2 %vm2070_vm2, %v3059_v45 }
 0x52f   : > { %v2203_v16 = vpop.f32.mrf.mxu1 }
 0x530   : > { %v2337_v58 = vadd.f32 %v2336_v55, %v2203_v16  ;;  %v3185_v52 = vpop.f32.mrf.mxu2  ;;  %5335 = vmatmul.msk.bf16.gmra.mxu3 %vm2070_vm2, %v3322_v17  ;;  %v3067_v55 = vsel %vm1925_vm13, %v3062_v40, %v3066_v25 }
 0x532   : > { %5219 = vmatmul.msk.bf16.gmra.mxu1 %vm2070_vm2, %v5649_v30 }
 0x533   : > { %v2528_v43 = vpop.f32.mrf.mxu3 }
 0x534   : > { %v6785_v38 = vadd.f32 %v2528_v43, %v2337_v58  ;;  %v3325_v58 = vrot.slane %v6782_v27, 1 }
 0x536   : > { %v3326_v51 = vsel %vm2350_vm9, %v3323_v15, %v3325_v58 }
 0x537   : > { %v2205_v2 = vpop.f32.mrf.mxu1 }
 0x538   : > { %v2339_v10 = vadd.f32 %v2338_v11, %v2205_v2  ;;  %v3187_v23 = vpop.f32.mrf.mxu2 }
 0x53b   : > { %v2530_v57 = vpop.f32.mrf.mxu3 }
 0x53c   : > { %v6790_v49 = vadd.f32 %v2530_v57, %v2339_v10  ;;  %v5651_v10 = vld [vmem:[#allocation2 + $0x50] sm:$0xff] }
 0x53d   : > { %5309 = vmatmul.msk.bf16.gmra.mxu2 %vm2070_vm2, %v3067_v55 }
 0x53f   : > { %v2751_v63 = vpop.f32.mrf.mxu1 }
 0x540   : > { %v2831_v44 = vadd.f32 %v2751_v63, %v6591_v36  ;;  %v3190_v13 = vpop.f32.mrf.mxu2  ;;  %5336 = vmatmul.msk.bf16.gmra.mxu3 %vm2070_vm2, %v3324_v33  ;;  %v3068_v36 = vshrl.u32 %v6782_v27, 16 }
 0x542   : > { %5220 = vmatmul.msk.bf16.gmra.mxu1 %vm2070_vm2, %v5650_v28  ;;  %v3265_v3 = vadd.f32 %v3185_v52, %v2831_v44  ;;  %v3070_v16 = vor.u32 %v3068_v36, %v3066_v25  ;;  %v5652_v36 = vld [vmem:[#allocation2 + $0x58] sm:$0xff] }
 0x543   : > { %v3408_v0 = vpop.f32.mrf.mxu3 }
 0x544   : > { %v6800_v11 = vadd.f32 %v3408_v0, %v3265_v3  ;;  %v3075_v52 = vsel %vm1925_vm13, %v3070_v16, %v3074_v32  ;;  %v3327_v3 = vrot.slane %v6797_v12, 1 }
 0x547   : > { %v2753_v6 = vpop.f32.mrf.mxu1 }
 0x548   : > { %v2832_v46 = vadd.f32 %v2753_v6, %v6593_v47  ;;  %v3192_v60 = vpop.f32.mrf.mxu2  ;;  %v3328_v6 = vsel %vm2350_vm9, %v3325_v58, %v3327_v3 }
 0x54a   : > { %v3266_v45 = vadd.f32 %v3187_v23, %v2832_v46  ;;  %v6813_v23 = vld [vmem:[#allocation2 + $0x68] sm:$0xff] }
 0x54b   : > { %v3410_v17 = vpop.f32.mrf.mxu3  ;;  %v3080_v40 = vshll.u32 %v6813_v23, 16 }
 0x54c   : > { %v6806_v30 = vadd.f32 %v3410_v17, %v3266_v45 }
 0x54d   : > { %5310 = vmatmul.msk.bf16.gmra.mxu2 %vm2070_vm2, %v3075_v52  ;;  %v3082_v63 = vrot.slane %v3080_v40, 1 }
 0x54f   : > { %v2756_v43 = vpop.f32.mrf.mxu1 }
 0x550   : > { %v2833_v47 = vadd.f32 %v2756_v43, %v6600_v34  ;;  %v3195_v2 = vpop.f32.mrf.mxu2  ;;  %5337 = vmatmul.msk.bf16.gmra.mxu3 %vm2070_vm2, %v3326_v51  ;;  %v3076_v34 = vshrl.u32 %v6797_v12, 16 }
 0x552   : > { %5221 = vmatmul.msk.bf16.gmra.mxu1 %vm2070_vm2, %v5651_v10  ;;  %v3267_v27 = vadd.f32 %v3190_v13, %v2833_v47  ;;  %v3078_v44 = vor.u32 %v3076_v34, %v3074_v32  ;;  %v5653_v34 = vld [vmem:[#allocation2 + $0x60] sm:$0xff] }
 0x553   : > { %v3413_v48 = vpop.f32.mrf.mxu3 }
 0x554   : > { %v6816_v25 = vadd.f32 %v3413_v48, %v3267_v27  ;;  %v3083_v13 = vsel %vm1925_vm13, %v3078_v44, %v3082_v63  ;;  %v3329_v27 = vrot.slane %v6813_v23, 1 }
 0x557   : > { %v2758_v57 = vpop.f32.mrf.mxu1 }
 0x558   : > { %v2834_v55 = vadd.f32 %v2758_v57, %v6602_v61  ;;  %v3197_v15 = vpop.f32.mrf.mxu2  ;;  %v3330_v57 = vsel %vm2350_vm9, %v3327_v3, %v3329_v27 }
 0x55a   : > { %v3268_v33 = vadd.f32 %v3192_v60, %v2834_v55  ;;  %v6829_v60 = vld [vmem:[#allocation2 + $0x70] sm:$0xff] }
 0x55b   : > { %v3415_v28 = vpop.f32.mrf.mxu3  ;;  %v3088_v16 = vshll.u32 %v6829_v60, 16 }
 0x55c   : > { %v6822_v0 = vadd.f32 %v3415_v28, %v3268_v33 }
 0x55d   : > { %5311 = vmatmul.msk.bf16.gmra.mxu2 %vm2070_vm2, %v3083_v13  ;;  %v3090_v43 = vrot.slane %v3088_v16, 1 }
 0x55f   : > { %v2761_v21 = vpop.f32.mrf.mxu1 }
 0x560   : > { %v2835_v61 = vadd.f32 %v2761_v21, %v6609_v9  ;;  %v3200_v46 = vpop.f32.mrf.mxu2  ;;  %5338 = vmatmul.msk.bf16.gmra.mxu3 %vm2070_vm2, %v3328_v6  ;;  %v3084_v9 = vshrl.u32 %v6813_v23, 16 }
 0x562   : > { %5222 = vmatmul.msk.bf16.gmra.mxu1 %vm2070_vm2, %v5652_v36  ;;  %v3269_v12 = vadd.f32 %v3195_v2, %v2835_v61  ;;  %v3086_v47 = vor.u32 %v3084_v9, %v3082_v63  ;;  %v5654_v9 = vld [vmem:[#allocation2 + $0x68] sm:$0xff] }
 0x563   : > { %v3418_v32 = vpop.f32.mrf.mxu3 }
 0x564   : > { %v6832_v45 = vadd.f32 %v3418_v32, %v3269_v12  ;;  %v3091_v2 = vsel %vm1925_vm13, %v3086_v47, %v3090_v43  ;;  %v3331_v12 = vrot.slane %v6829_v60, 1 }
 0x567   : > { %v2763_v17 = vpop.f32.mrf.mxu1 }
 0x568   : > { %v2836_v52 = vadd.f32 %v2763_v17, %v6611_v56  ;;  %v3202_v58 = vpop.f32.mrf.mxu2  ;;  %v3332_v17 = vsel %vm2350_vm9, %v3329_v27, %v3331_v12  ;;  %v2895_v27 = vld [vmem:[#allocation2 + $0x88] sm:$0x1] }
 0x56a   : > { %v3270_v51 = vadd.f32 %v3197_v15, %v2836_v52  ;;  %v6845_v15 = vld [vmem:[#allocation2 + $0x78] sm:$0xff] }
 0x56b   : > { %v3420_v10 = vpop.f32.mrf.mxu3  ;;  %v3096_v44 = vshll.u32 %v6845_v15, 16 }
 0x56c   : > { %v6838_v48 = vadd.f32 %v3420_v10, %v3270_v51  ;;  %v3100_v10 = vshrl.u32 %v6845_v15, 16 }
 0x56d   : > { %5312 = vmatmul.msk.bf16.gmra.mxu2 %vm2070_vm2, %v3091_v2  ;;  %v3098_v21 = vrot.slane %v3096_v44, 1 }
 0x56f   : > { %v2766_v40 = vpop.f32.mrf.mxu1 }
 0x570   : > { %v2837_v56 = vadd.f32 %v2766_v40, %v6618_v41  ;;  %v3205_v55 = vpop.f32.mrf.mxu2  ;;  %5339 = vmatmul.msk.bf16.gmra.mxu3 %vm2070_vm2, %v3330_v57  ;;  %v3092_v41 = vshrl.u32 %v6829_v60, 16  ;;  %v3102_v57 = vor.u32 %v3100_v10, %v3098_v21 }
 0x572   : > { %5223 = vmatmul.msk.bf16.gmra.mxu1 %vm2070_vm2, %v5653_v34  ;;  %v3271_v23 = vadd.f32 %v3200_v46, %v2837_v56  ;;  %v3094_v61 = vor.u32 %v3092_v41, %v3090_v43  ;;  %v6862_v43 = vld [vmem:[#allocation2 + $0x80] sm:$0xff] }
 0x573   : > { %v3423_v63 = vpop.f32.mrf.mxu3  ;;  %v3104_v47 = vshll.u32 %v6862_v43, 16  ;;  %v3335_v10 = vrot.slane %v6862_v43, 1 }
 0x574   : > { %v6848_v33 = vadd.f32 %v3423_v63, %v3271_v23  ;;  %v3099_v46 = vsel %vm1925_vm13, %v3094_v61, %v3098_v21  ;;  %v2966_v23 = vunpack.c.l.b16 %v2895_v27 }
 0x575   : > { %v3106_v56 = vrot.slane %v3104_v47, 1 }
 0x577   : > { %v2768_v28 = vpop.f32.mrf.mxu1 }
 0x578   : > { %v2838_v13 = vadd.f32 %v2768_v28, %v6620_v39  ;;  %v3207_v3 = vpop.f32.mrf.mxu2  ;;  %v3107_v28 = vsel %vm1925_vm13, %v3102_v57, %v3106_v56 }
 0x57a   : > { %v3272_v6 = vadd.f32 %v3202_v58, %v2838_v13  ;;  %v2983_v13 = vpack.c.b16 %v2966_v23, %v2966_v23 }
 0x57b   : > { %v3425_v36 = vpop.f32.mrf.mxu3 }
 0x57c   : > { %v6854_v32 = vadd.f32 %v3425_v36, %v3272_v6  ;;  %v3112_v36 = vshll.u32 %v2983_v13, 16 }
 0x57d   : > { %5313 = vmatmul.msk.bf16.gmra.mxu2 %vm2070_vm2, %v3099_v46 }
 0x57f   : > { %v2771_v16 = vpop.f32.mrf.mxu1 }
 0x580   : > { %v2839_v39 = vadd.f32 %v2771_v16, %v6627_v59  ;;  %v3210_v52 = vpop.f32.mrf.mxu2  ;;  %5340 = vmatmul.msk.bf16.gmra.mxu3 %vm2070_vm2, %v3332_v17 }
 0x582   : > { %5224 = vmatmul.msk.bf16.gmra.mxu1 %vm2070_vm2, %v5654_v9  ;;  %v3273_v58 = vadd.f32 %v3205_v55, %v2839_v39  ;;  %v3333_v55 = vrot.slane %v6845_v15, 1  ;;  %v3108_v15 = vshrl.u32 %v6862_v43, 16  ;;  %v3114_v39 = vrot.slane %v3112_v36, 1 }
 0x583   : > { %v3428_v60 = vpop.f32.mrf.mxu3 }
 0x584   : > { %v6864_v51 = vadd.f32 %v3428_v60, %v3273_v58  ;;  %v3334_v6 = vsel %vm2350_vm9, %v3331_v12, %v3333_v55  ;;  %v3110_v17 = vor.u32 %v3108_v15, %v3106_v56  ;;  %v3336_v27 = vsel %vm2350_vm9, %v3333_v55, %v3335_v10 }
 0x586   : > { %v3115_v60 = vsel %vm1925_vm13, %v3110_v17, %v3114_v39 }
 0x587   : > { %v2773_v2 = vpop.f32.mrf.mxu1 }
 0x588   : > { %v2840_v59 = vadd.f32 %v2773_v2, %v6629_v24  ;;  %v3212_v40 = vpop.f32.mrf.mxu2 }
 0x58a   : > { %v3274_v34 = vadd.f32 %v3207_v3, %v2840_v59  ;;  %v5655_v3 = vld [vmem:[#allocation2 + $0x70] sm:$0xff] }
 0x58b   : > { %v3430_v63 = vpop.f32.mrf.mxu3  ;;  %v5735_v59 = vld [vmem:[#allocation2 + $0x10] sm:$0xff]  }
 0x58c   : > { %v6870_v44 = vadd.f32 %v3430_v63, %v3274_v34  ;;  %v3942_v43 = vshll.u32 %v5735_v59, 16 }
 0x58d   : > { %5314 = vmatmul.msk.bf16.gmra.mxu2 %vm2070_vm2, %v3107_v28 }
 0x58f   : > { %v2776_v41 = vpop.f32.mrf.mxu1 }
 0x590   : > { %v2841_v24 = vadd.f32 %v2776_v41, %v6636_v37  ;;  %v3215_v61 = vpop.f32.mrf.mxu2  ;;  %5341 = vmatmul.msk.bf16.gmra.mxu3 %vm2070_vm2, %v3334_v6  ;;  %v3944_v41 = vrot.slane %v3942_v43, 1 }
 0x592   : > { %5225 = vmatmul.msk.bf16.gmra.mxu1 %vm2070_vm2, %v5655_v3  ;;  %v3275_v21 = vadd.f32 %v3210_v52, %v2841_v24  ;;  %v3940_v24 = vshrl.u32 %v5735_v59, 16 }
 0x593   : > { %v3433_v46 = vpop.f32.mrf.mxu3 }
 0x594   : > { %v6879_v16 = vadd.f32 %v3433_v46, %v3275_v21  ;;  %v3337_v21 = vrot.slane %v2983_v13, 1  ;;  %v3945_v36 = vor.u32 %v3944_v41, %v3940_v24 }
 0x596   : > { %v3338_v39 = vsel %vm2350_vm9, %v3335_v10, %v3337_v21  ;;  %v5736_v10 = vld [vmem:[#allocation2 + $0x10] sm:$0xf0] }
 0x597   : > { %v2778_v9 = vpop.f32.mrf.mxu1 }
 0x598   : > { %v2842_v12 = vadd.f32 %v2778_v9, %v6638_v62  ;;  %v3217_v58 = vpop.f32.mrf.mxu2  ;;  %v5656_v62 = vld [vmem:[#allocation2 + $0x78] sm:$0xff]  ;;  %v5657_v9 = vld [vmem:[#allocation2 + $0x80] sm:$0xff] }
 0x59a   : > { %v3276_v37 = vadd.f32 %v3212_v40, %v2842_v12  ;;  %v6890_v40 = vld [vmem:[#allocation2 + $0x18] sm:$0xff] }
 0x59b   : > { %v3435_v47 = vpop.f32.mrf.mxu3  ;;  %v3947_v28 = vshll.u32 %v6890_v40, 16  ;;  %v4262_v41 = vrot.slane %v6890_v40, 1 }
 0x59c   : > { %v6884_v2 = vadd.f32 %v3435_v47, %v3276_v37 }
 0x59d   : > { %5315 = vmatmul.msk.bf16.gmra.mxu2 %vm2070_vm2, %v3115_v60  ;;  %v3949_v3 = vrot.slane %v3947_v28, 1 }
 0x59f   : > { %v2781_v52 = vpop.f32.mrf.mxu1 }
 0x5a0   : > { %v2843_v57 = vadd.f32 %v2781_v52, %v6656_v35  ;;  %v3220_v56 = vpop.f32.mrf.mxu2  ;;  %5342 = vmatmul.msk.bf16.gmra.mxu3 %vm2070_vm2, %v3336_v27  ;;  %v3951_v52 = vshrl.u32 %v6890_v40, 16 }
 0x5a2   : > { %5226 = vmatmul.msk.bf16.gmra.mxu1 %vm2070_vm2, %v5656_v62  ;;  %v3277_v34 = vadd.f32 %v3215_v61, %v2843_v57  ;;  %v3950_v61 = vsel %vm1925_vm13, %v3945_v36, %v3949_v3  ;;  %v3953_v62 = vor.u32 %v3951_v52, %v3949_v3  ;;  %v6920_v36 = vld [vmem:[#allocation2 + $0x28] sm:$0xff] }
 0x5a3   : > { %v3438_v23 = vpop.f32.mrf.mxu3 }
 0x5a4   : > { %v6893_v63 = vadd.f32 %v3438_v23, %v3277_v34  ;;  %v5737_v34 = vld [vmem:[#allocation2 + $0x10] sm:$0xe] }
 0x5a5   : > { %v5738_v43 = vor.u32 %v5737_v34, %v5736_v10 }
 0x5a7   : > { %v2783_v55 = vpop.f32.mrf.mxu1  ;;  %v4261_v24 = vrot.slane %v5738_v43, 1  ;;  %v5680_v43 = vld [vmem:[#allocation2 + $0x18] sm:$0xff] }
 0x5a8   : > { %v2844_v6 = vadd.f32 %v2783_v55, %v6659_v31  ;;  %v3222_v35 = vpop.f32.mrf.mxu2 }
 0x5aa   : > { %v3278_v15 = vadd.f32 %v3217_v58, %v2844_v6  ;;  %v6905_v58 = vld [vmem:[#allocation2 + $0x20] sm:$0xff] }
 0x5ab   : > { %v3440_v46 = vpop.f32.mrf.mxu3  ;;  %v3955_v27 = vshll.u32 %v6905_v58, 16 }
 0x5ac   : > { %v6897_v17 = vadd.f32 %v3440_v46, %v3278_v15  ;;  %v4263_v15 = vsel %vm2350_vm9, %v4261_v24, %v4262_v41 }
 0x5ad   : > { %5508 = vmatmul.msk.bf16.vlgmr.msrb.gmra.mxu2 %vm2070_vm2, %v3950_v61  ;;  %v3957_v28 = vrot.slane %v3955_v27, 1 }
 0x5af   : > { %v2786_v12 = vpop.f32.mrf.mxu1  ;;  %v3958_v6 = vsel %vm1925_vm13, %v3953_v62, %v3957_v28 }
 0x5b0   : > { %v2845_v37 = vadd.f32 %v2786_v12, %v6669_v5  ;;  %v3225_v31 = vpop.f32.mrf.mxu2  ;;  %5343 = vmatmul.msk.bf16.gmra.mxu3 %vm2070_vm2, %v3338_v39  ;;  %v3963_v39 = vshll.u32 %v6920_v36, 16 }
 0x5b2   : > { %5227 = vmatmul.msk.bf16.gmra.mxu1 %vm2070_vm2, %v5657_v9  ;;  %v3279_v13 = vadd.f32 %v3220_v56, %v2845_v37 }
 0x5b3   : > { %v3443_v60 = vpop.f32.mrf.mxu3 }
 0x5b4   : > { %v6907_v47 = vadd.f32 %v3443_v60, %v3279_v13  ;;  %v3965_v13 = vrot.slane %v3963_v39, 1 }
 0x5b7   : > { %v2788_v59 = vpop.f32.mrf.mxu1 }
 0x5b8   : > { %v2846_v57 = vadd.f32 %v2788_v59, %v6674_v22  ;;  %v3227_v5 = vpop.f32.mrf.mxu2 }
 0x5ba   : > { %v3280_v23 = vadd.f32 %v3222_v35, %v2846_v57  ;;  %v5679_v35 = vld [vmem:[#allocation2 + $0x10] sm:$0xff] }
 0x5bb   : > { %v3445_v56 = vpop.f32.mrf.mxu3 }
 0x5bc   : > { %v6913_v55 = vadd.f32 %v3445_v56, %v3280_v23 }
 0x5bd   : > { %5509 = vmatmul.msk.bf16.gmra.mxu2 %vm2070_vm2, %v3958_v6 }
 0x5bf   : > { %v2791_v21 = vpop.f32.mrf.mxu1 }
 0x5c0   : > { %v2847_v22 = vadd.f32 %v2791_v21, %v6681_v14  ;;  %v3230_v3 = vpop.f32.mrf.mxu2  ;;  %5536 = vmatmul.msk.bf16.vlgmr.msrb.gmra.mxu3 %vm2070_vm2, %v4263_v15  ;;  %v3959_v14 = vshrl.u32 %v6905_v58, 16 }
 0x5c2   : > { %5420 = vmatmul.msk.bf16.vlgmr.msrb.gmra.mxu1 %vm2070_vm2, %v5679_v35  ;;  %v3281_v40 = vadd.f32 %v3225_v31, %v2847_v22  ;;  %v3961_v52 = vor.u32 %v3959_v14, %v3957_v28  ;;  %v4264_v31 = vrot.slane %v6905_v58, 1  ;;  %v5681_v14 = vld [vmem:[#allocation2 + $0x20] sm:$0xff] }
 0x5c3   : > { %v3448_v46 = vpop.f32.mrf.mxu3 }
 0x5c4   : > { %v6923_v61 = vadd.f32 %v3448_v46, %v3281_v40  ;;  %v3966_v59 = vsel %vm1925_vm13, %v3961_v52, %v3965_v13  ;;  %v4265_v62 = vsel %vm2350_vm9, %v4262_v41, %v4264_v31  ;;  %v4266_v40 = vrot.slane %v6920_v36, 1 }
 0x5c7   : > { %v2793_v9 = vpop.f32.mrf.mxu1 }
 0x5c8   : > { %v2848_v12 = vadd.f32 %v2793_v9, %v6685_v19  ;;  %v3232_v37 = vpop.f32.mrf.mxu2  ;;  %v4267_v9 = vsel %vm2350_vm9, %v4264_v31, %v4266_v40 }
 0x5ca   : > { %v3282_v60 = vadd.f32 %v3227_v5, %v2848_v12  ;;  %v6936_v5 = vld [vmem:[#allocation2 + $0x30] sm:$0xff] }
 0x5cb   : > { %v3450_v27 = vpop.f32.mrf.mxu3  ;;  %v3971_v6 = vshll.u32 %v6936_v5, 16 }
 0x5cc   : > { %v6928_v10 = vadd.f32 %v3450_v27, %v3282_v60 }
 0x5cd   : > { %5510 = vmatmul.msk.bf16.gmra.mxu2 %vm2070_vm2, %v3966_v59  ;;  %v3973_v21 = vrot.slane %v3971_v6, 1 }
 0x5cf   : > { %v2796_v57 = vpop.f32.mrf.mxu1 }
 0x5d0   : > { %v2849_v19 = vadd.f32 %v2796_v57, %v6694_v53  ;;  %v3235_v34 = vpop.f32.mrf.mxu2  ;;  %5537 = vmatmul.msk.bf16.gmra.mxu3 %vm2070_vm2, %v4265_v62  ;;  %v3967_v53 = vshrl.u32 %v6920_v36, 16 }
 0x5d2   : > { %5421 = vmatmul.msk.bf16.gmra.mxu1 %vm2070_vm2, %v5680_v43  ;;  %v3283_v23 = vadd.f32 %v3230_v3, %v2849_v19  ;;  %v3969_v22 = vor.u32 %v3967_v53, %v3965_v13  ;;  %v5682_v53 = vld [vmem:[#allocation2 + $0x28] sm:$0xff] }
 0x5d3   : > { %v3453_v28 = vpop.f32.mrf.mxu3 }
 0x5d4   : > { %v6939_v56 = vadd.f32 %v3453_v28, %v3283_v23  ;;  %v3974_v3 = vsel %vm1925_vm13, %v3969_v22, %v3973_v21  ;;  %v4268_v23 = vrot.slane %v6936_v5, 1 }
 0x5d7   : > { %v2798_v58 = vpop.f32.mrf.mxu1 }
 0x5d8   : > { %v2850_v24 = vadd.f32 %v2798_v58, %v6697_v8  ;;  %v3237_v41 = vpop.f32.mrf.mxu2  ;;  %v4269_v58 = vsel %vm2350_vm9, %v4266_v40, %v4268_v23 }
 0x5da   : > { %v3284_v15 = vadd.f32 %v3232_v37, %v2850_v24  ;;  %v6952_v37 = vld [vmem:[#allocation2 + $0x38] sm:$0xff] }
 0x5db   : > { %v3455_v35 = vpop.f32.mrf.mxu3  ;;  %v3979_v52 = vshll.u32 %v6952_v37, 16 }
 0x5dc   : > { %v6945_v46 = vadd.f32 %v3455_v35, %v3284_v15 }
 0x5dd   : > { %5511 = vmatmul.msk.bf16.gmra.mxu2 %vm2070_vm2, %v3974_v3  ;;  %v3981_v57 = vrot.slane %v3979_v52, 1 }
 0x5df   : > { %v2801_v39 = vpop.f32.mrf.mxu1 }
 0x5e0   : > { %v2851_v8 = vadd.f32 %v2801_v39, %v6706_v1  ;;  %v3240_v12 = vpop.f32.mrf.mxu2  ;;  %5538 = vmatmul.msk.bf16.gmra.mxu3 %vm2070_vm2, %v4267_v9  ;;  %v3975_v1 = vshrl.u32 %v6936_v5, 16 }
 0x5e2   : > { %5422 = vmatmul.msk.bf16.gmra.mxu1 %vm2070_vm2, %v5681_v14  ;;  %v3285_v36 = vadd.f32 %v3235_v34, %v2851_v8  ;;  %v3977_v19 = vor.u32 %v3975_v1, %v3973_v21  ;;  %v5683_v1 = vld [vmem:[#allocation2 + $0x30] sm:$0xff] }
 0x5e3   : > { %v3458_v13 = vpop.f32.mrf.mxu3 }
 0x5e4   : > { %v6955_v60 = vadd.f32 %v3458_v13, %v3285_v36  ;;  %v3982_v34 = vsel %vm1925_vm13, %v3977_v19, %v3981_v57  ;;  %v4270_v36 = vrot.slane %v6952_v37, 1 }
 0x5e7   : > { %v2803_v27 = vpop.f32.mrf.mxu1 }
 0x5e8   : > { %v2852_v59 = vadd.f32 %v2803_v27, %v6711_v7  ;;  %v3242_v31 = vpop.f32.mrf.mxu2  ;;  %v4271_v27 = vsel %vm2350_vm9, %v4268_v23, %v4270_v36 }
 0x5ea   : > { %v3286_v62 = vadd.f32 %v3237_v41, %v2852_v59  ;;  %v6968_v41 = vld [vmem:[#allocation2 + $0x40] sm:$0xff] }
 0x5eb   : > { %v3460_v43 = vpop.f32.mrf.mxu3  ;;  %v3987_v22 = vshll.u32 %v6968_v41, 16 }
 0x5ec   : > { %v6961_v28 = vadd.f32 %v3460_v43, %v3286_v62 }
 0x5ed   : > { %5512 = vmatmul.msk.bf16.gmra.mxu2 %vm2070_vm2, %v3982_v34  ;;  %v3989_v39 = vrot.slane %v3987_v22, 1 }
 0x5ef   : > { %v2806_v6 = vpop.f32.mrf.mxu1 }
 0x5f0   : > { %v2853_v7 = vadd.f32 %v2806_v6, %v6720_v4  ;;  %v3245_v24 = vpop.f32.mrf.mxu2  ;;  %5539 = vmatmul.msk.bf16.gmra.mxu3 %vm2070_vm2, %v4269_v58  ;;  %v3983_v4 = vshrl.u32 %v6952_v37, 16 }
 0x5f2   : > { %5423 = vmatmul.msk.bf16.gmra.mxu1 %vm2070_vm2, %v5682_v53  ;;  %v3287_v5 = vadd.f32 %v3240_v12, %v2853_v7  ;;  %v3985_v8 = vor.u32 %v3983_v4, %v3981_v57  ;;  %v5684_v4 = vld [vmem:[#allocation2 + $0x38] sm:$0xff] }
 0x5f3   : > { %v3463_v21 = vpop.f32.mrf.mxu3 }
 0x5f4   : > { %v6971_v15 = vadd.f32 %v3463_v21, %v3287_v5  ;;  %v3990_v12 = vsel %vm1925_vm13, %v3985_v8, %v3989_v39  ;;  %v4272_v5 = vrot.slane %v6968_v41, 1 }
 0x5f7   : > { %v2808_v35 = vpop.f32.mrf.mxu1 }
 0x5f8   : > { %v2854_v3 = vadd.f32 %v2808_v35, %v6725_v42  ;;  %v3247_v40 = vpop.f32.mrf.mxu2  ;;  %v4273_v35 = vsel %vm2350_vm9, %v4270_v36, %v4272_v5 }
 0x5fa   : > { %v3288_v9 = vadd.f32 %v3242_v31, %v2854_v3  ;;  %v6984_v31 = vld [vmem:[#allocation2 + $0x48] sm:$0xff] }
 0x5fb   : > { %v3465_v14 = vpop.f32.mrf.mxu3  ;;  %v3995_v19 = vshll.u32 %v6984_v31, 16 }
 0x5fc   : > { %v6977_v13 = vadd.f32 %v3465_v14, %v3288_v9 }
 0x5fd   : > { %5513 = vmatmul.msk.bf16.gmra.mxu2 %vm2070_vm2, %v3990_v12  ;;  %v3997_v6 = vrot.slane %v3995_v19, 1 }
 0x5ff   : > { %v2811_v52 = vpop.f32.mrf.mxu1 }
 0x600   : > { %v2855_v42 = vadd.f32 %v2811_v52, %v6734_v54  ;;  %v3250_v59 = vpop.f32.mrf.mxu2  ;;  %5540 = vmatmul.msk.bf16.gmra.mxu3 %vm2070_vm2, %v4271_v27  ;;  %v3991_v54 = vshrl.u32 %v6968_v41, 16 }
 0x602   : > { %5424 = vmatmul.msk.bf16.gmra.mxu1 %vm2070_vm2, %v5683_v1  ;;  %v3289_v37 = vadd.f32 %v3245_v24, %v2855_v42  ;;  %v3993_v7 = vor.u32 %v3991_v54, %v3989_v39  ;;  %v5685_v54 = vld [vmem:[#allocation2 + $0x40] sm:$0xff] }
 0x603   : > { %v3468_v57 = vpop.f32.mrf.mxu3 }
 0x604   : > { %v6987_v62 = vadd.f32 %v3468_v57, %v3289_v37  ;;  %v3998_v24 = vsel %vm1925_vm13, %v3993_v7, %v3997_v6  ;;  %v4274_v37 = vrot.slane %v6984_v31, 1 }
 0x607   : > { %v2813_v43 = vpop.f32.mrf.mxu1 }
 0x608   : > { %v2856_v34 = vadd.f32 %v2813_v43, %v6739_v50  ;;  %v3252_v23 = vpop.f32.mrf.mxu2  ;;  %v4275_v43 = vsel %vm2350_vm9, %v4272_v5, %v4274_v37 }
 0x60a   : > { %v3290_v58 = vadd.f32 %v3247_v40, %v2856_v34  ;;  %v7000_v40 = vld [vmem:[#allocation2 + $0x50] sm:$0xff] }
 0x60b   : > { %v3470_v53 = vpop.f32.mrf.mxu3  ;;  %v4003_v8 = vshll.u32 %v7000_v40, 16 }
 0x60c   : > { %v6993_v21 = vadd.f32 %v3470_v53, %v3290_v58 }
 0x60d   : > { %5514 = vmatmul.msk.bf16.gmra.mxu2 %vm2070_vm2, %v3998_v24  ;;  %v4005_v52 = vrot.slane %v4003_v8, 1 }
 0x60f   : > { %v2816_v22 = vpop.f32.mrf.mxu1 }
 0x610   : > { %v2857_v50 = vadd.f32 %v2816_v22, %v6748_v26  ;;  %v3255_v3 = vpop.f32.mrf.mxu2  ;;  %5541 = vmatmul.msk.bf16.gmra.mxu3 %vm2070_vm2, %v4273_v35  ;;  %v3999_v26 = vshrl.u32 %v6984_v31, 16 }
 0x612   : > { %5425 = vmatmul.msk.bf16.gmra.mxu1 %vm2070_vm2, %v5684_v4  ;;  %v3291_v41 = vadd.f32 %v3250_v59, %v2857_v50  ;;  %v4001_v42 = vor.u32 %v3999_v26, %v3997_v6  ;;  %v5686_v26 = vld [vmem:[#allocation2 + $0x48] sm:$0xff] }
 0x613   : > { %v3473_v39 = vpop.f32.mrf.mxu3 }
 0x614   : > { %v7003_v9 = vadd.f32 %v3473_v39, %v3291_v41  ;;  %v4006_v59 = vsel %vm1925_vm13, %v4001_v42, %v4005_v52  ;;  %v4276_v41 = vrot.slane %v7000_v40, 1 }
 0x617   : > { %v2818_v14 = vpop.f32.mrf.mxu1 }
 0x618   : > { %v2858_v12 = vadd.f32 %v2818_v14, %v6753_v29  ;;  %v3257_v36 = vpop.f32.mrf.mxu2  ;;  %v4277_v14 = vsel %vm2350_vm9, %v4274_v37, %v4276_v41 }
 0x61a   : > { %v3292_v27 = vadd.f32 %v3252_v23, %v2858_v12  ;;  %v7016_v23 = vld [vmem:[#allocation2 + $0x58] sm:$0xff] }
 0x61b   : > { %v3475_v1 = vpop.f32.mrf.mxu3  ;;  %v4011_v7 = vshll.u32 %v7016_v23, 16 }
 0x61c   : > { %v7009_v57 = vadd.f32 %v3475_v1, %v3292_v27 }
 0x61d   : > { %5515 = vmatmul.msk.bf16.gmra.mxu2 %vm2070_vm2, %v4006_v59  ;;  %v4013_v22 = vrot.slane %v4011_v7, 1 }
 0x61f   : > { %v2821_v19 = vpop.f32.mrf.mxu1 }
 0x620   : > { %v2859_v29 = vadd.f32 %v2821_v19, %v6771_v20  ;;  %v3260_v34 = vpop.f32.mrf.mxu2  ;;  %5542 = vmatmul.msk.bf16.gmra.mxu3 %vm2070_vm2, %v4275_v43  ;;  %v4007_v20 = vshrl.u32 %v7000_v40, 16 }
 0x622   : > { %5426 = vmatmul.msk.bf16.gmra.mxu1 %vm2070_vm2, %v5685_v54  ;;  %v3293_v31 = vadd.f32 %v3255_v3, %v2859_v29  ;;  %v4009_v50 = vor.u32 %v4007_v20, %v4005_v52  ;;  %v7048_v20 = vld [vmem:[#allocation2 + $0x68] sm:$0xff] }
 0x623   : > { %v3478_v6 = vpop.f32.mrf.mxu3 }
 0x624   : > { %v7019_v58 = vadd.f32 %v3478_v6, %v3293_v31  ;;  %v4014_v3 = vsel %vm1925_vm13, %v4009_v50, %v4013_v22  ;;  %v4278_v31 = vrot.slane %v7016_v23, 1 }
 0x627   : > { %v2823_v53 = vpop.f32.mrf.mxu1 }
 0x628   : > { %v2860_v24 = vadd.f32 %v2823_v53, %v6776_v18  ;;  %v3262_v5 = vpop.f32.mrf.mxu2  ;;  %v4279_v53 = vsel %vm2350_vm9, %v4276_v41, %v4278_v31 }
 0x62a   : > { %v3294_v35 = vadd.f32 %v3257_v36, %v2860_v24  ;;  %v7032_v36 = vld [vmem:[#allocation2 + $0x60] sm:$0xff] }
 0x62b   : > { %v3480_v4 = vpop.f32.mrf.mxu3  ;;  %v4019_v42 = vshll.u32 %v7032_v36, 16 }
 0x62c   : > { %v7025_v39 = vadd.f32 %v3480_v4, %v3294_v35  ;;  %v4027_v4 = vshll.u32 %v7048_v20, 16 }
 0x62d   : > { %5516 = vmatmul.msk.bf16.gmra.mxu2 %vm2070_vm2, %v4014_v3  ;;  %v4021_v19 = vrot.slane %v4019_v42, 1 }
 0x62f   : > { %v2826_v8 = vpop.f32.mrf.mxu1 }
 0x630   : > { %v2861_v18 = vadd.f32 %v2826_v8, %v6785_v38  ;;  %v4140_v12 = vpop.f32.mrf.mxu2  ;;  %5543 = vmatmul.msk.bf16.gmra.mxu3 %vm2070_vm2, %v4277_v14  ;;  %v4015_v38 = vshrl.u32 %v7016_v23, 16 }
 0x632   : > { %5427 = vmatmul.msk.bf16.gmra.mxu1 %vm2070_vm2, %v5686_v26  ;;  %v3295_v40 = vadd.f32 %v3260_v34, %v2861_v18  ;;  %v4017_v29 = vor.u32 %v4015_v38, %v4013_v22  ;;  %v7054_v22 = vld [vmem:[%s7254_s4] ss:$0 sm:$0xff]  ;;  %v4023_v18 = vshrl.u32 %v7032_v36, 16 }
 0x633   : > { %v3483_v52 = vpop.f32.mrf.mxu3 }
 0x634   : > { %v7035_v27 = vadd.f32 %v3483_v52, %v3295_v40  ;;  %v4022_v34 = vsel %vm1925_vm13, %v4017_v29, %v4021_v19  ;;  %v4025_v52 = vor.u32 %v4023_v18, %v4021_v19 }
 0x637   : > { %v2828_v1 = vpop.f32.mrf.mxu1 }
 0x638   : > { %v2862_v59 = vadd.f32 %v2828_v1, %v6790_v49  ;;  %v4142_v37 = vpop.f32.mrf.mxu2  ;;  %v4280_v1 = vrot.slane %v7032_v36, 1  ;;  %v5688_v36 = vld [vmem:[#allocation2 + $0x58] sm:$0xff] }
 0x63a   : > { %v3296_v43 = vadd.f32 %v3262_v5, %v2862_v59  ;;  %v5687_v5 = vld [vmem:[#allocation2 + $0x50] sm:$0xff]  ;;  %v4281_v29 = vsel %vm2350_vm9, %v4278_v31, %v4280_v1 }
 0x63b   : > { %v3485_v54 = vpop.f32.mrf.mxu3 }
 0x63c   : > { %v7041_v6 = vadd.f32 %v3485_v54, %v3296_v43 }
 0x63d   : > { %5517 = vmatmul.msk.bf16.gmra.mxu2 %vm2070_vm2, %v4022_v34  ;;  %v7075_v34 = vld [vmem:[#allocation2 + $0x70] sm:$0xff] }
 0x63e   : > { %v4035_v31 = vshll.u32 %v7075_v34, 16 }
 0x63f   : > { %v3706_v7 = vpop.f32.mrf.mxu1 }
 0x640   : > { %v3786_v49 = vadd.f32 %v3706_v7, %v6800_v11  ;;  %v4145_v24 = vpop.f32.mrf.mxu2  ;;  %5544 = vmatmul.msk.bf16.gmra.mxu3 %vm2070_vm2, %v4279_v53 }
 0x642   : > { %5428 = vmatmul.msk.bf16.gmra.mxu1 %vm2070_vm2, %v5687_v5  ;;  %v4220_v23 = vadd.f32 %v4140_v12, %v3786_v49  ;;  %v4029_v12 = vrot.slane %v4027_v4, 1 }
 0x643   : > { %v4363_v35 = vpop.f32.mrf.mxu3 }
 0x644   : > { %v4443_v50 = vadd.f32 %v4363_v35, %v4220_v23  ;;  %v4030_v59 = vsel %vm1925_vm13, %v4025_v52, %v4029_v12 }
 0x646   : > { %v4479_v11 = vadd.f32 %v7054_v22, %v4443_v50 }
 0x647   : > { %v3708_v41 = vpop.f32.mrf.mxu1 }
 0x648   : > { %v4511_v3 = vmax.f32 %v4479_v11, 0.0  ;;  %v3787_v8 = vadd.f32 %v3708_v41, %v6806_v30  ;;  %v4147_v14 = vpop.f32.mrf.mxu2  ;;  %v4031_v11 = vshrl.u32 %v7048_v20, 16  ;;  %v4037_v41 = vrot.slane %v4035_v31, 1 }
 0x64a   : > { %v4543_v26 = vpack.c.bf16 %v4511_v3, %v4511_v3  ;;  %v4221_v40 = vadd.f32 %v4142_v37, %v3787_v8 }
 0x64b   : > { %v4365_v42 = vpop.f32.mrf.mxu3 }
 0x64c   : > { %4576 = vst.msk [vmem:[%s7064_s27] sm:$0xf] %vm4575_vm10, %v4543_v26  ;;  %v4444_v30 = vadd.f32 %v4365_v42, %v4221_v40  ;;  %v4282_v26 = vrot.slane %v7048_v20, 1  ;;  %v5689_v20 = vld [vmem:[#allocation2 + $0x60] sm:$0xff] }
 0x64d   : > { %5518 = vmatmul.msk.bf16.gmra.mxu2 %vm2070_vm2, %v4030_v59 }
 0x64e   : > { %v4480_v38 = vadd.f32 %v7054_v22, %v4444_v30  ;;  %v4283_v30 = vsel %vm2350_vm9, %v4280_v1, %v4282_v26 }
 0x64f   : > { %v3711_v43 = vpop.f32.mrf.mxu1 }
 0x650   : > { %v4512_v54 = vmax.f32 %v4480_v38, 0.0  ;;  %v3788_v37 = vadd.f32 %v3711_v43, %v6816_v25  ;;  %v4150_v19 = vpop.f32.mrf.mxu2  ;;  %5545 = vmatmul.msk.bf16.gmra.mxu3 %vm2070_vm2, %v4281_v29  ;;  %v7093_v38 = vld [vmem:[#allocation2 + $0x78] sm:$0xff] }
 0x651   : > { %v4043_v1 = vshll.u32 %v7093_v38, 16 }
 0x652   : > { %v4544_v7 = vpack.c.bf16 %v4512_v54, %v4512_v54  ;;  %5429 = vmatmul.msk.bf16.gmra.mxu1 %vm2070_vm2, %v5688_v36  ;;  %v4222_v53 = vadd.f32 %v4145_v24, %v3788_v37  ;;  %v4033_v24 = vor.u32 %v4031_v11, %v4029_v12 }
 0x653   : > { %v4368_v49 = vpop.f32.mrf.mxu3  ;;  %v4045_v31 = vrot.slane %v4043_v1, 1 }
 0x654   : > { %4577 = vst.msk [vmem:[%s7064_s27 + $0x4] sm:$0xf] %vm4575_vm10, %v4544_v7  ;;  %v4445_v5 = vadd.f32 %v4368_v49, %v4222_v53  ;;  %v4038_v52 = vsel %vm1925_vm13, %v4033_v24, %v4037_v41 }
 0x656   : > { %v4481_v23 = vadd.f32 %v7054_v22, %v4445_v5  ;;  %v4039_v5 = vshrl.u32 %v7075_v34, 16 }
 0x657   : > { %v3713_v25 = vpop.f32.mrf.mxu1 }
 0x658   : > { %v4513_v35 = vmax.f32 %v4481_v23, 0.0  ;;  %v3789_v50 = vadd.f32 %v3713_v25, %v6822_v0  ;;  %v4152_v4 = vpop.f32.mrf.mxu2 }
 0x65a   : > { %v4545_v3 = vpack.c.bf16 %v4513_v35, %v4513_v35  ;;  %v4223_v8 = vadd.f32 %v4147_v14, %v3789_v50  ;;  %v4284_v50 = vrot.slane %v7075_v34, 1  ;;  %v5690_v34 = vld [vmem:[#allocation2 + $0x68] sm:$0xff] }
 0x65b   : > { %v4370_v18 = vpop.f32.mrf.mxu3 }
 0x65c   : > { %4578 = vst.msk [vmem:[%s7064_s27 + $0x8] sm:$0xf] %vm4575_vm10, %v4545_v3  ;;  %v4446_v40 = vadd.f32 %v4370_v18, %v4223_v8  ;;  %v4285_v24 = vsel %vm2350_vm9, %v4282_v26, %v4284_v50 }
 0x65d   : > { %5519 = vmatmul.msk.bf16.gmra.mxu2 %vm2070_vm2, %v4038_v52 }
 0x65e   : > { %v4482_v0 = vadd.f32 %v7054_v22, %v4446_v40 }
 0x65f   : > { %v3716_v42 = vpop.f32.mrf.mxu1 }
 0x660   : > { %v4514_v59 = vmax.f32 %v4482_v0, 0.0  ;;  %v3790_v14 = vadd.f32 %v3716_v42, %v6832_v45  ;;  %v4155_v12 = vpop.f32.mrf.mxu2  ;;  %5546 = vmatmul.msk.bf16.gmra.mxu3 %vm2070_vm2, %v4283_v30  ;;  %v7112_v0 = vld [vmem:[#allocation2 + $0x80] sm:$0xff] }
 0x661   : > { %v4051_v26 = vshll.u32 %v7112_v0, 16 }
 0x662   : > { %v4546_v43 = vpack.c.bf16 %v4514_v59, %v4514_v59  ;;  %5430 = vmatmul.msk.bf16.gmra.mxu1 %vm2070_vm2, %v5689_v20  ;;  %v4224_v29 = vadd.f32 %v4150_v19, %v3790_v14  ;;  %v4041_v19 = vor.u32 %v4039_v5, %v4037_v41 }
 0x663   : > { %v4373_v54 = vpop.f32.mrf.mxu3 }
 0x664   : > { %4579 = vst.msk [vmem:[%s7064_s27 + $0xc] sm:$0xf] %vm4575_vm10, %v4546_v43  ;;  %v4447_v37 = vadd.f32 %v4373_v54, %v4224_v29  ;;  %v4046_v3 = vsel %vm1925_vm13, %v4041_v19, %v4045_v31 }
 0x666   : > { %v4483_v36 = vadd.f32 %v7054_v22, %v4447_v37 }
 0x667   : > { %v3718_v45 = vpop.f32.mrf.mxu1 }
 0x668   : > { %v4515_v7 = vmax.f32 %v4483_v36, 0.0  ;;  %v3791_v53 = vadd.f32 %v3718_v45, %v6838_v48  ;;  %v4157_v49 = vpop.f32.mrf.mxu2  ;;  %v4286_v45 = vrot.slane %v7093_v38, 1 }
 0x66a   : > { %v4547_v23 = vpack.c.bf16 %v4515_v7, %v4515_v7  ;;  %v4225_v25 = vadd.f32 %v4152_v4, %v3791_v53 }
 0x66b   : > { %v4375_v35 = vpop.f32.mrf.mxu3 }
 0x66c   : > { %4580 = vst.msk [vmem:[%s7064_s27 + $0x10] sm:$0xf] %vm4575_vm10, %v4547_v23  ;;  %v4448_v11 = vadd.f32 %v4375_v35, %v4225_v25  ;;  %v7126_v23 = vld [vmem:[#allocation2 + $0x88] sm:$0xff] }
 0x66d   : > { %5520 = vmatmul.msk.bf16.gmra.mxu2 %vm2070_vm2, %v4046_v3  ;;  %v4055_v3 = vshrl.u32 %v7112_v0, 16 }
 0x66e   : > { %v4484_v48 = vadd.f32 %v7054_v22, %v4448_v11 }
 0x66f   : > { %v3721_v8 = vpop.f32.mrf.mxu1 }
 0x670   : > { %v4516_v18 = vmax.f32 %v4484_v48, 0.0  ;;  %v3792_v4 = vadd.f32 %v3721_v8, %v6848_v33  ;;  %v4160_v41 = vpop.f32.mrf.mxu2  ;;  %5547 = vmatmul.msk.bf16.gmra.mxu3 %vm2070_vm2, %v4285_v24  ;;  %v4047_v33 = vshrl.u32 %v7093_v38, 16  ;;  %v5691_v38 = vld [vmem:[#allocation2 + $0x70] sm:$0xff]  ;;  %v4059_v48 = vshll.u32 %v7126_v23, 16 }
 0x672   : > { %v4548_v40 = vpack.c.bf16 %v4516_v18, %v4516_v18  ;;  %5431 = vmatmul.msk.bf16.gmra.mxu1 %vm2070_vm2, %v5690_v34  ;;  %v4226_v52 = vadd.f32 %v4155_v12, %v3792_v4  ;;  %v4049_v54 = vor.u32 %v4047_v33, %v4045_v31  ;;  %v4053_v12 = vrot.slane %v4051_v26, 1  ;;  %v3850_v34 = vld [vmem:[#allocation2 + $0x90] sm:$0x1] }
 0x673   : > { %v4378_v42 = vpop.f32.mrf.mxu3  ;;  %v4287_v31 = vsel %vm2350_vm9, %v4284_v50, %v4286_v45  ;;  %v4061_v18 = vrot.slane %v4059_v48, 1 }
 0x674   : > { %4581 = vst.msk [vmem:[%s7064_s27 + $0x14] sm:$0xf] %vm4575_vm10, %v4548_v40  ;;  %v4449_v30 = vadd.f32 %v4378_v42, %v4226_v52  ;;  %v4054_v53 = vsel %vm1925_vm13, %v4049_v54, %v4053_v12 }
 0x676   : > { %v4485_v59 = vadd.f32 %v7054_v22, %v4449_v30 }
 0x677   : > { %v3723_v14 = vpop.f32.mrf.mxu1 }
 0x678   : > { %v4517_v20 = vmax.f32 %v4485_v59, 0.0  ;;  %v3793_v43 = vadd.f32 %v3723_v14, %v6854_v32  ;;  %v4162_v29 = vpop.f32.mrf.mxu2  ;;  %v3921_v59 = vunpack.c.l.b16 %v3850_v34  ;;  %v4288_v14 = vrot.slane %v7112_v0, 1 }
 0x67a   : > { %v4549_v37 = vpack.c.bf16 %v4517_v20, %v4517_v20  ;;  %v4227_v1 = vadd.f32 %v4157_v49, %v3793_v43  ;;  %v3938_v54 = vpack.c.b16 %v3921_v59, %v3921_v59 }
 0x67b   : > { %v4380_v36 = vpop.f32.mrf.mxu3 }
 0x67c   : > { %4582 = vst.msk [vmem:[%s7064_s27 + $0x18] sm:$0xf] %vm4575_vm10, %v4549_v37  ;;  %v4450_v7 = vadd.f32 %v4380_v36, %v4227_v1  ;;  %v5692_v36 = vld [vmem:[#allocation2 + $0x78] sm:$0xff] }
 0x67d   : > { %5521 = vmatmul.msk.bf16.gmra.mxu2 %vm2070_vm2, %v4054_v53  ;;  %v4063_v53 = vshrl.u32 %v7126_v23, 16 }
 0x67e   : > { %v4486_v5 = vadd.f32 %v7054_v22, %v4450_v7 }
 0x67f   : > { %v3726_v32 = vpop.f32.mrf.mxu1 }
 0x680   : > { %v4518_v25 = vmax.f32 %v4486_v5, 0.0  ;;  %v3794_v49 = vadd.f32 %v3726_v32, %v6864_v51  ;;  %v4165_v19 = vpop.f32.mrf.mxu2  ;;  %5548 = vmatmul.msk.bf16.gmra.mxu3 %vm2070_vm2, %v4287_v31  ;;  %v4057_v51 = vor.u32 %v4055_v3, %v4053_v12  ;;  %v4067_v5 = vshll.u32 %v3938_v54, 16 }
 0x681   : > { %v4290_v3 = vrot.slane %v7126_v23, 1 }
 0x682   : > { %v4550_v35 = vpack.c.bf16 %v4518_v25, %v4518_v25  ;;  %5432 = vmatmul.msk.bf16.gmra.mxu1 %vm2070_vm2, %v5691_v38  ;;  %v4228_v11 = vadd.f32 %v4160_v41, %v3794_v49  ;;  %v4062_v26 = vsel %vm1925_vm13, %v4057_v51, %v4061_v18  ;;  %v4065_v25 = vor.u32 %v4063_v53, %v4061_v18 }
 0x683   : > { %v4383_v8 = vpop.f32.mrf.mxu3  ;;  %v4291_v51 = vsel %vm2350_vm9, %v4288_v14, %v4290_v3 }
 0x684   : > { %4583 = vst.msk [vmem:[%s7064_s27 + $0x1c] sm:$0xf] %vm4575_vm10, %v4550_v35  ;;  %v4451_v50 = vadd.f32 %v4383_v8, %v4228_v11 }
 0x686   : > { %v4487_v24 = vadd.f32 %v7054_v22, %v4451_v50 }
 0x687   : > { %v3728_v4 = vpop.f32.mrf.mxu1 }
 0x688   : > { %v4519_v40 = vmax.f32 %v4487_v24, 0.0  ;;  %v3795_v52 = vadd.f32 %v3728_v4, %v6870_v44  ;;  %v4167_v42 = vpop.f32.mrf.mxu2  ;;  %v4289_v44 = vsel %vm2350_vm9, %v4286_v45, %v4288_v14  ;;  %v5693_v4 = vld [vmem:[#allocation2 + $0x80] sm:$0xff] }
 0x68a   : > { %v4551_v41 = vpack.c.bf16 %v4519_v40, %v4519_v40  ;;  %v4229_v30 = vadd.f32 %v4162_v29, %v3795_v52 }
 0x68b   : > { %v4385_v33 = vpop.f32.mrf.mxu3 }
 0x68c   : > { %4584 = vst.msk [vmem:[%s7064_s27 + $0x20] sm:$0xf] %vm4575_vm10, %v4551_v41  ;;  %v4452_v20 = vadd.f32 %v4385_v33, %v4229_v30 }
 0x68d   : > { %5522 = vmatmul.msk.bf16.gmra.mxu2 %vm2070_vm2, %v4062_v26 }
 0x68e   : > { %v4488_v43 = vadd.f32 %v7054_v22, %v4452_v20 }
 0x68f   : > { %v3731_v12 = vpop.f32.mrf.mxu1 }
 0x690   : > { %v4520_v37 = vmax.f32 %v4488_v43, 0.0  ;;  %v3796_v29 = vadd.f32 %v3731_v12, %v6879_v16  ;;  %v4170_v1 = vpop.f32.mrf.mxu2  ;;  %5549 = vmatmul.msk.bf16.gmra.mxu3 %vm2070_vm2, %v4289_v44  ;;  %v4069_v16 = vrot.slane %v4067_v5, 1 }
 0x692   : > { %v4552_v0 = vpack.c.bf16 %v4520_v37, %v4520_v37  ;;  %5433 = vmatmul.msk.bf16.gmra.mxu1 %vm2070_vm2, %v5692_v36  ;;  %v4230_v7 = vadd.f32 %v4165_v19, %v3796_v29  ;;  %v4070_v8 = vsel %vm1925_vm13, %v4065_v25, %v4069_v16  ;;  %v5694_v36 = vld [vmem:[#allocation2 + $0x88] sm:$0xff] }
 0x693   : > { %v4388_v32 = vpop.f32.mrf.mxu3 }
 0x694   : > { %4585 = vst.msk [vmem:[%s7064_s27 + $0x24] sm:$0xf] %vm4575_vm10, %v4552_v0  ;;  %v4453_v31 = vadd.f32 %v4388_v32, %v4230_v7 }
 0x696   : > { %v4489_v45 = vadd.f32 %v7054_v22, %v4453_v31 }
 0x697   : > { %v3733_v49 = vpop.f32.mrf.mxu1 }
 0x698   : > { %v4521_v38 = vmax.f32 %v4489_v45, 0.0  ;;  %v3797_v35 = vadd.f32 %v3733_v49, %v6884_v2  ;;  %v4172_v11 = vpop.f32.mrf.mxu2 }
 0x69a   : > { %v4553_v19 = vpack.c.bf16 %v4521_v38, %v4521_v38  ;;  %v4231_v48 = vadd.f32 %v4167_v42, %v3797_v35 }
 0x69b   : > { %v4390_v50 = vpop.f32.mrf.mxu3 }
 0x69c   : > { %4586 = vst.msk [vmem:[%s7064_s27 + $0x28] sm:$0xf] %vm4575_vm10, %v4553_v19  ;;  %v4454_v24 = vadd.f32 %v4390_v50, %v4231_v48 }
 0x69d   : > { %5523 = vmatmul.msk.bf16.gmra.mxu2 %vm2070_vm2, %v4070_v8 }
 0x69e   : > { %v4490_v18 = vadd.f32 %v7054_v22, %v4454_v24 }
 0x69f   : > { %v3736_v2 = vpop.f32.mrf.mxu1 }
 0x6a0   : > { %v4522_v34 = vmax.f32 %v4490_v18, 0.0  ;;  %v3798_v23 = vadd.f32 %v3736_v2, %v6893_v63  ;;  %v4175_v40 = vpop.f32.mrf.mxu2  ;;  %5550 = vmatmul.msk.bf16.gmra.mxu3 %vm2070_vm2, %v4291_v51  ;;  %v4292_v63 = vrot.slane %v3938_v54, 1 }
 0x6a2   : > { %v4554_v52 = vpack.c.bf16 %v4522_v34, %v4522_v34  ;;  %5434 = vmatmul.msk.bf16.gmra.mxu1 %vm2070_vm2, %v5693_v4  ;;  %v4232_v42 = vadd.f32 %v4170_v1, %v3798_v23  ;;  %v4293_v29 = vsel %vm2350_vm9, %v4290_v3, %v4292_v63 }
 0x6a3   : > { %v4393_v41 = vpop.f32.mrf.mxu3 }
 0x6a4   : > { %4587 = vst.msk [vmem:[%s7064_s27 + $0x2c] sm:$0xf] %vm4575_vm10, %v4554_v52  ;;  %v4455_v30 = vadd.f32 %v4393_v41, %v4232_v42 }
 0x6a6   : > { %v4491_v26 = vadd.f32 %v7054_v22, %v4455_v30 }
 0x6a7   : > { %v3738_v59 = vpop.f32.mrf.mxu1 }
 0x6a8   : > { %v4523_v33 = vmax.f32 %v4491_v26, 0.0  ;;  %v3799_v14 = vadd.f32 %v3738_v59, %v6897_v17  ;;  %v4177_v20 = vpop.f32.mrf.mxu2 }
 0x6aa   : > { %v4555_v43 = vpack.c.bf16 %v4523_v33, %v4523_v33  ;;  %v4233_v12 = vadd.f32 %v4172_v11, %v3799_v14 }
 0x6ab   : > { %v4395_v44 = vpop.f32.mrf.mxu3 }
 0x6ac   : > { %4588 = vst.msk [vmem:[%s7064_s27 + $0x30] sm:$0xf] %vm4575_vm10, %v4555_v43  ;;  %v4456_v37 = vadd.f32 %v4395_v44, %v4233_v12 }
 0x6ae   : > { %v4492_v1 = vadd.f32 %v7054_v22, %v4456_v37 }
 0x6af   : > { %v3741_v0 = vpop.f32.mrf.mxu1 }
 0x6b0   : > { %v4524_v7 = vmax.f32 %v4492_v1, 0.0  ;;  %v3800_v53 = vadd.f32 %v3741_v0, %v6907_v47  ;;  %v4180_v5 = vpop.f32.mrf.mxu2  ;;  %5551 = vmatmul.msk.bf16.gmra.mxu3 %vm2070_vm2, %v4293_v29 }
 0x6b2   : > { %v4556_v17 = vpack.c.bf16 %v4524_v7, %v4524_v7  ;;  %5435 = vmatmul.msk.bf16.gmra.mxu1 %vm2070_vm2, %v5694_v36  ;;  %v4234_v54 = vadd.f32 %v4175_v40, %v3800_v53 }
 0x6b3   : > { %v4398_v32 = vpop.f32.mrf.mxu3 }
 0x6b4   : > { %4589 = vst.msk [vmem:[%s7064_s27 + $0x34] sm:$0xf] %vm4575_vm10, %v4556_v17  ;;  %v4457_v31 = vadd.f32 %v4398_v32, %v4234_v54 }
 0x6b6   : > { %v4493_v45 = vadd.f32 %v7054_v22, %v4457_v31 }
 0x6b7   : > { %v3743_v25 = vpop.f32.mrf.mxu1 }
 0x6b8   : > { %v4525_v16 = vmax.f32 %v4493_v45, 0.0  ;;  %v3801_v49 = vadd.f32 %v3743_v25, %v6913_v55  ;;  %v4182_v47 = vpop.f32.mrf.mxu2 }
 0x6ba   : > { %v4557_v38 = vpack.c.bf16 %v4525_v16, %v4525_v16  ;;  %v4235_v35 = vadd.f32 %v4177_v20, %v3801_v49 }
 0x6bb   : > { %v4400_v11 = vpop.f32.mrf.mxu3 }
 0x6bc   : > { %4590 = vst.msk [vmem:[%s7064_s27 + $0x38] sm:$0xf] %vm4575_vm10, %v4557_v38  ;;  %v4458_v3 = vadd.f32 %v4400_v11, %v4235_v35 }
 0x6be   : > { %v4494_v19 = vadd.f32 %v7054_v22, %v4458_v3 }
 0x6bf   : > { %v3746_v48 = vpop.f32.mrf.mxu1 }
 0x6c0   : > { %v4526_v8 = vmax.f32 %v4494_v19, 0.0  ;;  %v3802_v50 = vadd.f32 %v3746_v48, %v6923_v61  ;;  %v4185_v24 = vpop.f32.mrf.mxu2 }
 0x6c2   : > { %v4558_v51 = vpack.c.bf16 %v4526_v8, %v4526_v8  ;;  %v4236_v18 = vadd.f32 %v4180_v5, %v3802_v50 }
 0x6c3   : > { %v4403_v4 = vpop.f32.mrf.mxu3 }
 0x6c4   : > { %4591 = vst.msk [vmem:[%s7064_s27 + $0x3c] sm:$0xf] %vm4575_vm10, %v4558_v51  ;;  %v4459_v55 = vadd.f32 %v4403_v4, %v4236_v18 }
 0x6c6   : > { %v4495_v2 = vadd.f32 %v7054_v22, %v4459_v55 }
 0x6c7   : > { %v3748_v34 = vpop.f32.mrf.mxu1 }
 0x6c8   : > { %v4527_v23 = vmax.f32 %v4495_v2, 0.0  ;;  %v3803_v40 = vadd.f32 %v3748_v34, %v6928_v10  ;;  %v4187_v52 = vpop.f32.mrf.mxu2 }
 0x6ca   : > { %v4559_v42 = vpack.c.bf16 %v4527_v23, %v4527_v23  ;;  %v4237_v41 = vadd.f32 %v4182_v47, %v3803_v40 }
 0x6cb   : > { %v4405_v30 = vpop.f32.mrf.mxu3 }
 0x6cc   : > { %4592 = vst.msk [vmem:[%s7064_s27 + $0x40] sm:$0xf] %vm4575_vm10, %v4559_v42  ;;  %v4460_v61 = vadd.f32 %v4405_v30, %v4237_v41 }
 0x6ce   : > { %v4496_v26 = vadd.f32 %v7054_v22, %v4460_v61 }
 0x6cf   : > { %v3751_v59 = vpop.f32.mrf.mxu1 }
 0x6d0   : > { %v4528_v33 = vmax.f32 %v4496_v26, 0.0  ;;  %v3804_v14 = vadd.f32 %v3751_v59, %v6939_v56  ;;  %v4190_v20 = vpop.f32.mrf.mxu2 }
 0x6d2   : > { %v4560_v63 = vpack.c.bf16 %v4528_v33, %v4528_v33  ;;  %v4238_v43 = vadd.f32 %v4185_v24, %v3804_v14 }
 0x6d3   : > { %v4408_v12 = vpop.f32.mrf.mxu3 }
 0x6d4   : > { %4593 = vst.msk [vmem:[%s7064_s27 + $0x44] sm:$0xf] %vm4575_vm10, %v4560_v63  ;;  %v4461_v10 = vadd.f32 %v4408_v12, %v4238_v43 }
 0x6d6   : > { %v4497_v44 = vadd.f32 %v7054_v22, %v4461_v10 }
 0x6d7   : > { %v3753_v37 = vpop.f32.mrf.mxu1 }
 0x6d8   : > { %v4529_v29 = vmax.f32 %v4497_v44, 0.0  ;;  %v3805_v1 = vadd.f32 %v3753_v37, %v6945_v46  ;;  %v4192_v36 = vpop.f32.mrf.mxu2 }
 0x6da   : > { %v4561_v0 = vpack.c.bf16 %v4529_v29, %v4529_v29  ;;  %v4239_v7 = vadd.f32 %v4187_v52, %v3805_v1 }
 0x6db   : > { %v4410_v53 = vpop.f32.mrf.mxu3 }
 0x6dc   : > { %4594 = vst.msk [vmem:[%s7064_s27 + $0x48] sm:$0xf] %vm4575_vm10, %v4561_v0  ;;  %v4462_v56 = vadd.f32 %v4410_v53, %v4239_v7 }
 0x6de   : > { %v4498_v5 = vadd.f32 %v7054_v22, %v4462_v56 }
 0x6df   : > { %v3756_v17 = vpop.f32.mrf.mxu1 }
 0x6e0   : > { %v4530_v54 = vmax.f32 %v4498_v5, 0.0  ;;  %v3806_v32 = vadd.f32 %v3756_v17, %v6955_v60  ;;  %v4195_v31 = vpop.f32.mrf.mxu2 }
 0x6e2   : > { %v4562_v45 = vpack.c.bf16 %v4530_v54, %v4530_v54  ;;  %v4240_v25 = vadd.f32 %v4190_v20, %v3806_v32 }
 0x6e3   : > { %v4413_v16 = vpop.f32.mrf.mxu3 }
 0x6e4   : > { %4595 = vst.msk [vmem:[%s7064_s27 + $0x4c] sm:$0xf] %vm4575_vm10, %v4562_v45  ;;  %v4463_v46 = vadd.f32 %v4413_v16, %v4240_v25 }
 0x6e6   : > { %v4499_v49 = vadd.f32 %v7054_v22, %v4463_v46 }
 0x6e7   : > { %v3758_v47 = vpop.f32.mrf.mxu1 }
 0x6e8   : > { %v4531_v38 = vmax.f32 %v4499_v49, 0.0  ;;  %v3807_v35 = vadd.f32 %v3758_v47, %v6961_v28  ;;  %v4197_v19 = vpop.f32.mrf.mxu2 }
 0x6ea   : > { %v4563_v11 = vpack.c.bf16 %v4531_v38, %v4531_v38  ;;  %v4241_v3 = vadd.f32 %v4192_v36, %v3807_v35 }
 0x6eb   : > { %v4415_v48 = vpop.f32.mrf.mxu3 }
 0x6ec   : > { %4596 = vst.msk [vmem:[%s7064_s27 + $0x50] sm:$0xf] %vm4575_vm10, %v4563_v11  ;;  %v4464_v60 = vadd.f32 %v4415_v48, %v4241_v3 }
 0x6ee   : > { %v4500_v8 = vadd.f32 %v7054_v22, %v4464_v60 }
 0x6ef   : > { %v3761_v50 = vpop.f32.mrf.mxu1 }
 0x6f0   : > { %v4532_v24 = vmax.f32 %v4500_v8, 0.0  ;;  %v3808_v51 = vadd.f32 %v3761_v50, %v6971_v15  ;;  %v4200_v2 = vpop.f32.mrf.mxu2 }
 0x6f2   : > { %v4564_v18 = vpack.c.bf16 %v4532_v24, %v4532_v24  ;;  %v4242_v4 = vadd.f32 %v4195_v31, %v3808_v51 }
 0x6f3   : > { %v4418_v55 = vpop.f32.mrf.mxu3 }
 0x6f4   : > { %4597 = vst.msk [vmem:[%s7064_s27 + $0x54] sm:$0xf] %vm4575_vm10, %v4564_v18  ;;  %v4465_v28 = vadd.f32 %v4418_v55, %v4242_v4 }
 0x6f6   : > { %v4501_v34 = vadd.f32 %v7054_v22, %v4465_v28 }
 0x6f7   : > { %v3763_v23 = vpop.f32.mrf.mxu1 }
 0x6f8   : > { %v4533_v40 = vmax.f32 %v4501_v34, 0.0  ;;  %v3809_v52 = vadd.f32 %v3763_v23, %v6977_v13  ;;  %v4202_v26 = vpop.f32.mrf.mxu2 }
 0x6fa   : > { %v4565_v42 = vpack.c.bf16 %v4533_v40, %v4533_v40  ;;  %v4243_v41 = vadd.f32 %v4197_v19, %v3809_v52 }
 0x6fb   : > { %v4420_v30 = vpop.f32.mrf.mxu3 }
 0x6fc   : > { %4598 = vst.msk [vmem:[%s7064_s27 + $0x58] sm:$0xf] %vm4575_vm10, %v4565_v42  ;;  %v4466_v15 = vadd.f32 %v4420_v30, %v4243_v41 }
 0x6fe   : > { %v4502_v61 = vadd.f32 %v7054_v22, %v4466_v15 }
 0x6ff   : > { %v3766_v59 = vpop.f32.mrf.mxu1 }
 0x700   : > { %v4534_v33 = vmax.f32 %v4502_v61, 0.0  ;;  %v3810_v14 = vadd.f32 %v3766_v59, %v6987_v62  ;;  %v4205_v29 = vpop.f32.mrf.mxu2 }
 0x702   : > { %v4566_v20 = vpack.c.bf16 %v4534_v33, %v4534_v33  ;;  %v4244_v63 = vadd.f32 %v4200_v2, %v3810_v14 }
 0x703   : > { %v4423_v43 = vpop.f32.mrf.mxu3 }
 0x704   : > { %4599 = vst.msk [vmem:[%s7064_s27 + $0x5c] sm:$0xf] %vm4575_vm10, %v4566_v20  ;;  %v4467_v13 = vadd.f32 %v4423_v43, %v4244_v63 }
 0x706   : > { %v4503_v12 = vadd.f32 %v7054_v22, %v4467_v13 }
 0x707   : > { %v3768_v10 = vpop.f32.mrf.mxu1 }
 0x708   : > { %v4535_v44 = vmax.f32 %v4503_v12, 0.0  ;;  %v3811_v37 = vadd.f32 %v3768_v10, %v6993_v21  ;;  %v4207_v32 = vpop.f32.mrf.mxu2 }
 0x70a   : > { %v4567_v1 = vpack.c.bf16 %v4535_v44, %v4535_v44  ;;  %v4245_v36 = vadd.f32 %v4202_v26, %v3811_v37 }
 0x70b   : > { %v4425_v0 = vpop.f32.mrf.mxu3 }
 0x70c   : > { %4600 = vst.msk [vmem:[%s7064_s27 + $0x60] sm:$0xf] %vm4575_vm10, %v4567_v1  ;;  %v4468_v62 = vadd.f32 %v4425_v0, %v4245_v36 }
 0x70e   : > { %v4504_v7 = vadd.f32 %v7054_v22, %v4468_v62 }
 0x70f   : > { %v3771_v53 = vpop.f32.mrf.mxu1 }
 0x710   : > { %v4536_v56 = vmax.f32 %v4504_v7, 0.0  ;;  %v3812_v5 = vadd.f32 %v3771_v53, %v7003_v9  ;;  %v4210_v38 = vpop.f32.mrf.mxu2 }
 0x712   : > { %v4568_v17 = vpack.c.bf16 %v4536_v56, %v4536_v56  ;;  %v4246_v54 = vadd.f32 %v4205_v29, %v3812_v5 }
 0x713   : > { %v4428_v31 = vpop.f32.mrf.mxu3 }
 0x714   : > { %4601 = vst.msk [vmem:[%s7064_s27 + $0x64] sm:$0xf] %vm4575_vm10, %v4568_v17  ;;  %v4469_v21 = vadd.f32 %v4428_v31, %v4246_v54 }
 0x716   : > { %v4505_v45 = vadd.f32 %v7054_v22, %v4469_v21 }
 0x717   : > { %v3773_v25 = vpop.f32.mrf.mxu1 }
 0x718   : > { %v4537_v16 = vmax.f32 %v4505_v45, 0.0  ;;  %v3813_v46 = vadd.f32 %v3773_v25, %v7009_v57  ;;  %v4212_v24 = vpop.f32.mrf.mxu2 }
 0x71a   : > { %v4569_v49 = vpack.c.bf16 %v4537_v16, %v4537_v16  ;;  %v4247_v47 = vadd.f32 %v4207_v32, %v3813_v46 }
 0x71b   : > { %v4430_v35 = vpop.f32.mrf.mxu3 }
 0x71c   : > { %4602 = vst.msk [vmem:[%s7064_s27 + $0x68] sm:$0xf] %vm4575_vm10, %v4569_v49  ;;  %v4470_v9 = vadd.f32 %v4430_v35, %v4247_v47 }
 0x71e   : > { %v4506_v11 = vadd.f32 %v7054_v22, %v4470_v9 }
 0x71f   : > { %v3776_v3 = vpop.f32.mrf.mxu1 }
 0x720   : > { %v4538_v19 = vmax.f32 %v4506_v11, 0.0  ;;  %v3814_v48 = vadd.f32 %v3776_v3, %v7019_v58  ;;  %v4215_v40 = vpop.f32.mrf.mxu2 }
 0x722   : > { %v4570_v60 = vpack.c.bf16 %v4538_v19, %v4538_v19  ;;  %v4248_v8 = vadd.f32 %v4210_v38, %v3814_v48 }
 0x723   : > { %v4433_v50 = vpop.f32.mrf.mxu3 }
 0x724   : > { %4603 = vst.msk [vmem:[%s7064_s27 + $0x6c] sm:$0xf] %vm4575_vm10, %v4570_v60  ;;  %v4471_v57 = vadd.f32 %v4433_v50, %v4248_v8 }
 0x726   : > { %v4507_v51 = vadd.f32 %v7054_v22, %v4471_v57 }
 0x727   : > { %v3778_v18 = vpop.f32.mrf.mxu1 }
 0x728   : > { %v4539_v4 = vmax.f32 %v4507_v51, 0.0  ;;  %v3815_v55 = vadd.f32 %v3778_v18, %v7025_v39  ;;  %v4217_v20 = vpop.f32.mrf.mxu2 }
 0x72a   : > { %v4571_v28 = vpack.c.bf16 %v4539_v4, %v4539_v4  ;;  %v4249_v2 = vadd.f32 %v4212_v24, %v3815_v55 }
 0x72b   : > { %v4435_v34 = vpop.f32.mrf.mxu3 }
 0x72c   : > { %4604 = vst.msk [vmem:[%s7064_s27 + $0x70] sm:$0xf] %vm4575_vm10, %v4571_v28  ;;  %v4472_v58 = vadd.f32 %v4435_v34, %v4249_v2 }
 0x72e   : > { %v4508_v23 = vadd.f32 %v7054_v22, %v4472_v58 }
 0x72f   : > { %v3781_v52 = vpop.f32.mrf.mxu1 }
 0x730   : > { %v4540_v42 = vmax.f32 %v4508_v23, 0.0  ;;  %v3816_v41 = vadd.f32 %v3781_v52, %v7035_v27 }
 0x732   : > { %v4572_v30 = vpack.c.bf16 %v4540_v42, %v4540_v42  ;;  %v4250_v15 = vadd.f32 %v4215_v40, %v3816_v41 }
 0x733   : > { %v4438_v61 = vpop.f32.mrf.mxu3 }
 0x734   : > { %4605 = vst.msk [vmem:[%s7064_s27 + $0x74] sm:$0xf] %vm4575_vm10, %v4572_v30  ;;  %v4473_v39 = vadd.f32 %v4438_v61, %v4250_v15 }
 0x736   : > { %v4509_v26 = vadd.f32 %v7054_v22, %v4473_v39 }
 0x737   : > { %v3783_v59 = vpop.f32.mrf.mxu1 }
 0x738   : > { %v4541_v33 = vmax.f32 %v4509_v26, 0.0  ;;  %v3817_v14 = vadd.f32 %v3783_v59, %v7041_v6 }
 0x73a   : > { %v4573_v63 = vpack.c.bf16 %v4541_v33, %v4541_v33  ;;  %v4251_v43 = vadd.f32 %v4217_v20, %v3817_v14 }
 0x73b   : > { %v4440_v13 = vpop.f32.mrf.mxu3 }
 0x73c   : > { %4606 = vst.msk [vmem:[%s7064_s27 + $0x78] sm:$0xf] %vm4575_vm10, %v4573_v63  ;;  %v4474_v27 = vadd.f32 %v4440_v13, %v4251_v43 }
 0x73e   : > { %v4510_v12 = vadd.f32 %v7054_v22, %v4474_v27 }
 0x740   : > { %v4542_v10 = vmax.f32 %v4510_v12, 0.0 }
 0x742   : > { %v4574_v44 = vpack.c.bf16 %v4542_v10, %v4542_v10 }
 0x744   : > { %4607 = vst.msk [vmem:[%s7064_s27 + $0x7c] sm:$0xf] %vm4575_vm10, %v4574_v44 }
 0x745 PF: > { %s15_s18 = sadd.s32 1, %s5761_s18  }
 0x746   : > { %p12_p4 = scmp.ge.s32.totalorder %s15_s18, 4  }
 0x748   :  { %14 = sbr.rel (!%p12_p4) target bundleno = 1 (0x1), region = 78 }

// kernel: convnet_forward.3
= control target key start
LH: loop header
LB: loop body
LE: loop exit
PB: predicated region body
PF: predicated region fallthrough
CT: control target
= control target key end

     0   :  { %s20278_s0 = inlined_call_operand.vmem [shape: bf16[2,4096], index: 0, kind: input, shape index: {}]   ;;  %s20279_s1 = inlined_call_operand.vmem [shape: bf16[4096,512], index: 1, kind: input, shape index: {}]   ;;  %s20280_s2 = inlined_call_operand.vmem [shape: f32[1,512], index: 2, kind: input, shape index: {}]   ;;  %s20281_s3 = inlined_call_operand.vmem [shape: bf16[512,128], index: 3, kind: input, shape index: {}]   ;;  %s20282_s4 = inlined_call_operand.vmem [shape: f32[1,128], index: 4, kind: input, shape index: {}]   ;;  %s20283_s5 = inlined_call_operand.vmem [shape: bf16[128,10], index: 5, kind: input, shape index: {}]   ;;  %s20284_s6 = inlined_call_operand.vmem [shape: f32[1,10], index: 6, kind: input, shape index: {}]   ;;  %s20285_s7 = inlined_call_operand.hbm [shape: f32[2,10], index: 7, kind: output, shape index: {}]  }
   0x1   :  { %v8456_v0 = vld [vmem:[%s20279_s1 + $0xe0] sm:$0xf]  ;;  %v12628_v1 = vld [vmem:[%s20279_s1 + $0xec] sm:$0xf0] }
   0x2   :  { %v8584_v2 = vld [vmem:[%s20279_s1 + $0x1e0] sm:$0xf]  ;;  %v8457_v3 = vor.u32 %v12628_v1, %v8456_v0  ;;  %v12660_v4 = vld [vmem:[%s20279_s1 + $0x1ec] sm:$0xf0] }
   0x3   :  { %v8712_v5 = vld [vmem:[%s20279_s1 + $0x2e0] sm:$0xf]  ;;  %v12692_v6 = vld [vmem:[%s20279_s1 + $0x2ec] sm:$0xf0]  ;;  %v8585_v7 = vor.u32 %v12660_v4, %v8584_v2 }
   0x4   :  { %v8713_v8 = vor.u32 %v12692_v6, %v8712_v5  ;;  %v8840_v9 = vld [vmem:[%s20279_s1 + $0x3e0] sm:$0xf]  ;;  %v12724_v10 = vld [vmem:[%s20279_s1 + $0x3ec] sm:$0xf0]  ;;  %6257 = vmatpush.bf16.msra.mxu0 %v8457_v3 }
   0x5   :  { %v8440_v11 = vld [vmem:[%s20279_s1 + $0xc0] sm:$0xf]  ;;  %v8841_v12 = vor.u32 %v12724_v10, %v8840_v9  ;;  %v12624_v13 = vld [vmem:[%s20279_s1 + $0xcc] sm:$0xf0]  ;;  %6270 = vmatpush.bf16.msra.mxu1 %v8585_v7 }
   0x6   :  { %v8568_v14 = vld [vmem:[%s20279_s1 + $0x1c0] sm:$0xf]  ;;  %v12656_v15 = vld [vmem:[%s20279_s1 + $0x1cc] sm:$0xf0]  ;;  %6283 = vmatpush.bf16.msra.mxu2 %v8713_v8  ;;  %v8441_v16 = vor.u32 %v12624_v13, %v8440_v11 }
   0x7   :  { %v8569_v17 = vor.u32 %v12656_v15, %v8568_v14  ;;  %v8696_v18 = vld [vmem:[%s20279_s1 + $0x2c0] sm:$0xf]  ;;  %v12688_v19 = vld [vmem:[%s20279_s1 + $0x2cc] sm:$0xf0]  ;;  %6296 = vmatpush.bf16.msra.mxu3 %v8841_v12 }
   0x8   :  { %v8824_v20 = vld [vmem:[%s20279_s1 + $0x3c0] sm:$0xf]  ;;  %v8697_v21 = vor.u32 %v12688_v19, %v8696_v18  ;;  %v12720_v22 = vld [vmem:[%s20279_s1 + $0x3cc] sm:$0xf0]  ;;  %6258 = vmatpush.bf16.msra.mxu0 %v8441_v16 }
   0x9   :  { %v8424_v23 = vld [vmem:[%s20279_s1 + $0xa0] sm:$0xf]  ;;  %v12620_v24 = vld [vmem:[%s20279_s1 + $0xac] sm:$0xf0]  ;;  %v8825_v25 = vor.u32 %v12720_v22, %v8824_v20  ;;  %6271 = vmatpush.bf16.msra.mxu1 %v8569_v17 }
   0xa   :  { %v8552_v26 = vld [vmem:[%s20279_s1 + $0x1a0] sm:$0xf]  ;;  %v12652_v27 = vld [vmem:[%s20279_s1 + $0x1ac] sm:$0xf0]  ;;  %v8425_v29 = vor.u32 %v12620_v24, %v8424_v23  ;;  %6284 = vmatpush.bf16.msra.mxu2 %v8697_v21 }
   0xb   :  { %v8680_v28 = vld [vmem:[%s20279_s1 + $0x2a0] sm:$0xf]  ;;  %v12684_v30 = vld [vmem:[%s20279_s1 + $0x2ac] sm:$0xf0]  ;;  %v8553_v33 = vor.u32 %v12652_v27, %v8552_v26  ;;  %6297 = vmatpush.bf16.msra.mxu3 %v8825_v25 }
   0xc   :  { %v8808_v31 = vld [vmem:[%s20279_s1 + $0x3a0] sm:$0xf]  ;;  %v12716_v32 = vld [vmem:[%s20279_s1 + $0x3ac] sm:$0xf0]  ;;  %v8681_v34 = vor.u32 %v12684_v30, %v8680_v28  ;;  %6259 = vmatpush.bf16.msra.mxu0 %v8425_v29 }
   0xd   :  { %v8408_v35 = vld [vmem:[%s20279_s1 + $0x80] sm:$0xf]  ;;  %v12616_v36 = vld [vmem:[%s20279_s1 + $0x8c] sm:$0xf0]  ;;  %v8809_v38 = vor.u32 %v12716_v32, %v8808_v31  ;;  %6272 = vmatpush.bf16.msra.mxu1 %v8553_v33 }
   0xe   :  { %v8536_v37 = vld [vmem:[%s20279_s1 + $0x180] sm:$0xf]  ;;  %v12648_v39 = vld [vmem:[%s20279_s1 + $0x18c] sm:$0xf0]  ;;  %v8409_v44 = vor.u32 %v12616_v36, %v8408_v35  ;;  %6285 = vmatpush.bf16.msra.mxu2 %v8681_v34 }
   0xf   :  { %v8664_v40 = vld [vmem:[%s20279_s1 + $0x280] sm:$0xf]  ;;  %v12680_v41 = vld [vmem:[%s20279_s1 + $0x28c] sm:$0xf0]  ;;  %v8537_v45 = vor.u32 %v12648_v39, %v8536_v37  ;;  %6298 = vmatpush.bf16.msra.mxu3 %v8809_v38 }
  0x10   :  { %v8792_v42 = vld [vmem:[%s20279_s1 + $0x380] sm:$0xf]  ;;  %v12712_v43 = vld [vmem:[%s20279_s1 + $0x38c] sm:$0xf0]  ;;  %v8665_v46 = vor.u32 %v12680_v41, %v8664_v40  ;;  %6260 = vmatpush.bf16.msra.mxu0 %v8409_v44 }
  0x11   :  { %v8392_v47 = vld [vmem:[%s20279_s1 + $0x60] sm:$0xf]  ;;  %v12612_v48 = vld [vmem:[%s20279_s1 + $0x6c] sm:$0xf0]  ;;  %v8793_v50 = vor.u32 %v12712_v43, %v8792_v42  ;;  %6273 = vmatpush.bf16.msra.mxu1 %v8537_v45 }
  0x12   :  { %v8520_v49 = vld [vmem:[%s20279_s1 + $0x160] sm:$0xf]  ;;  %v12644_v51 = vld [vmem:[%s20279_s1 + $0x16c] sm:$0xf0]  ;;  %v8393_v56 = vor.u32 %v12612_v48, %v8392_v47  ;;  %6286 = vmatpush.bf16.msra.mxu2 %v8665_v46 }
  0x13   :  { %v8648_v52 = vld [vmem:[%s20279_s1 + $0x260] sm:$0xf]  ;;  %v12676_v53 = vld [vmem:[%s20279_s1 + $0x26c] sm:$0xf0]  ;;  %v8521_v57 = vor.u32 %v12644_v51, %v8520_v49  ;;  %6299 = vmatpush.bf16.msra.mxu3 %v8793_v50 }
  0x14   :  { %v8776_v54 = vld [vmem:[%s20279_s1 + $0x360] sm:$0xf]  ;;  %v12708_v55 = vld [vmem:[%s20279_s1 + $0x36c] sm:$0xf0]  ;;  %v8649_v58 = vor.u32 %v12676_v53, %v8648_v52  ;;  %6261 = vmatpush.bf16.msra.mxu0 %v8393_v56 }
  0x15   :  { %v8376_v59 = vld [vmem:[%s20279_s1 + $0x40] sm:$0xf]  ;;  %v12608_v60 = vld [vmem:[%s20279_s1 + $0x4c] sm:$0xf0]  ;;  %v8777_v62 = vor.u32 %v12708_v55, %v8776_v54  ;;  %6274 = vmatpush.bf16.msra.mxu1 %v8521_v57 }
  0x16   :  { %v8504_v61 = vld [vmem:[%s20279_s1 + $0x140] sm:$0xf]  ;;  %v12640_v63 = vld [vmem:[%s20279_s1 + $0x14c] sm:$0xf0]  ;;  %v8377_v4 = vor.u32 %v12608_v60, %v8376_v59  ;;  %6287 = vmatpush.bf16.msra.mxu2 %v8649_v58 }
  0x17   :  { %v8632_v0 = vld [vmem:[%s20279_s1 + $0x240] sm:$0xf]  ;;  %v12672_v1 = vld [vmem:[%s20279_s1 + $0x24c] sm:$0xf0]  ;;  %v8505_v5 = vor.u32 %v12640_v63, %v8504_v61  ;;  %6300 = vmatpush.bf16.msra.mxu3 %v8777_v62 }
  0x18   :  { %v8760_v2 = vld [vmem:[%s20279_s1 + $0x340] sm:$0xf]  ;;  %v12704_v3 = vld [vmem:[%s20279_s1 + $0x34c] sm:$0xf0]  ;;  %v8633_v6 = vor.u32 %v12672_v1, %v8632_v0  ;;  %6262 = vmatpush.bf16.msra.mxu0 %v8377_v4 }
  0x19   :  { %v8360_v7 = vld [vmem:[%s20279_s1 + $0x20] sm:$0xf]  ;;  %v12604_v8 = vld [vmem:[%s20279_s1 + $0x2c] sm:$0xf0]  ;;  %v8761_v10 = vor.u32 %v12704_v3, %v8760_v2  ;;  %6275 = vmatpush.bf16.msra.mxu1 %v8505_v5 }
  0x1a   :  { %v8488_v9 = vld [vmem:[%s20279_s1 + $0x120] sm:$0xf]  ;;  %v12636_v11 = vld [vmem:[%s20279_s1 + $0x12c] sm:$0xf0]  ;;  %v8361_v16 = vor.u32 %v12604_v8, %v8360_v7  ;;  %6288 = vmatpush.bf16.msra.mxu2 %v8633_v6 }
  0x1b   :  { %v8616_v12 = vld [vmem:[%s20279_s1 + $0x220] sm:$0xf]  ;;  %v12668_v13 = vld [vmem:[%s20279_s1 + $0x22c] sm:$0xf0]  ;;  %v8489_v19 = vor.u32 %v12636_v11, %v8488_v9  ;;  %6301 = vmatpush.bf16.msra.mxu3 %v8761_v10 }
  0x1c   :  { %v8744_v14 = vld [vmem:[%s20279_s1 + $0x320] sm:$0xf]  ;;  %v12700_v15 = vld [vmem:[%s20279_s1 + $0x32c] sm:$0xf0]  ;;  %v8617_v20 = vor.u32 %v12668_v13, %v8616_v12  ;;  %6263 = vmatpush.bf16.msra.mxu0 %v8361_v16 }
  0x1d   :  { %v8344_v17 = vld [vmem:[%s20279_s1] sm:$0xf]  ;;  %v12600_v18 = vld [vmem:[%s20279_s1 + $0xc] sm:$0xf0]  ;;  %v8745_v24 = vor.u32 %v12700_v15, %v8744_v14  ;;  %6276 = vmatpush.bf16.msra.mxu1 %v8489_v19 }
  0x1e   :  { %v8472_v21 = vld [vmem:[%s20279_s1 + $0x100] sm:$0xf]  ;;  %v12632_v22 = vld [vmem:[%s20279_s1 + $0x10c] sm:$0xf0]  ;;  %v8345_v31 = vor.u32 %v12600_v18, %v8344_v17  ;;  %6289 = vmatpush.bf16.msra.mxu2 %v8617_v20 }
  0x1f   :  { %v8600_v23 = vld [vmem:[%s20279_s1 + $0x200] sm:$0xf]  ;;  %v12664_v25 = vld [vmem:[%s20279_s1 + $0x20c] sm:$0xf0]  ;;  %v8473_v35 = vor.u32 %v12632_v22, %v8472_v21  ;;  %6302 = vmatpush.bf16.msra.mxu3 %v8745_v24 }
  0x20   :  { %v8728_v26 = vld [vmem:[%s20279_s1 + $0x300] sm:$0xf]  ;;  %v12696_v27 = vld [vmem:[%s20279_s1 + $0x30c] sm:$0xf0]  ;;  %v8601_v36 = vor.u32 %v12664_v25, %v8600_v23  ;;  %6264 = vmatpush.bf16.msra.mxu0 %v8345_v31 }
  0x21   :  { %v8968_v28 = vld [vmem:[%s20279_s1 + $0x4e0] sm:$0xf]  ;;  %v12756_v29 = vld [vmem:[%s20279_s1 + $0x4ec] sm:$0xf0]  ;;  %v8729_v39 = vor.u32 %v12696_v27, %v8728_v26  ;;  %6277 = vmatpush.bf16.msra.mxu1 %v8473_v35 }
  0x22   :  { %v9096_v30 = vld [vmem:[%s20279_s1 + $0x5e0] sm:$0xf]  ;;  %v12788_v32 = vld [vmem:[%s20279_s1 + $0x5ec] sm:$0xf0]  ;;  %v8969_v40 = vor.u32 %v12756_v29, %v8968_v28  ;;  %6290 = vmatpush.bf16.msra.mxu2 %v8601_v36 }
  0x23   :  { %v9224_v33 = vld [vmem:[%s20279_s1 + $0x6e0] sm:$0xf]  ;;  %v12820_v34 = vld [vmem:[%s20279_s1 + $0x6ec] sm:$0xf0]  ;;  %v9097_v41 = vor.u32 %v12788_v32, %v9096_v30  ;;  %6303 = vmatpush.bf16.msra.mxu3 %v8729_v39 }
  0x24   :  { %v9352_v37 = vld [vmem:[%s20279_s1 + $0x7e0] sm:$0xf]  ;;  %v12852_v38 = vld [vmem:[%s20279_s1 + $0x7ec] sm:$0xf0]  ;;  %v9225_v42 = vor.u32 %v12820_v34, %v9224_v33  ;;  %6309 = vmatpush.bf16.msrb.mxu0 %v8969_v40 }
  0x25   :  { %v8952_v43 = vld [vmem:[%s20279_s1 + $0x4c0] sm:$0xf]  ;;  %v12752_v44 = vld [vmem:[%s20279_s1 + $0x4cc] sm:$0xf0]  ;;  %v9353_v46 = vor.u32 %v12852_v38, %v9352_v37  ;;  %6322 = vmatpush.bf16.msrb.mxu1 %v9097_v41 }
  0x26   :  { %v9080_v45 = vld [vmem:[%s20279_s1 + $0x5c0] sm:$0xf]  ;;  %v12784_v47 = vld [vmem:[%s20279_s1 + $0x5cc] sm:$0xf0]  ;;  %v8953_v52 = vor.u32 %v12752_v44, %v8952_v43  ;;  %6335 = vmatpush.bf16.msrb.mxu2 %v9225_v42 }
  0x27   :  { %v9208_v48 = vld [vmem:[%s20279_s1 + $0x6c0] sm:$0xf]  ;;  %v12816_v49 = vld [vmem:[%s20279_s1 + $0x6cc] sm:$0xf0]  ;;  %v9081_v53 = vor.u32 %v12784_v47, %v9080_v45  ;;  %6348 = vmatpush.bf16.msrb.mxu3 %v9353_v46 }
  0x28   :  { %v9336_v50 = vld [vmem:[%s20279_s1 + $0x7c0] sm:$0xf]  ;;  %v12848_v51 = vld [vmem:[%s20279_s1 + $0x7cc] sm:$0xf0]  ;;  %v9209_v54 = vor.u32 %v12816_v49, %v9208_v48  ;;  %6310 = vmatpush.bf16.msrb.mxu0 %v8953_v52 }
  0x29   :  { %v8936_v55 = vld [vmem:[%s20279_s1 + $0x4a0] sm:$0xf]  ;;  %v12748_v56 = vld [vmem:[%s20279_s1 + $0x4ac] sm:$0xf0]  ;;  %v9337_v58 = vor.u32 %v12848_v51, %v9336_v50  ;;  %6323 = vmatpush.bf16.msrb.mxu1 %v9081_v53 }
  0x2a   :  { %v9064_v57 = vld [vmem:[%s20279_s1 + $0x5a0] sm:$0xf]  ;;  %v12780_v59 = vld [vmem:[%s20279_s1 + $0x5ac] sm:$0xf0]  ;;  %v8937_v0 = vor.u32 %v12748_v56, %v8936_v55  ;;  %6336 = vmatpush.bf16.msrb.mxu2 %v9209_v54 }
  0x2b   :  { %v9192_v60 = vld [vmem:[%s20279_s1 + $0x6a0] sm:$0xf]  ;;  %v12812_v61 = vld [vmem:[%s20279_s1 + $0x6ac] sm:$0xf0]  ;;  %v9065_v3 = vor.u32 %v12780_v59, %v9064_v57  ;;  %6349 = vmatpush.bf16.msrb.mxu3 %v9337_v58 }
  0x2c   :  { %v9320_v62 = vld [vmem:[%s20279_s1 + $0x7a0] sm:$0xf]  ;;  %v12844_v63 = vld [vmem:[%s20279_s1 + $0x7ac] sm:$0xf0]  ;;  %v9193_v4 = vor.u32 %v12812_v61, %v9192_v60  ;;  %6311 = vmatpush.bf16.msrb.mxu0 %v8937_v0  ;;  %v28_v61 = vld [vmem:[%s20278_s0 + $0x8] sm:$0xff] }
  0x2d   :  { %v8920_v1 = vld [vmem:[%s20279_s1 + $0x480] sm:$0xf]  ;;  %v12744_v5 = vld [vmem:[%s20279_s1 + $0x48c] sm:$0xf0]  ;;  %v9321_v7 = vor.u32 %v12844_v63, %v9320_v62  ;;  %6324 = vmatpush.bf16.msrb.mxu1 %v9065_v3 }
  0x2e   :  { %v27_v2 = vld [vmem:[%s20278_s0] sm:$0xff]  ;;  %v12776_v8 = vld [vmem:[%s20279_s1 + $0x58c] sm:$0xf0]  ;;  %v8921_v13 = vor.u32 %v12744_v5, %v8920_v1  ;;  %6337 = vmatpush.bf16.msrb.mxu2 %v9193_v4 }
  0x2f   :  { %v9048_v6 = vld [vmem:[%s20279_s1 + $0x580] sm:$0xf]  ;;  %1066 = vst [vmem:[#allocation1] ss:$9 sm:$0xff] %v27_v2  ;;  %v12808_v10 = vld [vmem:[%s20279_s1 + $0x68c] sm:$0xf0]  ;;  %6350 = vmatpush.bf16.msrb.mxu3 %v9321_v7 }
  0x30   :  { %v9176_v9 = vld [vmem:[%s20279_s1 + $0x680] sm:$0xf]  ;;  %v12840_v12 = vld [vmem:[%s20279_s1 + $0x78c] sm:$0xf0]  ;;  %v9049_v14 = vor.u32 %v12776_v8, %v9048_v6  ;;  %6312 = vmatpush.bf16.msrb.mxu0 %v8921_v13 }
  0x31   :  { %v9304_v11 = vld [vmem:[%s20279_s1 + $0x780] sm:$0xf]  ;;  %v9177_v15 = vor.u32 %v12808_v10, %v9176_v9  ;;  %v12740_v17 = vld [vmem:[%s20279_s1 + $0x46c] sm:$0xf0] }
  0x32   :  { %v8904_v16 = vld [vmem:[%s20279_s1 + $0x460] sm:$0xf]  ;;  %v9305_v19 = vor.u32 %v12840_v12, %v9304_v11  ;;  %v12772_v20 = vld [vmem:[%s20279_s1 + $0x56c] sm:$0xf0]  ;;  %6325 = vmatpush.bf16.msrb.mxu1 %v9049_v14 }
  0x33   :  { %v9032_v18 = vld [vmem:[%s20279_s1 + $0x560] sm:$0xf]  ;;  %v12804_v22 = vld [vmem:[%s20279_s1 + $0x66c] sm:$0xf0]  ;;  %v8905_v26 = vor.u32 %v12740_v17, %v8904_v16  ;;  %6338 = vmatpush.bf16.msrb.mxu2 %v9177_v15 }
  0x34   :  { %v9160_v21 = vld [vmem:[%s20279_s1 + $0x660] sm:$0xf]  ;;  %v12836_v24 = vld [vmem:[%s20279_s1 + $0x76c] sm:$0xf0]  ;;  %v9033_v30 = vor.u32 %v12772_v20, %v9032_v18  ;;  %6351 = vmatpush.bf16.msrb.mxu3 %v9305_v19 }
  0x35   :  { %v9288_v23 = vld [vmem:[%s20279_s1 + $0x760] sm:$0xf]  ;;  %v9161_v31 = vor.u32 %v12804_v22, %v9160_v21  ;;  %v12736_v32 = vld [vmem:[%s20279_s1 + $0x44c] sm:$0xf0]  ;;  %6313 = vmatpush.bf16.msrb.mxu0 %v8905_v26 }
  0x36   :  { %v8888_v25 = vld [vmem:[%s20279_s1 + $0x440] sm:$0xf]  ;;  %v14077_v27 = vld [vmem:[#allocation1 + $0x12] sm:$0xff]  ;;  %v14089_v34 = vld [vmem:[#allocation1 + $0x9] sm:$0xff]  ;;  %v9289_v35 = vor.u32 %v12836_v24, %v9288_v23  ;;  %6326 = vmatpush.bf16.msrb.mxu1 %v9033_v30 }
  0x37   :  { %v14079_v28 = vld [vmem:[#allocation1] sm:$0xff]  ;;  %v12768_v36 = vld [vmem:[%s20279_s1 + $0x54c] sm:$0xf0]  ;;  %6291 = vmatmul.bf16.vlgmr.msra.gmra.mxu2 %v14077_v27  ;;  %v8889_v41 = vor.u32 %v12736_v32, %v8888_v25  ;;  %6278 = vmatmul.bf16.vlgmr.msra.gmra.mxu1 %v14089_v34  ;;  %v14152_v60 = vld [vmem:[#allocation1 + $0x36] sm:$0xff] }
  0x38   :  { %v14081_v29 = vld [vmem:[#allocation1 + $0x1b] sm:$0xff]  ;;  %v12800_v38 = vld [vmem:[%s20279_s1 + $0x64c] sm:$0xf0]  ;;  %6265 = vmatmul.bf16.vlgmr.msra.gmra.mxu0 %v14079_v28  ;;  %6339 = vmatpush.bf16.msrb.mxu2 %v9161_v31  ;;  %v14157_v0 = vld [vmem:[#allocation1 + $0x24] sm:$0xff] }
  0x39   :  { %v9016_v33 = vld [vmem:[%s20279_s1 + $0x540] sm:$0xf]  ;;  %v12832_v40 = vld [vmem:[%s20279_s1 + $0x74c] sm:$0xf0]  ;;  %6304 = vmatmul.bf16.vlgmr.msra.gmra.mxu3 %v14081_v29  ;;  %6314 = vmatpush.bf16.msrb.mxu0 %v8889_v41 }
  0x3a   :  { %v9144_v37 = vld [vmem:[%s20279_s1 + $0x640] sm:$0xf]  ;;  %v9017_v43 = vor.u32 %v12768_v36, %v9016_v33  ;;  %v12732_v45 = vld [vmem:[%s20279_s1 + $0x42c] sm:$0xf0]  ;;  %6352 = vmatpush.bf16.msrb.mxu3 %v9289_v35 }
  0x3b   :  { %v9272_v39 = vld [vmem:[%s20279_s1 + $0x740] sm:$0xf]  ;;  %v9145_v44 = vor.u32 %v12800_v38, %v9144_v37  ;;  %v12764_v47 = vld [vmem:[%s20279_s1 + $0x52c] sm:$0xf0] }
  0x3c   :  { %v8872_v42 = vld [vmem:[%s20279_s1 + $0x420] sm:$0xf]  ;;  %v9273_v48 = vor.u32 %v12832_v40, %v9272_v39  ;;  %v12796_v50 = vld [vmem:[%s20279_s1 + $0x62c] sm:$0xf0]  ;;  %6327 = vmatpush.bf16.msrb.mxu1 %v9017_v43 }
  0x3d   :  { %v9000_v46 = vld [vmem:[%s20279_s1 + $0x520] sm:$0xf]  ;;  %v12828_v52 = vld [vmem:[%s20279_s1 + $0x72c] sm:$0xf0]  ;;  %v8873_v55 = vor.u32 %v12732_v45, %v8872_v42  ;;  %6340 = vmatpush.bf16.msrb.mxu2 %v9145_v44 }
  0x3e   :  { %v9128_v49 = vld [vmem:[%s20279_s1 + $0x620] sm:$0xf]  ;;  %v12728_v54 = vld [vmem:[%s20279_s1 + $0x40c] sm:$0xf0]  ;;  %v9001_v62 = vor.u32 %v12764_v47, %v9000_v46  ;;  %6353 = vmatpush.bf16.msrb.mxu3 %v9273_v48 }
  0x3f   :  { %v9256_v51 = vld [vmem:[%s20279_s1 + $0x720] sm:$0xf]  ;;  %v12760_v57 = vld [vmem:[%s20279_s1 + $0x50c] sm:$0xf0]  ;;  %v9129_v63 = vor.u32 %v12796_v50, %v9128_v49  ;;  %6315 = vmatpush.bf16.msrb.mxu0 %v8873_v55 }
  0x40   :  { %v8856_v53 = vld [vmem:[%s20279_s1 + $0x400] sm:$0xf]  ;;  %v12792_v59 = vld [vmem:[%s20279_s1 + $0x60c] sm:$0xf0]  ;;  %v9257_v3 = vor.u32 %v12828_v52, %v9256_v51  ;;  %6328 = vmatpush.bf16.msrb.mxu1 %v9001_v62 }
  0x41   :  { %v8984_v56 = vld [vmem:[%s20279_s1 + $0x500] sm:$0xf]  ;;  %v14161_v2 = vld [vmem:[#allocation1 + $0x2d] sm:$0xff]  ;;  %v8857_v9 = vor.u32 %v12728_v54, %v8856_v53  ;;  %6341 = vmatpush.bf16.msrb.mxu2 %v9129_v63 }
  0x42   :  { %v9112_v58 = vld [vmem:[%s20279_s1 + $0x600] sm:$0xf]  ;;  %v12824_v5 = vld [vmem:[%s20279_s1 + $0x70c] sm:$0xf0]  ;;  %v8985_v13 = vor.u32 %v12760_v57, %v8984_v56  ;;  %6354 = vmatpush.bf16.msrb.mxu3 %v9257_v3 }
  0x43   :  { %v14159_v1 = vld [vmem:[#allocation1 + $0x3f] sm:$0xff]  ;;  %v12884_v7 = vld [vmem:[%s20279_s1 + $0x8ec] sm:$0xf0]  ;;  %v9113_v14 = vor.u32 %v12792_v59, %v9112_v58  ;;  %6316 = vmatpush.bf16.msrb.mxu0 %v8857_v9 }
  0x44   :  { %v9240_v4 = vld [vmem:[%s20279_s1 + $0x700] sm:$0xf]  ;;  %1076 = vst [vmem:[#allocation1] ss:$9 sm:$0xff] %v28_v61  ;;  %v12916_v10 = vld [vmem:[%s20279_s1 + $0x9ec] sm:$0xf0]  ;;  %6329 = vmatpush.bf16.msrb.mxu1 %v8985_v13 }
  0x45   :  { %v9480_v6 = vld [vmem:[%s20279_s1 + $0x8e0] sm:$0xf]  ;;  %v12948_v12 = vld [vmem:[%s20279_s1 + $0xaec] sm:$0xf0]  ;;  %v9241_v17 = vor.u32 %v12824_v5, %v9240_v4  ;;  %6342 = vmatpush.bf16.msrb.mxu2 %v9113_v14 }
  0x46   :  { %v9608_v8 = vld [vmem:[%s20279_s1 + $0x9e0] sm:$0xf]  ;;  %v12980_v16 = vld [vmem:[%s20279_s1 + $0xbec] sm:$0xf0]  ;;  %v9481_v18 = vor.u32 %v12884_v7, %v9480_v6 }
  0x47   :  { %v9736_v11 = vld [vmem:[%s20279_s1 + $0xae0] sm:$0xf]  ;;  %v9609_v19 = vor.u32 %v12916_v10, %v9608_v8  ;;  %v12880_v22 = vld [vmem:[%s20279_s1 + $0x8cc] sm:$0xf0]  ;;  %6355 = vmatpush.bf16.msrb.mxu3 %v9241_v17  ;;  %6330 = vmatmul.bf16.vlgmr.msrb.gmra.mxu1 %v14161_v2 }
  0x48   :  { %v9864_v15 = vld [vmem:[%s20279_s1 + $0xbe0] sm:$0xf]  ;;  %v9737_v20 = vor.u32 %v12948_v12, %v9736_v11  ;;  %v12912_v25 = vld [vmem:[%s20279_s1 + $0x9cc] sm:$0xf0]  ;;  %6361 = vmatpush.bf16.msra.mxu0 %v9481_v18  ;;  %6343 = vmatmul.bf16.vlgmr.msrb.gmra.mxu2 %v14152_v60 }
  0x49   :  { %v9464_v21 = vld [vmem:[%s20279_s1 + $0x8c0] sm:$0xf]  ;;  %v9865_v24 = vor.u32 %v12980_v16, %v9864_v15  ;;  %v12944_v30 = vld [vmem:[%s20279_s1 + $0xacc] sm:$0xf0]  ;;  %6374 = vmatpush.bf16.msra.mxu1 %v9609_v19  ;;  %6317 = vmatmul.bf16.vlgmr.msrb.gmra.mxu0 %v14157_v0 }
  0x4a   :  { %v9592_v23 = vld [vmem:[%s20279_s1 + $0x9c0] sm:$0xf]  ;;  %v12976_v32 = vld [vmem:[%s20279_s1 + $0xbcc] sm:$0xf0]  ;;  %v9465_v33 = vor.u32 %v12880_v22, %v9464_v21  ;;  %6387 = vmatpush.bf16.msra.mxu2 %v9737_v20  ;;  %6356 = vmatmul.bf16.vlgmr.msrb.gmra.mxu3 %v14159_v1 }
  0x4b   :  { %v9720_v26 = vld [vmem:[%s20279_s1 + $0xac0] sm:$0xf]  ;;  %v9593_v35 = vor.u32 %v12912_v25, %v9592_v23  ;;  %v12876_v38 = vld [vmem:[%s20279_s1 + $0x8ac] sm:$0xf0]  ;;  %6400 = vmatpush.bf16.msra.mxu3 %v9865_v24 }
  0x4c   :  { %v9848_v31 = vld [vmem:[%s20279_s1 + $0xbc0] sm:$0xf]  ;;  %v9721_v36 = vor.u32 %v12944_v30, %v9720_v26  ;;  %v12908_v41 = vld [vmem:[%s20279_s1 + $0x9ac] sm:$0xf0]  ;;  %6362 = vmatpush.bf16.msra.mxu0 %v9465_v33 }
  0x4d   :  { %v9448_v37 = vld [vmem:[%s20279_s1 + $0x8a0] sm:$0xf]  ;;  %v9849_v40 = vor.u32 %v12976_v32, %v9848_v31  ;;  %v12940_v43 = vld [vmem:[%s20279_s1 + $0xaac] sm:$0xf0]  ;;  %6375 = vmatpush.bf16.msra.mxu1 %v9593_v35 }
  0x4e   :  { %v9576_v39 = vld [vmem:[%s20279_s1 + $0x9a0] sm:$0xf]  ;;  %v12972_v45 = vld [vmem:[%s20279_s1 + $0xbac] sm:$0xf0]  ;;  %v9449_v46 = vor.u32 %v12876_v38, %v9448_v37  ;;  %6388 = vmatpush.bf16.msra.mxu2 %v9721_v36 }
  0x4f   :  { %v9704_v42 = vld [vmem:[%s20279_s1 + $0xaa0] sm:$0xf]  ;;  %v9577_v47 = vor.u32 %v12908_v41, %v9576_v39  ;;  %v12872_v50 = vld [vmem:[%s20279_s1 + $0x88c] sm:$0xf0]  ;;  %6401 = vmatpush.bf16.msra.mxu3 %v9849_v40 }
  0x50   :  { %v9832_v44 = vld [vmem:[%s20279_s1 + $0xba0] sm:$0xf]  ;;  %v9705_v48 = vor.u32 %v12940_v43, %v9704_v42  ;;  %v12904_v53 = vld [vmem:[%s20279_s1 + $0x98c] sm:$0xf0]  ;;  %6363 = vmatpush.bf16.msra.mxu0 %v9449_v46 }
  0x51   :  { %v9432_v49 = vld [vmem:[%s20279_s1 + $0x880] sm:$0xf]  ;;  %v9833_v52 = vor.u32 %v12972_v45, %v9832_v44  ;;  %v12936_v55 = vld [vmem:[%s20279_s1 + $0xa8c] sm:$0xf0]  ;;  %6376 = vmatpush.bf16.msra.mxu1 %v9577_v47 }
  0x52   :  { %v9560_v51 = vld [vmem:[%s20279_s1 + $0x980] sm:$0xf]  ;;  %v12968_v57 = vld [vmem:[%s20279_s1 + $0xb8c] sm:$0xf0]  ;;  %v9433_v58 = vor.u32 %v12872_v50, %v9432_v49  ;;  %6389 = vmatpush.bf16.msra.mxu2 %v9705_v48 }
  0x53   :  { %v9688_v54 = vld [vmem:[%s20279_s1 + $0xa80] sm:$0xf]  ;;  %v9561_v59 = vor.u32 %v12904_v53, %v9560_v51  ;;  %v12868_v63 = vld [vmem:[%s20279_s1 + $0x86c] sm:$0xf0]  ;;  %6402 = vmatpush.bf16.msra.mxu3 %v9833_v52 }
  0x54   :  { %v9816_v56 = vld [vmem:[%s20279_s1 + $0xb80] sm:$0xf]  ;;  %v9689_v61 = vor.u32 %v12936_v55, %v9688_v54  ;;  %v12900_v5 = vld [vmem:[%s20279_s1 + $0x96c] sm:$0xf0]  ;;  %6364 = vmatpush.bf16.msra.mxu0 %v9433_v58 }
  0x55   :  { %v9416_v62 = vld [vmem:[%s20279_s1 + $0x860] sm:$0xf]  ;;  %v9817_v4 = vor.u32 %v12968_v57, %v9816_v56  ;;  %v12932_v7 = vld [vmem:[%s20279_s1 + $0xa6c] sm:$0xf0]  ;;  %6377 = vmatpush.bf16.msra.mxu1 %v9561_v59 }
  0x56   :  { %v9544_v3 = vld [vmem:[%s20279_s1 + $0x960] sm:$0xf]  ;;  %v12964_v9 = vld [vmem:[%s20279_s1 + $0xb6c] sm:$0xf0]  ;;  %v9417_v10 = vor.u32 %v12868_v63, %v9416_v62  ;;  %6390 = vmatpush.bf16.msra.mxu2 %v9689_v61 }
  0x57   :  { %v9672_v6 = vld [vmem:[%s20279_s1 + $0xa60] sm:$0xf]  ;;  %v9545_v11 = vor.u32 %v12900_v5, %v9544_v3  ;;  %v12864_v14 = vld [vmem:[%s20279_s1 + $0x84c] sm:$0xf0]  ;;  %6403 = vmatpush.bf16.msra.mxu3 %v9817_v4 }
  0x58   :  { %v9800_v8 = vld [vmem:[%s20279_s1 + $0xb60] sm:$0xf]  ;;  %v9673_v12 = vor.u32 %v12932_v7, %v9672_v6  ;;  %v12896_v17 = vld [vmem:[%s20279_s1 + $0x94c] sm:$0xf0]  ;;  %6365 = vmatpush.bf16.msra.mxu0 %v9417_v10 }
  0x59   :  { %v9400_v13 = vld [vmem:[%s20279_s1 + $0x840] sm:$0xf]  ;;  %v9801_v16 = vor.u32 %v12964_v9, %v9800_v8  ;;  %v12928_v19 = vld [vmem:[%s20279_s1 + $0xa4c] sm:$0xf0]  ;;  %6378 = vmatpush.bf16.msra.mxu1 %v9545_v11 }
  0x5a   :  { %v9528_v15 = vld [vmem:[%s20279_s1 + $0x940] sm:$0xf]  ;;  %v12960_v21 = vld [vmem:[%s20279_s1 + $0xb4c] sm:$0xf0]  ;;  %v9401_v22 = vor.u32 %v12864_v14, %v9400_v13  ;;  %6391 = vmatpush.bf16.msra.mxu2 %v9673_v12 }
  0x5b   :  { %v9656_v18 = vld [vmem:[%s20279_s1 + $0xa40] sm:$0xf]  ;;  %v9529_v23 = vor.u32 %v12896_v17, %v9528_v15  ;;  %v12860_v26 = vld [vmem:[%s20279_s1 + $0x82c] sm:$0xf0]  ;;  %6404 = vmatpush.bf16.msra.mxu3 %v9801_v16 }
  0x5c   :  { %v9784_v20 = vld [vmem:[%s20279_s1 + $0xb40] sm:$0xf]  ;;  %v9657_v24 = vor.u32 %v12928_v19, %v9656_v18  ;;  %v12892_v32 = vld [vmem:[%s20279_s1 + $0x92c] sm:$0xf0]  ;;  %6366 = vmatpush.bf16.msra.mxu0 %v9401_v22 }
  0x5d   :  { %v9384_v25 = vld [vmem:[%s20279_s1 + $0x820] sm:$0xf]  ;;  %v9785_v31 = vor.u32 %v12960_v21, %v9784_v20  ;;  %v12924_v35 = vld [vmem:[%s20279_s1 + $0xa2c] sm:$0xf0]  ;;  %6379 = vmatpush.bf16.msra.mxu1 %v9529_v23 }
  0x5e   :  { %v9512_v30 = vld [vmem:[%s20279_s1 + $0x920] sm:$0xf]  ;;  %v12956_v37 = vld [vmem:[%s20279_s1 + $0xb2c] sm:$0xf0]  ;;  %v9385_v38 = vor.u32 %v12860_v26, %v9384_v25  ;;  %6392 = vmatpush.bf16.msra.mxu2 %v9657_v24 }
  0x5f   :  { %v9640_v33 = vld [vmem:[%s20279_s1 + $0xa20] sm:$0xf]  ;;  %v12856_v40 = vld [vmem:[%s20279_s1 + $0x80c] sm:$0xf0]  ;;  %v9513_v41 = vor.u32 %v12892_v32, %v9512_v30  ;;  %6405 = vmatpush.bf16.msra.mxu3 %v9785_v31 }
  0x60   :  { %v9768_v36 = vld [vmem:[%s20279_s1 + $0xb20] sm:$0xf]  ;;  %v9641_v42 = vor.u32 %v12924_v35, %v9640_v33  ;;  %v12888_v44 = vld [vmem:[%s20279_s1 + $0x90c] sm:$0xf0]  ;;  %6367 = vmatpush.bf16.msra.mxu0 %v9385_v38 }
  0x61   :  { %v9368_v39 = vld [vmem:[%s20279_s1 + $0x800] sm:$0xf]  ;;  %v9769_v46 = vor.u32 %v12956_v37, %v9768_v36  ;;  %v12920_v47 = vld [vmem:[%s20279_s1 + $0xa0c] sm:$0xf0]  ;;  %6380 = vmatpush.bf16.msra.mxu1 %v9513_v41 }
  0x62   :  { %v9496_v43 = vld [vmem:[%s20279_s1 + $0x900] sm:$0xf]  ;;  %v12952_v49 = vld [vmem:[%s20279_s1 + $0xb0c] sm:$0xf0]  ;;  %v9369_v53 = vor.u32 %v12856_v40, %v9368_v39  ;;  %6393 = vmatpush.bf16.msra.mxu2 %v9641_v42 }
  0x63   :  { %v9624_v45 = vld [vmem:[%s20279_s1 + $0xa00] sm:$0xf]  ;;  %v13012_v51 = vld [vmem:[%s20279_s1 + $0xcec] sm:$0xf0]  ;;  %v9497_v57 = vor.u32 %v12888_v44, %v9496_v43  ;;  %6406 = vmatpush.bf16.msra.mxu3 %v9769_v46 }
  0x64   :  { %v9752_v48 = vld [vmem:[%s20279_s1 + $0xb00] sm:$0xf]  ;;  %v13044_v54 = vld [vmem:[%s20279_s1 + $0xdec] sm:$0xf0]  ;;  %v9625_v58 = vor.u32 %v12920_v47, %v9624_v45  ;;  %6368 = vmatpush.bf16.msra.mxu0 %v9369_v53 }
  0x65   :  { %v9992_v50 = vld [vmem:[%s20279_s1 + $0xce0] sm:$0xf]  ;;  %v13076_v56 = vld [vmem:[%s20279_s1 + $0xeec] sm:$0xf0]  ;;  %v9753_v62 = vor.u32 %v12952_v49, %v9752_v48  ;;  %6381 = vmatpush.bf16.msra.mxu1 %v9497_v57 }
  0x66   :  { %v10120_v52 = vld [vmem:[%s20279_s1 + $0xde0] sm:$0xf]  ;;  %v13108_v61 = vld [vmem:[%s20279_s1 + $0xfec] sm:$0xf0]  ;;  %v9993_v63 = vor.u32 %v13012_v51, %v9992_v50  ;;  %6394 = vmatpush.bf16.msra.mxu2 %v9625_v58 }
  0x67   :  { %v10248_v55 = vld [vmem:[%s20279_s1 + $0xee0] sm:$0xf]  ;;  %v10121_v3 = vor.u32 %v13044_v54, %v10120_v52  ;;  %v13008_v6 = vld [vmem:[%s20279_s1 + $0xccc] sm:$0xf0]  ;;  %6407 = vmatpush.bf16.msra.mxu3 %v9753_v62 }
  0x68   :  { %v10376_v59 = vld [vmem:[%s20279_s1 + $0xfe0] sm:$0xf]  ;;  %v10249_v4 = vor.u32 %v13076_v56, %v10248_v55  ;;  %v13040_v9 = vld [vmem:[%s20279_s1 + $0xdcc] sm:$0xf0]  ;;  %6413 = vmatpush.bf16.msrb.mxu0 %v9993_v63 }
  0x69   :  { %v9976_v5 = vld [vmem:[%s20279_s1 + $0xcc0] sm:$0xf]  ;;  %v10377_v8 = vor.u32 %v13108_v61, %v10376_v59  ;;  %v13072_v11 = vld [vmem:[%s20279_s1 + $0xecc] sm:$0xf0]  ;;  %6426 = vmatpush.bf16.msrb.mxu1 %v10121_v3 }
  0x6a   :  { %v10104_v7 = vld [vmem:[%s20279_s1 + $0xdc0] sm:$0xf]  ;;  %v13104_v14 = vld [vmem:[%s20279_s1 + $0xfcc] sm:$0xf0]  ;;  %v9977_v18 = vor.u32 %v13008_v6, %v9976_v5  ;;  %6439 = vmatpush.bf16.msrb.mxu2 %v10249_v4 }
  0x6b   :  { %v10232_v10 = vld [vmem:[%s20279_s1 + $0xec0] sm:$0xf]  ;;  %v14415_v15 = vld [vmem:[#allocation1 + $0x12] sm:$0xff]  ;;  %v14417_v16 = vld [vmem:[#allocation1 + $0x9] sm:$0xff]  ;;  %v10105_v19 = vor.u32 %v13040_v9, %v10104_v7  ;;  %6452 = vmatpush.bf16.msrb.mxu3 %v10377_v8 }
  0x6c   :  { %v14407_v12 = vld [vmem:[#allocation1] sm:$0xff]  ;;  %v10233_v20 = vor.u32 %v13072_v11, %v10232_v10  ;;  %v13004_v22 = vld [vmem:[%s20279_s1 + $0xcac] sm:$0xf0]  ;;  %6395 = vmatmul.bf16.vlgmr.msra.gmra.mxu2 %v14415_v15  ;;  %6382 = vmatmul.bf16.vlgmr.msra.gmra.mxu1 %v14417_v16 }
  0x6d   :  { %v10360_v13 = vld [vmem:[%s20279_s1 + $0xfc0] sm:$0xf]  ;;  %6369 = vmatmul.bf16.vlgmr.msra.gmra.mxu0 %v14407_v12  ;;  %v13036_v25 = vld [vmem:[%s20279_s1 + $0xdac] sm:$0xf0]  ;;  %6427 = vmatpush.bf16.msrb.mxu1 %v10105_v19 }
  0x6e   :  { %v14419_v17 = vld [vmem:[#allocation1 + $0x1b] sm:$0xff]  ;;  %v10361_v24 = vor.u32 %v13104_v14, %v10360_v13  ;;  %v13068_v30 = vld [vmem:[%s20279_s1 + $0xeac] sm:$0xf0]  ;;  %6414 = vmatpush.bf16.msrb.mxu0 %v9977_v18  ;;  %6440 = vmatpush.bf16.msrb.mxu2 %v10233_v20 }
  0x6f   :  { %v9960_v21 = vld [vmem:[%s20279_s1 + $0xca0] sm:$0xf]  ;;  %v13100_v32 = vld [vmem:[%s20279_s1 + $0xfac] sm:$0xf0]  ;;  %6408 = vmatmul.bf16.vlgmr.msra.gmra.mxu3 %v14419_v17 }
  0x70   :  { %v10088_v23 = vld [vmem:[%s20279_s1 + $0xda0] sm:$0xf]  ;;  %v9961_v33 = vor.u32 %v13004_v22, %v9960_v21  ;;  %v13000_v36 = vld [vmem:[%s20279_s1 + $0xc8c] sm:$0xf0]  ;;  %6453 = vmatpush.bf16.msrb.mxu3 %v10361_v24 }
  0x71   :  { %v10216_v26 = vld [vmem:[%s20279_s1 + $0xea0] sm:$0xf]  ;;  %v10089_v37 = vor.u32 %v13036_v25, %v10088_v23  ;;  %v13032_v40 = vld [vmem:[%s20279_s1 + $0xd8c] sm:$0xf0] }
  0x72   :  { %v10344_v31 = vld [vmem:[%s20279_s1 + $0xfa0] sm:$0xf]  ;;  %v10217_v38 = vor.u32 %v13068_v30, %v10216_v26  ;;  %v13064_v43 = vld [vmem:[%s20279_s1 + $0xe8c] sm:$0xf0] }
  0x73   :  { %v9944_v35 = vld [vmem:[%s20279_s1 + $0xc80] sm:$0xf]  ;;  %v10345_v42 = vor.u32 %v13100_v32, %v10344_v31  ;;  %v13096_v45 = vld [vmem:[%s20279_s1 + $0xf8c] sm:$0xf0] }
  0x74   :  { %v10072_v39 = vld [vmem:[%s20279_s1 + $0xd80] sm:$0xf] }
  0x75   :  { %v10200_v41 = vld [vmem:[%s20279_s1 + $0xe80] sm:$0xf] }
  0x76   :  { %v10328_v44 = vld [vmem:[%s20279_s1 + $0xf80] sm:$0xf] }
  0x77   :  { %12 = vsyncpa [#allocation3], 0  ;;  %6415 = vmatpush.bf16.msrb.mxu0 %v9961_v33  ;;  %v9945_v46 = vor.u32 %v13000_v36, %v9944_v35  ;;  %6428 = vmatpush.bf16.msrb.mxu1 %v10089_v37  ;;  %v10073_v47 = vor.u32 %v13032_v40, %v10072_v39  ;;  %v10201_v48 = vor.u32 %v13064_v43, %v10200_v41  ;;  %v9928_v49 = vld [vmem:[%s20279_s1 + $0xc60] sm:$0xf]  ;;  %v12996_v50 = vld [vmem:[%s20279_s1 + $0xc6c] sm:$0xf0] }
  0x78   :  { %6441 = vmatpush.bf16.msrb.mxu2 %v10217_v38  ;;  %v10056_v51 = vld [vmem:[%s20279_s1 + $0xd60] sm:$0xf]  ;;  %6454 = vmatpush.bf16.msrb.mxu3 %v10345_v42  ;;  %v10329_v52 = vor.u32 %v13096_v45, %v10328_v44  ;;  %v13028_v53 = vld [vmem:[%s20279_s1 + $0xd6c] sm:$0xf0]  ;;  %v9929_v58 = vor.u32 %v12996_v50, %v9928_v49  ;;  %s13718_s9 = smov [#allocation2]   ;;  %s8333_s11 = sshll.u32 %s20285_s7, 4  ;;  %s8334_s11 = int_to_ptr.hbm [resolvable:$true] %s8333_s11 }
  0x79   :  { %v10184_v54 = vld [vmem:[%s20279_s1 + $0xe60] sm:$0xf]  ;;  %v13060_v55 = vld [vmem:[%s20279_s1 + $0xe6c] sm:$0xf0]  ;;  %v10057_v59 = vor.u32 %v13028_v53, %v10056_v51  ;;  %s8331_s10 = sshll.u32 %s13718_s9, 4  ;;  %vm8324_vm0 = vcmask 74752   ;;  %s8332_s10 = int_to_ptr.vmem [resolvable:$true] %s8331_s10 }
  0x7a   :  { %v10312_v56 = vld [vmem:[%s20279_s1 + $0xf60] sm:$0xf]  ;;  %v13092_v57 = vld [vmem:[%s20279_s1 + $0xf6c] sm:$0xf0]  ;;  %v10185_v61 = vor.u32 %v13060_v55, %v10184_v54 }
  0x7b   :  { %6416 = vmatpush.bf16.msrb.mxu0 %v9945_v46  ;;  %6429 = vmatpush.bf16.msrb.mxu1 %v10073_v47  ;;  %v9912_v62 = vld [vmem:[%s20279_s1 + $0xc40] sm:$0xf]  ;;  %v12992_v63 = vld [vmem:[%s20279_s1 + $0xc4c] sm:$0xf0]  ;;  %v10313_v4 = vor.u32 %v13092_v57, %v10312_v56  ;;  %v14581_v46 = vld [vmem:[#allocation1 + $0x24] sm:$0xff] }
  0x7c   :  { %6442 = vmatpush.bf16.msrb.mxu2 %v10201_v48  ;;  %v10040_v3 = vld [vmem:[%s20279_s1 + $0xd40] sm:$0xf]  ;;  %6455 = vmatpush.bf16.msrb.mxu3 %v10329_v52  ;;  %v13024_v5 = vld [vmem:[%s20279_s1 + $0xd4c] sm:$0xf0]  ;;  %v9913_v10 = vor.u32 %v12992_v63, %v9912_v62  ;;  %v14583_v47 = vld [vmem:[#allocation1 + $0x36] sm:$0xff] }
  0x7d   :  { %v10168_v6 = vld [vmem:[%s20279_s1 + $0xe40] sm:$0xf]  ;;  %v13056_v7 = vld [vmem:[%s20279_s1 + $0xe4c] sm:$0xf0]  ;;  %v10041_v13 = vor.u32 %v13024_v5, %v10040_v3 }
  0x7e   :  { %v10296_v8 = vld [vmem:[%s20279_s1 + $0xf40] sm:$0xf]  ;;  %v13088_v9 = vld [vmem:[%s20279_s1 + $0xf4c] sm:$0xf0]  ;;  %v10169_v14 = vor.u32 %v13056_v7, %v10168_v6 }
  0x7f   :  { %6417 = vmatpush.bf16.msrb.mxu0 %v9929_v58  ;;  %v9896_v11 = vld [vmem:[%s20279_s1 + $0xc20] sm:$0xf]  ;;  %6430 = vmatpush.bf16.msrb.mxu1 %v10057_v59  ;;  %v12988_v18 = vld [vmem:[%s20279_s1 + $0xc2c] sm:$0xf0]  ;;  %v10297_v21 = vor.u32 %v13088_v9, %v10296_v8 }
  0x80   :  { %6443 = vmatpush.bf16.msrb.mxu2 %v10185_v61  ;;  %v10024_v19 = vld [vmem:[%s20279_s1 + $0xd20] sm:$0xf]  ;;  %v13020_v20 = vld [vmem:[%s20279_s1 + $0xd2c] sm:$0xf0]  ;;  %6456 = vmatpush.bf16.msrb.mxu3 %v10313_v4  ;;  %v9897_v31 = vor.u32 %v12988_v18, %v9896_v11 }
  0x81   :  { %v10152_v22 = vld [vmem:[%s20279_s1 + $0xe20] sm:$0xf]  ;;  %v13052_v23 = vld [vmem:[%s20279_s1 + $0xe2c] sm:$0xf0]  ;;  %v10025_v37 = vor.u32 %v13020_v20, %v10024_v19 }
  0x82   :  { %v10280_v24 = vld [vmem:[%s20279_s1 + $0xf20] sm:$0xf]  ;;  %v13084_v25 = vld [vmem:[%s20279_s1 + $0xf2c] sm:$0xf0]  ;;  %v10153_v38 = vor.u32 %v13052_v23, %v10152_v22 }
  0x83   :  { %v9880_v26 = vld [vmem:[%s20279_s1 + $0xc00] sm:$0xf]  ;;  %v12984_v30 = vld [vmem:[%s20279_s1 + $0xc0c] sm:$0xf0]  ;;  %6418 = vmatpush.bf16.msrb.mxu0 %v9913_v10  ;;  %6431 = vmatpush.bf16.msrb.mxu1 %v10041_v13  ;;  %v10281_v43 = vor.u32 %v13084_v25, %v10280_v24 }
  0x84   :  { %v10008_v32 = vld [vmem:[%s20279_s1 + $0xd00] sm:$0xf]  ;;  %v13016_v33 = vld [vmem:[%s20279_s1 + $0xd0c] sm:$0xf0]  ;;  %6444 = vmatpush.bf16.msrb.mxu2 %v10169_v14  ;;  %6457 = vmatpush.bf16.msrb.mxu3 %v10297_v21  ;;  %v9881_v51 = vor.u32 %v12984_v30, %v9880_v26 }
  0x85   :  { %v10136_v35 = vld [vmem:[%s20279_s1 + $0xe00] sm:$0xf]  ;;  %v13048_v36 = vld [vmem:[%s20279_s1 + $0xe0c] sm:$0xf0]  ;;  %v10009_v54 = vor.u32 %v13016_v33, %v10008_v32 }
  0x86   :  { %v10264_v39 = vld [vmem:[%s20279_s1 + $0xf00] sm:$0xf]  ;;  %v13080_v40 = vld [vmem:[%s20279_s1 + $0xf0c] sm:$0xf0]  ;;  %v10137_v55 = vor.u32 %v13048_v36, %v10136_v35 }
  0x87   :  { %v10504_v41 = vld [vmem:[%s20279_s1 + $0x10e0] sm:$0xf]  ;;  %v13140_v42 = vld [vmem:[%s20279_s1 + $0x10ec] sm:$0xf0]  ;;  %6419 = vmatpush.bf16.msrb.mxu0 %v9897_v31  ;;  %6432 = vmatpush.bf16.msrb.mxu1 %v10025_v37  ;;  %v10265_v58 = vor.u32 %v13080_v40, %v10264_v39 }
  0x88   :  { %v10632_v44 = vld [vmem:[%s20279_s1 + $0x11e0] sm:$0xf]  ;;  %v13172_v45 = vld [vmem:[%s20279_s1 + $0x11ec] sm:$0xf0]  ;;  %6445 = vmatpush.bf16.msrb.mxu2 %v10153_v38  ;;  %6458 = vmatpush.bf16.msrb.mxu3 %v10281_v43  ;;  %v10505_v59 = vor.u32 %v13140_v42, %v10504_v41 }
  0x89   :  { %v14585_v48 = vld [vmem:[#allocation1 + $0x2d] sm:$0xff]  ;;  %v14587_v49 = vld [vmem:[#allocation1 + $0x3f] sm:$0xff]  ;;  %v10633_v61 = vor.u32 %v13172_v45, %v10632_v44 }
  0x8a   :  { %v29_v50 = vld [vmem:[%s20278_s0 + $0x10] sm:$0xff]  ;;  %v10760_v52 = vld [vmem:[%s20279_s1 + $0x12e0] sm:$0xf] }
  0x8b   :  { %v13204_v53 = vld [vmem:[%s20279_s1 + $0x12ec] sm:$0xf0]  ;;  %1086 = vst [vmem:[#allocation1] ss:$9 sm:$0xff] %v29_v50  ;;  %v10888_v56 = vld [vmem:[%s20279_s1 + $0x13e0] sm:$0xf]  ;;  %6420 = vmatpush.bf16.msrb.mxu0 %v9881_v51  ;;  %6433 = vmatpush.bf16.msrb.mxu1 %v10009_v54 }
  0x8c   :  { %v13236_v57 = vld [vmem:[%s20279_s1 + $0x13ec] sm:$0xf0]  ;;  %v10761_v62 = vor.u32 %v13204_v53, %v10760_v52  ;;  %v10488_v63 = vld [vmem:[%s20279_s1 + $0x10c0] sm:$0xf]  ;;  %6446 = vmatpush.bf16.msrb.mxu2 %v10137_v55  ;;  %6459 = vmatpush.bf16.msrb.mxu3 %v10265_v58 }
  0x8d   :  { %v13136_v3 = vld [vmem:[%s20279_s1 + $0x10cc] sm:$0xf0]  ;;  %v10616_v4 = vld [vmem:[%s20279_s1 + $0x11c0] sm:$0xf]  ;;  %v10889_v5 = vor.u32 %v13236_v57, %v10888_v56 }
  0x8e   :  { %v13168_v6 = vld [vmem:[%s20279_s1 + $0x11cc] sm:$0xf0]  ;;  %v10744_v7 = vld [vmem:[%s20279_s1 + $0x12c0] sm:$0xf]  ;;  %v10489_v11 = vor.u32 %v13136_v3, %v10488_v63  ;;  %6421 = vmatmul.bf16.vlgmr.msrb.gmra.mxu0 %v14581_v46  ;;  %6434 = vmatmul.bf16.vlgmr.msrb.gmra.mxu1 %v14585_v48 }
  0x8f   :  { %v13200_v8 = vld [vmem:[%s20279_s1 + $0x12cc] sm:$0xf0]  ;;  %v10872_v9 = vld [vmem:[%s20279_s1 + $0x13c0] sm:$0xf]  ;;  %6465 = vmatpush.bf16.msra.mxu0 %v10505_v59  ;;  %6478 = vmatpush.bf16.msra.mxu1 %v10633_v61  ;;  %v10617_v13 = vor.u32 %v13168_v6, %v10616_v4 }
  0x90   :  { %v13232_v10 = vld [vmem:[%s20279_s1 + $0x13cc] sm:$0xf0]  ;;  %6491 = vmatpush.bf16.msra.mxu2 %v10761_v62  ;;  %v10745_v14 = vor.u32 %v13200_v8, %v10744_v7  ;;  %v10472_v18 = vld [vmem:[%s20279_s1 + $0x10a0] sm:$0xf]  ;;  %6504 = vmatpush.bf16.msra.mxu3 %v10889_v5 }
  0x91   :  { %v13132_v19 = vld [vmem:[%s20279_s1 + $0x10ac] sm:$0xf0]  ;;  %v10600_v20 = vld [vmem:[%s20279_s1 + $0x11a0] sm:$0xf]  ;;  %v10873_v21 = vor.u32 %v13232_v10, %v10872_v9  ;;  %6447 = vmatmul.bf16.vlgmr.msrb.gmra.mxu2 %v14583_v47  ;;  %6460 = vmatmul.bf16.vlgmr.msrb.gmra.mxu3 %v14587_v49 }
  0x92   :  { %v13164_v22 = vld [vmem:[%s20279_s1 + $0x11ac] sm:$0xf0]  ;;  %v10728_v23 = vld [vmem:[%s20279_s1 + $0x12a0] sm:$0xf]  ;;  %v10473_v30 = vor.u32 %v13132_v19, %v10472_v18 }
  0x93   :  { %v13196_v24 = vld [vmem:[%s20279_s1 + $0x12ac] sm:$0xf0]  ;;  %v10856_v25 = vld [vmem:[%s20279_s1 + $0x13a0] sm:$0xf]  ;;  %6466 = vmatpush.bf16.msra.mxu0 %v10489_v11  ;;  %6479 = vmatpush.bf16.msra.mxu1 %v10617_v13  ;;  %v10601_v31 = vor.u32 %v13164_v22, %v10600_v20 }
  0x94   :  { %v13228_v26 = vld [vmem:[%s20279_s1 + $0x13ac] sm:$0xf0]  ;;  %6492 = vmatpush.bf16.msra.mxu2 %v10745_v14  ;;  %v10729_v32 = vor.u32 %v13196_v24, %v10728_v23  ;;  %v10456_v33 = vld [vmem:[%s20279_s1 + $0x1080] sm:$0xf]  ;;  %6505 = vmatpush.bf16.msra.mxu3 %v10873_v21 }
  0x95   :  { %v13128_v35 = vld [vmem:[%s20279_s1 + $0x108c] sm:$0xf0]  ;;  %v10584_v36 = vld [vmem:[%s20279_s1 + $0x1180] sm:$0xf]  ;;  %v10857_v37 = vor.u32 %v13228_v26, %v10856_v25 }
  0x96   :  { %v13160_v38 = vld [vmem:[%s20279_s1 + $0x118c] sm:$0xf0]  ;;  %v10712_v39 = vld [vmem:[%s20279_s1 + $0x1280] sm:$0xf]  ;;  %v10457_v43 = vor.u32 %v13128_v35, %v10456_v33 }
  0x97   :  { %v13192_v40 = vld [vmem:[%s20279_s1 + $0x128c] sm:$0xf0]  ;;  %v10840_v41 = vld [vmem:[%s20279_s1 + $0x1380] sm:$0xf]  ;;  %6467 = vmatpush.bf16.msra.mxu0 %v10473_v30  ;;  %6480 = vmatpush.bf16.msra.mxu1 %v10601_v31  ;;  %v10585_v44 = vor.u32 %v13160_v38, %v10584_v36 }
  0x98   :  { %v13224_v42 = vld [vmem:[%s20279_s1 + $0x138c] sm:$0xf0]  ;;  %6493 = vmatpush.bf16.msra.mxu2 %v10729_v32  ;;  %v10713_v45 = vor.u32 %v13192_v40, %v10712_v39  ;;  %v10440_v50 = vld [vmem:[%s20279_s1 + $0x1060] sm:$0xf]  ;;  %6506 = vmatpush.bf16.msra.mxu3 %v10857_v37 }
  0x99   :  { %v13124_v51 = vld [vmem:[%s20279_s1 + $0x106c] sm:$0xf0]  ;;  %v10568_v52 = vld [vmem:[%s20279_s1 + $0x1160] sm:$0xf]  ;;  %v10841_v53 = vor.u32 %v13224_v42, %v10840_v41 }
  0x9a   :  { %v13156_v54 = vld [vmem:[%s20279_s1 + $0x116c] sm:$0xf0]  ;;  %v10696_v55 = vld [vmem:[%s20279_s1 + $0x1260] sm:$0xf]  ;;  %v10441_v59 = vor.u32 %v13124_v51, %v10440_v50 }
  0x9b   :  { %v13188_v56 = vld [vmem:[%s20279_s1 + $0x126c] sm:$0xf0]  ;;  %v10824_v57 = vld [vmem:[%s20279_s1 + $0x1360] sm:$0xf]  ;;  %6468 = vmatpush.bf16.msra.mxu0 %v10457_v43  ;;  %6481 = vmatpush.bf16.msra.mxu1 %v10585_v44  ;;  %v10569_v61 = vor.u32 %v13156_v54, %v10568_v52 }
  0x9c   :  { %v13220_v58 = vld [vmem:[%s20279_s1 + $0x136c] sm:$0xf0]  ;;  %6494 = vmatpush.bf16.msra.mxu2 %v10713_v45  ;;  %v10697_v62 = vor.u32 %v13188_v56, %v10696_v55  ;;  %v10424_v63 = vld [vmem:[%s20279_s1 + $0x1040] sm:$0xf]  ;;  %6507 = vmatpush.bf16.msra.mxu3 %v10841_v53 }
  0x9d   :  { %v13120_v3 = vld [vmem:[%s20279_s1 + $0x104c] sm:$0xf0]  ;;  %v10552_v4 = vld [vmem:[%s20279_s1 + $0x1140] sm:$0xf]  ;;  %v10825_v5 = vor.u32 %v13220_v58, %v10824_v57 }
  0x9e   :  { %v13152_v6 = vld [vmem:[%s20279_s1 + $0x114c] sm:$0xf0]  ;;  %v10680_v7 = vld [vmem:[%s20279_s1 + $0x1240] sm:$0xf]  ;;  %v10425_v11 = vor.u32 %v13120_v3, %v10424_v63 }
  0x9f   :  { %v13184_v8 = vld [vmem:[%s20279_s1 + $0x124c] sm:$0xf0]  ;;  %v10808_v9 = vld [vmem:[%s20279_s1 + $0x1340] sm:$0xf]  ;;  %6469 = vmatpush.bf16.msra.mxu0 %v10441_v59  ;;  %6482 = vmatpush.bf16.msra.mxu1 %v10569_v61  ;;  %v10553_v13 = vor.u32 %v13152_v6, %v10552_v4 }
  0xa0   :  { %v13216_v10 = vld [vmem:[%s20279_s1 + $0x134c] sm:$0xf0]  ;;  %6495 = vmatpush.bf16.msra.mxu2 %v10697_v62  ;;  %v10681_v14 = vor.u32 %v13184_v8, %v10680_v7  ;;  %v10408_v18 = vld [vmem:[%s20279_s1 + $0x1020] sm:$0xf]  ;;  %6508 = vmatpush.bf16.msra.mxu3 %v10825_v5 }
  0xa1   :  { %v13116_v19 = vld [vmem:[%s20279_s1 + $0x102c] sm:$0xf0]  ;;  %v10536_v20 = vld [vmem:[%s20279_s1 + $0x1120] sm:$0xf]  ;;  %v10809_v21 = vor.u32 %v13216_v10, %v10808_v9 }
  0xa2   :  { %v13148_v22 = vld [vmem:[%s20279_s1 + $0x112c] sm:$0xf0]  ;;  %v10664_v23 = vld [vmem:[%s20279_s1 + $0x1220] sm:$0xf]  ;;  %v10409_v30 = vor.u32 %v13116_v19, %v10408_v18 }
  0xa3   :  { %v13180_v24 = vld [vmem:[%s20279_s1 + $0x122c] sm:$0xf0]  ;;  %v10792_v25 = vld [vmem:[%s20279_s1 + $0x1320] sm:$0xf]  ;;  %6470 = vmatpush.bf16.msra.mxu0 %v10425_v11  ;;  %6483 = vmatpush.bf16.msra.mxu1 %v10553_v13  ;;  %v10537_v33 = vor.u32 %v13148_v22, %v10536_v20 }
  0xa4   :  { %v13212_v26 = vld [vmem:[%s20279_s1 + $0x132c] sm:$0xf0]  ;;  %v10392_v31 = vld [vmem:[%s20279_s1 + $0x1000] sm:$0xf]  ;;  %6496 = vmatpush.bf16.msra.mxu2 %v10681_v14  ;;  %v10665_v35 = vor.u32 %v13180_v24, %v10664_v23  ;;  %6509 = vmatpush.bf16.msra.mxu3 %v10809_v21 }
  0xa5   :  { %v13112_v32 = vld [vmem:[%s20279_s1 + $0x100c] sm:$0xf0]  ;;  %v10520_v36 = vld [vmem:[%s20279_s1 + $0x1100] sm:$0xf]  ;;  %v10793_v39 = vor.u32 %v13212_v26, %v10792_v25 }
  0xa6   :  { %v13144_v37 = vld [vmem:[%s20279_s1 + $0x110c] sm:$0xf0]  ;;  %v10648_v38 = vld [vmem:[%s20279_s1 + $0x1200] sm:$0xf]  ;;  %v10393_v50 = vor.u32 %v13112_v32, %v10392_v31 }
  0xa7   :  { %v13176_v40 = vld [vmem:[%s20279_s1 + $0x120c] sm:$0xf0]  ;;  %v10776_v41 = vld [vmem:[%s20279_s1 + $0x1300] sm:$0xf]  ;;  %6471 = vmatpush.bf16.msra.mxu0 %v10409_v30  ;;  %6484 = vmatpush.bf16.msra.mxu1 %v10537_v33  ;;  %v10521_v54 = vor.u32 %v13144_v37, %v10520_v36 }
  0xa8   :  { %v13208_v42 = vld [vmem:[%s20279_s1 + $0x130c] sm:$0xf0]  ;;  %v11016_v43 = vld [vmem:[%s20279_s1 + $0x14e0] sm:$0xf]  ;;  %6497 = vmatpush.bf16.msra.mxu2 %v10665_v35  ;;  %v10649_v55 = vor.u32 %v13176_v40, %v10648_v38  ;;  %6510 = vmatpush.bf16.msra.mxu3 %v10793_v39 }
  0xa9   :  { %v13268_v44 = vld [vmem:[%s20279_s1 + $0x14ec] sm:$0xf0]  ;;  %v11144_v45 = vld [vmem:[%s20279_s1 + $0x15e0] sm:$0xf]  ;;  %v10777_v58 = vor.u32 %v13208_v42, %v10776_v41 }
  0xaa   :  { %v13300_v51 = vld [vmem:[%s20279_s1 + $0x15ec] sm:$0xf0]  ;;  %v11272_v52 = vld [vmem:[%s20279_s1 + $0x16e0] sm:$0xf]  ;;  %v11017_v59 = vor.u32 %v13268_v44, %v11016_v43 }
  0xab   :  { %v13332_v53 = vld [vmem:[%s20279_s1 + $0x16ec] sm:$0xf0]  ;;  %v11400_v56 = vld [vmem:[%s20279_s1 + $0x17e0] sm:$0xf]  ;;  %v11145_v61 = vor.u32 %v13300_v51, %v11144_v45  ;;  %6472 = vmatpush.bf16.msra.mxu0 %v10393_v50  ;;  %6485 = vmatpush.bf16.msra.mxu1 %v10521_v54 }
  0xac   :  { %v13364_v57 = vld [vmem:[%s20279_s1 + $0x17ec] sm:$0xf0]  ;;  %v11273_v62 = vor.u32 %v13332_v53, %v11272_v52  ;;  %v11000_v63 = vld [vmem:[%s20279_s1 + $0x14c0] sm:$0xf]  ;;  %6498 = vmatpush.bf16.msra.mxu2 %v10649_v55  ;;  %6511 = vmatpush.bf16.msra.mxu3 %v10777_v58 }
  0xad   :  { %v13264_v3 = vld [vmem:[%s20279_s1 + $0x14cc] sm:$0xf0]  ;;  %v11128_v4 = vld [vmem:[%s20279_s1 + $0x15c0] sm:$0xf]  ;;  %v11401_v5 = vor.u32 %v13364_v57, %v11400_v56 }
  0xae   :  { %v13296_v6 = vld [vmem:[%s20279_s1 + $0x15cc] sm:$0xf0]  ;;  %v11256_v7 = vld [vmem:[%s20279_s1 + $0x16c0] sm:$0xf]  ;;  %v11001_v19 = vor.u32 %v13264_v3, %v11000_v63 }
  0xaf   :  { %v13328_v8 = vld [vmem:[%s20279_s1 + $0x16cc] sm:$0xf0]  ;;  %v14818_v9 = vld [vmem:[#allocation1] sm:$0xff]  ;;  %6517 = vmatpush.bf16.msrb.mxu0 %v11017_v59  ;;  %6530 = vmatpush.bf16.msrb.mxu1 %v11145_v61  ;;  %v11129_v20 = vor.u32 %v13296_v6, %v11128_v4 }
  0xb0   :  { %v11384_v10 = vld [vmem:[%s20279_s1 + $0x17c0] sm:$0xf]  ;;  %v13360_v11 = vld [vmem:[%s20279_s1 + $0x17cc] sm:$0xf0]  ;;  %6543 = vmatpush.bf16.msrb.mxu2 %v11273_v62  ;;  %v11257_v21 = vor.u32 %v13328_v8, %v11256_v7  ;;  %6556 = vmatpush.bf16.msrb.mxu3 %v11401_v5 }
  0xb1   :  { %v14826_v13 = vld [vmem:[#allocation1 + $0x12] sm:$0xff]  ;;  %v14828_v14 = vld [vmem:[#allocation1 + $0x9] sm:$0xff]  ;;  %v14830_v18 = vld [vmem:[#allocation1 + $0x1b] sm:$0xff]  ;;  %6473 = vmatmul.bf16.vlgmr.msra.gmra.mxu0 %v14818_v9  ;;  %v11385_v25 = vor.u32 %v13360_v11, %v11384_v10 }
  0xb2   :  { %v10984_v22 = vld [vmem:[%s20279_s1 + $0x14a0] sm:$0xf]  ;;  %v13260_v23 = vld [vmem:[%s20279_s1 + $0x14ac] sm:$0xf0]  ;;  %6499 = vmatmul.bf16.vlgmr.msra.gmra.mxu2 %v14826_v13  ;;  %6486 = vmatmul.bf16.vlgmr.msra.gmra.mxu1 %v14828_v14 }
  0xb3   :  { %v11112_v24 = vld [vmem:[%s20279_s1 + $0x15a0] sm:$0xf]  ;;  %v13292_v26 = vld [vmem:[%s20279_s1 + $0x15ac] sm:$0xf0]  ;;  %6512 = vmatmul.bf16.vlgmr.msra.gmra.mxu3 %v14830_v18  ;;  %6518 = vmatpush.bf16.msrb.mxu0 %v11001_v19  ;;  %v10985_v35 = vor.u32 %v13260_v23, %v10984_v22 }
  0xb4   :  { %v11240_v30 = vld [vmem:[%s20279_s1 + $0x16a0] sm:$0xf]  ;;  %v13324_v31 = vld [vmem:[%s20279_s1 + $0x16ac] sm:$0xf0]  ;;  %6531 = vmatpush.bf16.msrb.mxu1 %v11129_v20  ;;  %6544 = vmatpush.bf16.msrb.mxu2 %v11257_v21  ;;  %v11113_v36 = vor.u32 %v13292_v26, %v11112_v24 }
  0xb5   :  { %v11368_v32 = vld [vmem:[%s20279_s1 + $0x17a0] sm:$0xf]  ;;  %v13356_v33 = vld [vmem:[%s20279_s1 + $0x17ac] sm:$0xf0]  ;;  %v11241_v37 = vor.u32 %v13324_v31, %v11240_v30  ;;  %6557 = vmatpush.bf16.msrb.mxu3 %v11385_v25 }
  0xb6   :  { %v10968_v38 = vld [vmem:[%s20279_s1 + $0x1480] sm:$0xf]  ;;  %v13256_v39 = vld [vmem:[%s20279_s1 + $0x148c] sm:$0xf0]  ;;  %v11369_v41 = vor.u32 %v13356_v33, %v11368_v32 }
  0xb7   :  { %v11096_v40 = vld [vmem:[%s20279_s1 + $0x1580] sm:$0xf]  ;;  %v13288_v42 = vld [vmem:[%s20279_s1 + $0x158c] sm:$0xf0]  ;;  %6519 = vmatpush.bf16.msrb.mxu0 %v10985_v35  ;;  %v10969_v51 = vor.u32 %v13256_v39, %v10968_v38 }
  0xb8   :  { %v11224_v43 = vld [vmem:[%s20279_s1 + $0x1680] sm:$0xf]  ;;  %v13320_v44 = vld [vmem:[%s20279_s1 + $0x168c] sm:$0xf0]  ;;  %6532 = vmatpush.bf16.msrb.mxu1 %v11113_v36  ;;  %6545 = vmatpush.bf16.msrb.mxu2 %v11241_v37  ;;  %v11097_v52 = vor.u32 %v13288_v42, %v11096_v40 }
  0xb9   :  { %v11352_v45 = vld [vmem:[%s20279_s1 + $0x1780] sm:$0xf]  ;;  %v13352_v50 = vld [vmem:[%s20279_s1 + $0x178c] sm:$0xf0]  ;;  %v11225_v53 = vor.u32 %v13320_v44, %v11224_v43  ;;  %6558 = vmatpush.bf16.msrb.mxu3 %v11369_v41 }
  0xba   :  { %v10952_v54 = vld [vmem:[%s20279_s1 + $0x1460] sm:$0xf]  ;;  %v13252_v55 = vld [vmem:[%s20279_s1 + $0x146c] sm:$0xf0]  ;;  %v11353_v57 = vor.u32 %v13352_v50, %v11352_v45 }
  0xbb   :  { %v11080_v56 = vld [vmem:[%s20279_s1 + $0x1560] sm:$0xf]  ;;  %v13284_v58 = vld [vmem:[%s20279_s1 + $0x156c] sm:$0xf0]  ;;  %6520 = vmatpush.bf16.msrb.mxu0 %v10969_v51  ;;  %v10953_v3 = vor.u32 %v13252_v55, %v10952_v54 }
  0xbc   :  { %v11208_v59 = vld [vmem:[%s20279_s1 + $0x1660] sm:$0xf]  ;;  %v13316_v61 = vld [vmem:[%s20279_s1 + $0x166c] sm:$0xf0]  ;;  %6533 = vmatpush.bf16.msrb.mxu1 %v11097_v52  ;;  %6546 = vmatpush.bf16.msrb.mxu2 %v11225_v53  ;;  %v11081_v5 = vor.u32 %v13284_v58, %v11080_v56  ;;  %v6266_v52 = vpop.f32.mrf.mxu0 }
  0xbd   :  { %v11336_v62 = vld [vmem:[%s20279_s1 + $0x1760] sm:$0xf]  ;;  %v13348_v63 = vld [vmem:[%s20279_s1 + $0x176c] sm:$0xf0]  ;;  %v11209_v6 = vor.u32 %v13316_v61, %v11208_v59  ;;  %6559 = vmatpush.bf16.msrb.mxu3 %v11353_v57  ;;  %v6279_v61 = vpop.f32.mrf.mxu1 }
  0xbe   :  { %v10936_v4 = vld [vmem:[%s20279_s1 + $0x1440] sm:$0xf]  ;;  %v13248_v7 = vld [vmem:[%s20279_s1 + $0x144c] sm:$0xf0]  ;;  %v11337_v11 = vor.u32 %v13348_v63, %v11336_v62 }
  0xbf   :  { %v11064_v8 = vld [vmem:[%s20279_s1 + $0x1540] sm:$0xf]  ;;  %v13280_v10 = vld [vmem:[%s20279_s1 + $0x154c] sm:$0xf0]  ;;  %6521 = vmatpush.bf16.msrb.mxu0 %v10953_v3  ;;  %v10937_v24 = vor.u32 %v13248_v7, %v10936_v4  ;;  %v14995_v4 = vld [vmem:[#allocation1 + $0x24] sm:$0xff] }
  0xc0   :  { %v11192_v19 = vld [vmem:[%s20279_s1 + $0x1640] sm:$0xf]  ;;  %v13312_v20 = vld [vmem:[%s20279_s1 + $0x164c] sm:$0xf0]  ;;  %6534 = vmatpush.bf16.msrb.mxu1 %v11081_v5  ;;  %6547 = vmatpush.bf16.msrb.mxu2 %v11209_v6  ;;  %v11065_v30 = vor.u32 %v13280_v10, %v11064_v8  ;;  %v14997_v5 = vld [vmem:[#allocation1 + $0x36] sm:$0xff] }
  0xc1   :  { %v1055_v21 = vld [vmem:[%s20280_s2] sm:$0xf]  ;;  %v13344_v23 = vld [vmem:[%s20279_s1 + $0x174c] sm:$0xf0]  ;;  %v11193_v31 = vor.u32 %v13312_v20, %v11192_v19  ;;  %6560 = vmatpush.bf16.msrb.mxu3 %v11337_v11  ;;  %v30_v10 = vld [vmem:[%s20278_s0 + $0x18] sm:$0xff] }
  0xc2   :  { %v11320_v22 = vld [vmem:[%s20279_s1 + $0x1740] sm:$0xf]  ;;  %v13244_v26 = vld [vmem:[%s20279_s1 + $0x142c] sm:$0xf0]  ;;  %v1057_v35 = vperm.slane %v1055_v21, 0 }
  0xc3   :  { %v10920_v25 = vld [vmem:[%s20279_s1 + $0x1420] sm:$0xf]  ;;  %v13276_v33 = vld [vmem:[%s20279_s1 + $0x152c] sm:$0xf0]  ;;  %v11321_v36 = vor.u32 %v13344_v23, %v11320_v22  ;;  %6522 = vmatpush.bf16.msrb.mxu0 %v10937_v24 }
  0xc4   :  { %v11048_v32 = vld [vmem:[%s20279_s1 + $0x1520] sm:$0xf]  ;;  %v13308_v38 = vld [vmem:[%s20279_s1 + $0x162c] sm:$0xf0]  ;;  %v10921_v43 = vor.u32 %v13244_v26, %v10920_v25  ;;  %6535 = vmatpush.bf16.msrb.mxu1 %v11065_v30  ;;  %6548 = vmatpush.bf16.msrb.mxu2 %v11193_v31  ;;  %v6267_v59 = vadd.f32 %v6266_v52, %v1057_v35  ;;  %v6292_v25 = vpop.f32.mrf.mxu2 }
  0xc5   :  { %v11176_v37 = vld [vmem:[%s20279_s1 + $0x1620] sm:$0xf]  ;;  %v13340_v40 = vld [vmem:[%s20279_s1 + $0x172c] sm:$0xf0]  ;;  %v11049_v53 = vor.u32 %v13276_v33, %v11048_v32  ;;  %6561 = vmatpush.bf16.msrb.mxu3 %v11321_v36  ;;  %v6305_v32 = vpop.f32.mrf.mxu3 }
  0xc6   :  { %v11304_v39 = vld [vmem:[%s20279_s1 + $0x1720] sm:$0xf]  ;;  %v13240_v42 = vld [vmem:[%s20279_s1 + $0x140c] sm:$0xf0]  ;;  %v11177_v54 = vor.u32 %v13308_v38, %v11176_v37  ;;  %v6280_v8 = vadd.f32 %v6279_v61, %v6267_v59 }
  0xc7   :  { %v10904_v41 = vld [vmem:[%s20279_s1 + $0x1400] sm:$0xf]  ;;  %v13272_v45 = vld [vmem:[%s20279_s1 + $0x150c] sm:$0xf0]  ;;  %v11305_v62 = vor.u32 %v13340_v40, %v11304_v39  ;;  %6523 = vmatpush.bf16.msrb.mxu0 %v10921_v43 }
  0xc8   :  { %v11032_v44 = vld [vmem:[%s20279_s1 + $0x1500] sm:$0xf]  ;;  %v13304_v51 = vld [vmem:[%s20279_s1 + $0x160c] sm:$0xf0]  ;;  %v10905_v11 = vor.u32 %v13240_v42, %v10904_v41  ;;  %6536 = vmatpush.bf16.msrb.mxu1 %v11049_v53  ;;  %6549 = vmatpush.bf16.msrb.mxu2 %v11177_v54  ;;  %v6293_v31 = vadd.f32 %v6292_v25, %v6280_v8 }
  0xc9   :  { %v11160_v50 = vld [vmem:[%s20279_s1 + $0x1600] sm:$0xf]  ;;  %v13336_v56 = vld [vmem:[%s20279_s1 + $0x170c] sm:$0xf0]  ;;  %v11033_v21 = vor.u32 %v13272_v45, %v11032_v44  ;;  %6562 = vmatpush.bf16.msrb.mxu3 %v11305_v62  ;;  %v6268_v44 = vpop.f32.mrf.mxu0 }
  0xca   :  { %v11288_v55 = vld [vmem:[%s20279_s1 + $0x1700] sm:$0xf]  ;;  %v13396_v58 = vld [vmem:[%s20279_s1 + $0x18ec] sm:$0xf0]  ;;  %v11161_v22 = vor.u32 %v13304_v51, %v11160_v50  ;;  %v6306_v43 = vadd.f32 %v6305_v32, %v6293_v31  ;;  %v6281_v51 = vpop.f32.mrf.mxu1 }
  0xcb   :  { %v11528_v57 = vld [vmem:[%s20279_s1 + $0x18e0] sm:$0xf]  ;;  %v13428_v3 = vld [vmem:[%s20279_s1 + $0x19ec] sm:$0xf0]  ;;  %v11289_v26 = vor.u32 %v13336_v56, %v11288_v55  ;;  %6524 = vmatpush.bf16.msrb.mxu0 %v10905_v11 }
  0xcc   :  { %v11656_v63 = vld [vmem:[%s20279_s1 + $0x19e0] sm:$0xf]  ;;  %v14999_v6 = vld [vmem:[#allocation1 + $0x2d] sm:$0xff]  ;;  %v11529_v30 = vor.u32 %v13396_v58, %v11528_v57  ;;  %6537 = vmatpush.bf16.msrb.mxu1 %v11033_v21  ;;  %6550 = vmatpush.bf16.msrb.mxu2 %v11161_v22  ;;  %v6294_v8 = vpop.f32.mrf.mxu2 }
  0xcd   :  { %v15001_v7 = vld [vmem:[#allocation1 + $0x3f] sm:$0xff]  ;;  %v13460_v20 = vld [vmem:[%s20279_s1 + $0x1aec] sm:$0xf0]  ;;  %v11657_v33 = vor.u32 %v13428_v3, %v11656_v63  ;;  %6563 = vmatpush.bf16.msrb.mxu3 %v11289_v26  ;;  %v6307_v11 = vpop.f32.mrf.mxu3 }
  0xce   :  { %v11784_v19 = vld [vmem:[%s20279_s1 + $0x1ae0] sm:$0xf]  ;;  %1096 = vst [vmem:[#allocation1] ss:$9 sm:$0xff] %v30_v10  ;;  %v13492_v24 = vld [vmem:[%s20279_s1 + $0x1bec] sm:$0xf0]  ;;  %6525 = vmatmul.bf16.vlgmr.msrb.gmra.mxu0 %v14995_v4 }
  0xcf   :  { %v11912_v23 = vld [vmem:[%s20279_s1 + $0x1be0] sm:$0xf]  ;;  %v11785_v35 = vor.u32 %v13460_v20, %v11784_v19  ;;  %v13392_v37 = vld [vmem:[%s20279_s1 + $0x18cc] sm:$0xf0]  ;;  %6569 = vmatpush.bf16.msra.mxu0 %v11529_v30  ;;  %6551 = vmatmul.bf16.vlgmr.msrb.gmra.mxu2 %v14997_v5 }
  0xd0   :  { %v11512_v36 = vld [vmem:[%s20279_s1 + $0x18c0] sm:$0xf]  ;;  %v11913_v39 = vor.u32 %v13492_v24, %v11912_v23  ;;  %v13424_v40 = vld [vmem:[%s20279_s1 + $0x19cc] sm:$0xf0]  ;;  %6582 = vmatpush.bf16.msra.mxu1 %v11657_v33  ;;  %6564 = vmatmul.bf16.vlgmr.msrb.gmra.mxu3 %v15001_v7 }
  0xd1   :  { %v11640_v38 = vld [vmem:[%s20279_s1 + $0x19c0] sm:$0xf]  ;;  %v13456_v42 = vld [vmem:[%s20279_s1 + $0x1acc] sm:$0xf0]  ;;  %v11513_v52 = vor.u32 %v13392_v37, %v11512_v36  ;;  %6595 = vmatpush.bf16.msra.mxu2 %v11785_v35  ;;  %6538 = vmatmul.bf16.vlgmr.msrb.gmra.mxu1 %v14999_v6  ;;  %v6318_v35 = vpop.f32.mrf.mxu0 }
  0xd2   :  { %v11768_v41 = vld [vmem:[%s20279_s1 + $0x1ac0] sm:$0xf]  ;;  %v13488_v50 = vld [vmem:[%s20279_s1 + $0x1bcc] sm:$0xf0]  ;;  %v11641_v53 = vor.u32 %v13424_v40, %v11640_v38  ;;  %6608 = vmatpush.bf16.msra.mxu3 %v11913_v39 }
  0xd3   :  { %v11896_v45 = vld [vmem:[%s20279_s1 + $0x1bc0] sm:$0xf]  ;;  %v11769_v54 = vor.u32 %v13456_v42, %v11768_v41  ;;  %v13388_v56 = vld [vmem:[%s20279_s1 + $0x18ac] sm:$0xf0]  ;;  %6570 = vmatpush.bf16.msra.mxu0 %v11513_v52  ;;  %v6319_v41 = vadd.f32 %v6318_v35, %v6306_v43  ;;  %v6331_v42 = vpop.f32.mrf.mxu1 }
  0xd4   :  { %v11496_v55 = vld [vmem:[%s20279_s1 + $0x18a0] sm:$0xf]  ;;  %v11897_v58 = vor.u32 %v13488_v50, %v11896_v45  ;;  %v13420_v59 = vld [vmem:[%s20279_s1 + $0x19ac] sm:$0xf0]  ;;  %6583 = vmatpush.bf16.msra.mxu1 %v11641_v53 }
  0xd5   :  { %v11624_v57 = vld [vmem:[%s20279_s1 + $0x19a0] sm:$0xf]  ;;  %v13452_v62 = vld [vmem:[%s20279_s1 + $0x1aac] sm:$0xf0]  ;;  %v11497_v10 = vor.u32 %v13388_v56, %v11496_v55  ;;  %6596 = vmatpush.bf16.msra.mxu2 %v11769_v54  ;;  %v6332_v53 = vadd.f32 %v6331_v42, %v6319_v41  ;;  %v6357_v11 = vpop.f32.mrf.mxu3 }
  0xd6   :  { %v11752_v61 = vld [vmem:[%s20279_s1 + $0x1aa0] sm:$0xf]  ;;  %v13484_v3 = vld [vmem:[%s20279_s1 + $0x1bac] sm:$0xf0]  ;;  %v11625_v19 = vor.u32 %v13420_v59, %v11624_v57  ;;  %6609 = vmatpush.bf16.msra.mxu3 %v11897_v58 }
  0xd7   :  { %v11880_v63 = vld [vmem:[%s20279_s1 + $0x1ba0] sm:$0xf]  ;;  %v11753_v20 = vor.u32 %v13452_v62, %v11752_v61  ;;  %v13384_v22 = vld [vmem:[%s20279_s1 + $0x188c] sm:$0xf0]  ;;  %6571 = vmatpush.bf16.msra.mxu0 %v11497_v10  ;;  %v6344_v61 = vpop.f32.mrf.mxu2 }
  0xd8   :  { %v11480_v21 = vld [vmem:[%s20279_s1 + $0x1880] sm:$0xf]  ;;  %v11881_v24 = vor.u32 %v13484_v3, %v11880_v63  ;;  %v13416_v25 = vld [vmem:[%s20279_s1 + $0x198c] sm:$0xf0]  ;;  %6584 = vmatpush.bf16.msra.mxu1 %v11625_v19  ;;  %v6345_v10 = vadd.f32 %v6344_v61, %v6332_v53 }
  0xd9   :  { %v11608_v23 = vld [vmem:[%s20279_s1 + $0x1980] sm:$0xf]  ;;  %v13448_v30 = vld [vmem:[%s20279_s1 + $0x1a8c] sm:$0xf0]  ;;  %v11481_v33 = vor.u32 %v13384_v22, %v11480_v21  ;;  %6597 = vmatpush.bf16.msra.mxu2 %v11753_v20 }
  0xda   :  { %v11736_v26 = vld [vmem:[%s20279_s1 + $0x1a80] sm:$0xf]  ;;  %v13480_v32 = vld [vmem:[%s20279_s1 + $0x1b8c] sm:$0xf0]  ;;  %v11609_v36 = vor.u32 %v13416_v25, %v11608_v23  ;;  %6610 = vmatpush.bf16.msra.mxu3 %v11881_v24  ;;  %v15142_v22 = vadd.f32 %v6357_v11, %v6345_v10  ;;  %v6320_v23 = vpop.f32.mrf.mxu0 }
  0xdb   :  { %v11864_v31 = vld [vmem:[%s20279_s1 + $0x1b80] sm:$0xf]  ;;  %v11737_v37 = vor.u32 %v13448_v30, %v11736_v26  ;;  %v13380_v39 = vld [vmem:[%s20279_s1 + $0x186c] sm:$0xf0]  ;;  %6572 = vmatpush.bf16.msra.mxu0 %v11481_v33 }
  0xdc   :  { %v11464_v38 = vld [vmem:[%s20279_s1 + $0x1860] sm:$0xf]  ;;  %v11865_v44 = vor.u32 %v13480_v32, %v11864_v31  ;;  %v13412_v45 = vld [vmem:[%s20279_s1 + $0x196c] sm:$0xf0]  ;;  %6585 = vmatpush.bf16.msra.mxu1 %v11609_v36  ;;  %v6333_v32 = vpop.f32.mrf.mxu1 }
  0xdd   :  { %v11592_v40 = vld [vmem:[%s20279_s1 + $0x1960] sm:$0xf]  ;;  %v13444_v51 = vld [vmem:[%s20279_s1 + $0x1a6c] sm:$0xf0]  ;;  %v11465_v54 = vor.u32 %v13380_v39, %v11464_v38  ;;  %6598 = vmatpush.bf16.msra.mxu2 %v11737_v37 }
  0xde   :  { %v11720_v50 = vld [vmem:[%s20279_s1 + $0x1a60] sm:$0xf]  ;;  %v13476_v43 = vld [vmem:[%s20279_s1 + $0x1b6c] sm:$0xf0]  ;;  %v11593_v55 = vor.u32 %v13412_v45, %v11592_v40  ;;  %6611 = vmatpush.bf16.msra.mxu3 %v11865_v44 }
  0xdf   :  { %v11848_v52 = vld [vmem:[%s20279_s1 + $0x1b60] sm:$0xf]  ;;  %v11721_v56 = vor.u32 %v13444_v51, %v11720_v50  ;;  %v13376_v58 = vld [vmem:[%s20279_s1 + $0x184c] sm:$0xf0]  ;;  %6573 = vmatpush.bf16.msra.mxu0 %v11465_v54 }
  0xe0   :  { %v11448_v57 = vld [vmem:[%s20279_s1 + $0x1840] sm:$0xf]  ;;  %v11849_v62 = vor.u32 %v13476_v43, %v11848_v52  ;;  %v13408_v63 = vld [vmem:[%s20279_s1 + $0x194c] sm:$0xf0]  ;;  %6586 = vmatpush.bf16.msra.mxu1 %v11593_v55  ;;  %v6346_v43 = vpop.f32.mrf.mxu2 }
  0xe1   :  { %v11576_v59 = vld [vmem:[%s20279_s1 + $0x1940] sm:$0xf]  ;;  %v13440_v8 = vld [vmem:[%s20279_s1 + $0x1a4c] sm:$0xf0]  ;;  %v11449_v21 = vor.u32 %v13376_v58, %v11448_v57  ;;  %6599 = vmatpush.bf16.msra.mxu2 %v11721_v56  ;;  %v6359_v57 = vpop.f32.mrf.mxu3 }
  0xe2   :  { %v11704_v3 = vld [vmem:[%s20279_s1 + $0x1a40] sm:$0xf]  ;;  %v13472_v20 = vld [vmem:[%s20279_s1 + $0x1b4c] sm:$0xf0]  ;;  %v11577_v24 = vor.u32 %v13408_v63, %v11576_v59  ;;  %6612 = vmatpush.bf16.msra.mxu3 %v11849_v62 }
  0xe3   :  { %v11832_v19 = vld [vmem:[%s20279_s1 + $0x1b40] sm:$0xf]  ;;  %v11705_v25 = vor.u32 %v13440_v8, %v11704_v3  ;;  %v13372_v30 = vld [vmem:[%s20279_s1 + $0x182c] sm:$0xf0]  ;;  %6574 = vmatpush.bf16.msra.mxu0 %v11449_v21 }
  0xe4   :  { %v11432_v26 = vld [vmem:[%s20279_s1 + $0x1820] sm:$0xf]  ;;  %v11833_v33 = vor.u32 %v13472_v20, %v11832_v19  ;;  %v13404_v35 = vld [vmem:[%s20279_s1 + $0x192c] sm:$0xf0]  ;;  %6587 = vmatpush.bf16.msra.mxu1 %v11577_v24 }
  0xe5   :  { %v11560_v31 = vld [vmem:[%s20279_s1 + $0x1920] sm:$0xf]  ;;  %v13436_v37 = vld [vmem:[%s20279_s1 + $0x1a2c] sm:$0xf0]  ;;  %v11433_v40 = vor.u32 %v13372_v30, %v11432_v26  ;;  %6600 = vmatpush.bf16.msra.mxu2 %v11705_v25 }
  0xe6   :  { %v11688_v36 = vld [vmem:[%s20279_s1 + $0x1a20] sm:$0xf]  ;;  %v13468_v39 = vld [vmem:[%s20279_s1 + $0x1b2c] sm:$0xf0]  ;;  %v11561_v44 = vor.u32 %v13404_v35, %v11560_v31  ;;  %6613 = vmatpush.bf16.msra.mxu3 %v11833_v33 }
  0xe7   :  { %v11816_v38 = vld [vmem:[%s20279_s1 + $0x1b20] sm:$0xf]  ;;  %v13368_v42 = vld [vmem:[%s20279_s1 + $0x180c] sm:$0xf0]  ;;  %v11689_v45 = vor.u32 %v13436_v37, %v11688_v36  ;;  %6575 = vmatpush.bf16.msra.mxu0 %v11433_v40 }
  0xe8   :  { %v11416_v41 = vld [vmem:[%s20279_s1 + $0x1800] sm:$0xf]  ;;  %v13400_v51 = vld [vmem:[%s20279_s1 + $0x190c] sm:$0xf0]  ;;  %v11817_v53 = vor.u32 %v13468_v39, %v11816_v38  ;;  %6588 = vmatpush.bf16.msra.mxu1 %v11561_v44 }
  0xe9   :  { %v11544_v50 = vld [vmem:[%s20279_s1 + $0x1900] sm:$0xf]  ;;  %v13432_v54 = vld [vmem:[%s20279_s1 + $0x1a0c] sm:$0xf0]  ;;  %v11417_v62 = vor.u32 %v13368_v42, %v11416_v41  ;;  %6601 = vmatpush.bf16.msra.mxu2 %v11689_v45 }
  0xea   :  { %v11672_v52 = vld [vmem:[%s20279_s1 + $0x1a00] sm:$0xf]  ;;  %v13464_v56 = vld [vmem:[%s20279_s1 + $0x1b0c] sm:$0xf0]  ;;  %v11545_v10 = vor.u32 %v13400_v51, %v11544_v50  ;;  %6614 = vmatpush.bf16.msra.mxu3 %v11817_v53 }
  0xeb   :  { %v11800_v55 = vld [vmem:[%s20279_s1 + $0x1b00] sm:$0xf]  ;;  %v13524_v59 = vld [vmem:[%s20279_s1 + $0x1cec] sm:$0xf0]  ;;  %v11673_v11 = vor.u32 %v13432_v54, %v11672_v52  ;;  %6576 = vmatpush.bf16.msra.mxu0 %v11417_v62 }
  0xec   :  { %v12040_v58 = vld [vmem:[%s20279_s1 + $0x1ce0] sm:$0xf]  ;;  %v13556_v63 = vld [vmem:[%s20279_s1 + $0x1dec] sm:$0xf0]  ;;  %v11801_v21 = vor.u32 %v13464_v56, %v11800_v55  ;;  %6589 = vmatpush.bf16.msra.mxu1 %v11545_v10 }
  0xed   :  { %v12168_v61 = vld [vmem:[%s20279_s1 + $0x1de0] sm:$0xf]  ;;  %v13588_v8 = vld [vmem:[%s20279_s1 + $0x1eec] sm:$0xf0]  ;;  %v12041_v23 = vor.u32 %v13524_v59, %v12040_v58  ;;  %6602 = vmatpush.bf16.msra.mxu2 %v11673_v11 }
  0xee   :  { %v12296_v3 = vld [vmem:[%s20279_s1 + $0x1ee0] sm:$0xf]  ;;  %v13620_v20 = vld [vmem:[%s20279_s1 + $0x1fec] sm:$0xf0]  ;;  %v12169_v24 = vor.u32 %v13556_v63, %v12168_v61  ;;  %6615 = vmatpush.bf16.msra.mxu3 %v11801_v21  ;;  %v6370_v21 = vpop.f32.mrf.mxu0 }
  0xef   :  { %v12424_v19 = vld [vmem:[%s20279_s1 + $0x1fe0] sm:$0xf]  ;;  %v12297_v25 = vor.u32 %v13588_v8, %v12296_v3  ;;  %v13520_v30 = vld [vmem:[%s20279_s1 + $0x1ccc] sm:$0xf0]  ;;  %6621 = vmatpush.bf16.msrb.mxu0 %v12041_v23 }
  0xf0   :  { %v12024_v26 = vld [vmem:[%s20279_s1 + $0x1cc0] sm:$0xf]  ;;  %v12425_v32 = vor.u32 %v13620_v20, %v12424_v19  ;;  %v13552_v33 = vld [vmem:[%s20279_s1 + $0x1dcc] sm:$0xf0]  ;;  %6634 = vmatpush.bf16.msrb.mxu1 %v12169_v24 }
  0xf1   :  { %v12152_v31 = vld [vmem:[%s20279_s1 + $0x1dc0] sm:$0xf]  ;;  %v13584_v36 = vld [vmem:[%s20279_s1 + $0x1ecc] sm:$0xf0]  ;;  %v12025_v44 = vor.u32 %v13520_v30, %v12024_v26  ;;  %6647 = vmatpush.bf16.msrb.mxu2 %v12297_v25  ;;  %v6371_v25 = vadd.f32 %v6370_v21, %v15142_v22  ;;  %v6383_v30 = vpop.f32.mrf.mxu1 }
  0xf2   :  { %v12280_v35 = vld [vmem:[%s20279_s1 + $0x1ec0] sm:$0xf]  ;;  %v13616_v39 = vld [vmem:[%s20279_s1 + $0x1fcc] sm:$0xf0]  ;;  %v12153_v45 = vor.u32 %v13552_v33, %v12152_v31  ;;  %6660 = vmatpush.bf16.msrb.mxu3 %v12425_v32 }
  0xf3   :  { %v1097_v37 = vld [vmem:[#allocation1] sm:$0xff]  ;;  %v1099_v40 = vld [vmem:[#allocation1 + $0x12] sm:$0xff]  ;;  %v1098_v41 = vld [vmem:[#allocation1 + $0x9] sm:$0xff]  ;;  %v12281_v50 = vor.u32 %v13584_v36, %v12280_v35  ;;  %6622 = vmatpush.bf16.msrb.mxu0 %v12025_v44 }
  0xf4   :  { %v12408_v38 = vld [vmem:[%s20279_s1 + $0x1fc0] sm:$0xf]  ;;  %v13516_v52 = vld [vmem:[%s20279_s1 + $0x1cac] sm:$0xf0]  ;;  %6577 = vmatmul.bf16.vlgmr.msra.gmra.mxu0 %v1097_v37  ;;  %6603 = vmatmul.bf16.vlgmr.msra.gmra.mxu2 %v1099_v40  ;;  %v6384_v37 = vadd.f32 %v6383_v30, %v6371_v25 }
  0xf5   :  { %v1100_v42 = vld [vmem:[#allocation1 + $0x1b] sm:$0xff]  ;;  %v12409_v53 = vor.u32 %v13616_v39, %v12408_v38  ;;  %v13548_v54 = vld [vmem:[%s20279_s1 + $0x1dac] sm:$0xf0]  ;;  %6590 = vmatmul.bf16.vlgmr.msra.gmra.mxu1 %v1098_v41  ;;  %6648 = vmatpush.bf16.msrb.mxu2 %v12281_v50 }
  0xf6   :  { %v12008_v51 = vld [vmem:[%s20279_s1 + $0x1ca0] sm:$0xf]  ;;  %v13580_v56 = vld [vmem:[%s20279_s1 + $0x1eac] sm:$0xf0]  ;;  %6616 = vmatmul.bf16.vlgmr.msra.gmra.mxu3 %v1100_v42  ;;  %6635 = vmatpush.bf16.msrb.mxu1 %v12153_v45 }
  0xf7   :  { %v12136_v43 = vld [vmem:[%s20279_s1 + $0x1da0] sm:$0xf]  ;;  %v13612_v58 = vld [vmem:[%s20279_s1 + $0x1fac] sm:$0xf0]  ;;  %v12009_v59 = vor.u32 %v13516_v52, %v12008_v51  ;;  %6661 = vmatpush.bf16.msrb.mxu3 %v12409_v53 }
  0xf8   :  { %v12264_v55 = vld [vmem:[%s20279_s1 + $0x1ea0] sm:$0xf]  ;;  %v12137_v61 = vor.u32 %v13548_v54, %v12136_v43  ;;  %v13512_v3 = vld [vmem:[%s20279_s1 + $0x1c8c] sm:$0xf0]  ;;  %v6396_v54 = vpop.f32.mrf.mxu2 }
  0xf9   :  { %v12392_v57 = vld [vmem:[%s20279_s1 + $0x1fa0] sm:$0xf]  ;;  %v12265_v62 = vor.u32 %v13580_v56, %v12264_v55  ;;  %v13544_v11 = vld [vmem:[%s20279_s1 + $0x1d8c] sm:$0xf0]  ;;  %6623 = vmatpush.bf16.msrb.mxu0 %v12009_v59  ;;  %v6409_v59 = vpop.f32.mrf.mxu3 }
  0xfa   :  { %v11992_v63 = vld [vmem:[%s20279_s1 + $0x1c80] sm:$0xf]  ;;  %v12393_v10 = vor.u32 %v13612_v58, %v12392_v57  ;;  %v13576_v20 = vld [vmem:[%s20279_s1 + $0x1e8c] sm:$0xf0]  ;;  %6636 = vmatpush.bf16.msrb.mxu1 %v12137_v61  ;;  %v6397_v58 = vadd.f32 %v6396_v54, %v6384_v37 }
  0xfb   :  { %v12120_v8 = vld [vmem:[%s20279_s1 + $0x1d80] sm:$0xf]  ;;  %v13608_v24 = vld [vmem:[%s20279_s1 + $0x1f8c] sm:$0xf0]  ;;  %v11993_v26 = vor.u32 %v13512_v3, %v11992_v63  ;;  %6649 = vmatpush.bf16.msrb.mxu2 %v12265_v62  ;;  %v6372_v63 = vpop.f32.mrf.mxu0 }
  0xfc   :  { %v12248_v19 = vld [vmem:[%s20279_s1 + $0x1e80] sm:$0xf]  ;;  %v12121_v31 = vor.u32 %v13544_v11, %v12120_v8  ;;  %v13508_v35 = vld [vmem:[%s20279_s1 + $0x1c6c] sm:$0xf0]  ;;  %6662 = vmatpush.bf16.msrb.mxu3 %v12393_v10  ;;  %v6385_v8 = vpop.f32.mrf.mxu1  ;;  %v15337_v10 = vadd.f32 %v6409_v59, %v6397_v58 }
  0xfd   :  { %v12376_v23 = vld [vmem:[%s20279_s1 + $0x1f80] sm:$0xf]  ;;  %v12249_v32 = vor.u32 %v13576_v20, %v12248_v19  ;;  %v13540_v38 = vld [vmem:[%s20279_s1 + $0x1d6c] sm:$0xf0]  ;;  %6624 = vmatpush.bf16.msrb.mxu0 %v11993_v26 }
  0xfe   :  { %v11976_v33 = vld [vmem:[%s20279_s1 + $0x1c60] sm:$0xf]  ;;  %v12377_v22 = vor.u32 %v13608_v24, %v12376_v23  ;;  %v13572_v40 = vld [vmem:[%s20279_s1 + $0x1e6c] sm:$0xf0]  ;;  %6637 = vmatpush.bf16.msrb.mxu1 %v12121_v31 }
  0xff   :  { %v12104_v36 = vld [vmem:[%s20279_s1 + $0x1d60] sm:$0xf]  ;;  %v13604_v42 = vld [vmem:[%s20279_s1 + $0x1f6c] sm:$0xf0]  ;;  %v11977_v44 = vor.u32 %v13508_v35, %v11976_v33  ;;  %6650 = vmatpush.bf16.msrb.mxu2 %v12249_v32 }
 0x100   :  { %v12232_v39 = vld [vmem:[%s20279_s1 + $0x1e60] sm:$0xf]  ;;  %v12105_v45 = vor.u32 %v13540_v38, %v12104_v36  ;;  %v13504_v52 = vld [vmem:[%s20279_s1 + $0x1c4c] sm:$0xf0]  ;;  %6663 = vmatpush.bf16.msrb.mxu3 %v12377_v22 }
 0x101   :  { %v12360_v41 = vld [vmem:[%s20279_s1 + $0x1f60] sm:$0xf]  ;;  %v12233_v50 = vor.u32 %v13572_v40, %v12232_v39  ;;  %v13536_v55 = vld [vmem:[%s20279_s1 + $0x1d4c] sm:$0xf0]  ;;  %6625 = vmatpush.bf16.msrb.mxu0 %v11977_v44 }
 0x102   :  { %v11960_v51 = vld [vmem:[%s20279_s1 + $0x1c40] sm:$0xf]  ;;  %v12361_v53 = vor.u32 %v13604_v42, %v12360_v41  ;;  %v13568_v57 = vld [vmem:[%s20279_s1 + $0x1e4c] sm:$0xf0]  ;;  %6638 = vmatpush.bf16.msrb.mxu1 %v12105_v45 }
 0x103   :  { %v12088_v43 = vld [vmem:[%s20279_s1 + $0x1d40] sm:$0xf]  ;;  %v13600_v62 = vld [vmem:[%s20279_s1 + $0x1f4c] sm:$0xf0]  ;;  %v11961_v3 = vor.u32 %v13504_v52, %v11960_v51  ;;  %6651 = vmatpush.bf16.msrb.mxu2 %v12233_v50  ;;  %v6398_v50 = vpop.f32.mrf.mxu2  ;;  %v12626_v51 = vld [vmem:[%s20279_s1 + $0xe4] sm:$0xf] }
 0x104   :  { %v12216_v56 = vld [vmem:[%s20279_s1 + $0x1e40] sm:$0xf]  ;;  %v12089_v11 = vor.u32 %v13536_v55, %v12088_v43  ;;  %v13500_v21 = vld [vmem:[%s20279_s1 + $0x1c2c] sm:$0xf0]  ;;  %6664 = vmatpush.bf16.msrb.mxu3 %v12361_v53  ;;  %v8458_v52 = vld [vmem:[%s20279_s1 + $0xf0] sm:$0xf0]  ;;  %v6411_v53 = vpop.f32.mrf.mxu3 }
 0x105   :  { %v12344_v61 = vld [vmem:[%s20279_s1 + $0x1f40] sm:$0xf]  ;;  %v12217_v19 = vor.u32 %v13568_v57, %v12216_v56  ;;  %v13532_v25 = vld [vmem:[%s20279_s1 + $0x1d2c] sm:$0xf0]  ;;  %6626 = vmatpush.bf16.msrb.mxu0 %v11961_v3  ;;  %v12658_v43 = vld [vmem:[%s20279_s1 + $0x1e4] sm:$0xf]  ;;  %v8461_v3 = vor.u32 %v12626_v51, %v8458_v52 }
 0x106   :  { %v11944_v20 = vld [vmem:[%s20279_s1 + $0x1c20] sm:$0xf]  ;;  %v12345_v24 = vor.u32 %v13600_v62, %v12344_v61  ;;  %v13564_v30 = vld [vmem:[%s20279_s1 + $0x1e2c] sm:$0xf0]  ;;  %6639 = vmatpush.bf16.msrb.mxu1 %v12089_v11  ;;  %v8586_v55 = vld [vmem:[%s20279_s1 + $0x1f0] sm:$0xf0] }
 0x107   :  { %v12072_v23 = vld [vmem:[%s20279_s1 + $0x1d20] sm:$0xf]  ;;  %v13596_v32 = vld [vmem:[%s20279_s1 + $0x1f2c] sm:$0xf0]  ;;  %v11945_v33 = vor.u32 %v13500_v21, %v11944_v20  ;;  %6652 = vmatpush.bf16.msrb.mxu2 %v12217_v19  ;;  %v12690_v56 = vld [vmem:[%s20279_s1 + $0x2e4] sm:$0xf]  ;;  %v8589_v8 = vor.u32 %v12658_v43, %v8586_v55 }
 0x108   :  { %v12200_v26 = vld [vmem:[%s20279_s1 + $0x1e20] sm:$0xf]  ;;  %v13496_v36 = vld [vmem:[%s20279_s1 + $0x1c0c] sm:$0xf0]  ;;  %v12073_v22 = vor.u32 %v13532_v25, %v12072_v23  ;;  %6665 = vmatpush.bf16.msrb.mxu3 %v12345_v24  ;;  %v8714_v57 = vld [vmem:[%s20279_s1 + $0x2f0] sm:$0xf0] }
 0x109   :  { %v12328_v31 = vld [vmem:[%s20279_s1 + $0x1f20] sm:$0xf]  ;;  %v12201_v37 = vor.u32 %v13564_v30, %v12200_v26  ;;  %v13528_v39 = vld [vmem:[%s20279_s1 + $0x1d0c] sm:$0xf0]  ;;  %6627 = vmatpush.bf16.msrb.mxu0 %v11945_v33  ;;  %v12722_v61 = vld [vmem:[%s20279_s1 + $0x3e4] sm:$0xf]  ;;  %v8717_v11 = vor.u32 %v12690_v56, %v8714_v57 }
 0x10a   :  { %v11928_v35 = vld [vmem:[%s20279_s1 + $0x1c00] sm:$0xf]  ;;  %v12329_v41 = vor.u32 %v13596_v32, %v12328_v31  ;;  %v13560_v42 = vld [vmem:[%s20279_s1 + $0x1e0c] sm:$0xf0]  ;;  %6640 = vmatpush.bf16.msrb.mxu1 %v12073_v22  ;;  %v8842_v62 = vld [vmem:[%s20279_s1 + $0x3f0] sm:$0xf0] }
 0x10b   :  { %v12056_v38 = vld [vmem:[%s20279_s1 + $0x1d00] sm:$0xf]  ;;  %v13592_v45 = vld [vmem:[%s20279_s1 + $0x1f0c] sm:$0xf0]  ;;  %v11929_v54 = vor.u32 %v13496_v36, %v11928_v35  ;;  %6653 = vmatpush.bf16.msrb.mxu2 %v12201_v37  ;;  %v12622_v19 = vld [vmem:[%s20279_s1 + $0xc4] sm:$0xf]  ;;  %v8845_v23 = vor.u32 %v12722_v61, %v8842_v62 }
 0x10c   :  { %v12184_v40 = vld [vmem:[%s20279_s1 + $0x1e00] sm:$0xf]  ;;  %v12057_v58 = vor.u32 %v13528_v39, %v12056_v38  ;;  %6666 = vmatpush.bf16.msrb.mxu3 %v12329_v41  ;;  %v8442_v20 = vld [vmem:[%s20279_s1 + $0xd0] sm:$0xf0]  ;;  %v12654_v21 = vld [vmem:[%s20279_s1 + $0x1c4] sm:$0xf] }
 0x10d   :  { %v12312_v44 = vld [vmem:[%s20279_s1 + $0x1f00] sm:$0xf]  ;;  %v12185_v59 = vor.u32 %v13560_v42, %v12184_v40  ;;  %6628 = vmatpush.bf16.msrb.mxu0 %v11929_v54  ;;  %v8570_v24 = vld [vmem:[%s20279_s1 + $0x1d0] sm:$0xf0]  ;;  %v12686_v25 = vld [vmem:[%s20279_s1 + $0x2c4] sm:$0xf]  ;;  %v8445_v22 = vor.u32 %v12622_v19, %v8442_v20  ;;  %v6435_v20 = vpop.f32.mrf.mxu1 }
 0x10e   :  { %v12313_v63 = vor.u32 %v13592_v45, %v12312_v44  ;;  %v8698_v26 = vld [vmem:[%s20279_s1 + $0x2d0] sm:$0xf0]  ;;  %6641 = vmatpush.bf16.msrb.mxu1 %v12057_v58  ;;  %v1101_v30 = vld [vmem:[#allocation1 + $0x24] sm:$0xff]  ;;  %v8573_v37 = vor.u32 %v12654_v21, %v8570_v24 }
 0x10f   :  { %6654 = vmatpush.bf16.msrb.mxu2 %v12185_v59  ;;  %v12718_v31 = vld [vmem:[%s20279_s1 + $0x3c4] sm:$0xf]  ;;  %v8826_v32 = vld [vmem:[%s20279_s1 + $0x3d0] sm:$0xf0]  ;;  %v8701_v38 = vor.u32 %v12686_v25, %v8698_v26 }
 0x110   :  { %6667 = vmatpush.bf16.msrb.mxu3 %v12313_v63  ;;  %v1103_v33 = vld [vmem:[#allocation1 + $0x36] sm:$0xff]  ;;  %v1102_v35 = vld [vmem:[#allocation1 + $0x2d] sm:$0xff]  ;;  %v1104_v36 = vld [vmem:[#allocation1 + $0x3f] sm:$0xff]  ;;  %6629 = vmatmul.bf16.vlgmr.msrb.gmra.mxu0 %v1101_v30  ;;  %v8829_v42 = vor.u32 %v12718_v31, %v8826_v32  ;;  %v6422_v63 = vpop.f32.mrf.mxu0 }
 0x111   :  { %6673 = vmatpush.bf16.msra.mxu0 %v8461_v3  ;;  %v12618_v39 = vld [vmem:[%s20279_s1 + $0xa4] sm:$0xf]  ;;  %v8426_v40 = vld [vmem:[%s20279_s1 + $0xb0] sm:$0xf0]  ;;  %6642 = vmatmul.bf16.vlgmr.msrb.gmra.mxu1 %v1102_v35 }
 0x112   :  { %6686 = vmatpush.bf16.msra.mxu1 %v8589_v8  ;;  %v12650_v41 = vld [vmem:[%s20279_s1 + $0x1a4] sm:$0xf]  ;;  %v8554_v44 = vld [vmem:[%s20279_s1 + $0x1b0] sm:$0xf0]  ;;  %6655 = vmatmul.bf16.vlgmr.msrb.gmra.mxu2 %v1103_v33  ;;  %v8429_v43 = vor.u32 %v12618_v39, %v8426_v40 }
 0x113   :  { %6699 = vmatpush.bf16.msra.mxu2 %v8717_v11  ;;  %v12682_v45 = vld [vmem:[%s20279_s1 + $0x2a4] sm:$0xf]  ;;  %v8682_v50 = vld [vmem:[%s20279_s1 + $0x2b0] sm:$0xf0]  ;;  %6668 = vmatmul.bf16.vlgmr.msrb.gmra.mxu3 %v1104_v36  ;;  %v8557_v53 = vor.u32 %v12650_v41, %v8554_v44  ;;  %v6423_v11 = vadd.f32 %v6422_v63, %v15337_v10 }
 0x114   :  { %6712 = vmatpush.bf16.msra.mxu3 %v8845_v23  ;;  %v12714_v51 = vld [vmem:[%s20279_s1 + $0x3a4] sm:$0xf]  ;;  %v8810_v52 = vld [vmem:[%s20279_s1 + $0x3b0] sm:$0xf0]  ;;  %v8685_v54 = vor.u32 %v12682_v45, %v8682_v50  ;;  %v6448_v44 = vpop.f32.mrf.mxu2 }
 0x115   :  { %6674 = vmatpush.bf16.msra.mxu0 %v8445_v22  ;;  %v12614_v55 = vld [vmem:[%s20279_s1 + $0x84] sm:$0xf]  ;;  %v8410_v56 = vld [vmem:[%s20279_s1 + $0x90] sm:$0xf0]  ;;  %v8813_v58 = vor.u32 %v12714_v51, %v8810_v52  ;;  %v6436_v30 = vadd.f32 %v6435_v20, %v6423_v11 }
 0x116   :  { %6687 = vmatpush.bf16.msra.mxu1 %v8573_v37  ;;  %v12646_v57 = vld [vmem:[%s20279_s1 + $0x184] sm:$0xf]  ;;  %v8538_v59 = vld [vmem:[%s20279_s1 + $0x190] sm:$0xf0]  ;;  %v8413_v19 = vor.u32 %v12614_v55, %v8410_v56 }
 0x117   :  { %6700 = vmatpush.bf16.msra.mxu2 %v8701_v38  ;;  %v12678_v61 = vld [vmem:[%s20279_s1 + $0x284] sm:$0xf]  ;;  %v8666_v62 = vld [vmem:[%s20279_s1 + $0x290] sm:$0xf0]  ;;  %v8541_v21 = vor.u32 %v12646_v57, %v8538_v59  ;;  %v6449_v52 = vadd.f32 %v6448_v44, %v6436_v30  ;;  %v6437_v57 = vpop.f32.mrf.mxu1 }
 0x118   :  { %6713 = vmatpush.bf16.msra.mxu3 %v8829_v42  ;;  %v12710_v3 = vld [vmem:[%s20279_s1 + $0x384] sm:$0xf]  ;;  %v8794_v8 = vld [vmem:[%s20279_s1 + $0x390] sm:$0xf0]  ;;  %v8669_v23 = vor.u32 %v12678_v61, %v8666_v62  ;;  %v6424_v55 = vpop.f32.mrf.mxu0 }
 0x119   :  { %6675 = vmatpush.bf16.msra.mxu0 %v8429_v43  ;;  %v12610_v24 = vld [vmem:[%s20279_s1 + $0x64] sm:$0xf]  ;;  %v8394_v25 = vld [vmem:[%s20279_s1 + $0x70] sm:$0xf0]  ;;  %v8797_v10 = vor.u32 %v12710_v3, %v8794_v8  ;;  %v6461_v43 = vpop.f32.mrf.mxu3 }
 0x11a   :  { %6688 = vmatpush.bf16.msra.mxu1 %v8557_v53  ;;  %v12642_v26 = vld [vmem:[%s20279_s1 + $0x164] sm:$0xf]  ;;  %v8522_v31 = vld [vmem:[%s20279_s1 + $0x170] sm:$0xf0]  ;;  %v8397_v22 = vor.u32 %v12610_v24, %v8394_v25 }
 0x11b   :  { %6701 = vmatpush.bf16.msra.mxu2 %v8685_v54  ;;  %v12674_v32 = vld [vmem:[%s20279_s1 + $0x264] sm:$0xf]  ;;  %v8650_v33 = vld [vmem:[%s20279_s1 + $0x270] sm:$0xf0]  ;;  %v8525_v37 = vor.u32 %v12642_v26, %v8522_v31 }
 0x11c   :  { %6714 = vmatpush.bf16.msra.mxu3 %v8813_v58  ;;  %v12706_v35 = vld [vmem:[%s20279_s1 + $0x364] sm:$0xf]  ;;  %v8778_v36 = vld [vmem:[%s20279_s1 + $0x370] sm:$0xf0]  ;;  %v8653_v38 = vor.u32 %v12674_v32, %v8650_v33  ;;  %v15532_v58 = vadd.f32 %v6461_v43, %v6449_v52 }
 0x11d   :  { %6676 = vmatpush.bf16.msra.mxu0 %v8413_v19  ;;  %v12606_v39 = vld [vmem:[%s20279_s1 + $0x44] sm:$0xf]  ;;  %v8378_v40 = vld [vmem:[%s20279_s1 + $0x50] sm:$0xf0]  ;;  %v8781_v42 = vor.u32 %v12706_v35, %v8778_v36 }
 0x11e   :  { %6689 = vmatpush.bf16.msra.mxu1 %v8541_v21  ;;  %v12638_v41 = vld [vmem:[%s20279_s1 + $0x144] sm:$0xf]  ;;  %v8506_v45 = vld [vmem:[%s20279_s1 + $0x150] sm:$0xf0]  ;;  %v8381_v56 = vor.u32 %v12606_v39, %v8378_v40 }
 0x11f   :  { %6702 = vmatpush.bf16.msra.mxu2 %v8669_v23  ;;  %v12670_v50 = vld [vmem:[%s20279_s1 + $0x244] sm:$0xf]  ;;  %v8634_v51 = vld [vmem:[%s20279_s1 + $0x250] sm:$0xf0]  ;;  %v8509_v59 = vor.u32 %v12638_v41, %v8506_v45 }
 0x120   :  { %6715 = vmatpush.bf16.msra.mxu3 %v8797_v10  ;;  %v12702_v53 = vld [vmem:[%s20279_s1 + $0x344] sm:$0xf]  ;;  %v8762_v54 = vld [vmem:[%s20279_s1 + $0x350] sm:$0xf0]  ;;  %v8637_v61 = vor.u32 %v12670_v50, %v8634_v51 }
 0x121   :  { %6677 = vmatpush.bf16.msra.mxu0 %v8397_v22  ;;  %v12602_v62 = vld [vmem:[%s20279_s1 + $0x24] sm:$0xf]  ;;  %v8362_v63 = vld [vmem:[%s20279_s1 + $0x30] sm:$0xf0]  ;;  %v8765_v8 = vor.u32 %v12702_v53, %v8762_v54 }
 0x122   :  { %6690 = vmatpush.bf16.msra.mxu1 %v8525_v37  ;;  %v12634_v3 = vld [vmem:[%s20279_s1 + $0x124] sm:$0xf]  ;;  %v8490_v11 = vld [vmem:[%s20279_s1 + $0x130] sm:$0xf0]  ;;  %v8365_v24 = vor.u32 %v12602_v62, %v8362_v63 }
 0x123   :  { %6703 = vmatpush.bf16.msra.mxu2 %v8653_v38  ;;  %v12666_v19 = vld [vmem:[%s20279_s1 + $0x224] sm:$0xf]  ;;  %v8618_v20 = vld [vmem:[%s20279_s1 + $0x230] sm:$0xf0]  ;;  %v8493_v10 = vor.u32 %v12634_v3, %v8490_v11  ;;  %v6450_v38 = vpop.f32.mrf.mxu2 }
 0x124   :  { %6716 = vmatpush.bf16.msra.mxu3 %v8781_v42  ;;  %v12698_v21 = vld [vmem:[%s20279_s1 + $0x324] sm:$0xf]  ;;  %v8746_v23 = vld [vmem:[%s20279_s1 + $0x330] sm:$0xf0]  ;;  %v8621_v30 = vor.u32 %v12666_v19, %v8618_v20  ;;  %v6463_v42 = vpop.f32.mrf.mxu3 }
 0x125   :  { %6678 = vmatpush.bf16.msra.mxu0 %v8381_v56  ;;  %v12598_v25 = vld [vmem:[%s20279_s1 + $0x4] sm:$0xf]  ;;  %v8346_v26 = vld [vmem:[%s20279_s1 + $0x10] sm:$0xf0]  ;;  %v8749_v35 = vor.u32 %v12698_v21, %v8746_v23 }
 0x126   :  { %6691 = vmatpush.bf16.msra.mxu1 %v8509_v59  ;;  %v12630_v31 = vld [vmem:[%s20279_s1 + $0x104] sm:$0xf]  ;;  %v8474_v32 = vld [vmem:[%s20279_s1 + $0x110] sm:$0xf0]  ;;  %v8349_v44 = vor.u32 %v12598_v25, %v8346_v26 }
 0x127   :  { %6704 = vmatpush.bf16.msra.mxu2 %v8637_v61  ;;  %v12662_v33 = vld [vmem:[%s20279_s1 + $0x204] sm:$0xf]  ;;  %v8602_v36 = vld [vmem:[%s20279_s1 + $0x210] sm:$0xf0]  ;;  %v8477_v52 = vor.u32 %v12630_v31, %v8474_v32 }
 0x128   :  { %6717 = vmatpush.bf16.msra.mxu3 %v8765_v8  ;;  %v12694_v22 = vld [vmem:[%s20279_s1 + $0x304] sm:$0xf]  ;;  %v8730_v37 = vld [vmem:[%s20279_s1 + $0x310] sm:$0xf0]  ;;  %v8605_v43 = vor.u32 %v12662_v33, %v8602_v36 }
 0x129   :  { %v12754_v39 = vld [vmem:[%s20279_s1 + $0x4e4] sm:$0xf]  ;;  %v8970_v40 = vld [vmem:[%s20279_s1 + $0x4f0] sm:$0xf0]  ;;  %6679 = vmatpush.bf16.msra.mxu0 %v8365_v24  ;;  %v8733_v55 = vor.u32 %v12694_v22, %v8730_v37 }
 0x12a   :  { %v12786_v41 = vld [vmem:[%s20279_s1 + $0x5e4] sm:$0xf]  ;;  %v9098_v45 = vld [vmem:[%s20279_s1 + $0x5f0] sm:$0xf0]  ;;  %6692 = vmatpush.bf16.msra.mxu1 %v8493_v10  ;;  %v8973_v56 = vor.u32 %v12754_v39, %v8970_v40 }
 0x12b   :  { %v12818_v50 = vld [vmem:[%s20279_s1 + $0x6e4] sm:$0xf]  ;;  %v9226_v51 = vld [vmem:[%s20279_s1 + $0x6f0] sm:$0xf0]  ;;  %6705 = vmatpush.bf16.msra.mxu2 %v8621_v30  ;;  %v9101_v57 = vor.u32 %v12786_v41, %v9098_v45 }
 0x12c   :  { %v12850_v53 = vld [vmem:[%s20279_s1 + $0x7e4] sm:$0xf]  ;;  %v9354_v54 = vld [vmem:[%s20279_s1 + $0x7f0] sm:$0xf0]  ;;  %6718 = vmatpush.bf16.msra.mxu3 %v8749_v35  ;;  %v9229_v59 = vor.u32 %v12818_v50, %v9226_v51 }
 0x12d   :  { %v12750_v61 = vld [vmem:[%s20279_s1 + $0x4c4] sm:$0xf]  ;;  %v8954_v62 = vld [vmem:[%s20279_s1 + $0x4d0] sm:$0xf0]  ;;  %6680 = vmatpush.bf16.msra.mxu0 %v8349_v44  ;;  %v9357_v3 = vor.u32 %v12850_v53, %v9354_v54 }
 0x12e   :  { %v12782_v63 = vld [vmem:[%s20279_s1 + $0x5c4] sm:$0xf]  ;;  %v9082_v8 = vld [vmem:[%s20279_s1 + $0x5d0] sm:$0xf0]  ;;  %6693 = vmatpush.bf16.msra.mxu1 %v8477_v52  ;;  %v8957_v23 = vor.u32 %v12750_v61, %v8954_v62  ;;  %v6474_v52 = vpop.f32.mrf.mxu0 }
 0x12f   :  { %v12814_v11 = vld [vmem:[%s20279_s1 + $0x6c4] sm:$0xf]  ;;  %v9210_v19 = vld [vmem:[%s20279_s1 + $0x6d0] sm:$0xf0]  ;;  %6706 = vmatpush.bf16.msra.mxu2 %v8605_v43  ;;  %v9085_v24 = vor.u32 %v12782_v63, %v9082_v8  ;;  %v6475_v54 = vadd.f32 %v6474_v52, %v15532_v58 }
 0x130   :  { %v12846_v20 = vld [vmem:[%s20279_s1 + $0x7c4] sm:$0xf]  ;;  %v9338_v21 = vld [vmem:[%s20279_s1 + $0x7d0] sm:$0xf0]  ;;  %6719 = vmatpush.bf16.msra.mxu3 %v8733_v55  ;;  %v9213_v25 = vor.u32 %v12814_v11, %v9210_v19  ;;  %6681 = vmatmul.bf16.vlgmr.msra.gmra.mxu0 %v14079_v28 }
 0x131   :  { %6725 = vmatpush.bf16.msrb.mxu0 %v8973_v56  ;;  %v12746_v26 = vld [vmem:[%s20279_s1 + $0x4a4] sm:$0xf]  ;;  %v8938_v10 = vld [vmem:[%s20279_s1 + $0x4b0] sm:$0xf0]  ;;  %v9341_v31 = vor.u32 %v12846_v20, %v9338_v21  ;;  %6694 = vmatmul.bf16.vlgmr.msra.gmra.mxu1 %v14089_v34  ;;  %v6487_v56 = vpop.f32.mrf.mxu1 }
 0x132   :  { %6738 = vmatpush.bf16.msrb.mxu1 %v9101_v57  ;;  %v12778_v30 = vld [vmem:[%s20279_s1 + $0x5a4] sm:$0xf]  ;;  %v9066_v32 = vld [vmem:[%s20279_s1 + $0x5b0] sm:$0xf0]  ;;  %6707 = vmatmul.bf16.vlgmr.msra.gmra.mxu2 %v14077_v27  ;;  %v8941_v37 = vor.u32 %v12746_v26, %v8938_v10 }
 0x133   :  { %6751 = vmatpush.bf16.msrb.mxu2 %v9229_v59  ;;  %v12810_v33 = vld [vmem:[%s20279_s1 + $0x6a4] sm:$0xf]  ;;  %v9194_v35 = vld [vmem:[%s20279_s1 + $0x6b0] sm:$0xf0]  ;;  %6720 = vmatmul.bf16.vlgmr.msra.gmra.mxu3 %v14081_v29  ;;  %v9069_v38 = vor.u32 %v12778_v30, %v9066_v32 }
 0x134   :  { %6764 = vmatpush.bf16.msrb.mxu3 %v9357_v3  ;;  %v12842_v36 = vld [vmem:[%s20279_s1 + $0x7a4] sm:$0xf]  ;;  %v9322_v22 = vld [vmem:[%s20279_s1 + $0x7b0] sm:$0xf0]  ;;  %v9197_v39 = vor.u32 %v12810_v33, %v9194_v35  ;;  %v6488_v3 = vadd.f32 %v6487_v56, %v6475_v54 }
 0x135   :  { %6726 = vmatpush.bf16.msrb.mxu0 %v8957_v23  ;;  %v12742_v40 = vld [vmem:[%s20279_s1 + $0x484] sm:$0xf]  ;;  %v8922_v41 = vld [vmem:[%s20279_s1 + $0x490] sm:$0xf0]  ;;  %v9325_v44 = vor.u32 %v12842_v36, %v9322_v22  ;;  %v6500_v32 = vpop.f32.mrf.mxu2 }
 0x136   :  { %6739 = vmatpush.bf16.msrb.mxu1 %v9085_v24  ;;  %v12774_v42 = vld [vmem:[%s20279_s1 + $0x584] sm:$0xf]  ;;  %v9050_v45 = vld [vmem:[%s20279_s1 + $0x590] sm:$0xf0]  ;;  %v8925_v55 = vor.u32 %v12742_v40, %v8922_v41  ;;  %v6501_v22 = vadd.f32 %v6500_v32, %v6488_v3  ;;  %v6476_v40 = vpop.f32.mrf.mxu0 }
 0x137   :  { %6752 = vmatpush.bf16.msrb.mxu2 %v9213_v25  ;;  %v12806_v50 = vld [vmem:[%s20279_s1 + $0x684] sm:$0xf]  ;;  %v9178_v51 = vld [vmem:[%s20279_s1 + $0x690] sm:$0xf0]  ;;  %v9053_v57 = vor.u32 %v12774_v42, %v9050_v45 }
 0x138   :  { %6765 = vmatpush.bf16.msrb.mxu3 %v9341_v31  ;;  %v12838_v43 = vld [vmem:[%s20279_s1 + $0x784] sm:$0xf]  ;;  %v9306_v53 = vld [vmem:[%s20279_s1 + $0x790] sm:$0xf0]  ;;  %v9181_v59 = vor.u32 %v12806_v50, %v9178_v51 }
 0x139   :  { %6727 = vmatpush.bf16.msrb.mxu0 %v8941_v37  ;;  %v12738_v61 = vld [vmem:[%s20279_s1 + $0x464] sm:$0xf]  ;;  %v8906_v62 = vld [vmem:[%s20279_s1 + $0x470] sm:$0xf0]  ;;  %v9309_v58 = vor.u32 %v12838_v43, %v9306_v53  ;;  %v6513_v37 = vpop.f32.mrf.mxu3  ;;  %v6489_v42 = vpop.f32.mrf.mxu1 }
 0x13a   :  { %6740 = vmatpush.bf16.msrb.mxu1 %v9069_v38  ;;  %v12770_v63 = vld [vmem:[%s20279_s1 + $0x564] sm:$0xf]  ;;  %v9034_v8 = vld [vmem:[%s20279_s1 + $0x570] sm:$0xf0]  ;;  %v8909_v23 = vor.u32 %v12738_v61, %v8906_v62 }
 0x13b   :  { %6753 = vmatpush.bf16.msrb.mxu2 %v9197_v39  ;;  %v12802_v11 = vld [vmem:[%s20279_s1 + $0x664] sm:$0xf]  ;;  %v9162_v19 = vld [vmem:[%s20279_s1 + $0x670] sm:$0xf0]  ;;  %v9037_v24 = vor.u32 %v12770_v63, %v9034_v8 }
 0x13c   :  { %6766 = vmatpush.bf16.msrb.mxu3 %v9325_v44  ;;  %v12834_v20 = vld [vmem:[%s20279_s1 + $0x764] sm:$0xf]  ;;  %v9290_v21 = vld [vmem:[%s20279_s1 + $0x770] sm:$0xf0]  ;;  %v9165_v25 = vor.u32 %v12802_v11, %v9162_v19  ;;  %v15731_v44 = vadd.f32 %v6513_v37, %v6501_v22 }
 0x13d   :  { %6728 = vmatpush.bf16.msrb.mxu0 %v8925_v55  ;;  %v12734_v26 = vld [vmem:[%s20279_s1 + $0x444] sm:$0xf]  ;;  %v8890_v10 = vld [vmem:[%s20279_s1 + $0x450] sm:$0xf0]  ;;  %v9293_v31 = vor.u32 %v12834_v20, %v9290_v21 }
 0x13e   :  { %6741 = vmatpush.bf16.msrb.mxu1 %v9053_v57  ;;  %v12766_v30 = vld [vmem:[%s20279_s1 + $0x544] sm:$0xf]  ;;  %v9018_v33 = vld [vmem:[%s20279_s1 + $0x550] sm:$0xf0]  ;;  %v8893_v41 = vor.u32 %v12734_v26, %v8890_v10 }
 0x13f   :  { %6754 = vmatpush.bf16.msrb.mxu2 %v9181_v59  ;;  %v12798_v35 = vld [vmem:[%s20279_s1 + $0x644] sm:$0xf]  ;;  %v9146_v36 = vld [vmem:[%s20279_s1 + $0x650] sm:$0xf0]  ;;  %v9021_v45 = vor.u32 %v12766_v30, %v9018_v33 }
 0x140   :  { %6767 = vmatpush.bf16.msrb.mxu3 %v9309_v58  ;;  %v12830_v38 = vld [vmem:[%s20279_s1 + $0x744] sm:$0xf]  ;;  %v9274_v39 = vld [vmem:[%s20279_s1 + $0x750] sm:$0xf0]  ;;  %v9149_v50 = vor.u32 %v12798_v35, %v9146_v36 }
 0x141   :  { %6729 = vmatpush.bf16.msrb.mxu0 %v8909_v23  ;;  %v12730_v51 = vld [vmem:[%s20279_s1 + $0x424] sm:$0xf]  ;;  %v8874_v52 = vld [vmem:[%s20279_s1 + $0x430] sm:$0xf0]  ;;  %v9277_v53 = vor.u32 %v12830_v38, %v9274_v39 }
 0x142   :  { %6742 = vmatpush.bf16.msrb.mxu1 %v9037_v24  ;;  %v12762_v43 = vld [vmem:[%s20279_s1 + $0x524] sm:$0xf]  ;;  %v9002_v54 = vld [vmem:[%s20279_s1 + $0x530] sm:$0xf0]  ;;  %v8877_v61 = vor.u32 %v12730_v51, %v8874_v52 }
 0x143   :  { %6755 = vmatpush.bf16.msrb.mxu2 %v9165_v25  ;;  %v12794_v55 = vld [vmem:[%s20279_s1 + $0x624] sm:$0xf]  ;;  %v9130_v56 = vld [vmem:[%s20279_s1 + $0x630] sm:$0xf0]  ;;  %v9005_v58 = vor.u32 %v12762_v43, %v9002_v54  ;;  %v6502_v25 = vpop.f32.mrf.mxu2 }
 0x144   :  { %6768 = vmatpush.bf16.msrb.mxu3 %v9293_v31  ;;  %v12826_v57 = vld [vmem:[%s20279_s1 + $0x724] sm:$0xf]  ;;  %v9258_v59 = vld [vmem:[%s20279_s1 + $0x730] sm:$0xf0]  ;;  %v9133_v3 = vor.u32 %v12794_v55, %v9130_v56  ;;  %v6515_v31 = vpop.f32.mrf.mxu3 }
 0x145   :  { %6730 = vmatpush.bf16.msrb.mxu0 %v8893_v41  ;;  %v12726_v62 = vld [vmem:[%s20279_s1 + $0x404] sm:$0xf]  ;;  %v8858_v63 = vld [vmem:[%s20279_s1 + $0x410] sm:$0xf0]  ;;  %v9261_v20 = vor.u32 %v12826_v57, %v9258_v59 }
 0x146   :  { %6743 = vmatpush.bf16.msrb.mxu1 %v9021_v45  ;;  %v12758_v8 = vld [vmem:[%s20279_s1 + $0x504] sm:$0xf]  ;;  %v8986_v11 = vld [vmem:[%s20279_s1 + $0x510] sm:$0xf0]  ;;  %v8861_v32 = vor.u32 %v12726_v62, %v8858_v63 }
 0x147   :  { %6756 = vmatpush.bf16.msrb.mxu2 %v9149_v50  ;;  %v12790_v19 = vld [vmem:[%s20279_s1 + $0x604] sm:$0xf]  ;;  %v9114_v21 = vld [vmem:[%s20279_s1 + $0x610] sm:$0xf0]  ;;  %v8989_v22 = vor.u32 %v12758_v8, %v8986_v11 }
 0x148   :  { %6769 = vmatpush.bf16.msrb.mxu3 %v9277_v53  ;;  %v12822_v23 = vld [vmem:[%s20279_s1 + $0x704] sm:$0xf]  ;;  %v9242_v24 = vld [vmem:[%s20279_s1 + $0x710] sm:$0xf0]  ;;  %v9117_v37 = vor.u32 %v12790_v19, %v9114_v21 }
 0x149   :  { %v12882_v26 = vld [vmem:[%s20279_s1 + $0x8e4] sm:$0xf]  ;;  %v9482_v10 = vld [vmem:[%s20279_s1 + $0x8f0] sm:$0xf0]  ;;  %6731 = vmatpush.bf16.msrb.mxu0 %v8877_v61  ;;  %v9245_v40 = vor.u32 %v12822_v23, %v9242_v24 }
 0x14a   :  { %v12914_v30 = vld [vmem:[%s20279_s1 + $0x9e4] sm:$0xf]  ;;  %v9610_v33 = vld [vmem:[%s20279_s1 + $0x9f0] sm:$0xf0]  ;;  %6744 = vmatpush.bf16.msrb.mxu1 %v9005_v58  ;;  %v9485_v41 = vor.u32 %v12882_v26, %v9482_v10 }
 0x14b   :  { %v12946_v35 = vld [vmem:[%s20279_s1 + $0xae4] sm:$0xf]  ;;  %v9738_v36 = vld [vmem:[%s20279_s1 + $0xaf0] sm:$0xf0]  ;;  %6757 = vmatpush.bf16.msrb.mxu2 %v9133_v3  ;;  %v9613_v42 = vor.u32 %v12914_v30, %v9610_v33 }
 0x14c   :  { %v12978_v38 = vld [vmem:[%s20279_s1 + $0xbe4] sm:$0xf]  ;;  %v9866_v39 = vld [vmem:[%s20279_s1 + $0xbf0] sm:$0xf0]  ;;  %6770 = vmatpush.bf16.msrb.mxu3 %v9261_v20  ;;  %v9741_v45 = vor.u32 %v12946_v35, %v9738_v36 }
 0x14d   :  { %v12878_v50 = vld [vmem:[%s20279_s1 + $0x8c4] sm:$0xf]  ;;  %v9466_v51 = vld [vmem:[%s20279_s1 + $0x8d0] sm:$0xf0]  ;;  %6732 = vmatpush.bf16.msrb.mxu0 %v8861_v32  ;;  %v9869_v43 = vor.u32 %v12978_v38, %v9866_v39 }
 0x14e   :  { %v12910_v52 = vld [vmem:[%s20279_s1 + $0x9c4] sm:$0xf]  ;;  %v9594_v53 = vld [vmem:[%s20279_s1 + $0x9d0] sm:$0xf0]  ;;  %6745 = vmatpush.bf16.msrb.mxu1 %v8989_v22  ;;  %v9469_v59 = vor.u32 %v12878_v50, %v9466_v51  ;;  %v6526_v22 = vpop.f32.mrf.mxu0 }
 0x14f   :  { %v12942_v54 = vld [vmem:[%s20279_s1 + $0xac4] sm:$0xf]  ;;  %v9722_v55 = vld [vmem:[%s20279_s1 + $0xad0] sm:$0xf0]  ;;  %6758 = vmatpush.bf16.msrb.mxu2 %v9117_v37  ;;  %v9597_v61 = vor.u32 %v12910_v52, %v9594_v53  ;;  %v6527_v39 = vadd.f32 %v6526_v22, %v15731_v44 }
 0x150   :  { %v12974_v56 = vld [vmem:[%s20279_s1 + $0xbc4] sm:$0xf]  ;;  %v9850_v57 = vld [vmem:[%s20279_s1 + $0xbd0] sm:$0xf0]  ;;  %6771 = vmatpush.bf16.msrb.mxu3 %v9245_v40  ;;  %v9725_v62 = vor.u32 %v12942_v54, %v9722_v55  ;;  %6733 = vmatmul.bf16.vlgmr.msrb.gmra.mxu0 %v14157_v0 }
 0x151   :  { %6777 = vmatpush.bf16.msra.mxu0 %v9485_v41  ;;  %v12874_v63 = vld [vmem:[%s20279_s1 + $0x8a4] sm:$0xf]  ;;  %v9450_v58 = vld [vmem:[%s20279_s1 + $0x8b0] sm:$0xf0]  ;;  %v9853_v8 = vor.u32 %v12974_v56, %v9850_v57  ;;  %6746 = vmatmul.bf16.vlgmr.msrb.gmra.mxu1 %v14161_v2  ;;  %v6539_v41 = vpop.f32.mrf.mxu1 }
 0x152   :  { %6790 = vmatpush.bf16.msra.mxu1 %v9613_v42  ;;  %v12906_v3 = vld [vmem:[%s20279_s1 + $0x9a4] sm:$0xf]  ;;  %6759 = vmatmul.bf16.vlgmr.msrb.gmra.mxu2 %v14152_v60  ;;  %v9578_v11 = vld [vmem:[%s20279_s1 + $0x9b0] sm:$0xf0]  ;;  %v9453_v24 = vor.u32 %v12874_v63, %v9450_v58 }
 0x153   :  { %6803 = vmatpush.bf16.msra.mxu2 %v9741_v45  ;;  %v12938_v19 = vld [vmem:[%s20279_s1 + $0xaa4] sm:$0xf]  ;;  %v9706_v20 = vld [vmem:[%s20279_s1 + $0xab0] sm:$0xf0]  ;;  %6772 = vmatmul.bf16.vlgmr.msrb.gmra.mxu3 %v14159_v1  ;;  %v9581_v25 = vor.u32 %v12906_v3, %v9578_v11  ;;  %v6552_v11 = vpop.f32.mrf.mxu2 }
 0x154   :  { %6816 = vmatpush.bf16.msra.mxu3 %v9869_v43  ;;  %v12970_v21 = vld [vmem:[%s20279_s1 + $0xba4] sm:$0xf]  ;;  %v9834_v23 = vld [vmem:[%s20279_s1 + $0xbb0] sm:$0xf0]  ;;  %v9709_v26 = vor.u32 %v12938_v19, %v9706_v20  ;;  %v6540_v43 = vadd.f32 %v6539_v41, %v6527_v39 }
 0x155   :  { %6778 = vmatpush.bf16.msra.mxu0 %v9469_v59  ;;  %v12870_v10 = vld [vmem:[%s20279_s1 + $0x884] sm:$0xf]  ;;  %v9434_v30 = vld [vmem:[%s20279_s1 + $0x890] sm:$0xf0]  ;;  %v9837_v32 = vor.u32 %v12970_v21, %v9834_v23 }
 0x156   :  { %6791 = vmatpush.bf16.msra.mxu1 %v9597_v61  ;;  %v12902_v31 = vld [vmem:[%s20279_s1 + $0x984] sm:$0xf]  ;;  %v9562_v33 = vld [vmem:[%s20279_s1 + $0x990] sm:$0xf0]  ;;  %v9437_v40 = vor.u32 %v12870_v10, %v9434_v30  ;;  %v6553_v23 = vadd.f32 %v6552_v11, %v6540_v43  ;;  %v6528_v10 = vpop.f32.mrf.mxu0 }
 0x157   :  { %6804 = vmatpush.bf16.msra.mxu2 %v9725_v62  ;;  %v12934_v35 = vld [vmem:[%s20279_s1 + $0xa84] sm:$0xf]  ;;  %v9690_v36 = vld [vmem:[%s20279_s1 + $0xa90] sm:$0xf0]  ;;  %v9565_v42 = vor.u32 %v12902_v31, %v9562_v33 }
 0x158   :  { %6817 = vmatpush.bf16.msra.mxu3 %v9853_v8  ;;  %v12966_v37 = vld [vmem:[%s20279_s1 + $0xb84] sm:$0xf]  ;;  %v9818_v38 = vld [vmem:[%s20279_s1 + $0xb90] sm:$0xf0]  ;;  %v9693_v45 = vor.u32 %v12934_v35, %v9690_v36 }
 0x159   :  { %6779 = vmatpush.bf16.msra.mxu0 %v9453_v24  ;;  %v12866_v50 = vld [vmem:[%s20279_s1 + $0x864] sm:$0xf]  ;;  %v9418_v51 = vld [vmem:[%s20279_s1 + $0x870] sm:$0xf0]  ;;  %v9821_v44 = vor.u32 %v12966_v37, %v9818_v38  ;;  %v6565_v24 = vpop.f32.mrf.mxu3  ;;  %v6541_v31 = vpop.f32.mrf.mxu1 }
 0x15a   :  { %6792 = vmatpush.bf16.msra.mxu1 %v9581_v25  ;;  %v12898_v52 = vld [vmem:[%s20279_s1 + $0x964] sm:$0xf]  ;;  %v9546_v53 = vld [vmem:[%s20279_s1 + $0x970] sm:$0xf0]  ;;  %v9421_v59 = vor.u32 %v12866_v50, %v9418_v51 }
 0x15b   :  { %6805 = vmatpush.bf16.msra.mxu2 %v9709_v26  ;;  %v12930_v54 = vld [vmem:[%s20279_s1 + $0xa64] sm:$0xf]  ;;  %v9674_v55 = vld [vmem:[%s20279_s1 + $0xa70] sm:$0xf0]  ;;  %v9549_v61 = vor.u32 %v12898_v52, %v9546_v53 }
 0x15c   :  { %6818 = vmatpush.bf16.msra.mxu3 %v9837_v32  ;;  %v12962_v56 = vld [vmem:[%s20279_s1 + $0xb64] sm:$0xf]  ;;  %v9802_v57 = vld [vmem:[%s20279_s1 + $0xb70] sm:$0xf0]  ;;  %v9677_v62 = vor.u32 %v12930_v54, %v9674_v55  ;;  %v15930_v32 = vadd.f32 %v6565_v24, %v6553_v23 }
 0x15d   :  { %6780 = vmatpush.bf16.msra.mxu0 %v9437_v40  ;;  %v12862_v63 = vld [vmem:[%s20279_s1 + $0x844] sm:$0xf]  ;;  %v9402_v58 = vld [vmem:[%s20279_s1 + $0x850] sm:$0xf0]  ;;  %v9805_v8 = vor.u32 %v12962_v56, %v9802_v57 }
 0x15e   :  { %6793 = vmatpush.bf16.msra.mxu1 %v9565_v42  ;;  %v12894_v3 = vld [vmem:[%s20279_s1 + $0x944] sm:$0xf]  ;;  %v9530_v19 = vld [vmem:[%s20279_s1 + $0x950] sm:$0xf0]  ;;  %v9405_v30 = vor.u32 %v12862_v63, %v9402_v58 }
 0x15f   :  { %6806 = vmatpush.bf16.msra.mxu2 %v9693_v45  ;;  %v12926_v20 = vld [vmem:[%s20279_s1 + $0xa44] sm:$0xf]  ;;  %v9658_v21 = vld [vmem:[%s20279_s1 + $0xa50] sm:$0xf0]  ;;  %v9533_v33 = vor.u32 %v12894_v3, %v9530_v19 }
 0x160   :  { %6819 = vmatpush.bf16.msra.mxu3 %v9821_v44  ;;  %v12958_v25 = vld [vmem:[%s20279_s1 + $0xb44] sm:$0xf]  ;;  %v9786_v26 = vld [vmem:[%s20279_s1 + $0xb50] sm:$0xf0]  ;;  %v9661_v35 = vor.u32 %v12926_v20, %v9658_v21 }
 0x161   :  { %6781 = vmatpush.bf16.msra.mxu0 %v9421_v59  ;;  %v12858_v36 = vld [vmem:[%s20279_s1 + $0x824] sm:$0xf]  ;;  %v9386_v22 = vld [vmem:[%s20279_s1 + $0x830] sm:$0xf0]  ;;  %v9789_v38 = vor.u32 %v12958_v25, %v9786_v26 }
 0x162   :  { %6794 = vmatpush.bf16.msra.mxu1 %v9549_v61  ;;  %v12890_v37 = vld [vmem:[%s20279_s1 + $0x924] sm:$0xf]  ;;  %v9514_v39 = vld [vmem:[%s20279_s1 + $0x930] sm:$0xf0]  ;;  %v9389_v50 = vor.u32 %v12858_v36, %v9386_v22 }
 0x163   :  { %6807 = vmatpush.bf16.msra.mxu2 %v9677_v62  ;;  %v12922_v40 = vld [vmem:[%s20279_s1 + $0xa24] sm:$0xf]  ;;  %v9642_v41 = vld [vmem:[%s20279_s1 + $0xa30] sm:$0xf0]  ;;  %v9517_v44 = vor.u32 %v12890_v37, %v9514_v39  ;;  %v6554_v62 = vpop.f32.mrf.mxu2 }
 0x164   :  { %6820 = vmatpush.bf16.msra.mxu3 %v9805_v8  ;;  %v12954_v42 = vld [vmem:[%s20279_s1 + $0xb24] sm:$0xf]  ;;  %v9770_v45 = vld [vmem:[%s20279_s1 + $0xb30] sm:$0xf0]  ;;  %v9645_v43 = vor.u32 %v12922_v40, %v9642_v41  ;;  %v6567_v8 = vpop.f32.mrf.mxu3 }
 0x165   :  { %6782 = vmatpush.bf16.msra.mxu0 %v9405_v30  ;;  %v12854_v51 = vld [vmem:[%s20279_s1 + $0x804] sm:$0xf]  ;;  %v9370_v52 = vld [vmem:[%s20279_s1 + $0x810] sm:$0xf0]  ;;  %v9773_v56 = vor.u32 %v12954_v42, %v9770_v45 }
 0x166   :  { %6795 = vmatpush.bf16.msra.mxu1 %v9533_v33  ;;  %v12886_v53 = vld [vmem:[%s20279_s1 + $0x904] sm:$0xf]  ;;  %v9498_v54 = vld [vmem:[%s20279_s1 + $0x910] sm:$0xf0]  ;;  %v9373_v11 = vor.u32 %v12854_v51, %v9370_v52 }
 0x167   :  { %6808 = vmatpush.bf16.msra.mxu2 %v9661_v35  ;;  %v12918_v55 = vld [vmem:[%s20279_s1 + $0xa04] sm:$0xf]  ;;  %v9626_v57 = vld [vmem:[%s20279_s1 + $0xa10] sm:$0xf0]  ;;  %v9501_v23 = vor.u32 %v12886_v53, %v9498_v54 }
 0x168   :  { %6821 = vmatpush.bf16.msra.mxu3 %v9789_v38  ;;  %v12950_v59 = vld [vmem:[%s20279_s1 + $0xb04] sm:$0xf]  ;;  %v9754_v61 = vld [vmem:[%s20279_s1 + $0xb10] sm:$0xf0]  ;;  %v9629_v24 = vor.u32 %v12918_v55, %v9626_v57 }
 0x169   :  { %v13010_v63 = vld [vmem:[%s20279_s1 + $0xce4] sm:$0xf]  ;;  %v9994_v58 = vld [vmem:[%s20279_s1 + $0xcf0] sm:$0xf0]  ;;  %6783 = vmatpush.bf16.msra.mxu0 %v9389_v50  ;;  %v9757_v10 = vor.u32 %v12950_v59, %v9754_v61 }
 0x16a   :  { %v13042_v3 = vld [vmem:[%s20279_s1 + $0xde4] sm:$0xf]  ;;  %v10122_v19 = vld [vmem:[%s20279_s1 + $0xdf0] sm:$0xf0]  ;;  %6796 = vmatpush.bf16.msra.mxu1 %v9517_v44  ;;  %v9997_v30 = vor.u32 %v13010_v63, %v9994_v58 }
 0x16b   :  { %v13074_v20 = vld [vmem:[%s20279_s1 + $0xee4] sm:$0xf]  ;;  %v10250_v21 = vld [vmem:[%s20279_s1 + $0xef0] sm:$0xf0]  ;;  %6809 = vmatpush.bf16.msra.mxu2 %v9645_v43  ;;  %v10125_v31 = vor.u32 %v13042_v3, %v10122_v19 }
 0x16c   :  { %v13106_v25 = vld [vmem:[%s20279_s1 + $0xfe4] sm:$0xf]  ;;  %v10378_v26 = vld [vmem:[%s20279_s1 + $0xff0] sm:$0xf0]  ;;  %6822 = vmatpush.bf16.msra.mxu3 %v9773_v56  ;;  %v10253_v33 = vor.u32 %v13074_v20, %v10250_v21 }
 0x16d   :  { %v13006_v35 = vld [vmem:[%s20279_s1 + $0xcc4] sm:$0xf]  ;;  %v9978_v36 = vld [vmem:[%s20279_s1 + $0xcd0] sm:$0xf0]  ;;  %6784 = vmatpush.bf16.msra.mxu0 %v9373_v11  ;;  %v10381_v37 = vor.u32 %v13106_v25, %v10378_v26 }
 0x16e   :  { %v13038_v22 = vld [vmem:[%s20279_s1 + $0xdc4] sm:$0xf]  ;;  %v10106_v38 = vld [vmem:[%s20279_s1 + $0xdd0] sm:$0xf0]  ;;  %6797 = vmatpush.bf16.msra.mxu1 %v9501_v23  ;;  %v9981_v45 = vor.u32 %v13006_v35, %v9978_v36 }
 0x16f   :  { %v13070_v39 = vld [vmem:[%s20279_s1 + $0xec4] sm:$0xf]  ;;  %v10234_v40 = vld [vmem:[%s20279_s1 + $0xed0] sm:$0xf0]  ;;  %6810 = vmatpush.bf16.msra.mxu2 %v9629_v24  ;;  %v10109_v50 = vor.u32 %v13038_v22, %v10106_v38 }
 0x170   :  { %v13102_v41 = vld [vmem:[%s20279_s1 + $0xfc4] sm:$0xf]  ;;  %v10362_v42 = vld [vmem:[%s20279_s1 + $0xfd0] sm:$0xf0]  ;;  %6823 = vmatpush.bf16.msra.mxu3 %v9757_v10  ;;  %v10237_v51 = vor.u32 %v13070_v39, %v10234_v40  ;;  %6785 = vmatmul.bf16.vlgmr.msra.gmra.mxu0 %v14407_v12 }
 0x171   :  { %6829 = vmatpush.bf16.msrb.mxu0 %v9997_v30  ;;  %v13002_v52 = vld [vmem:[%s20279_s1 + $0xca4] sm:$0xf]  ;;  %v9962_v44 = vld [vmem:[%s20279_s1 + $0xcb0] sm:$0xf0]  ;;  %v10365_v53 = vor.u32 %v13102_v41, %v10362_v42  ;;  %6798 = vmatmul.bf16.vlgmr.msra.gmra.mxu1 %v14417_v16  ;;  %v6578_v23 = vpop.f32.mrf.mxu0 }
 0x172   :  { %6842 = vmatpush.bf16.msrb.mxu1 %v10125_v31  ;;  %v13034_v43 = vld [vmem:[%s20279_s1 + $0xda4] sm:$0xf]  ;;  %v10090_v54 = vld [vmem:[%s20279_s1 + $0xdb0] sm:$0xf0]  ;;  %6811 = vmatmul.bf16.vlgmr.msra.gmra.mxu2 %v14415_v15  ;;  %v9965_v61 = vor.u32 %v13002_v52, %v9962_v44  ;;  %v6579_v26 = vadd.f32 %v6578_v23, %v15930_v32  ;;  %v6591_v30 = vpop.f32.mrf.mxu1 }
 0x173   :  { %6855 = vmatpush.bf16.msrb.mxu2 %v10253_v33  ;;  %v13066_v55 = vld [vmem:[%s20279_s1 + $0xea4] sm:$0xf]  ;;  %v10218_v56 = vld [vmem:[%s20279_s1 + $0xeb0] sm:$0xf0]  ;;  %6824 = vmatmul.bf16.vlgmr.msra.gmra.mxu3 %v14419_v17  ;;  %v10093_v62 = vor.u32 %v13034_v43, %v10090_v54 }
 0x174   :  { %6868 = vmatpush.bf16.msrb.mxu3 %v10381_v37  ;;  %v13098_v57 = vld [vmem:[%s20279_s1 + $0xfa4] sm:$0xf]  ;;  %v10346_v59 = vld [vmem:[%s20279_s1 + $0xfb0] sm:$0xf0]  ;;  %v10221_v63 = vor.u32 %v13066_v55, %v10218_v56  ;;  %v6592_v37 = vadd.f32 %v6591_v30, %v6579_v26 }
 0x175   :  { %6830 = vmatpush.bf16.msrb.mxu0 %v9981_v45  ;;  %v12998_v58 = vld [vmem:[%s20279_s1 + $0xc84] sm:$0xf]  ;;  %v9946_v3 = vld [vmem:[%s20279_s1 + $0xc90] sm:$0xf0]  ;;  %v10349_v11 = vor.u32 %v13098_v57, %v10346_v59 }
 0x176   :  { %6843 = vmatpush.bf16.msrb.mxu1 %v10109_v50  ;;  %v13030_v8 = vld [vmem:[%s20279_s1 + $0xd84] sm:$0xf]  ;;  %v10074_v19 = vld [vmem:[%s20279_s1 + $0xd90] sm:$0xf0]  ;;  %v9949_v10 = vor.u32 %v12998_v58, %v9946_v3 }
 0x177   :  { %6856 = vmatpush.bf16.msrb.mxu2 %v10237_v51  ;;  %v13062_v20 = vld [vmem:[%s20279_s1 + $0xe84] sm:$0xf]  ;;  %v10202_v21 = vld [vmem:[%s20279_s1 + $0xe90] sm:$0xf0]  ;;  %v10077_v31 = vor.u32 %v13030_v8, %v10074_v19  ;;  %v6604_v54 = vpop.f32.mrf.mxu2 }
 0x178   :  { %6869 = vmatpush.bf16.msrb.mxu3 %v10365_v53  ;;  %v13094_v24 = vld [vmem:[%s20279_s1 + $0xf84] sm:$0xf]  ;;  %v10330_v25 = vld [vmem:[%s20279_s1 + $0xf90] sm:$0xf0]  ;;  %v10205_v33 = vor.u32 %v13062_v20, %v10202_v21  ;;  %v6605_v59 = vadd.f32 %v6604_v54, %v6592_v37 }
 0x179   :  { %6831 = vmatpush.bf16.msrb.mxu0 %v9965_v61  ;;  %v12994_v35 = vld [vmem:[%s20279_s1 + $0xc64] sm:$0xf]  ;;  %v9930_v36 = vld [vmem:[%s20279_s1 + $0xc70] sm:$0xf0]  ;;  %v10333_v32 = vor.u32 %v13094_v24, %v10330_v25  ;;  %v6617_v61 = vpop.f32.mrf.mxu3  ;;  %v6580_v58 = vpop.f32.mrf.mxu0 }
 0x17a   :  { %6844 = vmatpush.bf16.msrb.mxu1 %v10093_v62  ;;  %v13026_v22 = vld [vmem:[%s20279_s1 + $0xd64] sm:$0xf]  ;;  %v10058_v38 = vld [vmem:[%s20279_s1 + $0xd70] sm:$0xf0]  ;;  %v9933_v45 = vor.u32 %v12994_v35, %v9930_v36  ;;  %v6593_v8 = vpop.f32.mrf.mxu1 }
 0x17b   :  { %6857 = vmatpush.bf16.msrb.mxu2 %v10221_v63  ;;  %v13058_v39 = vld [vmem:[%s20279_s1 + $0xe64] sm:$0xf]  ;;  %v10186_v40 = vld [vmem:[%s20279_s1 + $0xe70] sm:$0xf0]  ;;  %v10061_v50 = vor.u32 %v13026_v22, %v10058_v38 }
 0x17c   :  { %6870 = vmatpush.bf16.msrb.mxu3 %v10349_v11  ;;  %v13090_v41 = vld [vmem:[%s20279_s1 + $0xf64] sm:$0xf]  ;;  %v10314_v42 = vld [vmem:[%s20279_s1 + $0xf70] sm:$0xf0]  ;;  %v10189_v51 = vor.u32 %v13058_v39, %v10186_v40  ;;  %v16129_v11 = vadd.f32 %v6617_v61, %v6605_v59 }
 0x17d   :  { %6832 = vmatpush.bf16.msrb.mxu0 %v9949_v10  ;;  %v12990_v52 = vld [vmem:[%s20279_s1 + $0xc44] sm:$0xf]  ;;  %v9914_v44 = vld [vmem:[%s20279_s1 + $0xc50] sm:$0xf0]  ;;  %v10317_v53 = vor.u32 %v13090_v41, %v10314_v42 }
 0x17e   :  { %6845 = vmatpush.bf16.msrb.mxu1 %v10077_v31  ;;  %v13022_v43 = vld [vmem:[%s20279_s1 + $0xd44] sm:$0xf]  ;;  %v10042_v55 = vld [vmem:[%s20279_s1 + $0xd50] sm:$0xf0]  ;;  %v9917_v3 = vor.u32 %v12990_v52, %v9914_v44 }
 0x17f   :  { %6858 = vmatpush.bf16.msrb.mxu2 %v10205_v33  ;;  %v13054_v56 = vld [vmem:[%s20279_s1 + $0xe44] sm:$0xf]  ;;  %v10170_v57 = vld [vmem:[%s20279_s1 + $0xe50] sm:$0xf0]  ;;  %v10045_v19 = vor.u32 %v13022_v43, %v10042_v55 }
 0x180   :  { %6871 = vmatpush.bf16.msrb.mxu3 %v10333_v32  ;;  %v13086_v62 = vld [vmem:[%s20279_s1 + $0xf44] sm:$0xf]  ;;  %v10298_v63 = vld [vmem:[%s20279_s1 + $0xf50] sm:$0xf0]  ;;  %v10173_v20 = vor.u32 %v13054_v56, %v10170_v57 }
 0x181   :  { %6833 = vmatpush.bf16.msrb.mxu0 %v9933_v45  ;;  %v12986_v21 = vld [vmem:[%s20279_s1 + $0xc24] sm:$0xf]  ;;  %v9898_v23 = vld [vmem:[%s20279_s1 + $0xc30] sm:$0xf0]  ;;  %v10301_v25 = vor.u32 %v13086_v62, %v10298_v63 }
 0x182   :  { %6846 = vmatpush.bf16.msrb.mxu1 %v10061_v50  ;;  %v13018_v24 = vld [vmem:[%s20279_s1 + $0xd24] sm:$0xf]  ;;  %v10026_v26 = vld [vmem:[%s20279_s1 + $0xd30] sm:$0xf0]  ;;  %v9901_v35 = vor.u32 %v12986_v21, %v9898_v23 }
 0x183   :  { %6859 = vmatpush.bf16.msrb.mxu2 %v10189_v51  ;;  %v13050_v10 = vld [vmem:[%s20279_s1 + $0xe24] sm:$0xf]  ;;  %v10154_v30 = vld [vmem:[%s20279_s1 + $0xe30] sm:$0xf0]  ;;  %v10029_v32 = vor.u32 %v13018_v24, %v10026_v26  ;;  %v6606_v51 = vpop.f32.mrf.mxu2 }
 0x184   :  { %6872 = vmatpush.bf16.msrb.mxu3 %v10317_v53  ;;  %v13082_v31 = vld [vmem:[%s20279_s1 + $0xf24] sm:$0xf]  ;;  %v10282_v33 = vld [vmem:[%s20279_s1 + $0xf30] sm:$0xf0]  ;;  %v10157_v37 = vor.u32 %v13050_v10, %v10154_v30  ;;  %v6619_v53 = vpop.f32.mrf.mxu3 }
 0x185   :  { %6834 = vmatpush.bf16.msrb.mxu0 %v9917_v3  ;;  %v12982_v36 = vld [vmem:[%s20279_s1 + $0xc04] sm:$0xf]  ;;  %v9882_v22 = vld [vmem:[%s20279_s1 + $0xc10] sm:$0xf0]  ;;  %v10285_v41 = vor.u32 %v13082_v31, %v10282_v33 }
 0x186   :  { %6847 = vmatpush.bf16.msrb.mxu1 %v10045_v19  ;;  %v13014_v38 = vld [vmem:[%s20279_s1 + $0xd04] sm:$0xf]  ;;  %v10010_v39 = vld [vmem:[%s20279_s1 + $0xd10] sm:$0xf0]  ;;  %v9885_v54 = vor.u32 %v12982_v36, %v9882_v22 }
 0x187   :  { %6860 = vmatpush.bf16.msrb.mxu2 %v10173_v20  ;;  %v13046_v40 = vld [vmem:[%s20279_s1 + $0xe04] sm:$0xf]  ;;  %v10138_v42 = vld [vmem:[%s20279_s1 + $0xe10] sm:$0xf0]  ;;  %v10013_v59 = vor.u32 %v13014_v38, %v10010_v39 }
 0x188   :  { %6873 = vmatpush.bf16.msrb.mxu3 %v10301_v25  ;;  %v13078_v45 = vld [vmem:[%s20279_s1 + $0xf04] sm:$0xf]  ;;  %v10266_v50 = vld [vmem:[%s20279_s1 + $0xf10] sm:$0xf0]  ;;  %v10141_v61 = vor.u32 %v13046_v40, %v10138_v42 }
 0x189   :  { %v13138_v52 = vld [vmem:[%s20279_s1 + $0x10e4] sm:$0xf]  ;;  %v10506_v44 = vld [vmem:[%s20279_s1 + $0x10f0] sm:$0xf0]  ;;  %6835 = vmatpush.bf16.msrb.mxu0 %v9901_v35  ;;  %v10269_v58 = vor.u32 %v13078_v45, %v10266_v50 }
 0x18a   :  { %v13170_v43 = vld [vmem:[%s20279_s1 + $0x11e4] sm:$0xf]  ;;  %v10634_v55 = vld [vmem:[%s20279_s1 + $0x11f0] sm:$0xf0]  ;;  %6848 = vmatpush.bf16.msrb.mxu1 %v10029_v32  ;;  %v10509_v3 = vor.u32 %v13138_v52, %v10506_v44 }
 0x18b   :  { %v13202_v56 = vld [vmem:[%s20279_s1 + $0x12e4] sm:$0xf]  ;;  %v10762_v57 = vld [vmem:[%s20279_s1 + $0x12f0] sm:$0xf0]  ;;  %6861 = vmatpush.bf16.msrb.mxu2 %v10157_v37  ;;  %v10637_v8 = vor.u32 %v13170_v43, %v10634_v55 }
 0x18c   :  { %v13234_v62 = vld [vmem:[%s20279_s1 + $0x13e4] sm:$0xf]  ;;  %v10890_v63 = vld [vmem:[%s20279_s1 + $0x13f0] sm:$0xf0]  ;;  %6874 = vmatpush.bf16.msrb.mxu3 %v10285_v41  ;;  %v10765_v19 = vor.u32 %v13202_v56, %v10762_v57 }
 0x18d   :  { %v13134_v20 = vld [vmem:[%s20279_s1 + $0x10c4] sm:$0xf]  ;;  %v10490_v21 = vld [vmem:[%s20279_s1 + $0x10d0] sm:$0xf0]  ;;  %6836 = vmatpush.bf16.msrb.mxu0 %v9885_v54  ;;  %v10893_v24 = vor.u32 %v13234_v62, %v10890_v63 }
 0x18e   :  { %v13166_v23 = vld [vmem:[%s20279_s1 + $0x11c4] sm:$0xf]  ;;  %v10618_v25 = vld [vmem:[%s20279_s1 + $0x11d0] sm:$0xf0]  ;;  %6849 = vmatpush.bf16.msrb.mxu1 %v10013_v59  ;;  %v10493_v33 = vor.u32 %v13134_v20, %v10490_v21  ;;  %v6630_v59 = vpop.f32.mrf.mxu0 }
 0x18f   :  { %v13198_v26 = vld [vmem:[%s20279_s1 + $0x12c4] sm:$0xf]  ;;  %v10746_v10 = vld [vmem:[%s20279_s1 + $0x12d0] sm:$0xf0]  ;;  %6862 = vmatpush.bf16.msrb.mxu2 %v10141_v61  ;;  %v10621_v35 = vor.u32 %v13166_v23, %v10618_v25  ;;  %v6631_v63 = vadd.f32 %v6630_v59, %v16129_v11 }
 0x190   :  { %v13230_v30 = vld [vmem:[%s20279_s1 + $0x13c4] sm:$0xf]  ;;  %v10874_v31 = vld [vmem:[%s20279_s1 + $0x13d0] sm:$0xf0]  ;;  %6875 = vmatpush.bf16.msrb.mxu3 %v10269_v58  ;;  %v10749_v36 = vor.u32 %v13198_v26, %v10746_v10  ;;  %6837 = vmatmul.bf16.vlgmr.msrb.gmra.mxu0 %v14581_v46 }
 0x191   :  { %6881 = vmatpush.bf16.msra.mxu0 %v10509_v3  ;;  %v13130_v22 = vld [vmem:[%s20279_s1 + $0x10a4] sm:$0xf]  ;;  %v10474_v32 = vld [vmem:[%s20279_s1 + $0x10b0] sm:$0xf0]  ;;  %v10877_v38 = vor.u32 %v13230_v30, %v10874_v31  ;;  %6850 = vmatmul.bf16.vlgmr.msrb.gmra.mxu1 %v14585_v48  ;;  %v6643_v3 = vpop.f32.mrf.mxu1 }
 0x192   :  { %6894 = vmatpush.bf16.msra.mxu1 %v10637_v8  ;;  %v13162_v37 = vld [vmem:[%s20279_s1 + $0x11a4] sm:$0xf]  ;;  %v10602_v39 = vld [vmem:[%s20279_s1 + $0x11b0] sm:$0xf0]  ;;  %6863 = vmatmul.bf16.vlgmr.msrb.gmra.mxu2 %v14583_v47  ;;  %v10477_v50 = vor.u32 %v13130_v22, %v10474_v32 }
 0x193   :  { %6907 = vmatpush.bf16.msra.mxu2 %v10765_v19  ;;  %v13194_v40 = vld [vmem:[%s20279_s1 + $0x12a4] sm:$0xf]  ;;  %v10730_v41 = vld [vmem:[%s20279_s1 + $0x12b0] sm:$0xf0]  ;;  %6876 = vmatmul.bf16.vlgmr.msrb.gmra.mxu3 %v14587_v49  ;;  %v10605_v51 = vor.u32 %v13162_v37, %v10602_v39 }
 0x194   :  { %6920 = vmatpush.bf16.msra.mxu3 %v10893_v24  ;;  %v13226_v42 = vld [vmem:[%s20279_s1 + $0x13a4] sm:$0xf]  ;;  %v10858_v45 = vld [vmem:[%s20279_s1 + $0x13b0] sm:$0xf0]  ;;  %v10733_v52 = vor.u32 %v13194_v40, %v10730_v41  ;;  %v6644_v24 = vadd.f32 %v6643_v3, %v6631_v63 }
 0x195   :  { %6882 = vmatpush.bf16.msra.mxu0 %v10493_v33  ;;  %v13126_v44 = vld [vmem:[%s20279_s1 + $0x1084] sm:$0xf]  ;;  %v10458_v43 = vld [vmem:[%s20279_s1 + $0x1090] sm:$0xf0]  ;;  %v10861_v54 = vor.u32 %v13226_v42, %v10858_v45  ;;  %v6656_v39 = vpop.f32.mrf.mxu2 }
 0x196   :  { %6895 = vmatpush.bf16.msra.mxu1 %v10621_v35  ;;  %v13158_v53 = vld [vmem:[%s20279_s1 + $0x1184] sm:$0xf]  ;;  %v10586_v55 = vld [vmem:[%s20279_s1 + $0x1190] sm:$0xf0]  ;;  %v10461_v58 = vor.u32 %v13126_v44, %v10458_v43  ;;  %v6657_v45 = vadd.f32 %v6656_v39, %v6644_v24  ;;  %v6632_v44 = vpop.f32.mrf.mxu0 }
 0x197   :  { %6908 = vmatpush.bf16.msra.mxu2 %v10749_v36  ;;  %v13190_v56 = vld [vmem:[%s20279_s1 + $0x1284] sm:$0xf]  ;;  %v10714_v57 = vld [vmem:[%s20279_s1 + $0x1290] sm:$0xf0]  ;;  %v10589_v8 = vor.u32 %v13158_v53, %v10586_v55 }
 0x198   :  { %6921 = vmatpush.bf16.msra.mxu3 %v10877_v38  ;;  %v13222_v61 = vld [vmem:[%s20279_s1 + $0x1384] sm:$0xf]  ;;  %v10842_v62 = vld [vmem:[%s20279_s1 + $0x1390] sm:$0xf0]  ;;  %v10717_v19 = vor.u32 %v13190_v56, %v10714_v57 }
 0x199   :  { %6883 = vmatpush.bf16.msra.mxu0 %v10477_v50  ;;  %v13122_v20 = vld [vmem:[%s20279_s1 + $0x1064] sm:$0xf]  ;;  %v10442_v21 = vld [vmem:[%s20279_s1 + $0x1070] sm:$0xf0]  ;;  %v10845_v11 = vor.u32 %v13222_v61, %v10842_v62  ;;  %v6669_v50 = vpop.f32.mrf.mxu3  ;;  %v6645_v53 = vpop.f32.mrf.mxu1 }
 0x19a   :  { %6896 = vmatpush.bf16.msra.mxu1 %v10605_v51  ;;  %v13154_v23 = vld [vmem:[%s20279_s1 + $0x1164] sm:$0xf]  ;;  %v10570_v25 = vld [vmem:[%s20279_s1 + $0x1170] sm:$0xf0]  ;;  %v10445_v33 = vor.u32 %v13122_v20, %v10442_v21 }
 0x19b   :  { %6909 = vmatpush.bf16.msra.mxu2 %v10733_v52  ;;  %v13186_v26 = vld [vmem:[%s20279_s1 + $0x1264] sm:$0xf]  ;;  %v10698_v10 = vld [vmem:[%s20279_s1 + $0x1270] sm:$0xf0]  ;;  %v10573_v35 = vor.u32 %v13154_v23, %v10570_v25 }
 0x19c   :  { %6922 = vmatpush.bf16.msra.mxu3 %v10861_v54  ;;  %v13218_v30 = vld [vmem:[%s20279_s1 + $0x1364] sm:$0xf]  ;;  %v10826_v31 = vld [vmem:[%s20279_s1 + $0x1370] sm:$0xf0]  ;;  %v10701_v36 = vor.u32 %v13186_v26, %v10698_v10  ;;  %v16328_v54 = vadd.f32 %v6669_v50, %v6657_v45 }
 0x19d   :  { %6884 = vmatpush.bf16.msra.mxu0 %v10461_v58  ;;  %v13118_v22 = vld [vmem:[%s20279_s1 + $0x1044] sm:$0xf]  ;;  %v10426_v32 = vld [vmem:[%s20279_s1 + $0x1050] sm:$0xf0]  ;;  %v10829_v38 = vor.u32 %v13218_v30, %v10826_v31 }
 0x19e   :  { %6897 = vmatpush.bf16.msra.mxu1 %v10589_v8  ;;  %v13150_v37 = vld [vmem:[%s20279_s1 + $0x1144] sm:$0xf]  ;;  %v10554_v40 = vld [vmem:[%s20279_s1 + $0x1150] sm:$0xf0]  ;;  %v10429_v43 = vor.u32 %v13118_v22, %v10426_v32 }
 0x19f   :  { %6910 = vmatpush.bf16.msra.mxu2 %v10717_v19  ;;  %v13182_v41 = vld [vmem:[%s20279_s1 + $0x1244] sm:$0xf]  ;;  %v10682_v42 = vld [vmem:[%s20279_s1 + $0x1250] sm:$0xf0]  ;;  %v10557_v55 = vor.u32 %v13150_v37, %v10554_v40 }
 0x1a0   :  { %6923 = vmatpush.bf16.msra.mxu3 %v10845_v11  ;;  %v13214_v51 = vld [vmem:[%s20279_s1 + $0x1344] sm:$0xf]  ;;  %v10810_v52 = vld [vmem:[%s20279_s1 + $0x1350] sm:$0xf0]  ;;  %v10685_v56 = vor.u32 %v13182_v41, %v10682_v42 }
 0x1a1   :  { %6885 = vmatpush.bf16.msra.mxu0 %v10445_v33  ;;  %v13114_v57 = vld [vmem:[%s20279_s1 + $0x1024] sm:$0xf]  ;;  %v10410_v59 = vld [vmem:[%s20279_s1 + $0x1030] sm:$0xf0]  ;;  %v10813_v62 = vor.u32 %v13214_v51, %v10810_v52 }
 0x1a2   :  { %6898 = vmatpush.bf16.msra.mxu1 %v10573_v35  ;;  %v13146_v61 = vld [vmem:[%s20279_s1 + $0x1124] sm:$0xf]  ;;  %v10538_v63 = vld [vmem:[%s20279_s1 + $0x1130] sm:$0xf0]  ;;  %v10413_v20 = vor.u32 %v13114_v57, %v10410_v59 }
 0x1a3   :  { %6911 = vmatpush.bf16.msra.mxu2 %v10701_v36  ;;  %v13178_v58 = vld [vmem:[%s20279_s1 + $0x1224] sm:$0xf]  ;;  %v10666_v3 = vld [vmem:[%s20279_s1 + $0x1230] sm:$0xf0]  ;;  %v10541_v11 = vor.u32 %v13146_v61, %v10538_v63  ;;  %v6658_v36 = vpop.f32.mrf.mxu2 }
 0x1a4   :  { %6924 = vmatpush.bf16.msra.mxu3 %v10829_v38  ;;  %v13210_v8 = vld [vmem:[%s20279_s1 + $0x1324] sm:$0xf]  ;;  %v10794_v19 = vld [vmem:[%s20279_s1 + $0x1330] sm:$0xf0]  ;;  %v10669_v24 = vor.u32 %v13178_v58, %v10666_v3  ;;  %v6671_v38 = vpop.f32.mrf.mxu3 }
 0x1a5   :  { %6886 = vmatpush.bf16.msra.mxu0 %v10429_v43  ;;  %v13110_v21 = vld [vmem:[%s20279_s1 + $0x1004] sm:$0xf]  ;;  %v10394_v23 = vld [vmem:[%s20279_s1 + $0x1010] sm:$0xf0]  ;;  %v10797_v30 = vor.u32 %v13210_v8, %v10794_v19 }
 0x1a6   :  { %6899 = vmatpush.bf16.msra.mxu1 %v10557_v55  ;;  %v13142_v25 = vld [vmem:[%s20279_s1 + $0x1104] sm:$0xf]  ;;  %v10522_v26 = vld [vmem:[%s20279_s1 + $0x1110] sm:$0xf0]  ;;  %v10397_v39 = vor.u32 %v13110_v21, %v10394_v23 }
 0x1a7   :  { %6912 = vmatpush.bf16.msra.mxu2 %v10685_v56  ;;  %v13174_v10 = vld [vmem:[%s20279_s1 + $0x1204] sm:$0xf]  ;;  %v10650_v31 = vld [vmem:[%s20279_s1 + $0x1210] sm:$0xf0]  ;;  %v10525_v45 = vor.u32 %v13142_v25, %v10522_v26 }
 0x1a8   :  { %6925 = vmatpush.bf16.msra.mxu3 %v10813_v62  ;;  %v13206_v33 = vld [vmem:[%s20279_s1 + $0x1304] sm:$0xf]  ;;  %v10778_v35 = vld [vmem:[%s20279_s1 + $0x1310] sm:$0xf0]  ;;  %v10653_v50 = vor.u32 %v13174_v10, %v10650_v31 }
 0x1a9   :  { %v13266_v22 = vld [vmem:[%s20279_s1 + $0x14e4] sm:$0xf]  ;;  %v11018_v32 = vld [vmem:[%s20279_s1 + $0x14f0] sm:$0xf0]  ;;  %6887 = vmatpush.bf16.msra.mxu0 %v10413_v20  ;;  %v10781_v44 = vor.u32 %v13206_v33, %v10778_v35 }
 0x1aa   :  { %v13298_v37 = vld [vmem:[%s20279_s1 + $0x15e4] sm:$0xf]  ;;  %v11146_v40 = vld [vmem:[%s20279_s1 + $0x15f0] sm:$0xf0]  ;;  %6900 = vmatpush.bf16.msra.mxu1 %v10541_v11  ;;  %v11021_v43 = vor.u32 %v13266_v22, %v11018_v32 }
 0x1ab   :  { %v13330_v41 = vld [vmem:[%s20279_s1 + $0x16e4] sm:$0xf]  ;;  %v11274_v42 = vld [vmem:[%s20279_s1 + $0x16f0] sm:$0xf0]  ;;  %6913 = vmatpush.bf16.msra.mxu2 %v10669_v24  ;;  %v11149_v53 = vor.u32 %v13298_v37, %v11146_v40 }
 0x1ac   :  { %v13362_v51 = vld [vmem:[%s20279_s1 + $0x17e4] sm:$0xf]  ;;  %v11402_v52 = vld [vmem:[%s20279_s1 + $0x17f0] sm:$0xf0]  ;;  %6926 = vmatpush.bf16.msra.mxu3 %v10797_v30  ;;  %v11277_v55 = vor.u32 %v13330_v41, %v11274_v42 }
 0x1ad   :  { %v13262_v56 = vld [vmem:[%s20279_s1 + $0x14c4] sm:$0xf]  ;;  %v11002_v57 = vld [vmem:[%s20279_s1 + $0x14d0] sm:$0xf0]  ;;  %6888 = vmatpush.bf16.msra.mxu0 %v10397_v39  ;;  %v11405_v61 = vor.u32 %v13362_v51, %v11402_v52  ;;  %v13665_v39 = vld [vmem:[%s20280_s2] sm:$0xf] }
 0x1ae   :  { %v13294_v59 = vld [vmem:[%s20279_s1 + $0x15c4] sm:$0xf]  ;;  %v11130_v62 = vld [vmem:[%s20279_s1 + $0x15d0] sm:$0xf0]  ;;  %6901 = vmatpush.bf16.msra.mxu1 %v10525_v45  ;;  %v11005_v19 = vor.u32 %v13262_v56, %v11002_v57  ;;  %v1058_v40 = vperm.slane %v13665_v39, 1 }
 0x1af   :  { %v13326_v63 = vld [vmem:[%s20279_s1 + $0x16c4] sm:$0xf]  ;;  %v11258_v58 = vld [vmem:[%s20279_s1 + $0x16d0] sm:$0xf0]  ;;  %6914 = vmatpush.bf16.msra.mxu2 %v10653_v50  ;;  %v11133_v20 = vor.u32 %v13294_v59, %v11130_v62  ;;  %v6695_v62 = vpop.f32.mrf.mxu1 }
 0x1b0   :  { %v13358_v3 = vld [vmem:[%s20279_s1 + $0x17c4] sm:$0xf]  ;;  %v11386_v8 = vld [vmem:[%s20279_s1 + $0x17d0] sm:$0xf0]  ;;  %6927 = vmatpush.bf16.msra.mxu3 %v10781_v44  ;;  %v11261_v21 = vor.u32 %v13326_v63, %v11258_v58  ;;  %6889 = vmatmul.bf16.vlgmr.msra.gmra.mxu0 %v14818_v9 }
 0x1b1   :  { %6933 = vmatpush.bf16.msrb.mxu0 %v11021_v43  ;;  %v13258_v23 = vld [vmem:[%s20279_s1 + $0x14a4] sm:$0xf]  ;;  %v10986_v11 = vld [vmem:[%s20279_s1 + $0x14b0] sm:$0xf0]  ;;  %v11389_v25 = vor.u32 %v13358_v3, %v11386_v8  ;;  %6902 = vmatmul.bf16.vlgmr.msra.gmra.mxu1 %v14828_v14  ;;  %v6682_v43 = vpop.f32.mrf.mxu0 }
 0x1b2   :  { %6946 = vmatpush.bf16.msrb.mxu1 %v11149_v53  ;;  %v13290_v24 = vld [vmem:[%s20279_s1 + $0x15a4] sm:$0xf]  ;;  %v11114_v26 = vld [vmem:[%s20279_s1 + $0x15b0] sm:$0xf0]  ;;  %6915 = vmatmul.bf16.vlgmr.msra.gmra.mxu2 %v14826_v13  ;;  %v10989_v35 = vor.u32 %v13258_v23, %v10986_v11 }
 0x1b3   :  { %6959 = vmatpush.bf16.msrb.mxu2 %v11277_v55  ;;  %v13322_v10 = vld [vmem:[%s20279_s1 + $0x16a4] sm:$0xf]  ;;  %v11242_v30 = vld [vmem:[%s20279_s1 + $0x16b0] sm:$0xf0]  ;;  %6928 = vmatmul.bf16.vlgmr.msra.gmra.mxu3 %v14830_v18  ;;  %v11117_v22 = vor.u32 %v13290_v24, %v11114_v26 }
 0x1b4   :  { %6972 = vmatpush.bf16.msrb.mxu3 %v11405_v61  ;;  %v13354_v31 = vld [vmem:[%s20279_s1 + $0x17a4] sm:$0xf]  ;;  %v11370_v33 = vld [vmem:[%s20279_s1 + $0x17b0] sm:$0xf0]  ;;  %v11245_v32 = vor.u32 %v13322_v10, %v11242_v30  ;;  %v6683_v61 = vadd.f32 %v6682_v43, %v1058_v40 }
 0x1b5   :  { %6934 = vmatpush.bf16.msrb.mxu0 %v11005_v19  ;;  %v13254_v36 = vld [vmem:[%s20279_s1 + $0x1484] sm:$0xf]  ;;  %v10970_v37 = vld [vmem:[%s20279_s1 + $0x1490] sm:$0xf0]  ;;  %v11373_v41 = vor.u32 %v13354_v31, %v11370_v33  ;;  %v6708_v30 = vpop.f32.mrf.mxu2 }
 0x1b6   :  { %6947 = vmatpush.bf16.msrb.mxu1 %v11133_v20  ;;  %v13286_v38 = vld [vmem:[%s20279_s1 + $0x1584] sm:$0xf]  ;;  %v11098_v42 = vld [vmem:[%s20279_s1 + $0x1590] sm:$0xf0]  ;;  %v10973_v44 = vor.u32 %v13254_v36, %v10970_v37 }
 0x1b7   :  { %6960 = vmatpush.bf16.msrb.mxu2 %v11261_v21  ;;  %v13318_v45 = vld [vmem:[%s20279_s1 + $0x1684] sm:$0xf]  ;;  %v11226_v50 = vld [vmem:[%s20279_s1 + $0x1690] sm:$0xf0]  ;;  %v11101_v53 = vor.u32 %v13286_v38, %v11098_v42  ;;  %v6696_v21 = vadd.f32 %v6695_v62, %v6683_v61 }
 0x1b8   :  { %6973 = vmatpush.bf16.msrb.mxu3 %v11389_v25  ;;  %v13350_v51 = vld [vmem:[%s20279_s1 + $0x1784] sm:$0xf]  ;;  %v11354_v52 = vld [vmem:[%s20279_s1 + $0x1790] sm:$0xf0]  ;;  %v11229_v55 = vor.u32 %v13318_v45, %v11226_v50 }
 0x1b9   :  { %6935 = vmatpush.bf16.msrb.mxu0 %v10989_v35  ;;  %v13250_v56 = vld [vmem:[%s20279_s1 + $0x1464] sm:$0xf]  ;;  %v10954_v57 = vld [vmem:[%s20279_s1 + $0x1470] sm:$0xf0]  ;;  %v11357_v63 = vor.u32 %v13350_v51, %v11354_v52 }
 0x1ba   :  { %6948 = vmatpush.bf16.msrb.mxu1 %v11117_v22  ;;  %v13282_v59 = vld [vmem:[%s20279_s1 + $0x1564] sm:$0xf]  ;;  %v11082_v58 = vld [vmem:[%s20279_s1 + $0x1570] sm:$0xf0]  ;;  %v10957_v23 = vor.u32 %v13250_v56, %v10954_v57  ;;  %v6709_v22 = vadd.f32 %v6708_v30, %v6696_v21 }
 0x1bb   :  { %6961 = vmatpush.bf16.msrb.mxu2 %v11245_v32  ;;  %v13314_v3 = vld [vmem:[%s20279_s1 + $0x1664] sm:$0xf]  ;;  %v11210_v8 = vld [vmem:[%s20279_s1 + $0x1670] sm:$0xf0]  ;;  %v11085_v11 = vor.u32 %v13282_v59, %v11082_v58  ;;  %v6721_v32 = vpop.f32.mrf.mxu3 }
 0x1bc   :  { %6974 = vmatpush.bf16.msrb.mxu3 %v11373_v41  ;;  %v13346_v19 = vld [vmem:[%s20279_s1 + $0x1764] sm:$0xf]  ;;  %v11338_v20 = vld [vmem:[%s20279_s1 + $0x1770] sm:$0xf0]  ;;  %v11213_v24 = vor.u32 %v13314_v3, %v11210_v8  ;;  %v16529_v40 = vadd.f32 %v6721_v32, %v6709_v22  ;;  %v6684_v41 = vpop.f32.mrf.mxu0 }
 0x1bd   :  { %6936 = vmatpush.bf16.msrb.mxu0 %v10973_v44  ;;  %v13246_v25 = vld [vmem:[%s20279_s1 + $0x1444] sm:$0xf]  ;;  %v10938_v26 = vld [vmem:[%s20279_s1 + $0x1450] sm:$0xf0]  ;;  %v11341_v31 = vor.u32 %v13346_v19, %v11338_v20  ;;  %v6697_v44 = vpop.f32.mrf.mxu1  ;;  %v6710_v21 = vpop.f32.mrf.mxu2 }
 0x1be   :  { %6949 = vmatpush.bf16.msrb.mxu1 %v11101_v53  ;;  %v13278_v10 = vld [vmem:[%s20279_s1 + $0x1544] sm:$0xf]  ;;  %v11066_v33 = vld [vmem:[%s20279_s1 + $0x1550] sm:$0xf0]  ;;  %v10941_v39 = vor.u32 %v13246_v25, %v10938_v26 }
 0x1bf   :  { %6962 = vmatpush.bf16.msrb.mxu2 %v11229_v55  ;;  %v13310_v35 = vld [vmem:[%s20279_s1 + $0x1644] sm:$0xf]  ;;  %v11194_v36 = vld [vmem:[%s20279_s1 + $0x1650] sm:$0xf0]  ;;  %v11069_v42 = vor.u32 %v13278_v10, %v11066_v33 }
 0x1c0   :  { %6975 = vmatpush.bf16.msrb.mxu3 %v11357_v63  ;;  %v13342_v37 = vld [vmem:[%s20279_s1 + $0x1744] sm:$0xf]  ;;  %v11322_v38 = vld [vmem:[%s20279_s1 + $0x1750] sm:$0xf0]  ;;  %v11197_v45 = vor.u32 %v13310_v35, %v11194_v36 }
 0x1c1   :  { %6937 = vmatpush.bf16.msrb.mxu0 %v10957_v23  ;;  %v13242_v50 = vld [vmem:[%s20279_s1 + $0x1424] sm:$0xf]  ;;  %v10922_v51 = vld [vmem:[%s20279_s1 + $0x1430] sm:$0xf0]  ;;  %v11325_v43 = vor.u32 %v13342_v37, %v11322_v38 }
 0x1c2   :  { %6950 = vmatpush.bf16.msrb.mxu1 %v11085_v11  ;;  %v13274_v52 = vld [vmem:[%s20279_s1 + $0x1524] sm:$0xf]  ;;  %v11050_v53 = vld [vmem:[%s20279_s1 + $0x1530] sm:$0xf0]  ;;  %v10925_v61 = vor.u32 %v13242_v50, %v10922_v51 }
 0x1c3   :  { %6963 = vmatpush.bf16.msrb.mxu2 %v11213_v24  ;;  %v13306_v55 = vld [vmem:[%s20279_s1 + $0x1624] sm:$0xf]  ;;  %v11178_v56 = vld [vmem:[%s20279_s1 + $0x1630] sm:$0xf0]  ;;  %v11053_v58 = vor.u32 %v13274_v52, %v11050_v53  ;;  %v6723_v26 = vpop.f32.mrf.mxu3 }
 0x1c4   :  { %6976 = vmatpush.bf16.msrb.mxu3 %v11341_v31  ;;  %v13338_v57 = vld [vmem:[%s20279_s1 + $0x1724] sm:$0xf]  ;;  %v11306_v59 = vld [vmem:[%s20279_s1 + $0x1730] sm:$0xf0]  ;;  %v11181_v3 = vor.u32 %v13306_v55, %v11178_v56 }
 0x1c5   :  { %6938 = vmatpush.bf16.msrb.mxu0 %v10941_v39  ;;  %v13238_v62 = vld [vmem:[%s20279_s1 + $0x1404] sm:$0xf]  ;;  %v10906_v63 = vld [vmem:[%s20279_s1 + $0x1410] sm:$0xf0]  ;;  %v11309_v23 = vor.u32 %v13338_v57, %v11306_v59 }
 0x1c6   :  { %6951 = vmatpush.bf16.msrb.mxu1 %v11069_v42  ;;  %v13270_v8 = vld [vmem:[%s20279_s1 + $0x1504] sm:$0xf]  ;;  %v11034_v19 = vld [vmem:[%s20279_s1 + $0x1510] sm:$0xf0]  ;;  %v10909_v33 = vor.u32 %v13238_v62, %v10906_v63 }
 0x1c7   :  { %6964 = vmatpush.bf16.msrb.mxu2 %v11197_v45  ;;  %v13302_v20 = vld [vmem:[%s20279_s1 + $0x1604] sm:$0xf]  ;;  %v11162_v11 = vld [vmem:[%s20279_s1 + $0x1610] sm:$0xf0]  ;;  %v11037_v32 = vor.u32 %v13270_v8, %v11034_v19 }
 0x1c8   :  { %6977 = vmatpush.bf16.msrb.mxu3 %v11325_v43  ;;  %v13334_v24 = vld [vmem:[%s20279_s1 + $0x1704] sm:$0xf]  ;;  %v11290_v25 = vld [vmem:[%s20279_s1 + $0x1710] sm:$0xf0]  ;;  %v11165_v37 = vor.u32 %v13302_v20, %v11162_v11 }
 0x1c9   :  { %v13394_v10 = vld [vmem:[%s20279_s1 + $0x18e4] sm:$0xf]  ;;  %v11530_v30 = vld [vmem:[%s20279_s1 + $0x18f0] sm:$0xf0]  ;;  %6939 = vmatpush.bf16.msrb.mxu0 %v10925_v61  ;;  %v11293_v41 = vor.u32 %v13334_v24, %v11290_v25 }
 0x1ca   :  { %v13426_v31 = vld [vmem:[%s20279_s1 + $0x19e4] sm:$0xf]  ;;  %v11658_v35 = vld [vmem:[%s20279_s1 + $0x19f0] sm:$0xf0]  ;;  %6952 = vmatpush.bf16.msrb.mxu1 %v11053_v58  ;;  %v11533_v42 = vor.u32 %v13394_v10, %v11530_v30 }
 0x1cb   :  { %v13458_v36 = vld [vmem:[%s20279_s1 + $0x1ae4] sm:$0xf]  ;;  %v11786_v22 = vld [vmem:[%s20279_s1 + $0x1af0] sm:$0xf0]  ;;  %6965 = vmatpush.bf16.msrb.mxu2 %v11181_v3  ;;  %v11661_v45 = vor.u32 %v13426_v31, %v11658_v35 }
 0x1cc   :  { %v13490_v38 = vld [vmem:[%s20279_s1 + $0x1be4] sm:$0xf]  ;;  %v11914_v39 = vld [vmem:[%s20279_s1 + $0x1bf0] sm:$0xf0]  ;;  %6978 = vmatpush.bf16.msrb.mxu3 %v11309_v23  ;;  %v11789_v50 = vor.u32 %v13458_v36, %v11786_v22 }
 0x1cd   :  { %v13390_v51 = vld [vmem:[%s20279_s1 + $0x18c4] sm:$0xf]  ;;  %v11514_v52 = vld [vmem:[%s20279_s1 + $0x18d0] sm:$0xf0]  ;;  %6940 = vmatpush.bf16.msrb.mxu0 %v10909_v33  ;;  %v11917_v43 = vor.u32 %v13490_v38, %v11914_v39 }
 0x1ce   :  { %v13422_v44 = vld [vmem:[%s20279_s1 + $0x19c4] sm:$0xf]  ;;  %v11642_v53 = vld [vmem:[%s20279_s1 + $0x19d0] sm:$0xf0]  ;;  %6953 = vmatpush.bf16.msrb.mxu1 %v11037_v32  ;;  %v11517_v61 = vor.u32 %v13390_v51, %v11514_v52 }
 0x1cf   :  { %v13454_v55 = vld [vmem:[%s20279_s1 + $0x1ac4] sm:$0xf]  ;;  %v11770_v56 = vld [vmem:[%s20279_s1 + $0x1ad0] sm:$0xf0]  ;;  %6966 = vmatpush.bf16.msrb.mxu2 %v11165_v37  ;;  %v11645_v62 = vor.u32 %v13422_v44, %v11642_v53 }
 0x1d0   :  { %v13486_v57 = vld [vmem:[%s20279_s1 + $0x1bc4] sm:$0xf]  ;;  %v11898_v59 = vld [vmem:[%s20279_s1 + $0x1bd0] sm:$0xf0]  ;;  %6979 = vmatpush.bf16.msrb.mxu3 %v11293_v41  ;;  %v11773_v63 = vor.u32 %v13454_v55, %v11770_v56  ;;  %6941 = vmatmul.bf16.vlgmr.msrb.gmra.mxu0 %v14995_v4  ;;  %v6734_v41 = vpop.f32.mrf.mxu0 }
 0x1d1   :  { %6985 = vmatpush.bf16.msra.mxu0 %v11533_v42  ;;  %v13386_v58 = vld [vmem:[%s20279_s1 + $0x18a4] sm:$0xf]  ;;  %v11498_v3 = vld [vmem:[%s20279_s1 + $0x18b0] sm:$0xf0]  ;;  %v11901_v19 = vor.u32 %v13486_v57, %v11898_v59  ;;  %6954 = vmatmul.bf16.vlgmr.msrb.gmra.mxu1 %v14999_v6  ;;  %v6735_v44 = vadd.f32 %v6734_v41, %v16529_v40 }
 0x1d2   :  { %6998 = vmatpush.bf16.msra.mxu1 %v11661_v45  ;;  %v13418_v8 = vld [vmem:[%s20279_s1 + $0x19a4] sm:$0xf]  ;;  %v11626_v20 = vld [vmem:[%s20279_s1 + $0x19b0] sm:$0xf0]  ;;  %6967 = vmatmul.bf16.vlgmr.msrb.gmra.mxu2 %v14997_v5  ;;  %v11501_v25 = vor.u32 %v13386_v58, %v11498_v3 }
 0x1d3   :  { %7011 = vmatpush.bf16.msra.mxu2 %v11789_v50  ;;  %v13450_v21 = vld [vmem:[%s20279_s1 + $0x1aa4] sm:$0xf]  ;;  %v11754_v23 = vld [vmem:[%s20279_s1 + $0x1ab0] sm:$0xf0]  ;;  %6980 = vmatmul.bf16.vlgmr.msrb.gmra.mxu3 %v15001_v7  ;;  %v11629_v26 = vor.u32 %v13418_v8, %v11626_v20 }
 0x1d4   :  { %7024 = vmatpush.bf16.msra.mxu3 %v11917_v43  ;;  %v13482_v11 = vld [vmem:[%s20279_s1 + $0x1ba4] sm:$0xf]  ;;  %v11882_v24 = vld [vmem:[%s20279_s1 + $0x1bb0] sm:$0xf0]  ;;  %v11757_v10 = vor.u32 %v13450_v21, %v11754_v23  ;;  %v6747_v43 = vpop.f32.mrf.mxu1 }
 0x1d5   :  { %6986 = vmatpush.bf16.msra.mxu0 %v11517_v61  ;;  %v13382_v30 = vld [vmem:[%s20279_s1 + $0x1884] sm:$0xf]  ;;  %v11482_v31 = vld [vmem:[%s20279_s1 + $0x1890] sm:$0xf0]  ;;  %v11885_v35 = vor.u32 %v13482_v11, %v11882_v24  ;;  %v6748_v61 = vadd.f32 %v6747_v43, %v6735_v44  ;;  %v6760_v20 = vpop.f32.mrf.mxu2 }
 0x1d6   :  { %6999 = vmatpush.bf16.msra.mxu1 %v11645_v62  ;;  %v13414_v33 = vld [vmem:[%s20279_s1 + $0x1984] sm:$0xf]  ;;  %v11610_v36 = vld [vmem:[%s20279_s1 + $0x1990] sm:$0xf0]  ;;  %v11485_v39 = vor.u32 %v13382_v30, %v11482_v31 }
 0x1d7   :  { %7012 = vmatpush.bf16.msra.mxu2 %v11773_v63  ;;  %v13446_v22 = vld [vmem:[%s20279_s1 + $0x1a84] sm:$0xf]  ;;  %v11738_v32 = vld [vmem:[%s20279_s1 + $0x1a90] sm:$0xf0]  ;;  %v11613_v42 = vor.u32 %v13414_v33, %v11610_v36 }
 0x1d8   :  { %7025 = vmatpush.bf16.msra.mxu3 %v11901_v19  ;;  %v13478_v37 = vld [vmem:[%s20279_s1 + $0x1b84] sm:$0xf]  ;;  %v11866_v38 = vld [vmem:[%s20279_s1 + $0x1b90] sm:$0xf0]  ;;  %v11741_v45 = vor.u32 %v13446_v22, %v11738_v32 }
 0x1d9   :  { %6987 = vmatpush.bf16.msra.mxu0 %v11501_v25  ;;  %v13378_v50 = vld [vmem:[%s20279_s1 + $0x1864] sm:$0xf]  ;;  %v11466_v51 = vld [vmem:[%s20279_s1 + $0x1870] sm:$0xf0]  ;;  %v11869_v53 = vor.u32 %v13478_v37, %v11866_v38  ;;  %v6761_v25 = vadd.f32 %v6760_v20, %v6748_v61 }
 0x1da   :  { %7000 = vmatpush.bf16.msra.mxu1 %v11629_v26  ;;  %v13410_v52 = vld [vmem:[%s20279_s1 + $0x1964] sm:$0xf]  ;;  %v11594_v55 = vld [vmem:[%s20279_s1 + $0x1970] sm:$0xf0]  ;;  %v11469_v62 = vor.u32 %v13378_v50, %v11466_v51  ;;  %v6773_v26 = vpop.f32.mrf.mxu3 }
 0x1db   :  { %7013 = vmatpush.bf16.msra.mxu2 %v11757_v10  ;;  %v13442_v56 = vld [vmem:[%s20279_s1 + $0x1a64] sm:$0xf]  ;;  %v11722_v57 = vld [vmem:[%s20279_s1 + $0x1a70] sm:$0xf0]  ;;  %v11597_v63 = vor.u32 %v13410_v52, %v11594_v55  ;;  %v16728_v33 = vadd.f32 %v6773_v26, %v6761_v25 }
 0x1dc   :  { %7026 = vmatpush.bf16.msra.mxu3 %v11885_v35  ;;  %v13474_v59 = vld [vmem:[%s20279_s1 + $0x1b64] sm:$0xf]  ;;  %v11850_v40 = vld [vmem:[%s20279_s1 + $0x1b70] sm:$0xf0]  ;;  %v11725_v58 = vor.u32 %v13442_v56, %v11722_v57  ;;  %v6736_v35 = vpop.f32.mrf.mxu0 }
 0x1dd   :  { %6988 = vmatpush.bf16.msra.mxu0 %v11485_v39  ;;  %v13374_v3 = vld [vmem:[%s20279_s1 + $0x1844] sm:$0xf]  ;;  %v11450_v8 = vld [vmem:[%s20279_s1 + $0x1850] sm:$0xf0]  ;;  %v11853_v21 = vor.u32 %v13474_v59, %v11850_v40  ;;  %v6749_v39 = vpop.f32.mrf.mxu1  ;;  %v6762_v61 = vpop.f32.mrf.mxu2 }
 0x1de   :  { %7001 = vmatpush.bf16.msra.mxu1 %v11613_v42  ;;  %v13406_v19 = vld [vmem:[%s20279_s1 + $0x1944] sm:$0xf]  ;;  %v11578_v23 = vld [vmem:[%s20279_s1 + $0x1950] sm:$0xf0]  ;;  %v11453_v31 = vor.u32 %v13374_v3, %v11450_v8 }
 0x1df   :  { %7014 = vmatpush.bf16.msra.mxu2 %v11741_v45  ;;  %v13438_v11 = vld [vmem:[%s20279_s1 + $0x1a44] sm:$0xf]  ;;  %v11706_v24 = vld [vmem:[%s20279_s1 + $0x1a50] sm:$0xf0]  ;;  %v11581_v36 = vor.u32 %v13406_v19, %v11578_v23 }
 0x1e0   :  { %7027 = vmatpush.bf16.msra.mxu3 %v11869_v53  ;;  %v13470_v10 = vld [vmem:[%s20279_s1 + $0x1b44] sm:$0xf]  ;;  %v11834_v30 = vld [vmem:[%s20279_s1 + $0x1b50] sm:$0xf0]  ;;  %v11709_v22 = vor.u32 %v13438_v11, %v11706_v24 }
 0x1e1   :  { %6989 = vmatpush.bf16.msra.mxu0 %v11469_v62  ;;  %v13370_v32 = vld [vmem:[%s20279_s1 + $0x1824] sm:$0xf]  ;;  %v11434_v37 = vld [vmem:[%s20279_s1 + $0x1830] sm:$0xf0]  ;;  %v11837_v41 = vor.u32 %v13470_v10, %v11834_v30 }
 0x1e2   :  { %7002 = vmatpush.bf16.msra.mxu1 %v11597_v63  ;;  %v13402_v38 = vld [vmem:[%s20279_s1 + $0x1924] sm:$0xf]  ;;  %v11562_v42 = vld [vmem:[%s20279_s1 + $0x1930] sm:$0xf0]  ;;  %v11437_v44 = vor.u32 %v13370_v32, %v11434_v37  ;;  %v6775_v8 = vpop.f32.mrf.mxu3 }
 0x1e3   :  { %7015 = vmatpush.bf16.msra.mxu2 %v11725_v58  ;;  %v13434_v45 = vld [vmem:[%s20279_s1 + $0x1a24] sm:$0xf]  ;;  %v11690_v50 = vld [vmem:[%s20279_s1 + $0x1a30] sm:$0xf0]  ;;  %v11565_v55 = vor.u32 %v13402_v38, %v11562_v42 }
 0x1e4   :  { %7028 = vmatpush.bf16.msra.mxu3 %v11853_v21  ;;  %v13466_v51 = vld [vmem:[%s20279_s1 + $0x1b24] sm:$0xf]  ;;  %v11818_v52 = vld [vmem:[%s20279_s1 + $0x1b30] sm:$0xf0]  ;;  %v11693_v56 = vor.u32 %v13434_v45, %v11690_v50 }
 0x1e5   :  { %6990 = vmatpush.bf16.msra.mxu0 %v11453_v31  ;;  %v13366_v43 = vld [vmem:[%s20279_s1 + $0x1804] sm:$0xf]  ;;  %v11418_v53 = vld [vmem:[%s20279_s1 + $0x1810] sm:$0xf0]  ;;  %v11821_v62 = vor.u32 %v13466_v51, %v11818_v52 }
 0x1e6   :  { %7003 = vmatpush.bf16.msra.mxu1 %v11581_v36  ;;  %v13398_v57 = vld [vmem:[%s20279_s1 + $0x1904] sm:$0xf]  ;;  %v11546_v59 = vld [vmem:[%s20279_s1 + $0x1910] sm:$0xf0]  ;;  %v11421_v23 = vor.u32 %v13366_v43, %v11418_v53 }
 0x1e7   :  { %7016 = vmatpush.bf16.msra.mxu2 %v11709_v22  ;;  %v13430_v40 = vld [vmem:[%s20279_s1 + $0x1a04] sm:$0xf]  ;;  %v11674_v63 = vld [vmem:[%s20279_s1 + $0x1a10] sm:$0xf0]  ;;  %v11549_v26 = vor.u32 %v13398_v57, %v11546_v59 }
 0x1e8   :  { %7029 = vmatpush.bf16.msra.mxu3 %v11837_v41  ;;  %v13462_v58 = vld [vmem:[%s20279_s1 + $0x1b04] sm:$0xf]  ;;  %v11802_v3 = vld [vmem:[%s20279_s1 + $0x1b10] sm:$0xf0]  ;;  %v11677_v10 = vor.u32 %v13430_v40, %v11674_v63 }
 0x1e9   :  { %v13522_v19 = vld [vmem:[%s20279_s1 + $0x1ce4] sm:$0xf]  ;;  %v12042_v20 = vld [vmem:[%s20279_s1 + $0x1cf0] sm:$0xf0]  ;;  %6991 = vmatpush.bf16.msra.mxu0 %v11437_v44  ;;  %v11805_v35 = vor.u32 %v13462_v58, %v11802_v3  ;;  %v13668_v3 = vld [vmem:[#allocation1 + $0x9] sm:$0xff] }
 0x1ea   :  { %v13554_v21 = vld [vmem:[%s20279_s1 + $0x1de4] sm:$0xf]  ;;  %v12170_v11 = vld [vmem:[%s20279_s1 + $0x1df0] sm:$0xf0]  ;;  %7004 = vmatpush.bf16.msra.mxu1 %v11565_v55  ;;  %v12045_v36 = vor.u32 %v13522_v19, %v12042_v20  ;;  %v13669_v20 = vld [vmem:[#allocation1 + $0x1b] sm:$0xff] }
 0x1eb   :  { %v13586_v24 = vld [vmem:[%s20279_s1 + $0x1ee4] sm:$0xf]  ;;  %v12298_v25 = vld [vmem:[%s20279_s1 + $0x1ef0] sm:$0xf0]  ;;  %7017 = vmatpush.bf16.msra.mxu2 %v11693_v56  ;;  %v12173_v22 = vor.u32 %v13554_v21, %v12170_v11 }
 0x1ec   :  { %v13618_v30 = vld [vmem:[%s20279_s1 + $0x1fe4] sm:$0xf]  ;;  %v12426_v31 = vld [vmem:[%s20279_s1 + $0x1ff0] sm:$0xf0]  ;;  %7030 = vmatpush.bf16.msra.mxu3 %v11821_v62  ;;  %v12301_v32 = vor.u32 %v13586_v24, %v12298_v25 }
 0x1ed   :  { %v13518_v37 = vld [vmem:[%s20279_s1 + $0x1cc4] sm:$0xf]  ;;  %v12026_v38 = vld [vmem:[%s20279_s1 + $0x1cd0] sm:$0xf0]  ;;  %6992 = vmatpush.bf16.msra.mxu0 %v11421_v23  ;;  %v12429_v41 = vor.u32 %v13618_v30, %v12426_v31 }
 0x1ee   :  { %v13550_v39 = vld [vmem:[%s20279_s1 + $0x1dc4] sm:$0xf]  ;;  %v12154_v42 = vld [vmem:[%s20279_s1 + $0x1dd0] sm:$0xf0]  ;;  %7005 = vmatpush.bf16.msra.mxu1 %v11549_v26  ;;  %v12029_v44 = vor.u32 %v13518_v37, %v12026_v38 }
 0x1ef   :  { %v13582_v45 = vld [vmem:[%s20279_s1 + $0x1ec4] sm:$0xf]  ;;  %v12282_v50 = vld [vmem:[%s20279_s1 + $0x1ed0] sm:$0xf0]  ;;  %7018 = vmatpush.bf16.msra.mxu2 %v11677_v10  ;;  %v12157_v43 = vor.u32 %v13550_v39, %v12154_v42  ;;  %v6799_v39 = vpop.f32.mrf.mxu1 }
 0x1f0   :  { %v13614_v51 = vld [vmem:[%s20279_s1 + $0x1fc4] sm:$0xf]  ;;  %v12410_v52 = vld [vmem:[%s20279_s1 + $0x1fd0] sm:$0xf0]  ;;  %7031 = vmatpush.bf16.msra.mxu3 %v11805_v35  ;;  %v12285_v53 = vor.u32 %v13582_v45, %v12282_v50 }
 0x1f1   :  { %7037 = vmatpush.bf16.msrb.mxu0 %v12045_v36  ;;  %v13514_v55 = vld [vmem:[%s20279_s1 + $0x1ca4] sm:$0xf]  ;;  %v12010_v56 = vld [vmem:[%s20279_s1 + $0x1cb0] sm:$0xf0]  ;;  %v12413_v40 = vor.u32 %v13614_v51, %v12410_v52  ;;  %7006 = vmatmul.bf16.vlgmr.msra.gmra.mxu1 %v13668_v3  ;;  %v6786_v36 = vpop.f32.mrf.mxu0 }
 0x1f2   :  { %7050 = vmatpush.bf16.msrb.mxu1 %v12173_v22  ;;  %v13546_v57 = vld [vmem:[%s20279_s1 + $0x1da4] sm:$0xf]  ;;  %v12138_v61 = vld [vmem:[%s20279_s1 + $0x1db0] sm:$0xf0]  ;;  %v12013_v21 = vor.u32 %v13514_v55, %v12010_v56  ;;  %v6787_v37 = vadd.f32 %v6786_v36, %v16728_v33 }
 0x1f3   :  { %7063 = vmatpush.bf16.msrb.mxu2 %v12301_v32  ;;  %v13666_v59 = vld [vmem:[#allocation1] sm:$0xff]  ;;  %v12266_v63 = vld [vmem:[%s20279_s1 + $0x1eb0] sm:$0xf0]  ;;  %7032 = vmatmul.bf16.vlgmr.msra.gmra.mxu3 %v13669_v20  ;;  %v12141_v23 = vor.u32 %v13546_v57, %v12138_v61 }
 0x1f4   :  { %7076 = vmatpush.bf16.msrb.mxu3 %v12429_v41  ;;  %6993 = vmatmul.bf16.vlgmr.msra.gmra.mxu0 %v13666_v59  ;;  %v13578_v62 = vld [vmem:[%s20279_s1 + $0x1ea4] sm:$0xf]  ;;  %v13667_v58 = vld [vmem:[#allocation1 + $0x12] sm:$0xff]  ;;  %v6800_v52 = vadd.f32 %v6799_v39, %v6787_v37 }
 0x1f5   :  { %7019 = vmatmul.bf16.vlgmr.msra.gmra.mxu2 %v13667_v58  ;;  %v13610_v8 = vld [vmem:[%s20279_s1 + $0x1fa4] sm:$0xf]  ;;  %v12394_v19 = vld [vmem:[%s20279_s1 + $0x1fb0] sm:$0xf0]  ;;  %7038 = vmatpush.bf16.msrb.mxu0 %v12029_v44  ;;  %v12269_v11 = vor.u32 %v13578_v62, %v12266_v63  ;;  %v6812_v3 = vpop.f32.mrf.mxu2 }
 0x1f6   :  { %7051 = vmatpush.bf16.msrb.mxu1 %v12157_v43  ;;  %v13510_v24 = vld [vmem:[%s20279_s1 + $0x1c84] sm:$0xf]  ;;  %v11994_v25 = vld [vmem:[%s20279_s1 + $0x1c90] sm:$0xf0]  ;;  %v12397_v10 = vor.u32 %v13610_v8, %v12394_v19 }
 0x1f7   :  { %7064 = vmatpush.bf16.msrb.mxu2 %v12285_v53  ;;  %v13542_v26 = vld [vmem:[%s20279_s1 + $0x1d84] sm:$0xf]  ;;  %v12122_v30 = vld [vmem:[%s20279_s1 + $0x1d90] sm:$0xf0]  ;;  %v11997_v38 = vor.u32 %v13510_v24, %v11994_v25 }
 0x1f8   :  { %7077 = vmatpush.bf16.msrb.mxu3 %v12413_v40  ;;  %v13574_v31 = vld [vmem:[%s20279_s1 + $0x1e84] sm:$0xf]  ;;  %v12250_v35 = vld [vmem:[%s20279_s1 + $0x1e90] sm:$0xf0]  ;;  %v12125_v41 = vor.u32 %v13542_v26, %v12122_v30 }
 0x1f9   :  { %v13606_v22 = vld [vmem:[%s20279_s1 + $0x1f84] sm:$0xf]  ;;  %v12378_v32 = vld [vmem:[%s20279_s1 + $0x1f90] sm:$0xf0]  ;;  %7039 = vmatpush.bf16.msrb.mxu0 %v12013_v21  ;;  %v12253_v42 = vor.u32 %v13574_v31, %v12250_v35  ;;  %v6813_v21 = vadd.f32 %v6812_v3, %v6800_v52  ;;  %v6788_v25 = vpop.f32.mrf.mxu0 }
 0x1fa   :  { %7052 = vmatpush.bf16.msrb.mxu1 %v12141_v23  ;;  %v13506_v45 = vld [vmem:[%s20279_s1 + $0x1c64] sm:$0xf]  ;;  %v11978_v50 = vld [vmem:[%s20279_s1 + $0x1c70] sm:$0xf0]  ;;  %v12381_v33 = vor.u32 %v13606_v22, %v12378_v32  ;;  %v6825_v23 = vpop.f32.mrf.mxu3  ;;  %v12725_v25 = vld [vmem:[%s20279_s1 + $0x3f4] sm:$0xf0] }
 0x1fb   :  { %7065 = vmatpush.bf16.msrb.mxu2 %v12269_v11  ;;  %v13538_v51 = vld [vmem:[%s20279_s1 + $0x1d64] sm:$0xf]  ;;  %v12106_v44 = vld [vmem:[%s20279_s1 + $0x1d70] sm:$0xf0]  ;;  %v11981_v57 = vor.u32 %v13506_v45, %v11978_v50  ;;  %v16923_v30 = vadd.f32 %v6825_v23, %v6813_v21  ;;  %v12693_v21 = vld [vmem:[%s20279_s1 + $0x2f4] sm:$0xf0] }
 0x1fc   :  { %7078 = vmatpush.bf16.msrb.mxu3 %v12397_v10  ;;  %v13570_v43 = vld [vmem:[%s20279_s1 + $0x1e64] sm:$0xf]  ;;  %v12234_v53 = vld [vmem:[%s20279_s1 + $0x1e70] sm:$0xf0]  ;;  %v12109_v59 = vor.u32 %v13538_v51, %v12106_v44  ;;  %v6801_v10 = vpop.f32.mrf.mxu1 }
 0x1fd   :  { %v13602_v55 = vld [vmem:[%s20279_s1 + $0x1f64] sm:$0xf]  ;;  %v12362_v56 = vld [vmem:[%s20279_s1 + $0x1f70] sm:$0xf0]  ;;  %7040 = vmatpush.bf16.msrb.mxu0 %v11997_v38  ;;  %v12237_v40 = vor.u32 %v13570_v43, %v12234_v53 }
 0x1fe   :  { %7053 = vmatpush.bf16.msrb.mxu1 %v12125_v41  ;;  %v13502_v61 = vld [vmem:[%s20279_s1 + $0x1c44] sm:$0xf]  ;;  %v11962_v62 = vld [vmem:[%s20279_s1 + $0x1c50] sm:$0xf0]  ;;  %v12365_v58 = vor.u32 %v13602_v55, %v12362_v56 }
 0x1ff   :  { %7066 = vmatpush.bf16.msrb.mxu2 %v12253_v42  ;;  %v13534_v63 = vld [vmem:[%s20279_s1 + $0x1d44] sm:$0xf]  ;;  %v12090_v8 = vld [vmem:[%s20279_s1 + $0x1d50] sm:$0xf0]  ;;  %v11965_v26 = vor.u32 %v13502_v61, %v11962_v62  ;;  %v6814_v61 = vpop.f32.mrf.mxu2  ;;  %v8464_v62 = vld [vmem:[%s20279_s1 + $0xe8] sm:$0xf] }
 0x200   :  { %7079 = vmatpush.bf16.msrb.mxu3 %v12381_v33  ;;  %v13566_v19 = vld [vmem:[%s20279_s1 + $0x1e44] sm:$0xf]  ;;  %v12218_v20 = vld [vmem:[%s20279_s1 + $0x1e50] sm:$0xf0]  ;;  %v12093_v31 = vor.u32 %v13534_v63, %v12090_v8  ;;  %v12629_v63 = vld [vmem:[%s20279_s1 + $0xf4] sm:$0xf0] }
 0x201   :  { %v13598_v11 = vld [vmem:[%s20279_s1 + $0x1f44] sm:$0xf]  ;;  %v12346_v24 = vld [vmem:[%s20279_s1 + $0x1f50] sm:$0xf0]  ;;  %7041 = vmatpush.bf16.msrb.mxu0 %v11981_v57  ;;  %v12221_v35 = vor.u32 %v13566_v19, %v12218_v20  ;;  %v12661_v19 = vld [vmem:[%s20279_s1 + $0x1f4] sm:$0xf0]  ;;  %v8465_v10 = vor.u32 %v12629_v63, %v8464_v62 }
 0x202   :  { %7054 = vmatpush.bf16.msrb.mxu1 %v12109_v59  ;;  %v13498_v36 = vld [vmem:[%s20279_s1 + $0x1c24] sm:$0xf]  ;;  %v11946_v22 = vld [vmem:[%s20279_s1 + $0x1c30] sm:$0xf0]  ;;  %v12349_v37 = vor.u32 %v13598_v11, %v12346_v24  ;;  %v6827_v3 = vpop.f32.mrf.mxu3  ;;  %v8720_v20 = vld [vmem:[%s20279_s1 + $0x2e8] sm:$0xf] }
 0x203   :  { %7067 = vmatpush.bf16.msrb.mxu2 %v12237_v40  ;;  %v13530_v32 = vld [vmem:[%s20279_s1 + $0x1d24] sm:$0xf]  ;;  %v12074_v38 = vld [vmem:[%s20279_s1 + $0x1d30] sm:$0xf0]  ;;  %v11949_v50 = vor.u32 %v13498_v36, %v11946_v22  ;;  %v8848_v24 = vld [vmem:[%s20279_s1 + $0x3e8] sm:$0xf] }
 0x204   :  { %7080 = vmatpush.bf16.msrb.mxu3 %v12365_v58  ;;  %v13562_v39 = vld [vmem:[%s20279_s1 + $0x1e24] sm:$0xf]  ;;  %v12202_v41 = vld [vmem:[%s20279_s1 + $0x1e30] sm:$0xf0]  ;;  %v12077_v52 = vor.u32 %v13530_v32, %v12074_v38  ;;  %v8592_v58 = vld [vmem:[%s20279_s1 + $0x1e8] sm:$0xf] }
 0x205   :  { %v13594_v42 = vld [vmem:[%s20279_s1 + $0x1f24] sm:$0xf]  ;;  %v12330_v45 = vld [vmem:[%s20279_s1 + $0x1f30] sm:$0xf0]  ;;  %7042 = vmatpush.bf16.msrb.mxu0 %v11965_v26  ;;  %v12205_v44 = vor.u32 %v13562_v39, %v12202_v41  ;;  %v8448_v36 = vld [vmem:[%s20279_s1 + $0xc8] sm:$0xf] }
 0x206   :  { %v13494_v51 = vld [vmem:[%s20279_s1 + $0x1c04] sm:$0xf]  ;;  %v11930_v33 = vld [vmem:[%s20279_s1 + $0x1c10] sm:$0xf0]  ;;  %7055 = vmatpush.bf16.msrb.mxu1 %v12093_v31  ;;  %v12333_v56 = vor.u32 %v13594_v42, %v12330_v45  ;;  %v8593_v31 = vor.u32 %v12661_v19, %v8592_v58  ;;  %v12625_v22 = vld [vmem:[%s20279_s1 + $0xd4] sm:$0xf0] }
 0x207   :  { %7068 = vmatpush.bf16.msrb.mxu2 %v12221_v35  ;;  %v13526_v43 = vld [vmem:[%s20279_s1 + $0x1d04] sm:$0xf]  ;;  %v12058_v53 = vld [vmem:[%s20279_s1 + $0x1d10] sm:$0xf0]  ;;  %v11933_v8 = vor.u32 %v13494_v51, %v11930_v33  ;;  %v8721_v35 = vor.u32 %v12693_v21, %v8720_v20  ;;  %v8576_v32 = vld [vmem:[%s20279_s1 + $0x1c8] sm:$0xf] }
 0x208   :  { %v13558_v55 = vld [vmem:[%s20279_s1 + $0x1e04] sm:$0xf]  ;;  %7081 = vmatpush.bf16.msrb.mxu3 %v12349_v37  ;;  %v12186_v57 = vld [vmem:[%s20279_s1 + $0x1e10] sm:$0xf0]  ;;  %v12061_v23 = vor.u32 %v13526_v43, %v12058_v53  ;;  %v8849_v37 = vor.u32 %v12725_v25, %v8848_v24  ;;  %v12657_v38 = vld [vmem:[%s20279_s1 + $0x1d4] sm:$0xf0] }
 0x209   :  { %v13590_v59 = vld [vmem:[%s20279_s1 + $0x1f04] sm:$0xf]  ;;  %v12314_v40 = vld [vmem:[%s20279_s1 + $0x1f10] sm:$0xf0]  ;;  %7043 = vmatpush.bf16.msrb.mxu0 %v11949_v50  ;;  %v12189_v11 = vor.u32 %v13558_v55, %v12186_v57  ;;  %v8704_v39 = vld [vmem:[%s20279_s1 + $0x2c8] sm:$0xf]  ;;  %v8449_v50 = vor.u32 %v12625_v22, %v8448_v36  ;;  %v8577_v51 = vor.u32 %v12657_v38, %v8576_v32 }
 0x20a   :  { %7056 = vmatpush.bf16.msrb.mxu1 %v12077_v52  ;;  %v12317_v26 = vor.u32 %v13590_v59, %v12314_v40  ;;  %v12689_v41 = vld [vmem:[%s20279_s1 + $0x2d4] sm:$0xf0]  ;;  %v8832_v42 = vld [vmem:[%s20279_s1 + $0x3c8] sm:$0xf]  ;;  %v13672_v61 = vld [vmem:[#allocation1 + $0x2d] sm:$0xff] }
 0x20b   :  { %7069 = vmatpush.bf16.msrb.mxu2 %v12205_v44  ;;  %v12721_v45 = vld [vmem:[%s20279_s1 + $0x3d4] sm:$0xf0]  ;;  %v8705_v33 = vor.u32 %v12689_v41, %v8704_v39  ;;  %v8432_v52 = vld [vmem:[%s20279_s1 + $0xa8] sm:$0xf]  ;;  %v13673_v58 = vld [vmem:[#allocation1 + $0x3f] sm:$0xff] }
 0x20c   :  { %7082 = vmatpush.bf16.msrb.mxu3 %v12333_v56  ;;  %v12621_v44 = vld [vmem:[%s20279_s1 + $0xb4] sm:$0xf0]  ;;  %v8560_v43 = vld [vmem:[%s20279_s1 + $0x1a8] sm:$0xf]  ;;  %v8833_v55 = vor.u32 %v12721_v45, %v8832_v42 }
 0x20d   :  { %7044 = vmatpush.bf16.msrb.mxu0 %v11933_v8  ;;  %v13670_v53 = vld [vmem:[#allocation1 + $0x24] sm:$0xff]  ;;  %v12653_v56 = vld [vmem:[%s20279_s1 + $0x1b4] sm:$0xf0]  ;;  %v8433_v3 = vor.u32 %v12621_v44, %v8432_v52 }
 0x20e   :  { %7057 = vmatpush.bf16.msrb.mxu1 %v12061_v23  ;;  %v8688_v57 = vld [vmem:[%s20279_s1 + $0x2a8] sm:$0xf]  ;;  %v12685_v59 = vld [vmem:[%s20279_s1 + $0x2b4] sm:$0xf0]  ;;  %v8561_v8 = vor.u32 %v12653_v56, %v8560_v43  ;;  %v6851_v32 = vpop.f32.mrf.mxu1 }
 0x20f   :  { %7070 = vmatpush.bf16.msrb.mxu2 %v12189_v11  ;;  %v13671_v40 = vld [vmem:[#allocation1 + $0x36] sm:$0xff]  ;;  %v8816_v62 = vld [vmem:[%s20279_s1 + $0x3a8] sm:$0xf]  ;;  %v8689_v19 = vor.u32 %v12685_v59, %v8688_v57 }
 0x210   :  { %7083 = vmatpush.bf16.msrb.mxu3 %v12317_v26  ;;  %7045 = vmatmul.bf16.vlgmr.msrb.gmra.mxu0 %v13670_v53  ;;  %v12717_v63 = vld [vmem:[%s20279_s1 + $0x3b4] sm:$0xf0]  ;;  %v8416_v20 = vld [vmem:[%s20279_s1 + $0x88] sm:$0xf] }
 0x211   :  { %7089 = vmatpush.bf16.msra.mxu0 %v8465_v10  ;;  %7058 = vmatmul.bf16.vlgmr.msrb.gmra.mxu1 %v13672_v61  ;;  %v12617_v21 = vld [vmem:[%s20279_s1 + $0x94] sm:$0xf0]  ;;  %v8544_v23 = vld [vmem:[%s20279_s1 + $0x188] sm:$0xf]  ;;  %v8817_v11 = vor.u32 %v12717_v63, %v8816_v62  ;;  %v6838_v10 = vpop.f32.mrf.mxu0 }
 0x212   :  { %7102 = vmatpush.bf16.msra.mxu1 %v8593_v31  ;;  %7071 = vmatmul.bf16.vlgmr.msrb.gmra.mxu2 %v13671_v40  ;;  %v12649_v24 = vld [vmem:[%s20279_s1 + $0x194] sm:$0xf0]  ;;  %v8672_v25 = vld [vmem:[%s20279_s1 + $0x288] sm:$0xf]  ;;  %v6839_v36 = vadd.f32 %v6838_v10, %v16923_v30  ;;  %v8417_v22 = vor.u32 %v12617_v21, %v8416_v20 }
 0x213   :  { %7115 = vmatpush.bf16.msra.mxu2 %v8721_v35  ;;  %7084 = vmatmul.bf16.vlgmr.msrb.gmra.mxu3 %v13673_v58  ;;  %v12681_v26 = vld [vmem:[%s20279_s1 + $0x294] sm:$0xf0]  ;;  %v8800_v31 = vld [vmem:[%s20279_s1 + $0x388] sm:$0xf] }
 0x214   :  { %7128 = vmatpush.bf16.msra.mxu3 %v8849_v37  ;;  %v12713_v35 = vld [vmem:[%s20279_s1 + $0x394] sm:$0xf0]  ;;  %v8545_v37 = vor.u32 %v12649_v24, %v8544_v23  ;;  %v8673_v38 = vor.u32 %v12681_v26, %v8672_v25  ;;  %v8400_v39 = vld [vmem:[%s20279_s1 + $0x68] sm:$0xf]  ;;  %v6852_v45 = vadd.f32 %v6851_v32, %v6839_v36 }
 0x215   :  { %7090 = vmatpush.bf16.msra.mxu0 %v8449_v50  ;;  %v12613_v41 = vld [vmem:[%s20279_s1 + $0x74] sm:$0xf0]  ;;  %v8528_v42 = vld [vmem:[%s20279_s1 + $0x168] sm:$0xf]  ;;  %v8801_v30 = vor.u32 %v12713_v35, %v8800_v31  ;;  %v6864_v61 = vpop.f32.mrf.mxu2 }
 0x216   :  { %7103 = vmatpush.bf16.msra.mxu1 %v8577_v51  ;;  %v12645_v50 = vld [vmem:[%s20279_s1 + $0x174] sm:$0xf0]  ;;  %v8656_v51 = vld [vmem:[%s20279_s1 + $0x268] sm:$0xf]  ;;  %v8401_v43 = vor.u32 %v12613_v41, %v8400_v39 }
 0x217   :  { %7116 = vmatpush.bf16.msra.mxu2 %v8705_v33  ;;  %v12677_v33 = vld [vmem:[%s20279_s1 + $0x274] sm:$0xf0]  ;;  %v8784_v52 = vld [vmem:[%s20279_s1 + $0x368] sm:$0xf]  ;;  %v8529_v53 = vor.u32 %v12645_v50, %v8528_v42 }
 0x218   :  { %7129 = vmatpush.bf16.msra.mxu3 %v8833_v55  ;;  %v12709_v44 = vld [vmem:[%s20279_s1 + $0x374] sm:$0xf0]  ;;  %v8657_v55 = vor.u32 %v12677_v33, %v8656_v51  ;;  %v8384_v56 = vld [vmem:[%s20279_s1 + $0x48] sm:$0xf] }
 0x219   :  { %7091 = vmatpush.bf16.msra.mxu0 %v8433_v3  ;;  %v12609_v57 = vld [vmem:[%s20279_s1 + $0x54] sm:$0xf0]  ;;  %v8512_v59 = vld [vmem:[%s20279_s1 + $0x148] sm:$0xf]  ;;  %v8785_v40 = vor.u32 %v12709_v44, %v8784_v52  ;;  %v6865_v3 = vadd.f32 %v6864_v61, %v6852_v45  ;;  %v6840_v21 = vpop.f32.mrf.mxu0 }
 0x21a   :  { %7104 = vmatpush.bf16.msra.mxu1 %v8561_v8  ;;  %v12641_v62 = vld [vmem:[%s20279_s1 + $0x154] sm:$0xf0]  ;;  %v8640_v63 = vld [vmem:[%s20279_s1 + $0x248] sm:$0xf]  ;;  %v6877_v8 = vpop.f32.mrf.mxu3  ;;  %v8385_v23 = vor.u32 %v12609_v57, %v8384_v56 }
 0x21b   :  { %7117 = vmatpush.bf16.msra.mxu2 %v8689_v19  ;;  %v12673_v58 = vld [vmem:[%s20279_s1 + $0x254] sm:$0xf0]  ;;  %v8768_v19 = vld [vmem:[%s20279_s1 + $0x348] sm:$0xf]  ;;  %v17118_v24 = vadd.f32 %v6877_v8, %v6865_v3  ;;  %v8513_v25 = vor.u32 %v12641_v62, %v8512_v59 }
 0x21c   :  { %7130 = vmatpush.bf16.msra.mxu3 %v8817_v11  ;;  %v12705_v20 = vld [vmem:[%s20279_s1 + $0x354] sm:$0xf0]  ;;  %v6853_v11 = vpop.f32.mrf.mxu1  ;;  %v8641_v26 = vor.u32 %v12673_v58, %v8640_v63  ;;  %v8368_v10 = vld [vmem:[%s20279_s1 + $0x28] sm:$0xf] }
 0x21d   :  { %7092 = vmatpush.bf16.msra.mxu0 %v8417_v22  ;;  %v12605_v31 = vld [vmem:[%s20279_s1 + $0x34] sm:$0xf0]  ;;  %v8496_v35 = vld [vmem:[%s20279_s1 + $0x128] sm:$0xf]  ;;  %v8769_v36 = vor.u32 %v12705_v20, %v8768_v19  ;;  %v6866_v56 = vpop.f32.mrf.mxu2 }
 0x21e   :  { %7105 = vmatpush.bf16.msra.mxu1 %v8545_v37  ;;  %v12637_v22 = vld [vmem:[%s20279_s1 + $0x134] sm:$0xf0]  ;;  %v8624_v32 = vld [vmem:[%s20279_s1 + $0x228] sm:$0xf]  ;;  %v8369_v41 = vor.u32 %v12605_v31, %v8368_v10 }
 0x21f   :  { %7118 = vmatpush.bf16.msra.mxu2 %v8673_v38  ;;  %v12669_v37 = vld [vmem:[%s20279_s1 + $0x234] sm:$0xf0]  ;;  %v8752_v38 = vld [vmem:[%s20279_s1 + $0x328] sm:$0xf]  ;;  %v8497_v45 = vor.u32 %v12637_v22, %v8496_v35 }
 0x220   :  { %7131 = vmatpush.bf16.msra.mxu3 %v8801_v30  ;;  %v12701_v39 = vld [vmem:[%s20279_s1 + $0x334] sm:$0xf0]  ;;  %v8352_v42 = vld [vmem:[%s20279_s1 + $0x8] sm:$0xf]  ;;  %v8625_v50 = vor.u32 %v12669_v37, %v8624_v32 }
 0x221   :  { %7093 = vmatpush.bf16.msra.mxu0 %v8401_v43  ;;  %v12601_v30 = vld [vmem:[%s20279_s1 + $0x14] sm:$0xf0]  ;;  %v8480_v51 = vld [vmem:[%s20279_s1 + $0x108] sm:$0xf]  ;;  %v8753_v44 = vor.u32 %v12701_v39, %v8752_v38 }
 0x222   :  { %7106 = vmatpush.bf16.msra.mxu1 %v8529_v53  ;;  %v12633_v33 = vld [vmem:[%s20279_s1 + $0x114] sm:$0xf0]  ;;  %v8608_v52 = vld [vmem:[%s20279_s1 + $0x208] sm:$0xf]  ;;  %v6879_v61 = vpop.f32.mrf.mxu3  ;;  %v8353_v62 = vor.u32 %v12601_v30, %v8352_v42 }
 0x223   :  { %7119 = vmatpush.bf16.msra.mxu2 %v8657_v55  ;;  %v12665_v43 = vld [vmem:[%s20279_s1 + $0x214] sm:$0xf0]  ;;  %v8736_v53 = vld [vmem:[%s20279_s1 + $0x308] sm:$0xf]  ;;  %v8481_v8 = vor.u32 %v12633_v33, %v8480_v51 }
 0x224   :  { %7132 = vmatpush.bf16.msra.mxu3 %v8785_v40  ;;  %v12697_v55 = vld [vmem:[%s20279_s1 + $0x314] sm:$0xf0]  ;;  %v8976_v57 = vld [vmem:[%s20279_s1 + $0x4e8] sm:$0xf]  ;;  %v8609_v19 = vor.u32 %v12665_v43, %v8608_v52 }
 0x225   :  { %7094 = vmatpush.bf16.msra.mxu0 %v8385_v23  ;;  %v12757_v59 = vld [vmem:[%s20279_s1 + $0x4f4] sm:$0xf0]  ;;  %v9104_v40 = vld [vmem:[%s20279_s1 + $0x5e8] sm:$0xf]  ;;  %v8737_v23 = vor.u32 %v12697_v55, %v8736_v53 }
 0x226   :  { %7107 = vmatpush.bf16.msra.mxu1 %v8513_v25  ;;  %v12789_v63 = vld [vmem:[%s20279_s1 + $0x5f4] sm:$0xf0]  ;;  %v9232_v58 = vld [vmem:[%s20279_s1 + $0x6e8] sm:$0xf]  ;;  %v8977_v11 = vor.u32 %v12757_v59, %v8976_v57 }
 0x227   :  { %7120 = vmatpush.bf16.msra.mxu2 %v8641_v26  ;;  %v12821_v3 = vld [vmem:[%s20279_s1 + $0x6f4] sm:$0xf0]  ;;  %v9360_v20 = vld [vmem:[%s20279_s1 + $0x7e8] sm:$0xf]  ;;  %v9105_v25 = vor.u32 %v12789_v63, %v9104_v40 }
 0x228   :  { %7133 = vmatpush.bf16.msra.mxu3 %v8769_v36  ;;  %v12853_v21 = vld [vmem:[%s20279_s1 + $0x7f4] sm:$0xf0]  ;;  %v9233_v26 = vor.u32 %v12821_v3, %v9232_v58  ;;  %v8960_v10 = vld [vmem:[%s20279_s1 + $0x4c8] sm:$0xf] }
 0x229   :  { %7095 = vmatpush.bf16.msra.mxu0 %v8369_v41  ;;  %v12753_v31 = vld [vmem:[%s20279_s1 + $0x4d4] sm:$0xf0]  ;;  %v9088_v35 = vld [vmem:[%s20279_s1 + $0x5c8] sm:$0xf]  ;;  %v9361_v36 = vor.u32 %v12853_v21, %v9360_v20 }
 0x22a   :  { %7108 = vmatpush.bf16.msra.mxu1 %v8497_v45  ;;  %v12785_v22 = vld [vmem:[%s20279_s1 + $0x5d4] sm:$0xf0]  ;;  %v9216_v32 = vld [vmem:[%s20279_s1 + $0x6c8] sm:$0xf]  ;;  %v8961_v41 = vor.u32 %v12753_v31, %v8960_v10 }
 0x22b   :  { %7121 = vmatpush.bf16.msra.mxu2 %v8625_v50  ;;  %v12817_v37 = vld [vmem:[%s20279_s1 + $0x6d4] sm:$0xf0]  ;;  %v9344_v38 = vld [vmem:[%s20279_s1 + $0x7c8] sm:$0xf]  ;;  %v9089_v42 = vor.u32 %v12785_v22, %v9088_v35 }
 0x22c   :  { %7134 = vmatpush.bf16.msra.mxu3 %v8753_v44  ;;  %v12849_v39 = vld [vmem:[%s20279_s1 + $0x7d4] sm:$0xf0]  ;;  %v9217_v30 = vor.u32 %v12817_v37, %v9216_v32  ;;  %v8944_v45 = vld [vmem:[%s20279_s1 + $0x4a8] sm:$0xf] }
 0x22d   :  { %7096 = vmatpush.bf16.msra.mxu0 %v8353_v62  ;;  %v12749_v50 = vld [vmem:[%s20279_s1 + $0x4b4] sm:$0xf0]  ;;  %v9072_v51 = vld [vmem:[%s20279_s1 + $0x5a8] sm:$0xf]  ;;  %v9345_v33 = vor.u32 %v12849_v39, %v9344_v38 }
 0x22e   :  { %7109 = vmatpush.bf16.msra.mxu1 %v8481_v8  ;;  %v12781_v52 = vld [vmem:[%s20279_s1 + $0x5b4] sm:$0xf0]  ;;  %v9200_v44 = vld [vmem:[%s20279_s1 + $0x6a8] sm:$0xf]  ;;  %v8945_v56 = vor.u32 %v12749_v50, %v8944_v45 }
 0x22f   :  { %7122 = vmatpush.bf16.msra.mxu2 %v8609_v19  ;;  %v12813_v43 = vld [vmem:[%s20279_s1 + $0x6b4] sm:$0xf0]  ;;  %v9328_v53 = vld [vmem:[%s20279_s1 + $0x7a8] sm:$0xf]  ;;  %v9073_v57 = vor.u32 %v12781_v52, %v9072_v51  ;;  %v6890_v19 = vpop.f32.mrf.mxu0 }
 0x230   :  { %7135 = vmatpush.bf16.msra.mxu3 %v8737_v23  ;;  %v12845_v55 = vld [vmem:[%s20279_s1 + $0x7b4] sm:$0xf0]  ;;  %7097 = vmatmul.bf16.vlgmr.msra.gmra.mxu0 %v14079_v28  ;;  %v9201_v59 = vor.u32 %v12813_v43, %v9200_v44  ;;  %v8928_v40 = vld [vmem:[%s20279_s1 + $0x488] sm:$0xf]  ;;  %v6891_v23 = vadd.f32 %v6890_v19, %v17118_v24 }
 0x231   :  { %7141 = vmatpush.bf16.msrb.mxu0 %v8977_v11  ;;  %7110 = vmatmul.bf16.vlgmr.msra.gmra.mxu1 %v14089_v34  ;;  %v12745_v61 = vld [vmem:[%s20279_s1 + $0x494] sm:$0xf0]  ;;  %v9056_v62 = vld [vmem:[%s20279_s1 + $0x588] sm:$0xf]  ;;  %v9329_v63 = vor.u32 %v12845_v55, %v9328_v53 }
 0x232   :  { %7154 = vmatpush.bf16.msrb.mxu1 %v9105_v25  ;;  %7123 = vmatmul.bf16.vlgmr.msra.gmra.mxu2 %v14077_v27  ;;  %v12777_v58 = vld [vmem:[%s20279_s1 + $0x594] sm:$0xf0]  ;;  %v9184_v3 = vld [vmem:[%s20279_s1 + $0x688] sm:$0xf]  ;;  %v8929_v11 = vor.u32 %v12745_v61, %v8928_v40  ;;  %v6903_v25 = vpop.f32.mrf.mxu1 }
 0x233   :  { %7167 = vmatpush.bf16.msrb.mxu2 %v9233_v26  ;;  %7136 = vmatmul.bf16.vlgmr.msra.gmra.mxu3 %v14081_v29  ;;  %v12809_v8 = vld [vmem:[%s20279_s1 + $0x694] sm:$0xf0]  ;;  %v9312_v20 = vld [vmem:[%s20279_s1 + $0x788] sm:$0xf]  ;;  %v9057_v26 = vor.u32 %v12777_v58, %v9056_v62  ;;  %v6904_v22 = vadd.f32 %v6903_v25, %v6891_v23 }
 0x234   :  { %7180 = vmatpush.bf16.msrb.mxu3 %v9361_v36  ;;  %v12841_v21 = vld [vmem:[%s20279_s1 + $0x794] sm:$0xf0]  ;;  %v9185_v10 = vor.u32 %v12809_v8, %v9184_v3  ;;  %v8912_v31 = vld [vmem:[%s20279_s1 + $0x468] sm:$0xf] }
 0x235   :  { %7142 = vmatpush.bf16.msrb.mxu0 %v8961_v41  ;;  %v12741_v35 = vld [vmem:[%s20279_s1 + $0x474] sm:$0xf0]  ;;  %v9040_v36 = vld [vmem:[%s20279_s1 + $0x568] sm:$0xf]  ;;  %v9313_v24 = vor.u32 %v12841_v21, %v9312_v20  ;;  %v6916_v44 = vpop.f32.mrf.mxu2 }
 0x236   :  { %7155 = vmatpush.bf16.msrb.mxu1 %v9089_v42  ;;  %v12773_v32 = vld [vmem:[%s20279_s1 + $0x574] sm:$0xf0]  ;;  %v9168_v37 = vld [vmem:[%s20279_s1 + $0x668] sm:$0xf]  ;;  %v8913_v42 = vor.u32 %v12741_v35, %v8912_v31 }
 0x237   :  { %7168 = vmatpush.bf16.msrb.mxu2 %v9217_v30  ;;  %v12805_v38 = vld [vmem:[%s20279_s1 + $0x674] sm:$0xf0]  ;;  %v9296_v39 = vld [vmem:[%s20279_s1 + $0x768] sm:$0xf]  ;;  %v9041_v30 = vor.u32 %v12773_v32, %v9040_v36  ;;  %v6892_v61 = vpop.f32.mrf.mxu0 }
 0x238   :  { %7181 = vmatpush.bf16.msrb.mxu3 %v9345_v33  ;;  %v12837_v41 = vld [vmem:[%s20279_s1 + $0x774] sm:$0xf0]  ;;  %v9169_v45 = vor.u32 %v12805_v38, %v9168_v37  ;;  %v8896_v50 = vld [vmem:[%s20279_s1 + $0x448] sm:$0xf] }
 0x239   :  { %7143 = vmatpush.bf16.msrb.mxu0 %v8945_v56  ;;  %v12737_v51 = vld [vmem:[%s20279_s1 + $0x454] sm:$0xf0]  ;;  %v9024_v33 = vld [vmem:[%s20279_s1 + $0x548] sm:$0xf]  ;;  %v9297_v52 = vor.u32 %v12837_v41, %v9296_v39  ;;  %v6917_v56 = vadd.f32 %v6916_v44, %v6904_v22 }
 0x23a   :  { %7156 = vmatpush.bf16.msrb.mxu1 %v9073_v57  ;;  %v12769_v43 = vld [vmem:[%s20279_s1 + $0x554] sm:$0xf0]  ;;  %v9152_v53 = vld [vmem:[%s20279_s1 + $0x648] sm:$0xf]  ;;  %v6929_v57 = vpop.f32.mrf.mxu3  ;;  %v8897_v62 = vor.u32 %v12737_v51, %v8896_v50 }
 0x23b   :  { %7169 = vmatpush.bf16.msrb.mxu2 %v9201_v59  ;;  %v12801_v55 = vld [vmem:[%s20279_s1 + $0x654] sm:$0xf0]  ;;  %v9280_v59 = vld [vmem:[%s20279_s1 + $0x748] sm:$0xf]  ;;  %v17317_v58 = vadd.f32 %v6929_v57, %v6917_v56  ;;  %v9025_v3 = vor.u32 %v12769_v43, %v9024_v33 }
 0x23c   :  { %7182 = vmatpush.bf16.msrb.mxu3 %v9329_v63  ;;  %v12833_v40 = vld [vmem:[%s20279_s1 + $0x754] sm:$0xf0]  ;;  %v6905_v63 = vpop.f32.mrf.mxu1  ;;  %v9153_v8 = vor.u32 %v12801_v55, %v9152_v53  ;;  %v8880_v19 = vld [vmem:[%s20279_s1 + $0x428] sm:$0xf] }
 0x23d   :  { %7144 = vmatpush.bf16.msrb.mxu0 %v8929_v11  ;;  %v12733_v20 = vld [vmem:[%s20279_s1 + $0x434] sm:$0xf0]  ;;  %v9008_v21 = vld [vmem:[%s20279_s1 + $0x528] sm:$0xf]  ;;  %v9281_v23 = vor.u32 %v12833_v40, %v9280_v59  ;;  %v6918_v50 = vpop.f32.mrf.mxu2 }
 0x23e   :  { %7157 = vmatpush.bf16.msrb.mxu1 %v9057_v26  ;;  %v12765_v11 = vld [vmem:[%s20279_s1 + $0x534] sm:$0xf0]  ;;  %v9136_v25 = vld [vmem:[%s20279_s1 + $0x628] sm:$0xf]  ;;  %v8881_v35 = vor.u32 %v12733_v20, %v8880_v19 }
 0x23f   :  { %7170 = vmatpush.bf16.msrb.mxu2 %v9185_v10  ;;  %v12797_v26 = vld [vmem:[%s20279_s1 + $0x634] sm:$0xf0]  ;;  %v9264_v10 = vld [vmem:[%s20279_s1 + $0x728] sm:$0xf]  ;;  %v9009_v22 = vor.u32 %v12765_v11, %v9008_v21 }
 0x240   :  { %7183 = vmatpush.bf16.msrb.mxu3 %v9313_v24  ;;  %v12829_v31 = vld [vmem:[%s20279_s1 + $0x734] sm:$0xf0]  ;;  %v8864_v36 = vld [vmem:[%s20279_s1 + $0x408] sm:$0xf]  ;;  %v9137_v32 = vor.u32 %v12797_v26, %v9136_v25 }
 0x241   :  { %7145 = vmatpush.bf16.msrb.mxu0 %v8913_v42  ;;  %v12729_v24 = vld [vmem:[%s20279_s1 + $0x414] sm:$0xf0]  ;;  %v8992_v37 = vld [vmem:[%s20279_s1 + $0x508] sm:$0xf]  ;;  %v9265_v41 = vor.u32 %v12829_v31, %v9264_v10 }
 0x242   :  { %7158 = vmatpush.bf16.msrb.mxu1 %v9041_v30  ;;  %v12761_v38 = vld [vmem:[%s20279_s1 + $0x514] sm:$0xf0]  ;;  %v9120_v39 = vld [vmem:[%s20279_s1 + $0x608] sm:$0xf]  ;;  %v6931_v44 = vpop.f32.mrf.mxu3  ;;  %v8865_v43 = vor.u32 %v12729_v24, %v8864_v36 }
 0x243   :  { %7171 = vmatpush.bf16.msrb.mxu2 %v9169_v45  ;;  %v12793_v42 = vld [vmem:[%s20279_s1 + $0x614] sm:$0xf0]  ;;  %v9248_v30 = vld [vmem:[%s20279_s1 + $0x708] sm:$0xf]  ;;  %v8993_v57 = vor.u32 %v12761_v38, %v8992_v37 }
 0x244   :  { %7184 = vmatpush.bf16.msrb.mxu3 %v9297_v52  ;;  %v12825_v45 = vld [vmem:[%s20279_s1 + $0x714] sm:$0xf0]  ;;  %v9488_v51 = vld [vmem:[%s20279_s1 + $0x8e8] sm:$0xf]  ;;  %v9121_v59 = vor.u32 %v12793_v42, %v9120_v39 }
 0x245   :  { %7146 = vmatpush.bf16.msrb.mxu0 %v8897_v62  ;;  %v12885_v33 = vld [vmem:[%s20279_s1 + $0x8f4] sm:$0xf0]  ;;  %v9616_v52 = vld [vmem:[%s20279_s1 + $0x9e8] sm:$0xf]  ;;  %v9249_v62 = vor.u32 %v12825_v45, %v9248_v30 }
 0x246   :  { %7159 = vmatpush.bf16.msrb.mxu1 %v9025_v3  ;;  %v12917_v53 = vld [vmem:[%s20279_s1 + $0x9f4] sm:$0xf0]  ;;  %v9744_v55 = vld [vmem:[%s20279_s1 + $0xae8] sm:$0xf]  ;;  %v9489_v63 = vor.u32 %v12885_v33, %v9488_v51 }
 0x247   :  { %7172 = vmatpush.bf16.msrb.mxu2 %v9153_v8  ;;  %v12949_v56 = vld [vmem:[%s20279_s1 + $0xaf4] sm:$0xf0]  ;;  %v9872_v40 = vld [vmem:[%s20279_s1 + $0xbe8] sm:$0xf]  ;;  %v9617_v3 = vor.u32 %v12917_v53, %v9616_v52 }
 0x248   :  { %7185 = vmatpush.bf16.msrb.mxu3 %v9281_v23  ;;  %v12981_v61 = vld [vmem:[%s20279_s1 + $0xbf4] sm:$0xf0]  ;;  %v9745_v8 = vor.u32 %v12949_v56, %v9744_v55  ;;  %v9472_v19 = vld [vmem:[%s20279_s1 + $0x8c8] sm:$0xf] }
 0x249   :  { %7147 = vmatpush.bf16.msrb.mxu0 %v8881_v35  ;;  %v12881_v20 = vld [vmem:[%s20279_s1 + $0x8d4] sm:$0xf0]  ;;  %v9600_v21 = vld [vmem:[%s20279_s1 + $0x9c8] sm:$0xf]  ;;  %v9873_v23 = vor.u32 %v12981_v61, %v9872_v40 }
 0x24a   :  { %7160 = vmatpush.bf16.msrb.mxu1 %v9009_v22  ;;  %v12913_v11 = vld [vmem:[%s20279_s1 + $0x9d4] sm:$0xf0]  ;;  %v9728_v25 = vld [vmem:[%s20279_s1 + $0xac8] sm:$0xf]  ;;  %v9473_v35 = vor.u32 %v12881_v20, %v9472_v19 }
 0x24b   :  { %7173 = vmatpush.bf16.msrb.mxu2 %v9137_v32  ;;  %v12945_v26 = vld [vmem:[%s20279_s1 + $0xad4] sm:$0xf0]  ;;  %v9856_v10 = vld [vmem:[%s20279_s1 + $0xbc8] sm:$0xf]  ;;  %v9601_v36 = vor.u32 %v12913_v11, %v9600_v21 }
 0x24c   :  { %7186 = vmatpush.bf16.msrb.mxu3 %v9265_v41  ;;  %v12977_v31 = vld [vmem:[%s20279_s1 + $0xbd4] sm:$0xf0]  ;;  %v9729_v24 = vor.u32 %v12945_v26, %v9728_v25  ;;  %v9456_v22 = vld [vmem:[%s20279_s1 + $0x8a8] sm:$0xf] }
 0x24d   :  { %7148 = vmatpush.bf16.msrb.mxu0 %v8865_v43  ;;  %v12877_v32 = vld [vmem:[%s20279_s1 + $0x8b4] sm:$0xf0]  ;;  %v9584_v37 = vld [vmem:[%s20279_s1 + $0x9a8] sm:$0xf]  ;;  %v9857_v38 = vor.u32 %v12977_v31, %v9856_v10 }
 0x24e   :  { %7161 = vmatpush.bf16.msrb.mxu1 %v8993_v57  ;;  %v12909_v39 = vld [vmem:[%s20279_s1 + $0x9b4] sm:$0xf0]  ;;  %v9712_v41 = vld [vmem:[%s20279_s1 + $0xaa8] sm:$0xf]  ;;  %v9457_v50 = vor.u32 %v12877_v32, %v9456_v22 }
 0x24f   :  { %7174 = vmatpush.bf16.msrb.mxu2 %v9121_v59  ;;  %v12941_v42 = vld [vmem:[%s20279_s1 + $0xab4] sm:$0xf0]  ;;  %v9840_v30 = vld [vmem:[%s20279_s1 + $0xba8] sm:$0xf]  ;;  %v9585_v51 = vor.u32 %v12909_v39, %v9584_v37  ;;  %v6942_v59 = vpop.f32.mrf.mxu0 }
 0x250   :  { %7187 = vmatpush.bf16.msrb.mxu3 %v9249_v62  ;;  %v12973_v45 = vld [vmem:[%s20279_s1 + $0xbb4] sm:$0xf0]  ;;  %7149 = vmatmul.bf16.vlgmr.msrb.gmra.mxu0 %v14157_v0  ;;  %v9713_v33 = vor.u32 %v12941_v42, %v9712_v41  ;;  %v9440_v52 = vld [vmem:[%s20279_s1 + $0x888] sm:$0xf]  ;;  %v6943_v62 = vadd.f32 %v6942_v59, %v17317_v58 }
 0x251   :  { %7193 = vmatpush.bf16.msra.mxu0 %v9489_v63  ;;  %7162 = vmatmul.bf16.vlgmr.msrb.gmra.mxu1 %v14161_v2  ;;  %v12873_v44 = vld [vmem:[%s20279_s1 + $0x894] sm:$0xf0]  ;;  %v9568_v43 = vld [vmem:[%s20279_s1 + $0x988] sm:$0xf]  ;;  %v9841_v53 = vor.u32 %v12973_v45, %v9840_v30 }
 0x252   :  { %7206 = vmatpush.bf16.msra.mxu1 %v9617_v3  ;;  %7175 = vmatmul.bf16.vlgmr.msrb.gmra.mxu2 %v14152_v60  ;;  %v12905_v55 = vld [vmem:[%s20279_s1 + $0x994] sm:$0xf0]  ;;  %v9696_v56 = vld [vmem:[%s20279_s1 + $0xa88] sm:$0xf]  ;;  %v9441_v63 = vor.u32 %v12873_v44, %v9440_v52  ;;  %v6955_v3 = vpop.f32.mrf.mxu1 }
 0x253   :  { %7219 = vmatpush.bf16.msra.mxu2 %v9745_v8  ;;  %7188 = vmatmul.bf16.vlgmr.msrb.gmra.mxu3 %v14159_v1  ;;  %v12937_v57 = vld [vmem:[%s20279_s1 + $0xa94] sm:$0xf0]  ;;  %v9824_v40 = vld [vmem:[%s20279_s1 + $0xb88] sm:$0xf]  ;;  %v9569_v8 = vor.u32 %v12905_v55, %v9568_v43  ;;  %v6956_v11 = vadd.f32 %v6955_v3, %v6943_v62 }
 0x254   :  { %7232 = vmatpush.bf16.msra.mxu3 %v9873_v23  ;;  %v12969_v61 = vld [vmem:[%s20279_s1 + $0xb94] sm:$0xf0]  ;;  %v9697_v19 = vor.u32 %v12937_v57, %v9696_v56  ;;  %v9424_v20 = vld [vmem:[%s20279_s1 + $0x868] sm:$0xf] }
 0x255   :  { %7194 = vmatpush.bf16.msra.mxu0 %v9473_v35  ;;  %v12869_v21 = vld [vmem:[%s20279_s1 + $0x874] sm:$0xf0]  ;;  %v9552_v23 = vld [vmem:[%s20279_s1 + $0x968] sm:$0xf]  ;;  %v9825_v58 = vor.u32 %v12969_v61, %v9824_v40  ;;  %v6968_v41 = vpop.f32.mrf.mxu2 }
 0x256   :  { %7207 = vmatpush.bf16.msra.mxu1 %v9601_v36  ;;  %v12901_v25 = vld [vmem:[%s20279_s1 + $0x974] sm:$0xf0]  ;;  %v9680_v26 = vld [vmem:[%s20279_s1 + $0xa68] sm:$0xf]  ;;  %v9425_v36 = vor.u32 %v12869_v21, %v9424_v20 }
 0x257   :  { %7220 = vmatpush.bf16.msra.mxu2 %v9729_v24  ;;  %v12933_v10 = vld [vmem:[%s20279_s1 + $0xa74] sm:$0xf0]  ;;  %v9808_v31 = vld [vmem:[%s20279_s1 + $0xb68] sm:$0xf]  ;;  %v9553_v24 = vor.u32 %v12901_v25, %v9552_v23  ;;  %v6944_v44 = vpop.f32.mrf.mxu0 }
 0x258   :  { %7233 = vmatpush.bf16.msra.mxu3 %v9857_v38  ;;  %v12965_v35 = vld [vmem:[%s20279_s1 + $0xb74] sm:$0xf0]  ;;  %v9681_v22 = vor.u32 %v12933_v10, %v9680_v26  ;;  %v9408_v32 = vld [vmem:[%s20279_s1 + $0x848] sm:$0xf] }
 0x259   :  { %7195 = vmatpush.bf16.msra.mxu0 %v9457_v50  ;;  %v12865_v37 = vld [vmem:[%s20279_s1 + $0x854] sm:$0xf0]  ;;  %v9536_v38 = vld [vmem:[%s20279_s1 + $0x948] sm:$0xf]  ;;  %v9809_v39 = vor.u32 %v12965_v35, %v9808_v31  ;;  %v6969_v50 = vadd.f32 %v6968_v41, %v6956_v11 }
 0x25a   :  { %7208 = vmatpush.bf16.msra.mxu1 %v9585_v51  ;;  %v12897_v42 = vld [vmem:[%s20279_s1 + $0x954] sm:$0xf0]  ;;  %v9664_v30 = vld [vmem:[%s20279_s1 + $0xa48] sm:$0xf]  ;;  %v6981_v51 = vpop.f32.mrf.mxu3  ;;  %v9409_v43 = vor.u32 %v12865_v37, %v9408_v32 }
 0x25b   :  { %7221 = vmatpush.bf16.msra.mxu2 %v9713_v33  ;;  %v12929_v45 = vld [vmem:[%s20279_s1 + $0xa54] sm:$0xf0]  ;;  %v9792_v33 = vld [vmem:[%s20279_s1 + $0xb48] sm:$0xf]  ;;  %v17516_v55 = vadd.f32 %v6981_v51, %v6969_v50  ;;  %v9537_v56 = vor.u32 %v12897_v42, %v9536_v38 }
 0x25c   :  { %7234 = vmatpush.bf16.msra.mxu3 %v9841_v53  ;;  %v12961_v52 = vld [vmem:[%s20279_s1 + $0xb54] sm:$0xf0]  ;;  %v6957_v53 = vpop.f32.mrf.mxu1  ;;  %v9665_v57 = vor.u32 %v12929_v45, %v9664_v30  ;;  %v9392_v59 = vld [vmem:[%s20279_s1 + $0x828] sm:$0xf] }
 0x25d   :  { %7196 = vmatpush.bf16.msra.mxu0 %v9441_v63  ;;  %v12861_v40 = vld [vmem:[%s20279_s1 + $0x834] sm:$0xf0]  ;;  %v9520_v61 = vld [vmem:[%s20279_s1 + $0x928] sm:$0xf]  ;;  %v9793_v62 = vor.u32 %v12961_v52, %v9792_v33  ;;  %v6970_v32 = vpop.f32.mrf.mxu2 }
 0x25e   :  { %7209 = vmatpush.bf16.msra.mxu1 %v9569_v8  ;;  %v12893_v63 = vld [vmem:[%s20279_s1 + $0x934] sm:$0xf0]  ;;  %v9648_v3 = vld [vmem:[%s20279_s1 + $0xa28] sm:$0xf]  ;;  %v9393_v21 = vor.u32 %v12861_v40, %v9392_v59 }
 0x25f   :  { %7222 = vmatpush.bf16.msra.mxu2 %v9697_v19  ;;  %v12925_v8 = vld [vmem:[%s20279_s1 + $0xa34] sm:$0xf0]  ;;  %v9776_v19 = vld [vmem:[%s20279_s1 + $0xb28] sm:$0xf]  ;;  %v9521_v11 = vor.u32 %v12893_v63, %v9520_v61 }
 0x260   :  { %7235 = vmatpush.bf16.msra.mxu3 %v9825_v58  ;;  %v12957_v20 = vld [vmem:[%s20279_s1 + $0xb34] sm:$0xf0]  ;;  %v9376_v23 = vld [vmem:[%s20279_s1 + $0x808] sm:$0xf]  ;;  %v9649_v25 = vor.u32 %v12925_v8, %v9648_v3 }
 0x261   :  { %7197 = vmatpush.bf16.msra.mxu0 %v9425_v36  ;;  %v12857_v58 = vld [vmem:[%s20279_s1 + $0x814] sm:$0xf0]  ;;  %v9504_v26 = vld [vmem:[%s20279_s1 + $0x908] sm:$0xf]  ;;  %v9777_v35 = vor.u32 %v12957_v20, %v9776_v19 }
 0x262   :  { %7210 = vmatpush.bf16.msra.mxu1 %v9553_v24  ;;  %v12889_v10 = vld [vmem:[%s20279_s1 + $0x914] sm:$0xf0]  ;;  %v9632_v31 = vld [vmem:[%s20279_s1 + $0xa08] sm:$0xf]  ;;  %v6983_v41 = vpop.f32.mrf.mxu3  ;;  %v9377_v42 = vor.u32 %v12857_v58, %v9376_v23 }
 0x263   :  { %7223 = vmatpush.bf16.msra.mxu2 %v9681_v22  ;;  %v12921_v36 = vld [vmem:[%s20279_s1 + $0xa14] sm:$0xf0]  ;;  %v9760_v24 = vld [vmem:[%s20279_s1 + $0xb08] sm:$0xf]  ;;  %v9505_v51 = vor.u32 %v12889_v10, %v9504_v26 }
 0x264   :  { %7236 = vmatpush.bf16.msra.mxu3 %v9809_v39  ;;  %v12953_v22 = vld [vmem:[%s20279_s1 + $0xb14] sm:$0xf0]  ;;  %v10000_v37 = vld [vmem:[%s20279_s1 + $0xce8] sm:$0xf]  ;;  %v9633_v33 = vor.u32 %v12921_v36, %v9632_v31 }
 0x265   :  { %7198 = vmatpush.bf16.msra.mxu0 %v9409_v43  ;;  %v13013_v38 = vld [vmem:[%s20279_s1 + $0xcf4] sm:$0xf0]  ;;  %v10128_v39 = vld [vmem:[%s20279_s1 + $0xde8] sm:$0xf]  ;;  %v9761_v43 = vor.u32 %v12953_v22, %v9760_v24 }
 0x266   :  { %7211 = vmatpush.bf16.msra.mxu1 %v9537_v56  ;;  %v13045_v30 = vld [vmem:[%s20279_s1 + $0xdf4] sm:$0xf0]  ;;  %v10256_v45 = vld [vmem:[%s20279_s1 + $0xee8] sm:$0xf]  ;;  %v10001_v53 = vor.u32 %v13013_v38, %v10000_v37 }
 0x267   :  { %7224 = vmatpush.bf16.msra.mxu2 %v9665_v57  ;;  %v13077_v50 = vld [vmem:[%s20279_s1 + $0xef4] sm:$0xf0]  ;;  %v10384_v52 = vld [vmem:[%s20279_s1 + $0xfe8] sm:$0xf]  ;;  %v10129_v56 = vor.u32 %v13045_v30, %v10128_v39 }
 0x268   :  { %7237 = vmatpush.bf16.msra.mxu3 %v9793_v62  ;;  %v13109_v44 = vld [vmem:[%s20279_s1 + $0xff4] sm:$0xf0]  ;;  %v10257_v57 = vor.u32 %v13077_v50, %v10256_v45  ;;  %v9984_v59 = vld [vmem:[%s20279_s1 + $0xcc8] sm:$0xf] }
 0x269   :  { %7199 = vmatpush.bf16.msra.mxu0 %v9393_v21  ;;  %v13009_v40 = vld [vmem:[%s20279_s1 + $0xcd4] sm:$0xf0]  ;;  %v10112_v61 = vld [vmem:[%s20279_s1 + $0xdc8] sm:$0xf]  ;;  %v10385_v62 = vor.u32 %v13109_v44, %v10384_v52 }
 0x26a   :  { %7212 = vmatpush.bf16.msra.mxu1 %v9521_v11  ;;  %v13041_v63 = vld [vmem:[%s20279_s1 + $0xdd4] sm:$0xf0]  ;;  %v10240_v3 = vld [vmem:[%s20279_s1 + $0xec8] sm:$0xf]  ;;  %v9985_v21 = vor.u32 %v13009_v40, %v9984_v59 }
 0x26b   :  { %7225 = vmatpush.bf16.msra.mxu2 %v9649_v25  ;;  %v13073_v8 = vld [vmem:[%s20279_s1 + $0xed4] sm:$0xf0]  ;;  %v10368_v19 = vld [vmem:[%s20279_s1 + $0xfc8] sm:$0xf]  ;;  %v10113_v23 = vor.u32 %v13041_v63, %v10112_v61 }
 0x26c   :  { %7238 = vmatpush.bf16.msra.mxu3 %v9777_v35  ;;  %v13105_v20 = vld [vmem:[%s20279_s1 + $0xfd4] sm:$0xf0]  ;;  %v10241_v58 = vor.u32 %v13073_v8, %v10240_v3  ;;  %v9968_v11 = vld [vmem:[%s20279_s1 + $0xca8] sm:$0xf] }
 0x26d   :  { %7200 = vmatpush.bf16.msra.mxu0 %v9377_v42  ;;  %v13005_v25 = vld [vmem:[%s20279_s1 + $0xcb4] sm:$0xf0]  ;;  %v10096_v26 = vld [vmem:[%s20279_s1 + $0xda8] sm:$0xf]  ;;  %v10369_v10 = vor.u32 %v13105_v20, %v10368_v19 }
 0x26e   :  { %7213 = vmatpush.bf16.msra.mxu1 %v9505_v51  ;;  %v13037_v31 = vld [vmem:[%s20279_s1 + $0xdb4] sm:$0xf0]  ;;  %v10224_v35 = vld [vmem:[%s20279_s1 + $0xea8] sm:$0xf]  ;;  %v9969_v32 = vor.u32 %v13005_v25, %v9968_v11 }
 0x26f   :  { %7226 = vmatpush.bf16.msra.mxu2 %v9633_v33  ;;  %v13069_v36 = vld [vmem:[%s20279_s1 + $0xeb4] sm:$0xf0]  ;;  %v10352_v24 = vld [vmem:[%s20279_s1 + $0xfa8] sm:$0xf]  ;;  %v10097_v37 = vor.u32 %v13037_v31, %v10096_v26 }
 0x270   :  { %7239 = vmatpush.bf16.msra.mxu3 %v9761_v43  ;;  %7201 = vmatmul.bf16.vlgmr.msra.gmra.mxu0 %v14407_v12  ;;  %v13101_v22 = vld [vmem:[%s20279_s1 + $0xfb4] sm:$0xf0]  ;;  %v10225_v38 = vor.u32 %v13069_v36, %v10224_v35  ;;  %v9952_v39 = vld [vmem:[%s20279_s1 + $0xc88] sm:$0xf] }
 0x271   :  { %7245 = vmatpush.bf16.msrb.mxu0 %v10001_v53  ;;  %7214 = vmatmul.bf16.vlgmr.msra.gmra.mxu1 %v14417_v16  ;;  %v13001_v41 = vld [vmem:[%s20279_s1 + $0xc94] sm:$0xf0]  ;;  %v10080_v42 = vld [vmem:[%s20279_s1 + $0xd88] sm:$0xf]  ;;  %v10353_v30 = vor.u32 %v13101_v22, %v10352_v24  ;;  %v6994_v33 = vpop.f32.mrf.mxu0 }
 0x272   :  { %7258 = vmatpush.bf16.msrb.mxu1 %v10129_v56  ;;  %7227 = vmatmul.bf16.vlgmr.msra.gmra.mxu2 %v14415_v15  ;;  %v13033_v45 = vld [vmem:[%s20279_s1 + $0xd94] sm:$0xf0]  ;;  %v10208_v50 = vld [vmem:[%s20279_s1 + $0xe88] sm:$0xf]  ;;  %v6995_v43 = vadd.f32 %v6994_v33, %v17516_v55  ;;  %v9953_v53 = vor.u32 %v13001_v41, %v9952_v39  ;;  %v7007_v56 = vpop.f32.mrf.mxu1 }
 0x273   :  { %7271 = vmatpush.bf16.msrb.mxu2 %v10257_v57  ;;  %7240 = vmatmul.bf16.vlgmr.msra.gmra.mxu3 %v14419_v17  ;;  %v13065_v51 = vld [vmem:[%s20279_s1 + $0xe94] sm:$0xf0]  ;;  %v10336_v52 = vld [vmem:[%s20279_s1 + $0xf88] sm:$0xf]  ;;  %v10081_v57 = vor.u32 %v13033_v45, %v10080_v42 }
 0x274   :  { %7284 = vmatpush.bf16.msrb.mxu3 %v10385_v62  ;;  %v13097_v44 = vld [vmem:[%s20279_s1 + $0xf94] sm:$0xf0]  ;;  %v10209_v59 = vor.u32 %v13065_v51, %v10208_v50  ;;  %v9936_v40 = vld [vmem:[%s20279_s1 + $0xc68] sm:$0xf]  ;;  %v7008_v63 = vadd.f32 %v7007_v56, %v6995_v43 }
 0x275   :  { %7246 = vmatpush.bf16.msrb.mxu0 %v9985_v21  ;;  %v12997_v61 = vld [vmem:[%s20279_s1 + $0xc74] sm:$0xf0]  ;;  %v10064_v62 = vld [vmem:[%s20279_s1 + $0xd68] sm:$0xf]  ;;  %v10337_v55 = vor.u32 %v13097_v44, %v10336_v52 }
 0x276   :  { %7259 = vmatpush.bf16.msrb.mxu1 %v10113_v23  ;;  %v13029_v3 = vld [vmem:[%s20279_s1 + $0xd74] sm:$0xf0]  ;;  %v10192_v8 = vld [vmem:[%s20279_s1 + $0xe68] sm:$0xf]  ;;  %v9937_v23 = vor.u32 %v12997_v61, %v9936_v40 }
 0x277   :  { %7272 = vmatpush.bf16.msrb.mxu2 %v10241_v58  ;;  %v13061_v19 = vld [vmem:[%s20279_s1 + $0xe74] sm:$0xf0]  ;;  %v10320_v20 = vld [vmem:[%s20279_s1 + $0xf68] sm:$0xf]  ;;  %v10065_v58 = vor.u32 %v13029_v3, %v10064_v62 }
 0x278   :  { %7285 = vmatpush.bf16.msrb.mxu3 %v10369_v10  ;;  %v13093_v21 = vld [vmem:[%s20279_s1 + $0xf74] sm:$0xf0]  ;;  %v10193_v11 = vor.u32 %v13061_v19, %v10192_v8  ;;  %v9920_v25 = vld [vmem:[%s20279_s1 + $0xc48] sm:$0xf]  ;;  %v7020_v35 = vpop.f32.mrf.mxu2 }
 0x279   :  { %7247 = vmatpush.bf16.msrb.mxu0 %v9969_v32  ;;  %v12993_v26 = vld [vmem:[%s20279_s1 + $0xc54] sm:$0xf0]  ;;  %v10048_v10 = vld [vmem:[%s20279_s1 + $0xd48] sm:$0xf]  ;;  %v10321_v31 = vor.u32 %v13093_v21, %v10320_v20  ;;  %v7021_v32 = vadd.f32 %v7020_v35, %v7008_v63  ;;  %v6996_v41 = vpop.f32.mrf.mxu0 }
 0x27a   :  { %7260 = vmatpush.bf16.msrb.mxu1 %v10097_v37  ;;  %v13025_v36 = vld [vmem:[%s20279_s1 + $0xd54] sm:$0xf0]  ;;  %v10176_v24 = vld [vmem:[%s20279_s1 + $0xe48] sm:$0xf]  ;;  %v7033_v37 = vpop.f32.mrf.mxu3  ;;  %v9921_v42 = vor.u32 %v12993_v26, %v9920_v25 }
 0x27b   :  { %7273 = vmatpush.bf16.msrb.mxu2 %v10225_v38  ;;  %v13057_v22 = vld [vmem:[%s20279_s1 + $0xe54] sm:$0xf0]  ;;  %v10304_v38 = vld [vmem:[%s20279_s1 + $0xf48] sm:$0xf]  ;;  %v17715_v45 = vadd.f32 %v7033_v37, %v7021_v32  ;;  %v10049_v50 = vor.u32 %v13025_v36, %v10048_v10 }
 0x27c   :  { %7286 = vmatpush.bf16.msrb.mxu3 %v10353_v30  ;;  %v13089_v39 = vld [vmem:[%s20279_s1 + $0xf54] sm:$0xf0]  ;;  %v7009_v30 = vpop.f32.mrf.mxu1  ;;  %v10177_v51 = vor.u32 %v13057_v22, %v10176_v24  ;;  %v9904_v33 = vld [vmem:[%s20279_s1 + $0xc28] sm:$0xf] }
 0x27d   :  { %7248 = vmatpush.bf16.msrb.mxu0 %v9953_v53  ;;  %v12989_v52 = vld [vmem:[%s20279_s1 + $0xc34] sm:$0xf0]  ;;  %v10032_v44 = vld [vmem:[%s20279_s1 + $0xd28] sm:$0xf]  ;;  %v10305_v43 = vor.u32 %v13089_v39, %v10304_v38 }
 0x27e   :  { %7261 = vmatpush.bf16.msrb.mxu1 %v10081_v57  ;;  %v13021_v53 = vld [vmem:[%s20279_s1 + $0xd34] sm:$0xf0]  ;;  %v10160_v56 = vld [vmem:[%s20279_s1 + $0xe28] sm:$0xf]  ;;  %v9905_v61 = vor.u32 %v12989_v52, %v9904_v33 }
 0x27f   :  { %7274 = vmatpush.bf16.msrb.mxu2 %v10209_v59  ;;  %v13053_v57 = vld [vmem:[%s20279_s1 + $0xe34] sm:$0xf0]  ;;  %v10288_v59 = vld [vmem:[%s20279_s1 + $0xf28] sm:$0xf]  ;;  %v10033_v63 = vor.u32 %v13021_v53, %v10032_v44 }
 0x280   :  { %7287 = vmatpush.bf16.msrb.mxu3 %v10337_v55  ;;  %v13085_v40 = vld [vmem:[%s20279_s1 + $0xf34] sm:$0xf0]  ;;  %v9888_v62 = vld [vmem:[%s20279_s1 + $0xc08] sm:$0xf]  ;;  %v10161_v3 = vor.u32 %v13053_v57, %v10160_v56  ;;  %v7022_v25 = vpop.f32.mrf.mxu2 }
 0x281   :  { %7249 = vmatpush.bf16.msrb.mxu0 %v9937_v23  ;;  %v12985_v55 = vld [vmem:[%s20279_s1 + $0xc14] sm:$0xf0]  ;;  %v10016_v8 = vld [vmem:[%s20279_s1 + $0xd08] sm:$0xf]  ;;  %v10289_v21 = vor.u32 %v13085_v40, %v10288_v59 }
 0x282   :  { %7262 = vmatpush.bf16.msrb.mxu1 %v10065_v58  ;;  %v13017_v19 = vld [vmem:[%s20279_s1 + $0xd14] sm:$0xf0]  ;;  %v10144_v20 = vld [vmem:[%s20279_s1 + $0xe08] sm:$0xf]  ;;  %v7035_v35 = vpop.f32.mrf.mxu3  ;;  %v9889_v36 = vor.u32 %v12985_v55, %v9888_v62 }
 0x283   :  { %7275 = vmatpush.bf16.msrb.mxu2 %v10193_v11  ;;  %v13049_v23 = vld [vmem:[%s20279_s1 + $0xe14] sm:$0xf0]  ;;  %v10272_v58 = vld [vmem:[%s20279_s1 + $0xf08] sm:$0xf]  ;;  %v10017_v37 = vor.u32 %v13017_v19, %v10016_v8 }
 0x284   :  { %7288 = vmatpush.bf16.msrb.mxu3 %v10321_v31  ;;  %v13081_v11 = vld [vmem:[%s20279_s1 + $0xf14] sm:$0xf0]  ;;  %v10512_v26 = vld [vmem:[%s20279_s1 + $0x10e8] sm:$0xf]  ;;  %v10145_v38 = vor.u32 %v13049_v23, %v10144_v20 }
 0x285   :  { %7250 = vmatpush.bf16.msrb.mxu0 %v9921_v42  ;;  %v13141_v10 = vld [vmem:[%s20279_s1 + $0x10f4] sm:$0xf0]  ;;  %v10640_v31 = vld [vmem:[%s20279_s1 + $0x11e8] sm:$0xf]  ;;  %v10273_v42 = vor.u32 %v13081_v11, %v10272_v58 }
 0x286   :  { %7263 = vmatpush.bf16.msrb.mxu1 %v10049_v50  ;;  %v13173_v24 = vld [vmem:[%s20279_s1 + $0x11f4] sm:$0xf0]  ;;  %v10768_v22 = vld [vmem:[%s20279_s1 + $0x12e8] sm:$0xf]  ;;  %v10513_v30 = vor.u32 %v13141_v10, %v10512_v26 }
 0x287   :  { %7276 = vmatpush.bf16.msrb.mxu2 %v10177_v51  ;;  %v13205_v32 = vld [vmem:[%s20279_s1 + $0x12f4] sm:$0xf0]  ;;  %v10896_v39 = vld [vmem:[%s20279_s1 + $0x13e8] sm:$0xf]  ;;  %v10641_v50 = vor.u32 %v13173_v24, %v10640_v31 }
 0x288   :  { %7289 = vmatpush.bf16.msrb.mxu3 %v10305_v43  ;;  %v13237_v41 = vld [vmem:[%s20279_s1 + $0x13f4] sm:$0xf0]  ;;  %v10769_v51 = vor.u32 %v13205_v32, %v10768_v22  ;;  %v10496_v33 = vld [vmem:[%s20279_s1 + $0x10c8] sm:$0xf] }
 0x289   :  { %7251 = vmatpush.bf16.msrb.mxu0 %v9905_v61  ;;  %v13137_v52 = vld [vmem:[%s20279_s1 + $0x10d4] sm:$0xf0]  ;;  %v10624_v44 = vld [vmem:[%s20279_s1 + $0x11c8] sm:$0xf]  ;;  %v10897_v43 = vor.u32 %v13237_v41, %v10896_v39 }
 0x28a   :  { %7264 = vmatpush.bf16.msrb.mxu1 %v10033_v63  ;;  %v13169_v53 = vld [vmem:[%s20279_s1 + $0x11d4] sm:$0xf0]  ;;  %v10752_v56 = vld [vmem:[%s20279_s1 + $0x12c8] sm:$0xf]  ;;  %v10497_v61 = vor.u32 %v13137_v52, %v10496_v33 }
 0x28b   :  { %7277 = vmatpush.bf16.msrb.mxu2 %v10161_v3  ;;  %v13201_v57 = vld [vmem:[%s20279_s1 + $0x12d4] sm:$0xf0]  ;;  %v10880_v59 = vld [vmem:[%s20279_s1 + $0x13c8] sm:$0xf]  ;;  %v10625_v62 = vor.u32 %v13169_v53, %v10624_v44 }
 0x28c   :  { %7290 = vmatpush.bf16.msrb.mxu3 %v10289_v21  ;;  %v13233_v40 = vld [vmem:[%s20279_s1 + $0x13d4] sm:$0xf0]  ;;  %v10753_v55 = vor.u32 %v13201_v57, %v10752_v56  ;;  %v10480_v63 = vld [vmem:[%s20279_s1 + $0x10a8] sm:$0xf] }
 0x28d   :  { %7252 = vmatpush.bf16.msrb.mxu0 %v9889_v36  ;;  %v13133_v3 = vld [vmem:[%s20279_s1 + $0x10b4] sm:$0xf0]  ;;  %v10608_v8 = vld [vmem:[%s20279_s1 + $0x11a8] sm:$0xf]  ;;  %v10881_v19 = vor.u32 %v13233_v40, %v10880_v59 }
 0x28e   :  { %7265 = vmatpush.bf16.msrb.mxu1 %v10017_v37  ;;  %v13165_v20 = vld [vmem:[%s20279_s1 + $0x11b4] sm:$0xf0]  ;;  %v10736_v21 = vld [vmem:[%s20279_s1 + $0x12a8] sm:$0xf]  ;;  %v10481_v25 = vor.u32 %v13133_v3, %v10480_v63 }
 0x28f   :  { %7278 = vmatpush.bf16.msrb.mxu2 %v10145_v38  ;;  %v13197_v23 = vld [vmem:[%s20279_s1 + $0x12b4] sm:$0xf0]  ;;  %v10864_v58 = vld [vmem:[%s20279_s1 + $0x13a8] sm:$0xf]  ;;  %v10609_v26 = vor.u32 %v13165_v20, %v10608_v8  ;;  %v7046_v38 = vpop.f32.mrf.mxu0 }
 0x290   :  { %7291 = vmatpush.bf16.msrb.mxu3 %v10273_v42  ;;  %7253 = vmatmul.bf16.vlgmr.msrb.gmra.mxu0 %v14581_v46  ;;  %v13229_v11 = vld [vmem:[%s20279_s1 + $0x13b4] sm:$0xf0]  ;;  %v10737_v10 = vor.u32 %v13197_v23, %v10736_v21  ;;  %v10464_v31 = vld [vmem:[%s20279_s1 + $0x1088] sm:$0xf]  ;;  %v7047_v42 = vadd.f32 %v7046_v38, %v17715_v45 }
 0x291   :  { %7297 = vmatpush.bf16.msra.mxu0 %v10513_v30  ;;  %7266 = vmatmul.bf16.vlgmr.msrb.gmra.mxu1 %v14585_v48  ;;  %v13129_v35 = vld [vmem:[%s20279_s1 + $0x1094] sm:$0xf0]  ;;  %v10592_v36 = vld [vmem:[%s20279_s1 + $0x1188] sm:$0xf]  ;;  %v10865_v24 = vor.u32 %v13229_v11, %v10864_v58 }
 0x292   :  { %7310 = vmatpush.bf16.msra.mxu1 %v10641_v50  ;;  %7279 = vmatmul.bf16.vlgmr.msrb.gmra.mxu2 %v14583_v47  ;;  %v13161_v22 = vld [vmem:[%s20279_s1 + $0x1194] sm:$0xf0]  ;;  %v10720_v32 = vld [vmem:[%s20279_s1 + $0x1288] sm:$0xf]  ;;  %v10465_v30 = vor.u32 %v13129_v35, %v10464_v31  ;;  %v7059_v50 = vpop.f32.mrf.mxu1 }
 0x293   :  { %7323 = vmatpush.bf16.msra.mxu2 %v10769_v51  ;;  %7292 = vmatmul.bf16.vlgmr.msrb.gmra.mxu3 %v14587_v49  ;;  %v13193_v37 = vld [vmem:[%s20279_s1 + $0x1294] sm:$0xf0]  ;;  %v10848_v39 = vld [vmem:[%s20279_s1 + $0x1388] sm:$0xf]  ;;  %v10593_v51 = vor.u32 %v13161_v22, %v10592_v36  ;;  %v7060_v53 = vadd.f32 %v7059_v50, %v7047_v42 }
 0x294   :  { %7336 = vmatpush.bf16.msra.mxu3 %v10897_v43  ;;  %v13225_v41 = vld [vmem:[%s20279_s1 + $0x1394] sm:$0xf0]  ;;  %v10721_v33 = vor.u32 %v13193_v37, %v10720_v32  ;;  %v10448_v52 = vld [vmem:[%s20279_s1 + $0x1068] sm:$0xf] }
 0x295   :  { %7298 = vmatpush.bf16.msra.mxu0 %v10497_v61  ;;  %v13125_v44 = vld [vmem:[%s20279_s1 + $0x1074] sm:$0xf0]  ;;  %v10576_v43 = vld [vmem:[%s20279_s1 + $0x1168] sm:$0xf]  ;;  %v10849_v45 = vor.u32 %v13225_v41, %v10848_v39  ;;  %v7072_v21 = vpop.f32.mrf.mxu2 }
 0x296   :  { %7311 = vmatpush.bf16.msra.mxu1 %v10625_v62  ;;  %v13157_v56 = vld [vmem:[%s20279_s1 + $0x1174] sm:$0xf0]  ;;  %v10704_v57 = vld [vmem:[%s20279_s1 + $0x1268] sm:$0xf]  ;;  %v10449_v62 = vor.u32 %v13125_v44, %v10448_v52 }
 0x297   :  { %7324 = vmatpush.bf16.msra.mxu2 %v10753_v55  ;;  %v13189_v59 = vld [vmem:[%s20279_s1 + $0x1274] sm:$0xf0]  ;;  %v10832_v40 = vld [vmem:[%s20279_s1 + $0x1368] sm:$0xf]  ;;  %v10577_v55 = vor.u32 %v13157_v56, %v10576_v43  ;;  %v7048_v35 = vpop.f32.mrf.mxu0 }
 0x298   :  { %7337 = vmatpush.bf16.msra.mxu3 %v10881_v19  ;;  %v13221_v61 = vld [vmem:[%s20279_s1 + $0x1374] sm:$0xf0]  ;;  %v10705_v63 = vor.u32 %v13189_v59, %v10704_v57  ;;  %v10432_v3 = vld [vmem:[%s20279_s1 + $0x1048] sm:$0xf] }
 0x299   :  { %7299 = vmatpush.bf16.msra.mxu0 %v10481_v25  ;;  %v13121_v8 = vld [vmem:[%s20279_s1 + $0x1054] sm:$0xf0]  ;;  %v10560_v19 = vld [vmem:[%s20279_s1 + $0x1148] sm:$0xf]  ;;  %v10833_v20 = vor.u32 %v13221_v61, %v10832_v40  ;;  %v7073_v25 = vadd.f32 %v7072_v21, %v7060_v53 }
 0x29a   :  { %7312 = vmatpush.bf16.msra.mxu1 %v10609_v26  ;;  %v13153_v23 = vld [vmem:[%s20279_s1 + $0x1154] sm:$0xf0]  ;;  %v10688_v58 = vld [vmem:[%s20279_s1 + $0x1248] sm:$0xf]  ;;  %v7085_v26 = vpop.f32.mrf.mxu3  ;;  %v10433_v36 = vor.u32 %v13121_v8, %v10432_v3 }
 0x29b   :  { %7325 = vmatpush.bf16.msra.mxu2 %v10737_v10  ;;  %v13185_v11 = vld [vmem:[%s20279_s1 + $0x1254] sm:$0xf0]  ;;  %v10816_v10 = vld [vmem:[%s20279_s1 + $0x1348] sm:$0xf]  ;;  %v17914_v22 = vadd.f32 %v7085_v26, %v7073_v25  ;;  %v10561_v32 = vor.u32 %v13153_v23, %v10560_v19 }
 0x29c   :  { %7338 = vmatpush.bf16.msra.mxu3 %v10865_v24  ;;  %v13217_v31 = vld [vmem:[%s20279_s1 + $0x1354] sm:$0xf0]  ;;  %v7061_v24 = vpop.f32.mrf.mxu1  ;;  %v10689_v37 = vor.u32 %v13185_v11, %v10688_v58  ;;  %v10416_v38 = vld [vmem:[%s20279_s1 + $0x1028] sm:$0xf] }
 0x29d   :  { %7300 = vmatpush.bf16.msra.mxu0 %v10465_v30  ;;  %v13117_v39 = vld [vmem:[%s20279_s1 + $0x1034] sm:$0xf0]  ;;  %v10544_v41 = vld [vmem:[%s20279_s1 + $0x1128] sm:$0xf]  ;;  %v10817_v42 = vor.u32 %v13217_v31, %v10816_v10  ;;  %v7074_v3 = vpop.f32.mrf.mxu2 }
 0x29e   :  { %7313 = vmatpush.bf16.msra.mxu1 %v10593_v51  ;;  %v13149_v30 = vld [vmem:[%s20279_s1 + $0x1134] sm:$0xf0]  ;;  %v10672_v50 = vld [vmem:[%s20279_s1 + $0x1228] sm:$0xf]  ;;  %v10417_v44 = vor.u32 %v13117_v39, %v10416_v38 }
 0x29f   :  { %7326 = vmatpush.bf16.msra.mxu2 %v10721_v33  ;;  %v13181_v51 = vld [vmem:[%s20279_s1 + $0x1234] sm:$0xf0]  ;;  %v10800_v33 = vld [vmem:[%s20279_s1 + $0x1328] sm:$0xf]  ;;  %v10545_v53 = vor.u32 %v13149_v30, %v10544_v41 }
 0x2a0   :  { %7339 = vmatpush.bf16.msra.mxu3 %v10849_v45  ;;  %v13213_v52 = vld [vmem:[%s20279_s1 + $0x1334] sm:$0xf0]  ;;  %v10400_v43 = vld [vmem:[%s20279_s1 + $0x1008] sm:$0xf]  ;;  %v10673_v56 = vor.u32 %v13181_v51, %v10672_v50 }
 0x2a1   :  { %7301 = vmatpush.bf16.msra.mxu0 %v10449_v62  ;;  %v13113_v45 = vld [vmem:[%s20279_s1 + $0x1014] sm:$0xf0]  ;;  %v10528_v57 = vld [vmem:[%s20279_s1 + $0x1108] sm:$0xf]  ;;  %v10801_v61 = vor.u32 %v13213_v52, %v10800_v33 }
 0x2a2   :  { %7314 = vmatpush.bf16.msra.mxu1 %v10577_v55  ;;  %v13145_v59 = vld [vmem:[%s20279_s1 + $0x1114] sm:$0xf0]  ;;  %v10656_v40 = vld [vmem:[%s20279_s1 + $0x1208] sm:$0xf]  ;;  %v7087_v21 = vpop.f32.mrf.mxu3  ;;  %v10401_v23 = vor.u32 %v13113_v45, %v10400_v43 }
 0x2a3   :  { %7327 = vmatpush.bf16.msra.mxu2 %v10705_v63  ;;  %v13177_v62 = vld [vmem:[%s20279_s1 + $0x1214] sm:$0xf0]  ;;  %v10784_v55 = vld [vmem:[%s20279_s1 + $0x1308] sm:$0xf]  ;;  %v10529_v26 = vor.u32 %v13145_v59, %v10528_v57 }
 0x2a4   :  { %7340 = vmatpush.bf16.msra.mxu3 %v10833_v20  ;;  %v13209_v63 = vld [vmem:[%s20279_s1 + $0x1314] sm:$0xf0]  ;;  %v11024_v8 = vld [vmem:[%s20279_s1 + $0x14e8] sm:$0xf]  ;;  %v10657_v10 = vor.u32 %v13177_v62, %v10656_v40 }
 0x2a5   :  { %7302 = vmatpush.bf16.msra.mxu0 %v10433_v36  ;;  %v13269_v19 = vld [vmem:[%s20279_s1 + $0x14f4] sm:$0xf0]  ;;  %v11152_v20 = vld [vmem:[%s20279_s1 + $0x15e8] sm:$0xf]  ;;  %v10785_v36 = vor.u32 %v13209_v63, %v10784_v55 }
 0x2a6   :  { %7315 = vmatpush.bf16.msra.mxu1 %v10561_v32  ;;  %v13301_v58 = vld [vmem:[%s20279_s1 + $0x15f4] sm:$0xf0]  ;;  %v11280_v11 = vld [vmem:[%s20279_s1 + $0x16e8] sm:$0xf]  ;;  %v11025_v24 = vor.u32 %v13269_v19, %v11024_v8 }
 0x2a7   :  { %7328 = vmatpush.bf16.msra.mxu2 %v10689_v37  ;;  %v13333_v25 = vld [vmem:[%s20279_s1 + $0x16f4] sm:$0xf0]  ;;  %v11408_v31 = vld [vmem:[%s20279_s1 + $0x17e8] sm:$0xf]  ;;  %v11153_v32 = vor.u32 %v13301_v58, %v11152_v20  ;;  %v13674_v58 = vld [vmem:[%s20280_s2] sm:$0xf] }
 0x2a8   :  { %7341 = vmatpush.bf16.msra.mxu3 %v10817_v42  ;;  %v13365_v35 = vld [vmem:[%s20279_s1 + $0x17f4] sm:$0xf0]  ;;  %v11281_v37 = vor.u32 %v13333_v25, %v11280_v11  ;;  %v11008_v38 = vld [vmem:[%s20279_s1 + $0x14c8] sm:$0xf]  ;;  %v1059_v11 = vperm.slane %v13674_v58, 2 }
 0x2a9   :  { %7303 = vmatpush.bf16.msra.mxu0 %v10417_v44  ;;  %v13265_v39 = vld [vmem:[%s20279_s1 + $0x14d4] sm:$0xf0]  ;;  %v11136_v41 = vld [vmem:[%s20279_s1 + $0x15c8] sm:$0xf]  ;;  %v11409_v42 = vor.u32 %v13365_v35, %v11408_v31 }
 0x2aa   :  { %7316 = vmatpush.bf16.msra.mxu1 %v10545_v53  ;;  %v13297_v30 = vld [vmem:[%s20279_s1 + $0x15d4] sm:$0xf0]  ;;  %v11264_v50 = vld [vmem:[%s20279_s1 + $0x16c8] sm:$0xf]  ;;  %v11009_v44 = vor.u32 %v13265_v39, %v11008_v38 }
 0x2ab   :  { %7329 = vmatpush.bf16.msra.mxu2 %v10673_v56  ;;  %v13329_v51 = vld [vmem:[%s20279_s1 + $0x16d4] sm:$0xf0]  ;;  %v11392_v33 = vld [vmem:[%s20279_s1 + $0x17c8] sm:$0xf]  ;;  %v11137_v43 = vor.u32 %v13297_v30, %v11136_v41 }
 0x2ac   :  { %7342 = vmatpush.bf16.msra.mxu3 %v10801_v61  ;;  %v13361_v52 = vld [vmem:[%s20279_s1 + $0x17d4] sm:$0xf0]  ;;  %v11265_v45 = vor.u32 %v13329_v51, %v11264_v50  ;;  %v10992_v53 = vld [vmem:[%s20279_s1 + $0x14a8] sm:$0xf] }
 0x2ad   :  { %7304 = vmatpush.bf16.msra.mxu0 %v10401_v23  ;;  %v13261_v56 = vld [vmem:[%s20279_s1 + $0x14b4] sm:$0xf0]  ;;  %v11120_v57 = vld [vmem:[%s20279_s1 + $0x15a8] sm:$0xf]  ;;  %v11393_v59 = vor.u32 %v13361_v52, %v11392_v33 }
 0x2ae   :  { %7317 = vmatpush.bf16.msra.mxu1 %v10529_v26  ;;  %v13293_v40 = vld [vmem:[%s20279_s1 + $0x15b4] sm:$0xf0]  ;;  %v11248_v61 = vld [vmem:[%s20279_s1 + $0x16a8] sm:$0xf]  ;;  %v10993_v3 = vor.u32 %v13261_v56, %v10992_v53  ;;  %v7111_v50 = vpop.f32.mrf.mxu1 }
 0x2af   :  { %7330 = vmatpush.bf16.msra.mxu2 %v10657_v10  ;;  %v13325_v62 = vld [vmem:[%s20279_s1 + $0x16b4] sm:$0xf0]  ;;  %v11376_v55 = vld [vmem:[%s20279_s1 + $0x17a8] sm:$0xf]  ;;  %v11121_v19 = vor.u32 %v13293_v40, %v11120_v57 }
 0x2b0   :  { %7343 = vmatpush.bf16.msra.mxu3 %v10785_v36  ;;  %7305 = vmatmul.bf16.vlgmr.msra.gmra.mxu0 %v14818_v9  ;;  %v13357_v63 = vld [vmem:[%s20279_s1 + $0x17b4] sm:$0xf0]  ;;  %v10976_v8 = vld [vmem:[%s20279_s1 + $0x1488] sm:$0xf]  ;;  %v11249_v20 = vor.u32 %v13325_v62, %v11248_v61 }
 0x2b1   :  { %7349 = vmatpush.bf16.msrb.mxu0 %v11025_v24  ;;  %7318 = vmatmul.bf16.vlgmr.msra.gmra.mxu1 %v14828_v14  ;;  %v13257_v21 = vld [vmem:[%s20279_s1 + $0x1494] sm:$0xf0]  ;;  %v11104_v23 = vld [vmem:[%s20279_s1 + $0x1588] sm:$0xf]  ;;  %v11377_v25 = vor.u32 %v13357_v63, %v11376_v55 }
 0x2b2   :  { %7362 = vmatpush.bf16.msrb.mxu1 %v11153_v32  ;;  %7331 = vmatmul.bf16.vlgmr.msra.gmra.mxu2 %v14826_v13  ;;  %v13289_v26 = vld [vmem:[%s20279_s1 + $0x1594] sm:$0xf0]  ;;  %v11232_v10 = vld [vmem:[%s20279_s1 + $0x1688] sm:$0xf]  ;;  %v10977_v24 = vor.u32 %v13257_v21, %v10976_v8  ;;  %v7098_v32 = vpop.f32.mrf.mxu0 }
 0x2b3   :  { %7375 = vmatpush.bf16.msrb.mxu2 %v11281_v37  ;;  %7344 = vmatmul.bf16.vlgmr.msra.gmra.mxu3 %v14830_v18  ;;  %v13321_v31 = vld [vmem:[%s20279_s1 + $0x1694] sm:$0xf0]  ;;  %v11360_v35 = vld [vmem:[%s20279_s1 + $0x1788] sm:$0xf]  ;;  %v11105_v37 = vor.u32 %v13289_v26, %v11104_v23  ;;  %v7099_v30 = vadd.f32 %v7098_v32, %v1059_v11 }
 0x2b4   :  { %7388 = vmatpush.bf16.msrb.mxu3 %v11409_v42  ;;  %v13353_v36 = vld [vmem:[%s20279_s1 + $0x1794] sm:$0xf0]  ;;  %v11233_v38 = vor.u32 %v13321_v31, %v11232_v10  ;;  %v10960_v39 = vld [vmem:[%s20279_s1 + $0x1468] sm:$0xf] }
 0x2b5   :  { %7350 = vmatpush.bf16.msrb.mxu0 %v11009_v44  ;;  %v13253_v41 = vld [vmem:[%s20279_s1 + $0x1474] sm:$0xf0]  ;;  %v11088_v42 = vld [vmem:[%s20279_s1 + $0x1568] sm:$0xf]  ;;  %v11361_v51 = vor.u32 %v13353_v36, %v11360_v35  ;;  %v7112_v53 = vadd.f32 %v7111_v50, %v7099_v30  ;;  %v7124_v55 = vpop.f32.mrf.mxu2 }
 0x2b6   :  { %7363 = vmatpush.bf16.msrb.mxu1 %v11137_v43  ;;  %v13285_v33 = vld [vmem:[%s20279_s1 + $0x1574] sm:$0xf0]  ;;  %v11216_v52 = vld [vmem:[%s20279_s1 + $0x1668] sm:$0xf]  ;;  %v10961_v56 = vor.u32 %v13253_v41, %v10960_v39  ;;  %v7137_v21 = vpop.f32.mrf.mxu3  ;;  %v7113_v32 = vpop.f32.mrf.mxu1 }
 0x2b7   :  { %7376 = vmatpush.bf16.msrb.mxu2 %v11265_v45  ;;  %v13317_v44 = vld [vmem:[%s20279_s1 + $0x1674] sm:$0xf0]  ;;  %v11344_v43 = vld [vmem:[%s20279_s1 + $0x1768] sm:$0xf]  ;;  %v11089_v57 = vor.u32 %v13285_v33, %v11088_v42 }
 0x2b8   :  { %7389 = vmatpush.bf16.msrb.mxu3 %v11393_v59  ;;  %v13349_v45 = vld [vmem:[%s20279_s1 + $0x1774] sm:$0xf0]  ;;  %v11217_v59 = vor.u32 %v13317_v44, %v11216_v52  ;;  %v10944_v40 = vld [vmem:[%s20279_s1 + $0x1448] sm:$0xf] }
 0x2b9   :  { %7351 = vmatpush.bf16.msrb.mxu0 %v10993_v3  ;;  %v13249_v61 = vld [vmem:[%s20279_s1 + $0x1454] sm:$0xf0]  ;;  %v11072_v62 = vld [vmem:[%s20279_s1 + $0x1548] sm:$0xf]  ;;  %v11345_v63 = vor.u32 %v13349_v45, %v11344_v43 }
 0x2ba   :  { %7364 = vmatpush.bf16.msrb.mxu1 %v11121_v19  ;;  %v13281_v3 = vld [vmem:[%s20279_s1 + $0x1554] sm:$0xf0]  ;;  %v11200_v8 = vld [vmem:[%s20279_s1 + $0x1648] sm:$0xf]  ;;  %v10945_v11 = vor.u32 %v13249_v61, %v10944_v40  ;;  %v7100_v26 = vpop.f32.mrf.mxu0 }
 0x2bb   :  { %7377 = vmatpush.bf16.msrb.mxu2 %v11249_v20  ;;  %v13313_v19 = vld [vmem:[%s20279_s1 + $0x1654] sm:$0xf0]  ;;  %v7125_v20 = vadd.f32 %v7124_v55, %v7112_v53  ;;  %v11328_v23 = vld [vmem:[%s20279_s1 + $0x1748] sm:$0xf]  ;;  %v11073_v10 = vor.u32 %v13281_v3, %v11072_v62 }
 0x2bc   :  { %7390 = vmatpush.bf16.msrb.mxu3 %v11377_v25  ;;  %v13345_v58 = vld [vmem:[%s20279_s1 + $0x1754] sm:$0xf0]  ;;  %v11201_v31 = vor.u32 %v13313_v19, %v11200_v8  ;;  %v10928_v35 = vld [vmem:[%s20279_s1 + $0x1428] sm:$0xf] }
 0x2bd   :  { %7352 = vmatpush.bf16.msrb.mxu0 %v10977_v24  ;;  %v18115_v25 = vadd.f32 %v7137_v21, %v7125_v20  ;;  %v13245_v36 = vld [vmem:[%s20279_s1 + $0x1434] sm:$0xf0]  ;;  %v11056_v24 = vld [vmem:[%s20279_s1 + $0x1528] sm:$0xf] }
 0x2be   :  { %7365 = vmatpush.bf16.msrb.mxu1 %v11105_v37  ;;  %v11329_v37 = vor.u32 %v13345_v58, %v11328_v23  ;;  %v11184_v39 = vld [vmem:[%s20279_s1 + $0x1628] sm:$0xf]  ;;  %v13309_v41 = vld [vmem:[%s20279_s1 + $0x1634] sm:$0xf0]  ;;  %v10929_v50 = vor.u32 %v13245_v36, %v10928_v35  ;;  %v7139_v62 = vpop.f32.mrf.mxu3 }
 0x2bf   :  { %7378 = vmatpush.bf16.msrb.mxu2 %v11233_v38  ;;  %v13277_v38 = vld [vmem:[%s20279_s1 + $0x1534] sm:$0xf0]  ;;  %v11312_v42 = vld [vmem:[%s20279_s1 + $0x1728] sm:$0xf]  ;;  %v11185_v44 = vor.u32 %v13309_v41, %v11184_v39 }
 0x2c0   :  { %7391 = vmatpush.bf16.msrb.mxu3 %v11361_v51  ;;  %v13341_v30 = vld [vmem:[%s20279_s1 + $0x1734] sm:$0xf0]  ;;  %v10912_v51 = vld [vmem:[%s20279_s1 + $0x1408] sm:$0xf]  ;;  %v11057_v52 = vor.u32 %v13277_v38, %v11056_v24 }
 0x2c1   :  { %7353 = vmatpush.bf16.msrb.mxu0 %v10961_v56  ;;  %v13241_v33 = vld [vmem:[%s20279_s1 + $0x1414] sm:$0xf0]  ;;  %v11040_v43 = vld [vmem:[%s20279_s1 + $0x1508] sm:$0xf]  ;;  %v7126_v56 = vpop.f32.mrf.mxu2 }
 0x2c2   :  { %7366 = vmatpush.bf16.msrb.mxu1 %v11089_v57  ;;  %v13273_v45 = vld [vmem:[%s20279_s1 + $0x1514] sm:$0xf0]  ;;  %v11168_v53 = vld [vmem:[%s20279_s1 + $0x1608] sm:$0xf]  ;;  %v11313_v57 = vor.u32 %v13341_v30, %v11312_v42  ;;  %v10913_v8 = vor.u32 %v13241_v33, %v10912_v51 }
 0x2c3   :  { %7379 = vmatpush.bf16.msrb.mxu2 %v11217_v59  ;;  %v13305_v59 = vld [vmem:[%s20279_s1 + $0x1614] sm:$0xf0]  ;;  %v11296_v40 = vld [vmem:[%s20279_s1 + $0x1708] sm:$0xf]  ;;  %v11041_v23 = vor.u32 %v13273_v45, %v11040_v43 }
 0x2c4   :  { %7392 = vmatpush.bf16.msrb.mxu3 %v11345_v63  ;;  %v13337_v61 = vld [vmem:[%s20279_s1 + $0x1714] sm:$0xf0]  ;;  %v11536_v55 = vld [vmem:[%s20279_s1 + $0x18e8] sm:$0xf]  ;;  %v11169_v58 = vor.u32 %v13305_v59, %v11168_v53 }
 0x2c5   :  { %7354 = vmatpush.bf16.msrb.mxu0 %v10945_v11  ;;  %v13397_v63 = vld [vmem:[%s20279_s1 + $0x18f4] sm:$0xf0]  ;;  %v11664_v3 = vld [vmem:[%s20279_s1 + $0x19e8] sm:$0xf] }
 0x2c6   :  { %7367 = vmatpush.bf16.msrb.mxu1 %v11073_v10  ;;  %v13429_v19 = vld [vmem:[%s20279_s1 + $0x19f4] sm:$0xf0]  ;;  %v11792_v20 = vld [vmem:[%s20279_s1 + $0x1ae8] sm:$0xf]  ;;  %v11297_v10 = vor.u32 %v13337_v61, %v11296_v40 }
 0x2c7   :  { %7380 = vmatpush.bf16.msrb.mxu2 %v11201_v31  ;;  %v13461_v21 = vld [vmem:[%s20279_s1 + $0x1af4] sm:$0xf0]  ;;  %v11920_v11 = vld [vmem:[%s20279_s1 + $0x1be8] sm:$0xf]  ;;  %v11537_v31 = vor.u32 %v13397_v63, %v11536_v55  ;;  %v11665_v35 = vor.u32 %v13429_v19, %v11664_v3 }
 0x2c8   :  { %7393 = vmatpush.bf16.msrb.mxu3 %v11329_v37  ;;  %v13493_v26 = vld [vmem:[%s20279_s1 + $0x1bf4] sm:$0xf0]  ;;  %v11793_v36 = vor.u32 %v13461_v21, %v11792_v20  ;;  %v11520_v24 = vld [vmem:[%s20279_s1 + $0x18c8] sm:$0xf] }
 0x2c9   :  { %7355 = vmatpush.bf16.msrb.mxu0 %v10929_v50  ;;  %v13393_v32 = vld [vmem:[%s20279_s1 + $0x18d4] sm:$0xf0]  ;;  %v11648_v37 = vld [vmem:[%s20279_s1 + $0x19c8] sm:$0xf]  ;;  %v11921_v38 = vor.u32 %v13493_v26, %v11920_v11 }
 0x2ca   :  { %7368 = vmatpush.bf16.msrb.mxu1 %v11057_v52  ;;  %v13425_v39 = vld [vmem:[%s20279_s1 + $0x19d4] sm:$0xf0]  ;;  %v11776_v41 = vld [vmem:[%s20279_s1 + $0x1ac8] sm:$0xf]  ;;  %v11521_v51 = vor.u32 %v13393_v32, %v11520_v24 }
 0x2cb   :  { %7381 = vmatpush.bf16.msrb.mxu2 %v11185_v44  ;;  %v13457_v42 = vld [vmem:[%s20279_s1 + $0x1ad4] sm:$0xf0]  ;;  %v11904_v30 = vld [vmem:[%s20279_s1 + $0x1bc8] sm:$0xf]  ;;  %v11649_v33 = vor.u32 %v13425_v39, %v11648_v37 }
 0x2cc   :  { %7394 = vmatpush.bf16.msrb.mxu3 %v11313_v57  ;;  %v13489_v50 = vld [vmem:[%s20279_s1 + $0x1bd4] sm:$0xf0]  ;;  %v11777_v52 = vor.u32 %v13457_v42, %v11776_v41  ;;  %v11504_v44 = vld [vmem:[%s20279_s1 + $0x18a8] sm:$0xf] }
 0x2cd   :  { %7356 = vmatpush.bf16.msrb.mxu0 %v10913_v8  ;;  %v13389_v43 = vld [vmem:[%s20279_s1 + $0x18b4] sm:$0xf0]  ;;  %v11632_v45 = vld [vmem:[%s20279_s1 + $0x19a8] sm:$0xf]  ;;  %v11905_v53 = vor.u32 %v13489_v50, %v11904_v30 }
 0x2ce   :  { %7369 = vmatpush.bf16.msrb.mxu1 %v11041_v23  ;;  %v13421_v56 = vld [vmem:[%s20279_s1 + $0x19b4] sm:$0xf0]  ;;  %v11760_v57 = vld [vmem:[%s20279_s1 + $0x1aa8] sm:$0xf]  ;;  %v11505_v62 = vor.u32 %v13389_v43, %v11504_v44  ;;  %v7163_v39 = vpop.f32.mrf.mxu1 }
 0x2cf   :  { %7382 = vmatpush.bf16.msrb.mxu2 %v11169_v58  ;;  %v13453_v59 = vld [vmem:[%s20279_s1 + $0x1ab4] sm:$0xf0]  ;;  %v11888_v40 = vld [vmem:[%s20279_s1 + $0x1ba8] sm:$0xf]  ;;  %v11633_v55 = vor.u32 %v13421_v56, %v11632_v45 }
 0x2d0   :  { %7395 = vmatpush.bf16.msrb.mxu3 %v11297_v10  ;;  %7357 = vmatmul.bf16.vlgmr.msrb.gmra.mxu0 %v14995_v4  ;;  %v13485_v61 = vld [vmem:[%s20279_s1 + $0x1bb4] sm:$0xf0]  ;;  %v11761_v63 = vor.u32 %v13453_v59, %v11760_v57  ;;  %v11488_v3 = vld [vmem:[%s20279_s1 + $0x1888] sm:$0xf] }
 0x2d1   :  { %7401 = vmatpush.bf16.msra.mxu0 %v11537_v31  ;;  %7370 = vmatmul.bf16.vlgmr.msrb.gmra.mxu1 %v14999_v6  ;;  %v13385_v8 = vld [vmem:[%s20279_s1 + $0x1894] sm:$0xf0]  ;;  %v11616_v19 = vld [vmem:[%s20279_s1 + $0x1988] sm:$0xf]  ;;  %v11889_v20 = vor.u32 %v13485_v61, %v11888_v40  ;;  %v7150_v31 = vpop.f32.mrf.mxu0 }
 0x2d2   :  { %7414 = vmatpush.bf16.msra.mxu1 %v11665_v35  ;;  %7383 = vmatmul.bf16.vlgmr.msrb.gmra.mxu2 %v14997_v5  ;;  %v13417_v21 = vld [vmem:[%s20279_s1 + $0x1994] sm:$0xf0]  ;;  %v11744_v23 = vld [vmem:[%s20279_s1 + $0x1a88] sm:$0xf]  ;;  %v11489_v10 = vor.u32 %v13385_v8, %v11488_v3 }
 0x2d3   :  { %7427 = vmatpush.bf16.msra.mxu2 %v11793_v36  ;;  %7396 = vmatmul.bf16.vlgmr.msrb.gmra.mxu3 %v15001_v7  ;;  %v13449_v58 = vld [vmem:[%s20279_s1 + $0x1a94] sm:$0xf0]  ;;  %v11872_v11 = vld [vmem:[%s20279_s1 + $0x1b88] sm:$0xf]  ;;  %v11617_v35 = vor.u32 %v13417_v21, %v11616_v19 }
 0x2d4   :  { %7440 = vmatpush.bf16.msra.mxu3 %v11921_v38  ;;  %v13481_v26 = vld [vmem:[%s20279_s1 + $0x1b94] sm:$0xf0]  ;;  %v11745_v36 = vor.u32 %v13449_v58, %v11744_v23  ;;  %v11472_v24 = vld [vmem:[%s20279_s1 + $0x1868] sm:$0xf]  ;;  %v7151_v38 = vadd.f32 %v7150_v31, %v18115_v25 }
 0x2d5   :  { %7402 = vmatpush.bf16.msra.mxu0 %v11521_v51  ;;  %v13381_v32 = vld [vmem:[%s20279_s1 + $0x1874] sm:$0xf0]  ;;  %v11600_v37 = vld [vmem:[%s20279_s1 + $0x1968] sm:$0xf]  ;;  %v11873_v41 = vor.u32 %v13481_v26, %v11872_v11  ;;  %v7176_v57 = vpop.f32.mrf.mxu2 }
 0x2d6   :  { %7415 = vmatpush.bf16.msra.mxu1 %v11649_v33  ;;  %v13413_v42 = vld [vmem:[%s20279_s1 + $0x1974] sm:$0xf0]  ;;  %v11728_v30 = vld [vmem:[%s20279_s1 + $0x1a68] sm:$0xf]  ;;  %v7164_v33 = vadd.f32 %v7163_v39, %v7151_v38  ;;  %v7165_v31 = vpop.f32.mrf.mxu1 }
 0x2d7   :  { %7428 = vmatpush.bf16.msra.mxu2 %v11777_v52  ;;  %v13445_v50 = vld [vmem:[%s20279_s1 + $0x1a74] sm:$0xf0]  ;;  %v11856_v51 = vld [vmem:[%s20279_s1 + $0x1b68] sm:$0xf]  ;;  %v11473_v52 = vor.u32 %v13381_v32, %v11472_v24  ;;  %v11601_v44 = vor.u32 %v13413_v42, %v11600_v37 }
 0x2d8   :  { %7441 = vmatpush.bf16.msra.mxu3 %v11905_v53  ;;  %v13477_v25 = vld [vmem:[%s20279_s1 + $0x1b74] sm:$0xf0]  ;;  %v11729_v43 = vor.u32 %v13445_v50, %v11728_v30  ;;  %v11456_v45 = vld [vmem:[%s20279_s1 + $0x1848] sm:$0xf] }
 0x2d9   :  { %7403 = vmatpush.bf16.msra.mxu0 %v11505_v62  ;;  %v13377_v53 = vld [vmem:[%s20279_s1 + $0x1854] sm:$0xf0]  ;;  %v11584_v56 = vld [vmem:[%s20279_s1 + $0x1948] sm:$0xf]  ;;  %v11857_v59 = vor.u32 %v13477_v25, %v11856_v51  ;;  %v7152_v21 = vpop.f32.mrf.mxu0 }
 0x2da   :  { %7416 = vmatpush.bf16.msra.mxu1 %v11633_v55  ;;  %v13409_v40 = vld [vmem:[%s20279_s1 + $0x1954] sm:$0xf0]  ;;  %v11712_v61 = vld [vmem:[%s20279_s1 + $0x1a48] sm:$0xf]  ;;  %v7177_v55 = vadd.f32 %v7176_v57, %v7164_v33  ;;  %v11457_v19 = vor.u32 %v13377_v53, %v11456_v45 }
 0x2db   :  { %7429 = vmatpush.bf16.msra.mxu2 %v11761_v63  ;;  %v13441_v62 = vld [vmem:[%s20279_s1 + $0x1a54] sm:$0xf0]  ;;  %v7189_v63 = vpop.f32.mrf.mxu3  ;;  %v11840_v3 = vld [vmem:[%s20279_s1 + $0x1b48] sm:$0xf]  ;;  %v11585_v23 = vor.u32 %v13409_v40, %v11584_v56 }
 0x2dc   :  { %7442 = vmatpush.bf16.msra.mxu3 %v11889_v20  ;;  %v13473_v8 = vld [vmem:[%s20279_s1 + $0x1b54] sm:$0xf0]  ;;  %v18314_v20 = vadd.f32 %v7189_v63, %v7177_v55  ;;  %v11713_v58 = vor.u32 %v13441_v62, %v11712_v61  ;;  %v11440_v11 = vld [vmem:[%s20279_s1 + $0x1828] sm:$0xf] }
 0x2dd   :  { %7404 = vmatpush.bf16.msra.mxu0 %v11489_v10  ;;  %v13373_v26 = vld [vmem:[%s20279_s1 + $0x1834] sm:$0xf0]  ;;  %v11568_v10 = vld [vmem:[%s20279_s1 + $0x1928] sm:$0xf] }
 0x2de   :  { %7417 = vmatpush.bf16.msra.mxu1 %v11617_v35  ;;  %v11841_v35 = vor.u32 %v13473_v8, %v11840_v3  ;;  %v11696_v24 = vld [vmem:[%s20279_s1 + $0x1a28] sm:$0xf]  ;;  %v13437_v32 = vld [vmem:[%s20279_s1 + $0x1a34] sm:$0xf0]  ;;  %v11441_v39 = vor.u32 %v13373_v26, %v11440_v11 }
 0x2df   :  { %7430 = vmatpush.bf16.msra.mxu2 %v11745_v36  ;;  %v13405_v36 = vld [vmem:[%s20279_s1 + $0x1934] sm:$0xf0]  ;;  %v11824_v37 = vld [vmem:[%s20279_s1 + $0x1b28] sm:$0xf]  ;;  %v11697_v50 = vor.u32 %v13437_v32, %v11696_v24 }
 0x2e0   :  { %7443 = vmatpush.bf16.msra.mxu3 %v11873_v41  ;;  %v13469_v38 = vld [vmem:[%s20279_s1 + $0x1b34] sm:$0xf0]  ;;  %v11424_v41 = vld [vmem:[%s20279_s1 + $0x1808] sm:$0xf]  ;;  %v11569_v30 = vor.u32 %v13405_v36, %v11568_v10 }
 0x2e1   :  { %7405 = vmatpush.bf16.msra.mxu0 %v11473_v52  ;;  %v13369_v42 = vld [vmem:[%s20279_s1 + $0x1814] sm:$0xf0]  ;;  %v11552_v51 = vld [vmem:[%s20279_s1 + $0x1908] sm:$0xf]  ;;  %v7178_v52 = vpop.f32.mrf.mxu2 }
 0x2e2   :  { %7418 = vmatpush.bf16.msra.mxu1 %v11601_v44  ;;  %v13401_v25 = vld [vmem:[%s20279_s1 + $0x1914] sm:$0xf0]  ;;  %v11680_v33 = vld [vmem:[%s20279_s1 + $0x1a08] sm:$0xf]  ;;  %v11825_v44 = vor.u32 %v13469_v38, %v11824_v37  ;;  %v11425_v61 = vor.u32 %v13369_v42, %v11424_v41 }
 0x2e3   :  { %7431 = vmatpush.bf16.msra.mxu2 %v11729_v43  ;;  %v13433_v43 = vld [vmem:[%s20279_s1 + $0x1a14] sm:$0xf0]  ;;  %v11808_v45 = vld [vmem:[%s20279_s1 + $0x1b08] sm:$0xf]  ;;  %v7191_v56 = vpop.f32.mrf.mxu3  ;;  %v11553_v3 = vor.u32 %v13401_v25, %v11552_v51 }
 0x2e4   :  { %7444 = vmatpush.bf16.msra.mxu3 %v11857_v59  ;;  %v13465_v53 = vld [vmem:[%s20279_s1 + $0x1b14] sm:$0xf0]  ;;  %v12048_v57 = vld [vmem:[%s20279_s1 + $0x1ce8] sm:$0xf]  ;;  %v11681_v8 = vor.u32 %v13433_v43, %v11680_v33  ;;  %v13675_v33 = vld [vmem:[#allocation1] sm:$0xff] }
 0x2e5   :  { %7406 = vmatpush.bf16.msra.mxu0 %v11457_v19  ;;  %v13525_v59 = vld [vmem:[%s20279_s1 + $0x1cf4] sm:$0xf0]  ;;  %v12176_v40 = vld [vmem:[%s20279_s1 + $0x1de8] sm:$0xf] }
 0x2e6   :  { %7419 = vmatpush.bf16.msra.mxu1 %v11585_v23  ;;  %v13557_v62 = vld [vmem:[%s20279_s1 + $0x1df4] sm:$0xf0]  ;;  %v12304_v55 = vld [vmem:[%s20279_s1 + $0x1ee8] sm:$0xf]  ;;  %v11809_v23 = vor.u32 %v13465_v53, %v11808_v45 }
 0x2e7   :  { %7432 = vmatpush.bf16.msra.mxu2 %v11713_v58  ;;  %v13589_v63 = vld [vmem:[%s20279_s1 + $0x1ef4] sm:$0xf0]  ;;  %v12432_v19 = vld [vmem:[%s20279_s1 + $0x1fe8] sm:$0xf]  ;;  %v12049_v58 = vor.u32 %v13525_v59, %v12048_v57  ;;  %v12177_v11 = vor.u32 %v13557_v62, %v12176_v40 }
 0x2e8   :  { %7445 = vmatpush.bf16.msra.mxu3 %v11841_v35  ;;  %v13621_v21 = vld [vmem:[%s20279_s1 + $0x1ff4] sm:$0xf0]  ;;  %v12305_v26 = vor.u32 %v13589_v63, %v12304_v55  ;;  %v12032_v10 = vld [vmem:[%s20279_s1 + $0x1cc8] sm:$0xf] }
 0x2e9   :  { %7407 = vmatpush.bf16.msra.mxu0 %v11441_v39  ;;  %v13521_v31 = vld [vmem:[%s20279_s1 + $0x1cd4] sm:$0xf0]  ;;  %v12160_v35 = vld [vmem:[%s20279_s1 + $0x1dc8] sm:$0xf]  ;;  %v12433_v36 = vor.u32 %v13621_v21, %v12432_v19 }
 0x2ea   :  { %7420 = vmatpush.bf16.msra.mxu1 %v11569_v30  ;;  %v13553_v24 = vld [vmem:[%s20279_s1 + $0x1dd4] sm:$0xf0]  ;;  %v12288_v32 = vld [vmem:[%s20279_s1 + $0x1ec8] sm:$0xf]  ;;  %v12033_v41 = vor.u32 %v13521_v31, %v12032_v10 }
 0x2eb   :  { %7433 = vmatpush.bf16.msra.mxu2 %v11697_v50  ;;  %v13585_v37 = vld [vmem:[%s20279_s1 + $0x1ed4] sm:$0xf0]  ;;  %v12416_v38 = vld [vmem:[%s20279_s1 + $0x1fc8] sm:$0xf]  ;;  %v12161_v42 = vor.u32 %v13553_v24, %v12160_v35 }
 0x2ec   :  { %7446 = vmatpush.bf16.msra.mxu3 %v11825_v44  ;;  %v13617_v39 = vld [vmem:[%s20279_s1 + $0x1fd4] sm:$0xf0]  ;;  %v12289_v30 = vor.u32 %v13585_v37, %v12288_v32  ;;  %v12016_v50 = vld [vmem:[%s20279_s1 + $0x1ca8] sm:$0xf] }
 0x2ed   :  { %7408 = vmatpush.bf16.msra.mxu0 %v11425_v61  ;;  %v13517_v51 = vld [vmem:[%s20279_s1 + $0x1cb4] sm:$0xf0]  ;;  %v12144_v25 = vld [vmem:[%s20279_s1 + $0x1da8] sm:$0xf]  ;;  %v12417_v52 = vor.u32 %v13617_v39, %v12416_v38 }
 0x2ee   :  { %7421 = vmatpush.bf16.msra.mxu1 %v11553_v3  ;;  %v13549_v44 = vld [vmem:[%s20279_s1 + $0x1db4] sm:$0xf0]  ;;  %v12272_v43 = vld [vmem:[%s20279_s1 + $0x1ea8] sm:$0xf]  ;;  %v12017_v61 = vor.u32 %v13517_v51, %v12016_v50 }
 0x2ef   :  { %7434 = vmatpush.bf16.msra.mxu2 %v11681_v8  ;;  %v13581_v45 = vld [vmem:[%s20279_s1 + $0x1eb4] sm:$0xf0]  ;;  %v13677_v56 = vld [vmem:[#allocation1 + $0x9] sm:$0xff]  ;;  %v12145_v62 = vor.u32 %v13549_v44, %v12144_v25 }
 0x2f0   :  { %7447 = vmatpush.bf16.msra.mxu3 %v11809_v23  ;;  %7409 = vmatmul.bf16.vlgmr.msra.gmra.mxu0 %v13675_v33  ;;  %v13676_v53 = vld [vmem:[#allocation1 + $0x12] sm:$0xff]  ;;  %v12400_v57 = vld [vmem:[%s20279_s1 + $0x1fa8] sm:$0xf]  ;;  %v13678_v40 = vld [vmem:[#allocation1 + $0x1b] sm:$0xff]  ;;  %v12273_v55 = vor.u32 %v13581_v45, %v12272_v43 }
 0x2f1   :  { %7453 = vmatpush.bf16.msrb.mxu0 %v12049_v58  ;;  %7422 = vmatmul.bf16.vlgmr.msra.gmra.mxu1 %v13677_v56  ;;  %v13613_v59 = vld [vmem:[%s20279_s1 + $0x1fb4] sm:$0xf0]  ;;  %v12000_v63 = vld [vmem:[%s20279_s1 + $0x1c88] sm:$0xf] }
 0x2f2   :  { %7466 = vmatpush.bf16.msrb.mxu1 %v12177_v11  ;;  %7435 = vmatmul.bf16.vlgmr.msra.gmra.mxu2 %v13676_v53  ;;  %v13513_v3 = vld [vmem:[%s20279_s1 + $0x1c94] sm:$0xf0]  ;;  %v12128_v8 = vld [vmem:[%s20279_s1 + $0x1d88] sm:$0xf]  ;;  %v12401_v19 = vor.u32 %v13613_v59, %v12400_v57  ;;  %v7202_v11 = vpop.f32.mrf.mxu0 }
 0x2f3   :  { %7479 = vmatpush.bf16.msrb.mxu2 %v12305_v26  ;;  %7448 = vmatmul.bf16.vlgmr.msra.gmra.mxu3 %v13678_v40  ;;  %v13545_v21 = vld [vmem:[%s20279_s1 + $0x1d94] sm:$0xf0]  ;;  %v12256_v23 = vld [vmem:[%s20279_s1 + $0x1e88] sm:$0xf]  ;;  %v7203_v31 = vadd.f32 %v7202_v11, %v18314_v20  ;;  %v12001_v35 = vor.u32 %v13513_v3, %v12000_v63 }
 0x2f4   :  { %7492 = vmatpush.bf16.msrb.mxu3 %v12433_v36  ;;  %v13577_v58 = vld [vmem:[%s20279_s1 + $0x1e94] sm:$0xf0]  ;;  %v12384_v26 = vld [vmem:[%s20279_s1 + $0x1f88] sm:$0xf]  ;;  %v7215_v36 = vpop.f32.mrf.mxu1  ;;  %v12129_v24 = vor.u32 %v13545_v21, %v12128_v8 }
 0x2f5   :  { %7454 = vmatpush.bf16.msrb.mxu0 %v12033_v41  ;;  %v13609_v10 = vld [vmem:[%s20279_s1 + $0x1f94] sm:$0xf0]  ;;  %v12257_v32 = vor.u32 %v13577_v58, %v12256_v23  ;;  %v11984_v37 = vld [vmem:[%s20279_s1 + $0x1c68] sm:$0xf]  ;;  %v7216_v41 = vadd.f32 %v7215_v36, %v7203_v31  ;;  %v7228_v57 = vpop.f32.mrf.mxu2 }
 0x2f6   :  { %7467 = vmatpush.bf16.msrb.mxu1 %v12161_v42  ;;  %v13509_v38 = vld [vmem:[%s20279_s1 + $0x1c74] sm:$0xf0]  ;;  %v12112_v39 = vld [vmem:[%s20279_s1 + $0x1d68] sm:$0xf]  ;;  %v12385_v20 = vor.u32 %v13609_v10, %v12384_v26 }
 0x2f7   :  { %7480 = vmatpush.bf16.msrb.mxu2 %v12289_v30  ;;  %v13541_v42 = vld [vmem:[%s20279_s1 + $0x1d74] sm:$0xf0]  ;;  %v12240_v30 = vld [vmem:[%s20279_s1 + $0x1e68] sm:$0xf]  ;;  %v11985_v33 = vor.u32 %v13509_v38, %v11984_v37 }
 0x2f8   :  { %7493 = vmatpush.bf16.msrb.mxu3 %v12417_v52  ;;  %v13573_v50 = vld [vmem:[%s20279_s1 + $0x1e74] sm:$0xf0]  ;;  %v12368_v51 = vld [vmem:[%s20279_s1 + $0x1f68] sm:$0xf]  ;;  %v12113_v52 = vor.u32 %v13541_v42, %v12112_v39 }
 0x2f9   :  { %7455 = vmatpush.bf16.msrb.mxu0 %v12017_v61  ;;  %v13605_v25 = vld [vmem:[%s20279_s1 + $0x1f74] sm:$0xf0]  ;;  %v12241_v44 = vor.u32 %v13573_v50, %v12240_v30  ;;  %v11968_v43 = vld [vmem:[%s20279_s1 + $0x1c48] sm:$0xf] }
 0x2fa   :  { %7468 = vmatpush.bf16.msrb.mxu1 %v12145_v62  ;;  %v13505_v45 = vld [vmem:[%s20279_s1 + $0x1c54] sm:$0xf0]  ;;  %v12096_v53 = vld [vmem:[%s20279_s1 + $0x1d48] sm:$0xf]  ;;  %v12369_v56 = vor.u32 %v13605_v25, %v12368_v51  ;;  %v7229_v62 = vadd.f32 %v7228_v57, %v7216_v41  ;;  %v7204_v8 = vpop.f32.mrf.mxu0  ;;  %v12659_v57 = vld [vmem:[%s20279_s1 + $0x1ec] sm:$0xf] }
 0x2fb   :  { %7481 = vmatpush.bf16.msrb.mxu2 %v12273_v55  ;;  %v13537_v59 = vld [vmem:[%s20279_s1 + $0x1d54] sm:$0xf0]  ;;  %v12224_v40 = vld [vmem:[%s20279_s1 + $0x1e48] sm:$0xf]  ;;  %v7241_v55 = vpop.f32.mrf.mxu3  ;;  %v12723_v8 = vld [vmem:[%s20279_s1 + $0x3ec] sm:$0xf] }
 0x2fc   :  { %7494 = vmatpush.bf16.msrb.mxu3 %v12401_v19  ;;  %v13569_v61 = vld [vmem:[%s20279_s1 + $0x1e54] sm:$0xf0]  ;;  %v12352_v63 = vld [vmem:[%s20279_s1 + $0x1f48] sm:$0xf]  ;;  %v11969_v19 = vor.u32 %v13505_v45, %v11968_v43  ;;  %v7217_v21 = vpop.f32.mrf.mxu1  ;;  %v18509_v23 = vadd.f32 %v7241_v55, %v7229_v62  ;;  %v12097_v58 = vor.u32 %v13537_v59, %v12096_v53  ;;  %v12627_v53 = vld [vmem:[%s20279_s1 + $0xec] sm:$0xf] }
 0x2fd   :  { %7456 = vmatpush.bf16.msrb.mxu0 %v12001_v35  ;;  %v13601_v3 = vld [vmem:[%s20279_s1 + $0x1f54] sm:$0xf0]  ;;  %v12225_v11 = vor.u32 %v13569_v61, %v12224_v40  ;;  %v11952_v26 = vld [vmem:[%s20279_s1 + $0x1c28] sm:$0xf]  ;;  %v7230_v45 = vpop.f32.mrf.mxu2  ;;  %v8594_v61 = vld [vmem:[%s20279_s1 + $0x1f8] sm:$0xf0] }
 0x2fe   :  { %7469 = vmatpush.bf16.msrb.mxu1 %v12129_v24  ;;  %v13501_v10 = vld [vmem:[%s20279_s1 + $0x1c34] sm:$0xf0]  ;;  %v12080_v31 = vld [vmem:[%s20279_s1 + $0x1d28] sm:$0xf]  ;;  %v12353_v35 = vor.u32 %v13601_v3, %v12352_v63  ;;  %v12691_v62 = vld [vmem:[%s20279_s1 + $0x2ec] sm:$0xf] }
 0x2ff   :  { %7482 = vmatpush.bf16.msrb.mxu2 %v12257_v32  ;;  %v13533_v36 = vld [vmem:[%s20279_s1 + $0x1d34] sm:$0xf0]  ;;  %v12208_v24 = vld [vmem:[%s20279_s1 + $0x1e28] sm:$0xf]  ;;  %v11953_v39 = vor.u32 %v13501_v10, %v11952_v26  ;;  %v8722_v55 = vld [vmem:[%s20279_s1 + $0x2f8] sm:$0xf0] }
 0x300   :  { %7495 = vmatpush.bf16.msrb.mxu3 %v12385_v20  ;;  %v13565_v32 = vld [vmem:[%s20279_s1 + $0x1e34] sm:$0xf0]  ;;  %v12336_v37 = vld [vmem:[%s20279_s1 + $0x1f28] sm:$0xf]  ;;  %v12081_v42 = vor.u32 %v13533_v36, %v12080_v31  ;;  %v8725_v26 = vor.u32 %v12691_v62, %v8722_v55  ;;  %v12623_v10 = vld [vmem:[%s20279_s1 + $0xcc] sm:$0xf] }
 0x301   :  { %7457 = vmatpush.bf16.msrb.mxu0 %v11985_v33  ;;  %v13597_v38 = vld [vmem:[%s20279_s1 + $0x1f34] sm:$0xf0]  ;;  %v11936_v20 = vld [vmem:[%s20279_s1 + $0x1c08] sm:$0xf]  ;;  %v12209_v30 = vor.u32 %v13565_v32, %v12208_v24  ;;  %v8450_v31 = vld [vmem:[%s20279_s1 + $0xd8] sm:$0xf0] }
 0x302   :  { %7470 = vmatpush.bf16.msrb.mxu1 %v12113_v52  ;;  %v13497_v41 = vld [vmem:[%s20279_s1 + $0x1c14] sm:$0xf0]  ;;  %v12064_v50 = vld [vmem:[%s20279_s1 + $0x1d08] sm:$0xf]  ;;  %v12337_v33 = vor.u32 %v13597_v38, %v12336_v37  ;;  %v8578_v24 = vld [vmem:[%s20279_s1 + $0x1d8] sm:$0xf0] }
 0x303   :  { %7483 = vmatpush.bf16.msrb.mxu2 %v12241_v44  ;;  %v13529_v51 = vld [vmem:[%s20279_s1 + $0x1d14] sm:$0xf0]  ;;  %v12192_v25 = vld [vmem:[%s20279_s1 + $0x1e08] sm:$0xf]  ;;  %v7243_v59 = vpop.f32.mrf.mxu3  ;;  %v11937_v40 = vor.u32 %v13497_v41, %v11936_v20  ;;  %v12687_v32 = vld [vmem:[%s20279_s1 + $0x2cc] sm:$0xf]  ;;  %v8453_v20 = vor.u32 %v12623_v10, %v8450_v31 }
 0x304   :  { %7496 = vmatpush.bf16.msrb.mxu3 %v12369_v56  ;;  %v13561_v52 = vld [vmem:[%s20279_s1 + $0x1e14] sm:$0xf0]  ;;  %v12320_v44 = vld [vmem:[%s20279_s1 + $0x1f08] sm:$0xf]  ;;  %v8466_v56 = vld [vmem:[%s20279_s1 + $0xf8] sm:$0xf0]  ;;  %v12065_v63 = vor.u32 %v13529_v51, %v12064_v50 }
 0x305   :  { %7458 = vmatpush.bf16.msrb.mxu0 %v11969_v19  ;;  %v13593_v43 = vld [vmem:[%s20279_s1 + $0x1f14] sm:$0xf0]  ;;  %v12193_v3 = vor.u32 %v13561_v52, %v12192_v25  ;;  %v8850_v19 = vld [vmem:[%s20279_s1 + $0x3f8] sm:$0xf0]  ;;  %v12719_v38 = vld [vmem:[%s20279_s1 + $0x3cc] sm:$0xf] }
 0x306   :  { %7471 = vmatpush.bf16.msrb.mxu1 %v12097_v58  ;;  %v12321_v21 = vor.u32 %v13593_v43, %v12320_v44  ;;  %v8469_v58 = vor.u32 %v12627_v53, %v8466_v56  ;;  %v8853_v36 = vor.u32 %v12723_v8, %v8850_v19  ;;  %v8706_v37 = vld [vmem:[%s20279_s1 + $0x2d8] sm:$0xf0]  ;;  %v12651_v51 = vld [vmem:[%s20279_s1 + $0x1ac] sm:$0xf]  ;;  %v13679_v25 = vld [vmem:[#allocation1 + $0x24] sm:$0xff] }
 0x307   :  { %7484 = vmatpush.bf16.msrb.mxu2 %v12225_v11  ;;  %v8597_v11 = vor.u32 %v12659_v57, %v8594_v61  ;;  %v8434_v50 = vld [vmem:[%s20279_s1 + $0xb8] sm:$0xf0]  ;;  %v12683_v44 = vld [vmem:[%s20279_s1 + $0x2ac] sm:$0xf] }
 0x308   :  { %7497 = vmatpush.bf16.msrb.mxu3 %v12353_v35  ;;  %v12655_v35 = vld [vmem:[%s20279_s1 + $0x1cc] sm:$0xf]  ;;  %v8562_v52 = vld [vmem:[%s20279_s1 + $0x1b8] sm:$0xf0] }
 0x309   :  { %7459 = vmatpush.bf16.msrb.mxu0 %v11953_v39  ;;  %v8834_v39 = vld [vmem:[%s20279_s1 + $0x3d8] sm:$0xf0]  ;;  %v8581_v41 = vor.u32 %v12655_v35, %v8578_v24  ;;  %v13681_v53 = vld [vmem:[#allocation1 + $0x2d] sm:$0xff]  ;;  %v8565_v61 = vor.u32 %v12651_v51, %v8562_v52 }
 0x30a   :  { %7472 = vmatpush.bf16.msrb.mxu1 %v12081_v42  ;;  %v8709_v42 = vor.u32 %v12687_v32, %v8706_v37  ;;  %v8690_v43 = vld [vmem:[%s20279_s1 + $0x2b8] sm:$0xf0]  ;;  %v12715_v56 = vld [vmem:[%s20279_s1 + $0x3ac] sm:$0xf] }
 0x30b   :  { %7485 = vmatpush.bf16.msrb.mxu2 %v12209_v30  ;;  %v12619_v30 = vld [vmem:[%s20279_s1 + $0xac] sm:$0xf]  ;;  %v13680_v45 = vld [vmem:[#allocation1 + $0x36] sm:$0xff]  ;;  %v13682_v59 = vld [vmem:[#allocation1 + $0x3f] sm:$0xff]  ;;  %v8693_v62 = vor.u32 %v12683_v44, %v8690_v43 }
 0x30c   :  { %7498 = vmatpush.bf16.msrb.mxu3 %v12337_v33  ;;  %v8837_v33 = vor.u32 %v12719_v38, %v8834_v39  ;;  %v8818_v57 = vld [vmem:[%s20279_s1 + $0x3b8] sm:$0xf0]  ;;  %v12615_v55 = vld [vmem:[%s20279_s1 + $0x8c] sm:$0xf] }
 0x30d   :  { %7460 = vmatpush.bf16.msrb.mxu0 %v11937_v40  ;;  %v8437_v40 = vor.u32 %v12619_v30, %v8434_v50  ;;  %v8821_v8 = vor.u32 %v12715_v56, %v8818_v57  ;;  %v8546_v19 = vld [vmem:[%s20279_s1 + $0x198] sm:$0xf0]  ;;  %v12611_v37 = vld [vmem:[%s20279_s1 + $0x6c] sm:$0xf] }
 0x30e   :  { %7473 = vmatpush.bf16.msrb.mxu1 %v12065_v63  ;;  %v8418_v63 = vld [vmem:[%s20279_s1 + $0x98] sm:$0xf0]  ;;  %v12643_v39 = vld [vmem:[%s20279_s1 + $0x16c] sm:$0xf] }
 0x30f   :  { %7486 = vmatpush.bf16.msrb.mxu2 %v12193_v3  ;;  %v12647_v3 = vld [vmem:[%s20279_s1 + $0x18c] sm:$0xf]  ;;  %v8802_v10 = vld [vmem:[%s20279_s1 + $0x398] sm:$0xf0]  ;;  %v8421_v35 = vor.u32 %v12615_v55, %v8418_v63 }
 0x310   :  { %7499 = vmatpush.bf16.msrb.mxu3 %v12321_v21  ;;  %7461 = vmatmul.bf16.vlgmr.msrb.gmra.mxu0 %v13679_v25  ;;  %v12679_v21 = vld [vmem:[%s20279_s1 + $0x28c] sm:$0xf]  ;;  %v8549_v24 = vor.u32 %v12647_v3, %v8546_v19  ;;  %v8402_v38 = vld [vmem:[%s20279_s1 + $0x78] sm:$0xf0] }
 0x311   :  { %7505 = vmatpush.bf16.msra.mxu0 %v8469_v58  ;;  %7474 = vmatmul.bf16.vlgmr.msrb.gmra.mxu1 %v13681_v53  ;;  %v8674_v58 = vld [vmem:[%s20279_s1 + $0x298] sm:$0xf0]  ;;  %v12707_v50 = vld [vmem:[%s20279_s1 + $0x36c] sm:$0xf]  ;;  %v8405_v25 = vor.u32 %v12611_v37, %v8402_v38 }
 0x312   :  { %7518 = vmatpush.bf16.msra.mxu1 %v8597_v11  ;;  %7487 = vmatmul.bf16.vlgmr.msrb.gmra.mxu2 %v13680_v45  ;;  %v7254_v11 = vpop.f32.mrf.mxu0  ;;  %v8677_v32 = vor.u32 %v12679_v21, %v8674_v58  ;;  %v8658_v30 = vld [vmem:[%s20279_s1 + $0x278] sm:$0xf0]  ;;  %v12607_v44 = vld [vmem:[%s20279_s1 + $0x4c] sm:$0xf] }
 0x313   :  { %7531 = vmatpush.bf16.msra.mxu2 %v8725_v26  ;;  %7500 = vmatmul.bf16.vlgmr.msrb.gmra.mxu3 %v13682_v59  ;;  %v12711_v26 = vld [vmem:[%s20279_s1 + $0x38c] sm:$0xf]  ;;  %v7255_v31 = vadd.f32 %v7254_v11, %v18509_v23  ;;  %v8786_v51 = vld [vmem:[%s20279_s1 + $0x378] sm:$0xf0] }
 0x314   :  { %7544 = vmatpush.bf16.msra.mxu3 %v8853_v36  ;;  %v7267_v36 = vpop.f32.mrf.mxu1  ;;  %v8805_v23 = vor.u32 %v12711_v26, %v8802_v10  ;;  %v8386_v43 = vld [vmem:[%s20279_s1 + $0x58] sm:$0xf0]  ;;  %v12639_v45 = vld [vmem:[%s20279_s1 + $0x14c] sm:$0xf]  ;;  %v8789_v53 = vor.u32 %v12707_v50, %v8786_v51 }
 0x315   :  { %7506 = vmatpush.bf16.msra.mxu0 %v8453_v20  ;;  %v7268_v20 = vadd.f32 %v7267_v36, %v7255_v31  ;;  %v7280_v56 = vpop.f32.mrf.mxu2  ;;  %v8514_v57 = vld [vmem:[%s20279_s1 + $0x158] sm:$0xf0]  ;;  %v12671_v59 = vld [vmem:[%s20279_s1 + $0x24c] sm:$0xf] }
 0x316   :  { %7519 = vmatpush.bf16.msra.mxu1 %v8581_v41  ;;  %v8530_v41 = vld [vmem:[%s20279_s1 + $0x178] sm:$0xf0]  ;;  %v12703_v55 = vld [vmem:[%s20279_s1 + $0x34c] sm:$0xf]  ;;  %v8517_v58 = vor.u32 %v12639_v45, %v8514_v57 }
 0x317   :  { %7532 = vmatpush.bf16.msra.mxu2 %v8709_v42  ;;  %v12675_v42 = vld [vmem:[%s20279_s1 + $0x26c] sm:$0xf]  ;;  %v8770_v63 = vld [vmem:[%s20279_s1 + $0x358] sm:$0xf0] }
 0x318   :  { %7545 = vmatpush.bf16.msra.mxu3 %v8837_v33  ;;  %v8533_v33 = vor.u32 %v12643_v39, %v8530_v41  ;;  %v8661_v52 = vor.u32 %v12675_v42, %v8658_v30  ;;  %v12603_v26 = vld [vmem:[%s20279_s1 + $0x2c] sm:$0xf]  ;;  %v8370_v10 = vld [vmem:[%s20279_s1 + $0x38] sm:$0xf0] }
 0x319   :  { %7507 = vmatpush.bf16.msra.mxu0 %v8437_v40  ;;  %v8642_v40 = vld [vmem:[%s20279_s1 + $0x258] sm:$0xf0]  ;;  %v12635_v31 = vld [vmem:[%s20279_s1 + $0x12c] sm:$0xf]  ;;  %v8373_v39 = vor.u32 %v12603_v26, %v8370_v10 }
 0x31a   :  { %7520 = vmatpush.bf16.msra.mxu1 %v8565_v61  ;;  %v7281_v61 = vadd.f32 %v7280_v56, %v7268_v20  ;;  %v7256_v3 = vpop.f32.mrf.mxu0  ;;  %v8645_v11 = vor.u32 %v12671_v59, %v8642_v40  ;;  %v8498_v36 = vld [vmem:[%s20279_s1 + $0x138] sm:$0xf0]  ;;  %v12699_v37 = vld [vmem:[%s20279_s1 + $0x32c] sm:$0xf] }
 0x31b   :  { %7533 = vmatpush.bf16.msra.mxu2 %v8693_v62  ;;  %v7293_v62 = vpop.f32.mrf.mxu3  ;;  %v8754_v38 = vld [vmem:[%s20279_s1 + $0x338] sm:$0xf0]  ;;  %v8501_v41 = vor.u32 %v12635_v31, %v8498_v36  ;;  %v12631_v30 = vld [vmem:[%s20279_s1 + $0x10c] sm:$0xf] }
 0x31c   :  { %7546 = vmatpush.bf16.msra.mxu3 %v8821_v8  ;;  %v8389_v8 = vor.u32 %v12607_v44, %v8386_v43  ;;  %v7269_v19 = vpop.f32.mrf.mxu1  ;;  %v18704_v21 = vadd.f32 %v7293_v62, %v7281_v61  ;;  %v8354_v20 = vld [vmem:[%s20279_s1 + $0x18] sm:$0xf0]  ;;  %v12663_v51 = vld [vmem:[%s20279_s1 + $0x20c] sm:$0xf] }
 0x31d   :  { %7508 = vmatpush.bf16.msra.mxu0 %v8421_v35  ;;  %v8773_v35 = vor.u32 %v12703_v55, %v8770_v63  ;;  %v8482_v50 = vld [vmem:[%s20279_s1 + $0x118] sm:$0xf0]  ;;  %v7282_v43 = vpop.f32.mrf.mxu2  ;;  %v12755_v45 = vld [vmem:[%s20279_s1 + $0x4ec] sm:$0xf] }
 0x31e   :  { %7521 = vmatpush.bf16.msra.mxu1 %v8549_v24  ;;  %v12667_v24 = vld [vmem:[%s20279_s1 + $0x22c] sm:$0xf]  ;;  %v8738_v44 = vld [vmem:[%s20279_s1 + $0x318] sm:$0xf0]  ;;  %v8485_v55 = vor.u32 %v12631_v30, %v8482_v50 }
 0x31f   :  { %7534 = vmatpush.bf16.msra.mxu2 %v8677_v32  ;;  %v8626_v32 = vld [vmem:[%s20279_s1 + $0x238] sm:$0xf0]  ;;  %v12787_v56 = vld [vmem:[%s20279_s1 + $0x5ec] sm:$0xf] }
 0x320   :  { %7547 = vmatpush.bf16.msra.mxu3 %v8805_v23  ;;  %v12599_v23 = vld [vmem:[%s20279_s1 + $0xc] sm:$0xf]  ;;  %v8629_v42 = vor.u32 %v12667_v24, %v8626_v32  ;;  %v9106_v40 = vld [vmem:[%s20279_s1 + $0x5f8] sm:$0xf0] }
 0x321   :  { %7509 = vmatpush.bf16.msra.mxu0 %v8405_v25  ;;  %v8757_v25 = vor.u32 %v12699_v37, %v8754_v38  ;;  %v8357_v59 = vor.u32 %v12599_v23, %v8354_v20  ;;  %v12819_v61 = vld [vmem:[%s20279_s1 + $0x6ec] sm:$0xf]  ;;  %v9234_v62 = vld [vmem:[%s20279_s1 + $0x6f8] sm:$0xf0] }
 0x322   :  { %7522 = vmatpush.bf16.msra.mxu1 %v8533_v33  ;;  %v8610_v33 = vld [vmem:[%s20279_s1 + $0x218] sm:$0xf0]  ;;  %v12851_v3 = vld [vmem:[%s20279_s1 + $0x7ec] sm:$0xf]  ;;  %v9237_v26 = vor.u32 %v12819_v61, %v9234_v62 }
 0x323   :  { %7535 = vmatpush.bf16.msra.mxu2 %v8661_v52  ;;  %v12695_v52 = vld [vmem:[%s20279_s1 + $0x30c] sm:$0xf]  ;;  %v7295_v57 = vpop.f32.mrf.mxu3  ;;  %v8613_v63 = vor.u32 %v12663_v51, %v8610_v33  ;;  %v8962_v31 = vld [vmem:[%s20279_s1 + $0x4d8] sm:$0xf0] }
 0x324   :  { %7548 = vmatpush.bf16.msra.mxu3 %v8789_v53  ;;  %v8978_v53 = vld [vmem:[%s20279_s1 + $0x4f8] sm:$0xf0]  ;;  %v8741_v19 = vor.u32 %v12695_v52, %v8738_v44  ;;  %v12751_v10 = vld [vmem:[%s20279_s1 + $0x4cc] sm:$0xf] }
 0x325   :  { %7510 = vmatpush.bf16.msra.mxu0 %v8389_v8  ;;  %v9362_v8 = vld [vmem:[%s20279_s1 + $0x7f8] sm:$0xf0]  ;;  %v12815_v32 = vld [vmem:[%s20279_s1 + $0x6cc] sm:$0xf]  ;;  %v8965_v23 = vor.u32 %v12751_v10, %v8962_v31 }
 0x326   :  { %7523 = vmatpush.bf16.msra.mxu1 %v8517_v58  ;;  %v8981_v58 = vor.u32 %v12755_v45, %v8978_v53  ;;  %v9365_v36 = vor.u32 %v12851_v3, %v9362_v8  ;;  %v9090_v24 = vld [vmem:[%s20279_s1 + $0x5d8] sm:$0xf0]  ;;  %v12847_v38 = vld [vmem:[%s20279_s1 + $0x7cc] sm:$0xf] }
 0x327   :  { %7536 = vmatpush.bf16.msra.mxu2 %v8645_v11  ;;  %v9109_v11 = vor.u32 %v12787_v56, %v9106_v40  ;;  %v9218_v37 = vld [vmem:[%s20279_s1 + $0x6d8] sm:$0xf0]  ;;  %v12779_v50 = vld [vmem:[%s20279_s1 + $0x5ac] sm:$0xf] }
 0x328   :  { %7549 = vmatpush.bf16.msra.mxu3 %v8773_v35  ;;  %v12783_v35 = vld [vmem:[%s20279_s1 + $0x5cc] sm:$0xf]  ;;  %v8946_v30 = vld [vmem:[%s20279_s1 + $0x4b8] sm:$0xf0] }
 0x329   :  { %7511 = vmatpush.bf16.msra.mxu0 %v8373_v39  ;;  %v9346_v39 = vld [vmem:[%s20279_s1 + $0x7d8] sm:$0xf0]  ;;  %v9093_v20 = vor.u32 %v12783_v35, %v9090_v24  ;;  %v12811_v33 = vld [vmem:[%s20279_s1 + $0x6ac] sm:$0xf] }
 0x32a   :  { %7524 = vmatpush.bf16.msra.mxu1 %v8501_v41  ;;  %v9221_v41 = vor.u32 %v12815_v32, %v9218_v37  ;;  %v9349_v51 = vor.u32 %v12847_v38, %v9346_v39  ;;  %v9202_v52 = vld [vmem:[%s20279_s1 + $0x6b8] sm:$0xf0]  ;;  %v12843_v44 = vld [vmem:[%s20279_s1 + $0x7ac] sm:$0xf] }
 0x32b   :  { %7537 = vmatpush.bf16.msra.mxu2 %v8629_v42  ;;  %v12747_v42 = vld [vmem:[%s20279_s1 + $0x4ac] sm:$0xf]  ;;  %v9330_v43 = vld [vmem:[%s20279_s1 + $0x7b8] sm:$0xf0] }
 0x32c   :  { %7550 = vmatpush.bf16.msra.mxu3 %v8757_v25  ;;  %v9074_v25 = vld [vmem:[%s20279_s1 + $0x5b8] sm:$0xf0]  ;;  %v8949_v45 = vor.u32 %v12747_v42, %v8946_v30  ;;  %v12743_v56 = vld [vmem:[%s20279_s1 + $0x48c] sm:$0xf] }
 0x32d   :  { %7512 = vmatpush.bf16.msra.mxu0 %v8357_v59  ;;  %v9077_v53 = vor.u32 %v12779_v50, %v9074_v25  ;;  %v8930_v57 = vld [vmem:[%s20279_s1 + $0x498] sm:$0xf0]  ;;  %v12807_v59 = vld [vmem:[%s20279_s1 + $0x68c] sm:$0xf]  ;;  %v7306_v61 = vpop.f32.mrf.mxu0 }
 0x32e   :  { %7525 = vmatpush.bf16.msra.mxu1 %v8485_v55  ;;  %v9186_v40 = vld [vmem:[%s20279_s1 + $0x698] sm:$0xf0]  ;;  %v12839_v62 = vld [vmem:[%s20279_s1 + $0x78c] sm:$0xf]  ;;  %v8933_v3 = vor.u32 %v12743_v56, %v8930_v57  ;;  %v7319_v8 = vpop.f32.mrf.mxu1 }
 0x32f   :  { %7538 = vmatpush.bf16.msra.mxu2 %v8613_v63  ;;  %v9314_v55 = vld [vmem:[%s20279_s1 + $0x798] sm:$0xf0]  ;;  %v7307_v63 = vadd.f32 %v7306_v61, %v18704_v21  ;;  %v12771_v10 = vld [vmem:[%s20279_s1 + $0x56c] sm:$0xf] }
 0x330   :  { %7551 = vmatpush.bf16.msra.mxu3 %v8741_v19  ;;  %7513 = vmatmul.bf16.vlgmr.msra.gmra.mxu0 %v14079_v28  ;;  %v12775_v28 = vld [vmem:[%s20279_s1 + $0x58c] sm:$0xf]  ;;  %v9317_v21 = vor.u32 %v12839_v62, %v9314_v55  ;;  %v9042_v35 = vld [vmem:[%s20279_s1 + $0x578] sm:$0xf0] }
 0x331   :  { %7557 = vmatpush.bf16.msrb.mxu0 %v8981_v58  ;;  %7526 = vmatmul.bf16.vlgmr.msra.gmra.mxu1 %v14089_v34  ;;  %v9058_v34 = vld [vmem:[%s20279_s1 + $0x598] sm:$0xf0]  ;;  %v9189_v58 = vor.u32 %v12807_v59, %v9186_v40  ;;  %v7320_v31 = vadd.f32 %v7319_v8, %v7307_v63  ;;  %v12835_v32 = vld [vmem:[%s20279_s1 + $0x76c] sm:$0xf]  ;;  %v9045_v39 = vor.u32 %v12771_v10, %v9042_v35 }
 0x332   :  { %7570 = vmatpush.bf16.msrb.mxu1 %v9109_v11  ;;  %7539 = vmatmul.bf16.vlgmr.msra.gmra.mxu2 %v14077_v27  ;;  %v9205_v27 = vor.u32 %v12811_v33, %v9202_v52  ;;  %v9061_v19 = vor.u32 %v12775_v28, %v9058_v34  ;;  %v12739_v11 = vld [vmem:[%s20279_s1 + $0x46c] sm:$0xf]  ;;  %v9170_v24 = vld [vmem:[%s20279_s1 + $0x678] sm:$0xf0] }
 0x333   :  { %7583 = vmatpush.bf16.msrb.mxu2 %v9237_v26  ;;  %7552 = vmatmul.bf16.vlgmr.msra.gmra.mxu3 %v14081_v29  ;;  %v9333_v29 = vor.u32 %v12843_v44, %v9330_v43  ;;  %v8914_v26 = vld [vmem:[%s20279_s1 + $0x478] sm:$0xf0]  ;;  %v12767_v42 = vld [vmem:[%s20279_s1 + $0x54c] sm:$0xf] }
 0x334   :  { %7596 = vmatpush.bf16.msrb.mxu3 %v9365_v36  ;;  %v12803_v36 = vld [vmem:[%s20279_s1 + $0x66c] sm:$0xf]  ;;  %v9298_v37 = vld [vmem:[%s20279_s1 + $0x778] sm:$0xf0]  ;;  %v8917_v38 = vor.u32 %v12739_v11, %v8914_v26 }
 0x335   :  { %7558 = vmatpush.bf16.msrb.mxu0 %v8965_v23  ;;  %v9173_v23 = vor.u32 %v12803_v36, %v9170_v24  ;;  %v9301_v30 = vor.u32 %v12835_v32, %v9298_v37  ;;  %v7332_v50 = vpop.f32.mrf.mxu2  ;;  %v12799_v25 = vld [vmem:[%s20279_s1 + $0x64c] sm:$0xf]  ;;  %v9154_v33 = vld [vmem:[%s20279_s1 + $0x658] sm:$0xf0] }
 0x336   :  { %7571 = vmatpush.bf16.msrb.mxu1 %v9093_v20  ;;  %v12735_v20 = vld [vmem:[%s20279_s1 + $0x44c] sm:$0xf]  ;;  %v7333_v52 = vadd.f32 %v7332_v50, %v7320_v31  ;;  %v7345_v44 = vpop.f32.mrf.mxu3  ;;  %v7321_v56 = vpop.f32.mrf.mxu1  ;;  %v8882_v59 = vld [vmem:[%s20279_s1 + $0x438] sm:$0xf0] }
 0x337   :  { %7584 = vmatpush.bf16.msrb.mxu2 %v9221_v41  ;;  %v8898_v41 = vld [vmem:[%s20279_s1 + $0x458] sm:$0xf0]  ;;  %v12831_v43 = vld [vmem:[%s20279_s1 + $0x74c] sm:$0xf] }
 0x338   :  { %7597 = vmatpush.bf16.msrb.mxu3 %v9349_v51  ;;  %v9026_v51 = vld [vmem:[%s20279_s1 + $0x558] sm:$0xf0]  ;;  %v18903_v57 = vadd.f32 %v7345_v44, %v7333_v52  ;;  %v12731_v34 = vld [vmem:[%s20279_s1 + $0x42c] sm:$0xf] }
 0x339   :  { %7559 = vmatpush.bf16.msrb.mxu0 %v8949_v45  ;;  %v9282_v45 = vld [vmem:[%s20279_s1 + $0x758] sm:$0xf0]  ;;  %v9029_v28 = vor.u32 %v12767_v42, %v9026_v51  ;;  %v12763_v40 = vld [vmem:[%s20279_s1 + $0x52c] sm:$0xf] }
 0x33a   :  { %7572 = vmatpush.bf16.msrb.mxu1 %v9077_v53  ;;  %v7308_v53 = vpop.f32.mrf.mxu0  ;;  %v9285_v61 = vor.u32 %v12831_v43, %v9282_v45  ;;  %v9010_v62 = vld [vmem:[%s20279_s1 + $0x538] sm:$0xf0]  ;;  %v12795_v55 = vld [vmem:[%s20279_s1 + $0x62c] sm:$0xf] }
 0x33b   :  { %7585 = vmatpush.bf16.msrb.mxu2 %v9205_v27  ;;  %v8901_v27 = vor.u32 %v12735_v20, %v8898_v41  ;;  %v9138_v63 = vld [vmem:[%s20279_s1 + $0x638] sm:$0xf0]  ;;  %v9013_v26 = vor.u32 %v12763_v40, %v9010_v62  ;;  %v12791_v35 = vld [vmem:[%s20279_s1 + $0x60c] sm:$0xf] }
 0x33c   :  { %7598 = vmatpush.bf16.msrb.mxu3 %v9333_v29  ;;  %v9157_v29 = vor.u32 %v12799_v25, %v9154_v33  ;;  %v9266_v8 = vld [vmem:[%s20279_s1 + $0x738] sm:$0xf0]  ;;  %v9141_v10 = vor.u32 %v12795_v55, %v9138_v63  ;;  %v12823_v32 = vld [vmem:[%s20279_s1 + $0x70c] sm:$0xf] }
 0x33d   :  { %7560 = vmatpush.bf16.msrb.mxu0 %v8933_v3  ;;  %v12827_v3 = vld [vmem:[%s20279_s1 + $0x72c] sm:$0xf]  ;;  %v8866_v11 = vld [vmem:[%s20279_s1 + $0x418] sm:$0xf0] }
 0x33e   :  { %7573 = vmatpush.bf16.msrb.mxu1 %v9061_v19  ;;  %v8885_v19 = vor.u32 %v12731_v34, %v8882_v59  ;;  %v8994_v31 = vld [vmem:[%s20279_s1 + $0x518] sm:$0xf0]  ;;  %v9269_v36 = vor.u32 %v12827_v3, %v9266_v8  ;;  %v12915_v20 = vld [vmem:[%s20279_s1 + $0x9ec] sm:$0xf]  ;;  %v7347_v41 = vpop.f32.mrf.mxu3 }
 0x33f   :  { %7586 = vmatpush.bf16.msrb.mxu2 %v9189_v58  ;;  %v12727_v58 = vld [vmem:[%s20279_s1 + $0x40c] sm:$0xf]  ;;  %v9122_v24 = vld [vmem:[%s20279_s1 + $0x618] sm:$0xf0] }
 0x340   :  { %7599 = vmatpush.bf16.msrb.mxu3 %v9317_v21  ;;  %v12759_v21 = vld [vmem:[%s20279_s1 + $0x50c] sm:$0xf]  ;;  %v9250_v37 = vld [vmem:[%s20279_s1 + $0x718] sm:$0xf0]  ;;  %v8869_v42 = vor.u32 %v12727_v58, %v8866_v11  ;;  %v9125_v33 = vor.u32 %v12791_v35, %v9122_v24 }
 0x341   :  { %7561 = vmatpush.bf16.msrb.mxu0 %v8917_v38  ;;  %v7334_v38 = vpop.f32.mrf.mxu2  ;;  %v12947_v50 = vld [vmem:[%s20279_s1 + $0xaec] sm:$0xf]  ;;  %v9746_v51 = vld [vmem:[%s20279_s1 + $0xaf8] sm:$0xf0]  ;;  %v8997_v25 = vor.u32 %v12759_v21, %v8994_v31  ;;  %v9253_v43 = vor.u32 %v12823_v32, %v9250_v37 }
 0x342   :  { %7574 = vmatpush.bf16.msrb.mxu1 %v9045_v39  ;;  %v12883_v39 = vld [vmem:[%s20279_s1 + $0x8ec] sm:$0xf]  ;;  %v9874_v44 = vld [vmem:[%s20279_s1 + $0xbf8] sm:$0xf0] }
 0x343   :  { %7587 = vmatpush.bf16.msrb.mxu2 %v9173_v23  ;;  %v9490_v23 = vld [vmem:[%s20279_s1 + $0x8f8] sm:$0xf0]  ;;  %v12979_v52 = vld [vmem:[%s20279_s1 + $0xbec] sm:$0xf] }
 0x344   :  { %7600 = vmatpush.bf16.msrb.mxu3 %v9301_v30  ;;  %v9618_v30 = vld [vmem:[%s20279_s1 + $0x9f8] sm:$0xf0]  ;;  %v9493_v45 = vor.u32 %v12883_v39, %v9490_v23  ;;  %v12879_v56 = vld [vmem:[%s20279_s1 + $0x8cc] sm:$0xf]  ;;  %v9877_v34 = vor.u32 %v12979_v52, %v9874_v44 }
 0x345   :  { %7562 = vmatpush.bf16.msrb.mxu0 %v8901_v27  ;;  %v9621_v53 = vor.u32 %v12915_v20, %v9618_v30  ;;  %v9749_v27 = vor.u32 %v12947_v50, %v9746_v51  ;;  %v9602_v59 = vld [vmem:[%s20279_s1 + $0x9d8] sm:$0xf0]  ;;  %v12943_v40 = vld [vmem:[%s20279_s1 + $0xacc] sm:$0xf] }
 0x346   :  { %7575 = vmatpush.bf16.msrb.mxu1 %v9029_v28  ;;  %v9474_v28 = vld [vmem:[%s20279_s1 + $0x8d8] sm:$0xf0]  ;;  %v12975_v62 = vld [vmem:[%s20279_s1 + $0xbcc] sm:$0xf] }
 0x347   :  { %7588 = vmatpush.bf16.msrb.mxu2 %v9157_v29  ;;  %v12911_v29 = vld [vmem:[%s20279_s1 + $0x9cc] sm:$0xf]  ;;  %v9858_v55 = vld [vmem:[%s20279_s1 + $0xbd8] sm:$0xf0]  ;;  %v9477_v63 = vor.u32 %v12879_v56, %v9474_v28 }
 0x348   :  { %7601 = vmatpush.bf16.msrb.mxu3 %v9285_v61  ;;  %v9730_v61 = vld [vmem:[%s20279_s1 + $0xad8] sm:$0xf0]  ;;  %v9605_v3 = vor.u32 %v12911_v29, %v9602_v59  ;;  %v12907_v11 = vld [vmem:[%s20279_s1 + $0x9ac] sm:$0xf] }
 0x349   :  { %7563 = vmatpush.bf16.msrb.mxu0 %v8885_v19  ;;  %v9733_v8 = vor.u32 %v12943_v40, %v9730_v61  ;;  %v12875_v19 = vld [vmem:[%s20279_s1 + $0x8ac] sm:$0xf]  ;;  %v9458_v58 = vld [vmem:[%s20279_s1 + $0x8b8] sm:$0xf0] }
 0x34a   :  { %7576 = vmatpush.bf16.msrb.mxu1 %v9013_v26  ;;  %v9861_v26 = vor.u32 %v12975_v62, %v9858_v55  ;;  %v12939_v21 = vld [vmem:[%s20279_s1 + $0xaac] sm:$0xf]  ;;  %v9714_v31 = vld [vmem:[%s20279_s1 + $0xab8] sm:$0xf0] }
 0x34b   :  { %7589 = vmatpush.bf16.msrb.mxu2 %v9141_v10  ;;  %v9586_v10 = vld [vmem:[%s20279_s1 + $0x9b8] sm:$0xf0]  ;;  %v12971_v35 = vld [vmem:[%s20279_s1 + $0xbac] sm:$0xf]  ;;  %v9717_v32 = vor.u32 %v12939_v21, %v9714_v31 }
 0x34c   :  { %7602 = vmatpush.bf16.msrb.mxu3 %v9269_v36  ;;  %v9461_v36 = vor.u32 %v12875_v19, %v9458_v58  ;;  %v9589_v24 = vor.u32 %v12907_v11, %v9586_v10  ;;  %v12871_v37 = vld [vmem:[%s20279_s1 + $0x88c] sm:$0xf]  ;;  %v9442_v38 = vld [vmem:[%s20279_s1 + $0x898] sm:$0xf0] }
 0x34d   :  { %7564 = vmatpush.bf16.msrb.mxu0 %v8869_v42  ;;  %v12935_v39 = vld [vmem:[%s20279_s1 + $0xa8c] sm:$0xf]  ;;  %v9698_v23 = vld [vmem:[%s20279_s1 + $0xa98] sm:$0xf0]  ;;  %v7358_v20 = vpop.f32.mrf.mxu0  ;;  %v9445_v50 = vor.u32 %v12871_v37, %v9442_v38 }
 0x34e   :  { %7577 = vmatpush.bf16.msrb.mxu1 %v8997_v25  ;;  %v12967_v41 = vld [vmem:[%s20279_s1 + $0xb8c] sm:$0xf]  ;;  %v9826_v42 = vld [vmem:[%s20279_s1 + $0xb98] sm:$0xf0]  ;;  %v7359_v30 = vadd.f32 %v7358_v20, %v18903_v57  ;;  %v7371_v51 = vpop.f32.mrf.mxu1 }
 0x34f   :  { %7590 = vmatpush.bf16.msrb.mxu2 %v9125_v33  ;;  %v9701_v33 = vor.u32 %v12935_v39, %v9698_v23  ;;  %v12867_v52 = vld [vmem:[%s20279_s1 + $0x86c] sm:$0xf]  ;;  %v9426_v44 = vld [vmem:[%s20279_s1 + $0x878] sm:$0xf0]  ;;  %v9829_v57 = vor.u32 %v12967_v41, %v9826_v42 }
 0x350   :  { %7603 = vmatpush.bf16.msrb.mxu3 %v9253_v43  ;;  %7565 = vmatmul.bf16.vlgmr.msrb.gmra.mxu0 %v14157_v0  ;;  %v12903_v0 = vld [vmem:[%s20279_s1 + $0x98c] sm:$0xf]  ;;  %v9682_v56 = vld [vmem:[%s20279_s1 + $0xa78] sm:$0xf0] }
 0x351   :  { %7609 = vmatpush.bf16.msra.mxu0 %v9493_v45  ;;  %7578 = vmatmul.bf16.vlgmr.msrb.gmra.mxu1 %v14161_v2  ;;  %v9570_v2 = vld [vmem:[%s20279_s1 + $0x998] sm:$0xf0]  ;;  %v12899_v43 = vld [vmem:[%s20279_s1 + $0x96c] sm:$0xf]  ;;  %v7372_v45 = vadd.f32 %v7371_v51, %v7359_v30 }
 0x352   :  { %7622 = vmatpush.bf16.msra.mxu1 %v9621_v53  ;;  %7591 = vmatmul.bf16.vlgmr.msrb.gmra.mxu2 %v14152_v60  ;;  %v9842_v60 = vld [vmem:[%s20279_s1 + $0xbb8] sm:$0xf0]  ;;  %v9573_v25 = vor.u32 %v12903_v0, %v9570_v2  ;;  %v12963_v28 = vld [vmem:[%s20279_s1 + $0xb6c] sm:$0xf] }
 0x353   :  { %7635 = vmatpush.bf16.msra.mxu2 %v9749_v27  ;;  %7604 = vmatmul.bf16.vlgmr.msrb.gmra.mxu3 %v14159_v1  ;;  %v9845_v1 = vor.u32 %v12971_v35, %v9842_v60  ;;  %v9554_v53 = vld [vmem:[%s20279_s1 + $0x978] sm:$0xf0]  ;;  %v12931_v27 = vld [vmem:[%s20279_s1 + $0xa6c] sm:$0xf] }
 0x354   :  { %7648 = vmatpush.bf16.msra.mxu3 %v9877_v34  ;;  %v9810_v29 = vld [vmem:[%s20279_s1 + $0xb78] sm:$0xf0]  ;;  %v9429_v34 = vor.u32 %v12867_v52, %v9426_v44  ;;  %v9557_v59 = vor.u32 %v12899_v43, %v9554_v53  ;;  %v9685_v40 = vor.u32 %v12931_v27, %v9682_v56  ;;  %v12863_v61 = vld [vmem:[%s20279_s1 + $0x84c] sm:$0xf] }
 0x355   :  { %7610 = vmatpush.bf16.msra.mxu0 %v9477_v63  ;;  %v9410_v62 = vld [vmem:[%s20279_s1 + $0x858] sm:$0xf0]  ;;  %v12895_v55 = vld [vmem:[%s20279_s1 + $0x94c] sm:$0xf]  ;;  %v9813_v63 = vor.u32 %v12963_v28, %v9810_v29  ;;  %v7360_v31 = vpop.f32.mrf.mxu0 }
 0x356   :  { %7623 = vmatpush.bf16.msra.mxu1 %v9605_v3  ;;  %v7384_v3 = vpop.f32.mrf.mxu2  ;;  %v12927_v19 = vld [vmem:[%s20279_s1 + $0xa4c] sm:$0xf]  ;;  %v9666_v58 = vld [vmem:[%s20279_s1 + $0xa58] sm:$0xf0]  ;;  %v9413_v35 = vor.u32 %v12863_v61, %v9410_v62  ;;  %v7373_v60 = vpop.f32.mrf.mxu1 }
 0x357   :  { %7636 = vmatpush.bf16.msra.mxu2 %v9733_v8  ;;  %v9538_v8 = vld [vmem:[%s20279_s1 + $0x958] sm:$0xf0]  ;;  %v7385_v11 = vadd.f32 %v7384_v3, %v7372_v45  ;;  %v12959_v10 = vld [vmem:[%s20279_s1 + $0xb4c] sm:$0xf] }
 0x358   :  { %7649 = vmatpush.bf16.msra.mxu3 %v9861_v26  ;;  %v7397_v26 = vpop.f32.mrf.mxu3  ;;  %v9794_v21 = vld [vmem:[%s20279_s1 + $0xb58] sm:$0xf0]  ;;  %v12859_v37 = vld [vmem:[%s20279_s1 + $0x82c] sm:$0xf] }
 0x359   :  { %7611 = vmatpush.bf16.msra.mxu0 %v9461_v36  ;;  %v19102_v36 = vadd.f32 %v7397_v26, %v7385_v11  ;;  %v9394_v38 = vld [vmem:[%s20279_s1 + $0x838] sm:$0xf0]  ;;  %v12891_v0 = vld [vmem:[%s20279_s1 + $0x92c] sm:$0xf] }
 0x35a   :  { %7624 = vmatpush.bf16.msra.mxu1 %v9589_v24  ;;  %v9541_v24 = vor.u32 %v12895_v55, %v9538_v8  ;;  %v9522_v2 = vld [vmem:[%s20279_s1 + $0x938] sm:$0xf0]  ;;  %v12923_v39 = vld [vmem:[%s20279_s1 + $0xa2c] sm:$0xf]  ;;  %v9397_v42 = vor.u32 %v12859_v37, %v9394_v38 }
 0x35b   :  { %7637 = vmatpush.bf16.msra.mxu2 %v9717_v32  ;;  %v9669_v32 = vor.u32 %v12927_v19, %v9666_v58  ;;  %v9650_v23 = vld [vmem:[%s20279_s1 + $0xa38] sm:$0xf0]  ;;  %v12955_v20 = vld [vmem:[%s20279_s1 + $0xb2c] sm:$0xf]  ;;  %v9525_v51 = vor.u32 %v12891_v0, %v9522_v2 }
 0x35c   :  { %7650 = vmatpush.bf16.msra.mxu3 %v9845_v1  ;;  %v9797_v1 = vor.u32 %v12959_v10, %v9794_v21  ;;  %v9778_v41 = vld [vmem:[%s20279_s1 + $0xb38] sm:$0xf0]  ;;  %v12855_v30 = vld [vmem:[%s20279_s1 + $0x80c] sm:$0xf] }
 0x35d   :  { %7612 = vmatpush.bf16.msra.mxu0 %v9445_v50  ;;  %v9378_v50 = vld [vmem:[%s20279_s1 + $0x818] sm:$0xf0]  ;;  %v12919_v44 = vld [vmem:[%s20279_s1 + $0xa0c] sm:$0xf]  ;;  %v9781_v43 = vor.u32 %v12955_v20, %v9778_v41 }
 0x35e   :  { %7625 = vmatpush.bf16.msra.mxu1 %v9573_v25  ;;  %v9653_v25 = vor.u32 %v12923_v39, %v9650_v23  ;;  %v9506_v52 = vld [vmem:[%s20279_s1 + $0x918] sm:$0xf0]  ;;  %v12951_v45 = vld [vmem:[%s20279_s1 + $0xb0c] sm:$0xf]  ;;  %v7386_v27 = vpop.f32.mrf.mxu2 }
 0x35f   :  { %7638 = vmatpush.bf16.msra.mxu2 %v9701_v33  ;;  %v12887_v33 = vld [vmem:[%s20279_s1 + $0x90c] sm:$0xf]  ;;  %v9762_v53 = vld [vmem:[%s20279_s1 + $0xb18] sm:$0xf0] }
 0x360   :  { %7651 = vmatpush.bf16.msra.mxu3 %v9829_v57  ;;  %v9634_v57 = vld [vmem:[%s20279_s1 + $0xa18] sm:$0xf0]  ;;  %v13011_v56 = vld [vmem:[%s20279_s1 + $0xcec] sm:$0xf]  ;;  %v9509_v55 = vor.u32 %v12887_v33, %v9506_v52  ;;  %v9765_v19 = vor.u32 %v12951_v45, %v9762_v53 }
 0x361   :  { %7613 = vmatpush.bf16.msra.mxu0 %v9429_v34  ;;  %v10002_v28 = vld [vmem:[%s20279_s1 + $0xcf8] sm:$0xf0]  ;;  %v13043_v29 = vld [vmem:[%s20279_s1 + $0xdec] sm:$0xf]  ;;  %v7399_v34 = vpop.f32.mrf.mxu3 }
 0x362   :  { %7626 = vmatpush.bf16.msra.mxu1 %v9557_v59  ;;  %v9381_v59 = vor.u32 %v12855_v30, %v9378_v50  ;;  %v13075_v61 = vld [vmem:[%s20279_s1 + $0xeec] sm:$0xf]  ;;  %v10258_v62 = vld [vmem:[%s20279_s1 + $0xef8] sm:$0xf0]  ;;  %v10005_v58 = vor.u32 %v13011_v56, %v10002_v28 }
 0x363   :  { %7639 = vmatpush.bf16.msra.mxu2 %v9685_v40  ;;  %v10130_v40 = vld [vmem:[%s20279_s1 + $0xdf8] sm:$0xf0]  ;;  %v13107_v3 = vld [vmem:[%s20279_s1 + $0xfec] sm:$0xf]  ;;  %v10261_v26 = vor.u32 %v13075_v61, %v10258_v62 }
 0x364   :  { %7652 = vmatpush.bf16.msra.mxu3 %v9813_v63  ;;  %v9637_v63 = vor.u32 %v12919_v44, %v9634_v57  ;;  %v10386_v8 = vld [vmem:[%s20279_s1 + $0xff8] sm:$0xf0]  ;;  %v10133_v11 = vor.u32 %v13043_v29, %v10130_v40  ;;  %v13007_v10 = vld [vmem:[%s20279_s1 + $0xccc] sm:$0xf] }
 0x365   :  { %7614 = vmatpush.bf16.msra.mxu0 %v9413_v35  ;;  %v9986_v21 = vld [vmem:[%s20279_s1 + $0xcd8] sm:$0xf0]  ;;  %v13039_v31 = vld [vmem:[%s20279_s1 + $0xdcc] sm:$0xf]  ;;  %v10389_v35 = vor.u32 %v13107_v3, %v10386_v8 }
 0x366   :  { %7627 = vmatpush.bf16.msra.mxu1 %v9541_v24  ;;  %v10114_v60 = vld [vmem:[%s20279_s1 + $0xdd8] sm:$0xf0]  ;;  %v13071_v24 = vld [vmem:[%s20279_s1 + $0xecc] sm:$0xf]  ;;  %v9989_v0 = vor.u32 %v13007_v10, %v9986_v21 }
 0x367   :  { %7640 = vmatpush.bf16.msra.mxu2 %v9669_v32  ;;  %v10242_v32 = vld [vmem:[%s20279_s1 + $0xed8] sm:$0xf0]  ;;  %v13103_v37 = vld [vmem:[%s20279_s1 + $0xfcc] sm:$0xf] }
 0x368   :  { %7653 = vmatpush.bf16.msra.mxu3 %v9797_v1  ;;  %v10370_v38 = vld [vmem:[%s20279_s1 + $0xfd8] sm:$0xf0]  ;;  %v10117_v1 = vor.u32 %v13039_v31, %v10114_v60  ;;  %v10245_v2 = vor.u32 %v13071_v24, %v10242_v32  ;;  %v13003_v39 = vld [vmem:[%s20279_s1 + $0xcac] sm:$0xf] }
 0x369   :  { %7615 = vmatpush.bf16.msra.mxu0 %v9397_v42  ;;  %v9970_v23 = vld [vmem:[%s20279_s1 + $0xcb8] sm:$0xf0]  ;;  %v13035_v20 = vld [vmem:[%s20279_s1 + $0xdac] sm:$0xf]  ;;  %v10373_v41 = vor.u32 %v13103_v37, %v10370_v38 }
 0x36a   :  { %7628 = vmatpush.bf16.msra.mxu1 %v9525_v51  ;;  %v10098_v42 = vld [vmem:[%s20279_s1 + $0xdb8] sm:$0xf0]  ;;  %v13067_v30 = vld [vmem:[%s20279_s1 + $0xeac] sm:$0xf] }
 0x36b   :  { %7641 = vmatpush.bf16.msra.mxu2 %v9653_v25  ;;  %v10226_v50 = vld [vmem:[%s20279_s1 + $0xeb8] sm:$0xf0]  ;;  %v9973_v25 = vor.u32 %v13003_v39, %v9970_v23  ;;  %v10101_v33 = vor.u32 %v13035_v20, %v10098_v42  ;;  %v13031_v44 = vld [vmem:[%s20279_s1 + $0xd8c] sm:$0xf] }
 0x36c   :  { %7654 = vmatpush.bf16.msra.mxu3 %v9781_v43  ;;  %v10354_v51 = vld [vmem:[%s20279_s1 + $0xfb8] sm:$0xf0]  ;;  %v10229_v52 = vor.u32 %v13067_v30, %v10226_v50  ;;  %v13063_v57 = vld [vmem:[%s20279_s1 + $0xe8c] sm:$0xf] }
 0x36d   :  { %7616 = vmatpush.bf16.msra.mxu0 %v9381_v59  ;;  %v10082_v43 = vld [vmem:[%s20279_s1 + $0xd98] sm:$0xf0]  ;;  %v7410_v53 = vpop.f32.mrf.mxu0  ;;  %v13095_v27 = vld [vmem:[%s20279_s1 + $0xf8c] sm:$0xf] }
 0x36e   :  { %7629 = vmatpush.bf16.msra.mxu1 %v9509_v55  ;;  %v10210_v45 = vld [vmem:[%s20279_s1 + $0xe98] sm:$0xf0]  ;;  %v7411_v28 = vadd.f32 %v7410_v53, %v19102_v36  ;;  %v7423_v34 = vpop.f32.mrf.mxu1  ;;  %v10085_v59 = vor.u32 %v13031_v44, %v10082_v43  ;;  %v12995_v61 = vld [vmem:[%s20279_s1 + $0xc6c] sm:$0xf] }
 0x36f   :  { %7642 = vmatpush.bf16.msra.mxu2 %v9637_v63  ;;  %v10338_v56 = vld [vmem:[%s20279_s1 + $0xf98] sm:$0xf0]  ;;  %v10213_v40 = vor.u32 %v13063_v57, %v10210_v45  ;;  %v13027_v55 = vld [vmem:[%s20279_s1 + $0xd6c] sm:$0xf] }
 0x370   :  { %7655 = vmatpush.bf16.msra.mxu3 %v9765_v19  ;;  %7617 = vmatmul.bf16.vlgmr.msra.gmra.mxu0 %v14407_v12  ;;  %v13099_v12 = vld [vmem:[%s20279_s1 + $0xfac] sm:$0xf]  ;;  %v9938_v62 = vld [vmem:[%s20279_s1 + $0xc78] sm:$0xf0]  ;;  %v10341_v36 = vor.u32 %v13095_v27, %v10338_v56  ;;  %v7424_v63 = vadd.f32 %v7423_v34, %v7411_v28 }
 0x371   :  { %7661 = vmatpush.bf16.msrb.mxu0 %v10005_v58  ;;  %7630 = vmatmul.bf16.vlgmr.msra.gmra.mxu1 %v14417_v16  ;;  %v9954_v16 = vld [vmem:[%s20279_s1 + $0xc98] sm:$0xf0]  ;;  %v13059_v8 = vld [vmem:[%s20279_s1 + $0xe6c] sm:$0xf] }
 0x372   :  { %7674 = vmatpush.bf16.msrb.mxu1 %v10133_v11  ;;  %7643 = vmatmul.bf16.vlgmr.msra.gmra.mxu2 %v14415_v15  ;;  %v12999_v15 = vld [vmem:[%s20279_s1 + $0xc8c] sm:$0xf]  ;;  %v10066_v3 = vld [vmem:[%s20279_s1 + $0xd78] sm:$0xf0] }
 0x373   :  { %7687 = vmatpush.bf16.msrb.mxu2 %v10261_v26  ;;  %7656 = vmatmul.bf16.vlgmr.msra.gmra.mxu3 %v14419_v17  ;;  %v10357_v17 = vor.u32 %v13099_v12, %v10354_v51  ;;  %v9957_v29 = vor.u32 %v12999_v15, %v9954_v16  ;;  %v10194_v19 = vld [vmem:[%s20279_s1 + $0xe78] sm:$0xf0]  ;;  %v13091_v58 = vld [vmem:[%s20279_s1 + $0xf6c] sm:$0xf]  ;;  %v9941_v26 = vor.u32 %v12995_v61, %v9938_v62 }
 0x374   :  { %7700 = vmatpush.bf16.msrb.mxu3 %v10389_v35  ;;  %v10322_v11 = vld [vmem:[%s20279_s1 + $0xf78] sm:$0xf0]  ;;  %v10069_v10 = vor.u32 %v13027_v55, %v10066_v3  ;;  %v10197_v21 = vor.u32 %v13059_v8, %v10194_v19  ;;  %v12991_v31 = vld [vmem:[%s20279_s1 + $0xc4c] sm:$0xf] }
 0x375   :  { %7662 = vmatpush.bf16.msrb.mxu0 %v9989_v0  ;;  %v9922_v35 = vld [vmem:[%s20279_s1 + $0xc58] sm:$0xf0]  ;;  %v13023_v60 = vld [vmem:[%s20279_s1 + $0xd4c] sm:$0xf]  ;;  %v10325_v24 = vor.u32 %v13091_v58, %v10322_v11  ;;  %v7436_v32 = vpop.f32.mrf.mxu2  ;;  %v7412_v20 = vpop.f32.mrf.mxu0 }
 0x376   :  { %7675 = vmatpush.bf16.msrb.mxu1 %v10117_v1  ;;  %v10050_v37 = vld [vmem:[%s20279_s1 + $0xd58] sm:$0xf0]  ;;  %v13055_v38 = vld [vmem:[%s20279_s1 + $0xe4c] sm:$0xf]  ;;  %v7437_v1 = vadd.f32 %v7436_v32, %v7424_v63  ;;  %v7425_v42 = vpop.f32.mrf.mxu1 }
 0x377   :  { %7688 = vmatpush.bf16.msrb.mxu2 %v10245_v2  ;;  %v10178_v0 = vld [vmem:[%s20279_s1 + $0xe58] sm:$0xf0]  ;;  %v7449_v2 = vpop.f32.mrf.mxu3  ;;  %v13087_v39 = vld [vmem:[%s20279_s1 + $0xf4c] sm:$0xf]  ;;  %v10053_v50 = vor.u32 %v13023_v60, %v10050_v37 }
 0x378   :  { %7701 = vmatpush.bf16.msrb.mxu3 %v10373_v41  ;;  %v10306_v23 = vld [vmem:[%s20279_s1 + $0xf58] sm:$0xf0]  ;;  %v9925_v41 = vor.u32 %v12991_v31, %v9922_v35  ;;  %v19301_v30 = vadd.f32 %v7449_v2, %v7437_v1  ;;  %v10181_v12 = vor.u32 %v13055_v38, %v10178_v0  ;;  %v12987_v51 = vld [vmem:[%s20279_s1 + $0xc2c] sm:$0xf] }
 0x379   :  { %7663 = vmatpush.bf16.msrb.mxu0 %v9973_v25  ;;  %v9906_v25 = vld [vmem:[%s20279_s1 + $0xc38] sm:$0xf0]  ;;  %v13051_v16 = vld [vmem:[%s20279_s1 + $0xe2c] sm:$0xf] }
 0x37a   :  { %7676 = vmatpush.bf16.msrb.mxu1 %v10101_v33  ;;  %v13019_v33 = vld [vmem:[%s20279_s1 + $0xd2c] sm:$0xf]  ;;  %v10034_v15 = vld [vmem:[%s20279_s1 + $0xd38] sm:$0xf0]  ;;  %v9909_v57 = vor.u32 %v12987_v51, %v9906_v25 }
 0x37b   :  { %7689 = vmatpush.bf16.msrb.mxu2 %v10229_v52  ;;  %v10309_v52 = vor.u32 %v13087_v39, %v10306_v23  ;;  %v10162_v44 = vld [vmem:[%s20279_s1 + $0xe38] sm:$0xf0]  ;;  %v12983_v45 = vld [vmem:[%s20279_s1 + $0xc0c] sm:$0xf]  ;;  %v10037_v27 = vor.u32 %v13019_v33, %v10034_v15 }
 0x37c   :  { %7702 = vmatpush.bf16.msrb.mxu3 %v10357_v17  ;;  %v13083_v17 = vld [vmem:[%s20279_s1 + $0xf2c] sm:$0xf]  ;;  %v10290_v43 = vld [vmem:[%s20279_s1 + $0xf38] sm:$0xf0]  ;;  %v10165_v56 = vor.u32 %v13051_v16, %v10162_v44 }
 0x37d   :  { %7664 = vmatpush.bf16.msrb.mxu0 %v9957_v29  ;;  %v9890_v53 = vld [vmem:[%s20279_s1 + $0xc18] sm:$0xf0]  ;;  %v13015_v28 = vld [vmem:[%s20279_s1 + $0xd0c] sm:$0xf]  ;;  %v7438_v55 = vpop.f32.mrf.mxu2 }
 0x37e   :  { %7677 = vmatpush.bf16.msrb.mxu1 %v10085_v59  ;;  %v10018_v29 = vld [vmem:[%s20279_s1 + $0xd18] sm:$0xf0]  ;;  %v13047_v34 = vld [vmem:[%s20279_s1 + $0xe0c] sm:$0xf]  ;;  %v10293_v59 = vor.u32 %v13083_v17, %v10290_v43  ;;  %v9893_v19 = vor.u32 %v12983_v45, %v9890_v53 }
 0x37f   :  { %7690 = vmatpush.bf16.msrb.mxu2 %v10213_v40  ;;  %v10146_v40 = vld [vmem:[%s20279_s1 + $0xe18] sm:$0xf0]  ;;  %v13079_v61 = vld [vmem:[%s20279_s1 + $0xf0c] sm:$0xf]  ;;  %v7451_v8 = vpop.f32.mrf.mxu3 }
 0x380   :  { %7703 = vmatpush.bf16.msrb.mxu3 %v10341_v36  ;;  %v10274_v62 = vld [vmem:[%s20279_s1 + $0xf18] sm:$0xf0]  ;;  %v13139_v36 = vld [vmem:[%s20279_s1 + $0x10ec] sm:$0xf] }
 0x381   :  { %7665 = vmatpush.bf16.msrb.mxu0 %v9941_v26  ;;  %v10514_v63 = vld [vmem:[%s20279_s1 + $0x10f8] sm:$0xf0]  ;;  %v13171_v3 = vld [vmem:[%s20279_s1 + $0x11ec] sm:$0xf]  ;;  %v10277_v60 = vor.u32 %v13079_v61, %v10274_v62 }
 0x382   :  { %7678 = vmatpush.bf16.msrb.mxu1 %v10069_v10  ;;  %v10642_v58 = vld [vmem:[%s20279_s1 + $0x11f8] sm:$0xf0]  ;;  %v13203_v11 = vld [vmem:[%s20279_s1 + $0x12ec] sm:$0xf]  ;;  %v10021_v10 = vor.u32 %v13015_v28, %v10018_v29 }
 0x383   :  { %7691 = vmatpush.bf16.msrb.mxu2 %v10197_v21  ;;  %v10770_v26 = vld [vmem:[%s20279_s1 + $0x12f8] sm:$0xf0]  ;;  %v10149_v21 = vor.u32 %v13047_v34, %v10146_v40  ;;  %v13235_v31 = vld [vmem:[%s20279_s1 + $0x13ec] sm:$0xf]  ;;  %v10645_v32 = vor.u32 %v13171_v3, %v10642_v58 }
 0x384   :  { %7704 = vmatpush.bf16.msrb.mxu3 %v10325_v24  ;;  %v10898_v35 = vld [vmem:[%s20279_s1 + $0x13f8] sm:$0xf0]  ;;  %v10517_v24 = vor.u32 %v13139_v36, %v10514_v63  ;;  %v10773_v37 = vor.u32 %v13203_v11, %v10770_v26  ;;  %v13135_v38 = vld [vmem:[%s20279_s1 + $0x10cc] sm:$0xf] }
 0x385   :  { %7666 = vmatpush.bf16.msrb.mxu0 %v9925_v41  ;;  %v10498_v0 = vld [vmem:[%s20279_s1 + $0x10d8] sm:$0xf0]  ;;  %v13167_v1 = vld [vmem:[%s20279_s1 + $0x11cc] sm:$0xf]  ;;  %v10901_v2 = vor.u32 %v13235_v31, %v10898_v35 }
 0x386   :  { %7679 = vmatpush.bf16.msrb.mxu1 %v10053_v50  ;;  %v10626_v39 = vld [vmem:[%s20279_s1 + $0x11d8] sm:$0xf0]  ;;  %v13199_v23 = vld [vmem:[%s20279_s1 + $0x12cc] sm:$0xf]  ;;  %v10501_v50 = vor.u32 %v13135_v38, %v10498_v0 }
 0x387   :  { %7692 = vmatpush.bf16.msrb.mxu2 %v10181_v12  ;;  %v10754_v20 = vld [vmem:[%s20279_s1 + $0x12d8] sm:$0xf0]  ;;  %v13231_v41 = vld [vmem:[%s20279_s1 + $0x13cc] sm:$0xf]  ;;  %v10629_v12 = vor.u32 %v13167_v1, %v10626_v39 }
 0x388   :  { %7705 = vmatpush.bf16.msrb.mxu3 %v10309_v52  ;;  %v10882_v42 = vld [vmem:[%s20279_s1 + $0x13d8] sm:$0xf0]  ;;  %v10757_v51 = vor.u32 %v13199_v23, %v10754_v20  ;;  %v13131_v25 = vld [vmem:[%s20279_s1 + $0x10ac] sm:$0xf] }
 0x389   :  { %7667 = vmatpush.bf16.msrb.mxu0 %v9909_v57  ;;  %v10482_v33 = vld [vmem:[%s20279_s1 + $0x10b8] sm:$0xf0]  ;;  %v13163_v52 = vld [vmem:[%s20279_s1 + $0x11ac] sm:$0xf]  ;;  %v10885_v15 = vor.u32 %v13231_v41, %v10882_v42 }
 0x38a   :  { %7680 = vmatpush.bf16.msrb.mxu1 %v10037_v27  ;;  %v10610_v16 = vld [vmem:[%s20279_s1 + $0x11b8] sm:$0xf0]  ;;  %v13195_v44 = vld [vmem:[%s20279_s1 + $0x12ac] sm:$0xf]  ;;  %v10485_v57 = vor.u32 %v13131_v25, %v10482_v33 }
 0x38b   :  { %7693 = vmatpush.bf16.msrb.mxu2 %v10165_v56  ;;  %v10738_v17 = vld [vmem:[%s20279_s1 + $0x12b8] sm:$0xf0]  ;;  %v10613_v45 = vor.u32 %v13163_v52, %v10610_v16  ;;  %v13159_v27 = vld [vmem:[%s20279_s1 + $0x118c] sm:$0xf] }
 0x38c   :  { %7706 = vmatpush.bf16.msrb.mxu3 %v10293_v59  ;;  %v10866_v43 = vld [vmem:[%s20279_s1 + $0x13b8] sm:$0xf0]  ;;  %v10741_v53 = vor.u32 %v13195_v44, %v10738_v17  ;;  %v13191_v28 = vld [vmem:[%s20279_s1 + $0x128c] sm:$0xf] }
 0x38d   :  { %7668 = vmatpush.bf16.msrb.mxu0 %v9893_v19  ;;  %v10594_v56 = vld [vmem:[%s20279_s1 + $0x1198] sm:$0xf0]  ;;  %v7462_v34 = vpop.f32.mrf.mxu0  ;;  %v13223_v59 = vld [vmem:[%s20279_s1 + $0x138c] sm:$0xf] }
 0x38e   :  { %7681 = vmatpush.bf16.msrb.mxu1 %v10021_v10  ;;  %v10722_v29 = vld [vmem:[%s20279_s1 + $0x1298] sm:$0xf0]  ;;  %v7463_v61 = vadd.f32 %v7462_v34, %v19301_v30  ;;  %v7475_v55 = vpop.f32.mrf.mxu1  ;;  %v10597_v36 = vor.u32 %v13159_v27, %v10594_v56  ;;  %v13123_v3 = vld [vmem:[%s20279_s1 + $0x106c] sm:$0xf] }
 0x38f   :  { %7694 = vmatpush.bf16.msrb.mxu2 %v10149_v21  ;;  %v10850_v40 = vld [vmem:[%s20279_s1 + $0x1398] sm:$0xf0]  ;;  %v10725_v63 = vor.u32 %v13191_v28, %v10722_v29  ;;  %v13155_v19 = vld [vmem:[%s20279_s1 + $0x116c] sm:$0xf] }
 0x390   :  { %7707 = vmatpush.bf16.msrb.mxu3 %v10277_v60  ;;  %7669 = vmatmul.bf16.vlgmr.msrb.gmra.mxu0 %v14581_v46  ;;  %v13227_v46 = vld [vmem:[%s20279_s1 + $0x13ac] sm:$0xf]  ;;  %v10450_v8 = vld [vmem:[%s20279_s1 + $0x1078] sm:$0xf0]  ;;  %v10853_v30 = vor.u32 %v13223_v59, %v10850_v40  ;;  %v7476_v58 = vadd.f32 %v7475_v55, %v7463_v61 }
 0x391   :  { %7713 = vmatpush.bf16.msra.mxu0 %v10517_v24  ;;  %7682 = vmatmul.bf16.vlgmr.msrb.gmra.mxu1 %v14585_v48  ;;  %v10466_v48 = vld [vmem:[%s20279_s1 + $0x1098] sm:$0xf0]  ;;  %v13187_v26 = vld [vmem:[%s20279_s1 + $0x126c] sm:$0xf]  ;;  %v10453_v35 = vor.u32 %v13123_v3, %v10450_v8 }
 0x392   :  { %7726 = vmatpush.bf16.msra.mxu1 %v10645_v32  ;;  %7695 = vmatmul.bf16.vlgmr.msrb.gmra.mxu2 %v14583_v47  ;;  %v13127_v47 = vld [vmem:[%s20279_s1 + $0x108c] sm:$0xf]  ;;  %v10578_v11 = vld [vmem:[%s20279_s1 + $0x1178] sm:$0xf0] }
 0x393   :  { %7739 = vmatpush.bf16.msra.mxu2 %v10773_v37  ;;  %7708 = vmatmul.bf16.vlgmr.msrb.gmra.mxu3 %v14587_v49  ;;  %v10869_v49 = vor.u32 %v13227_v46, %v10866_v43  ;;  %v10469_v62 = vor.u32 %v13127_v47, %v10466_v48  ;;  %v10706_v10 = vld [vmem:[%s20279_s1 + $0x1278] sm:$0xf0]  ;;  %v13219_v21 = vld [vmem:[%s20279_s1 + $0x136c] sm:$0xf]  ;;  %v10581_v60 = vor.u32 %v13155_v19, %v10578_v11 }
 0x394   :  { %7752 = vmatpush.bf16.msra.mxu3 %v10901_v2  ;;  %v10834_v31 = vld [vmem:[%s20279_s1 + $0x1378] sm:$0xf0]  ;;  %v10709_v24 = vor.u32 %v13187_v26, %v10706_v10  ;;  %v13119_v32 = vld [vmem:[%s20279_s1 + $0x104c] sm:$0xf] }
 0x395   :  { %7714 = vmatpush.bf16.msra.mxu0 %v10501_v50  ;;  %v10434_v37 = vld [vmem:[%s20279_s1 + $0x1058] sm:$0xf0]  ;;  %v13151_v38 = vld [vmem:[%s20279_s1 + $0x114c] sm:$0xf]  ;;  %v10837_v0 = vor.u32 %v13219_v21, %v10834_v31  ;;  %v7488_v1 = vpop.f32.mrf.mxu2 }
 0x396   :  { %7727 = vmatpush.bf16.msra.mxu1 %v10629_v12  ;;  %v10562_v2 = vld [vmem:[%s20279_s1 + $0x1158] sm:$0xf0]  ;;  %v13183_v39 = vld [vmem:[%s20279_s1 + $0x124c] sm:$0xf]  ;;  %v7489_v20 = vadd.f32 %v7488_v1, %v7476_v58  ;;  %v7501_v41 = vpop.f32.mrf.mxu3  ;;  %v7464_v12 = vpop.f32.mrf.mxu0 }
 0x397   :  { %7740 = vmatpush.bf16.msra.mxu2 %v10757_v51  ;;  %v10690_v23 = vld [vmem:[%s20279_s1 + $0x1258] sm:$0xf0]  ;;  %v13215_v42 = vld [vmem:[%s20279_s1 + $0x134c] sm:$0xf]  ;;  %v10437_v51 = vor.u32 %v13119_v32, %v10434_v37  ;;  %v7477_v25 = vpop.f32.mrf.mxu1  ;;  %v10565_v52 = vor.u32 %v13151_v38, %v10562_v2 }
 0x398   :  { %7753 = vmatpush.bf16.msra.mxu3 %v10885_v15  ;;  %v10818_v50 = vld [vmem:[%s20279_s1 + $0x1358] sm:$0xf0]  ;;  %v19500_v33 = vadd.f32 %v7501_v41, %v7489_v20  ;;  %v10693_v15 = vor.u32 %v13183_v39, %v10690_v23  ;;  %v13115_v16 = vld [vmem:[%s20279_s1 + $0x102c] sm:$0xf] }
 0x399   :  { %7715 = vmatpush.bf16.msra.mxu0 %v10485_v57  ;;  %v10418_v44 = vld [vmem:[%s20279_s1 + $0x1038] sm:$0xf0]  ;;  %v13147_v17 = vld [vmem:[%s20279_s1 + $0x112c] sm:$0xf]  ;;  %v10821_v46 = vor.u32 %v13215_v42, %v10818_v50 }
 0x39a   :  { %7728 = vmatpush.bf16.msra.mxu1 %v10613_v45  ;;  %v10546_v43 = vld [vmem:[%s20279_s1 + $0x1138] sm:$0xf0]  ;;  %v13179_v57 = vld [vmem:[%s20279_s1 + $0x122c] sm:$0xf]  ;;  %v10421_v48 = vor.u32 %v13115_v16, %v10418_v44 }
 0x39b   :  { %7741 = vmatpush.bf16.msra.mxu2 %v10741_v53  ;;  %v10674_v45 = vld [vmem:[%s20279_s1 + $0x1238] sm:$0xf0]  ;;  %v13211_v53 = vld [vmem:[%s20279_s1 + $0x132c] sm:$0xf]  ;;  %v10549_v56 = vor.u32 %v13147_v17, %v10546_v43 }
 0x39c   :  { %7754 = vmatpush.bf16.msra.mxu3 %v10869_v49  ;;  %v10802_v47 = vld [vmem:[%s20279_s1 + $0x1338] sm:$0xf0]  ;;  %v13111_v27 = vld [vmem:[%s20279_s1 + $0x100c] sm:$0xf]  ;;  %v10677_v28 = vor.u32 %v13179_v57, %v10674_v45 }
 0x39d   :  { %7716 = vmatpush.bf16.msra.mxu0 %v10469_v62  ;;  %v10402_v49 = vld [vmem:[%s20279_s1 + $0x1018] sm:$0xf0]  ;;  %v13143_v29 = vld [vmem:[%s20279_s1 + $0x110c] sm:$0xf]  ;;  %v10805_v40 = vor.u32 %v13211_v53, %v10802_v47 }
 0x39e   :  { %7729 = vmatpush.bf16.msra.mxu1 %v10597_v36  ;;  %v10530_v34 = vld [vmem:[%s20279_s1 + $0x1118] sm:$0xf0]  ;;  %v13175_v59 = vld [vmem:[%s20279_s1 + $0x120c] sm:$0xf]  ;;  %v7490_v36 = vpop.f32.mrf.mxu2  ;;  %v7503_v19 = vpop.f32.mrf.mxu3 }
 0x39f   :  { %7742 = vmatpush.bf16.msra.mxu2 %v10725_v63  ;;  %v10658_v61 = vld [vmem:[%s20279_s1 + $0x1218] sm:$0xf0]  ;;  %v13207_v62 = vld [vmem:[%s20279_s1 + $0x130c] sm:$0xf]  ;;  %v10533_v10 = vor.u32 %v13143_v29, %v10530_v34 }
 0x3a0   :  { %7755 = vmatpush.bf16.msra.mxu3 %v10853_v30  ;;  %v10786_v55 = vld [vmem:[%s20279_s1 + $0x1318] sm:$0xf0]  ;;  %v13267_v63 = vld [vmem:[%s20279_s1 + $0x14ec] sm:$0xf]  ;;  %v10405_v30 = vor.u32 %v13111_v27, %v10402_v49  ;;  %v10661_v21 = vor.u32 %v13175_v59, %v10658_v61 }
 0x3a1   :  { %7717 = vmatpush.bf16.msra.mxu0 %v10453_v35  ;;  %v11026_v3 = vld [vmem:[%s20279_s1 + $0x14f8] sm:$0xf0]  ;;  %v13299_v8 = vld [vmem:[%s20279_s1 + $0x15ec] sm:$0xf] }
 0x3a2   :  { %7730 = vmatpush.bf16.msra.mxu1 %v10581_v60  ;;  %v11154_v58 = vld [vmem:[%s20279_s1 + $0x15f8] sm:$0xf0]  ;;  %v13331_v11 = vld [vmem:[%s20279_s1 + $0x16ec] sm:$0xf]  ;;  %v10789_v60 = vor.u32 %v13207_v62, %v10786_v55 }
 0x3a3   :  { %7743 = vmatpush.bf16.msra.mxu2 %v10709_v24  ;;  %v11282_v26 = vld [vmem:[%s20279_s1 + $0x16f8] sm:$0xf0]  ;;  %v13363_v31 = vld [vmem:[%s20279_s1 + $0x17ec] sm:$0xf]  ;;  %v11029_v24 = vor.u32 %v13267_v63, %v11026_v3  ;;  %v11157_v32 = vor.u32 %v13299_v8, %v11154_v58 }
 0x3a4   :  { %7756 = vmatpush.bf16.msra.mxu3 %v10837_v0  ;;  %v11410_v35 = vld [vmem:[%s20279_s1 + $0x17f8] sm:$0xf0]  ;;  %v11285_v37 = vor.u32 %v13331_v11, %v11282_v26  ;;  %v13263_v38 = vld [vmem:[%s20279_s1 + $0x14cc] sm:$0xf] }
 0x3a5   :  { %7718 = vmatpush.bf16.msra.mxu0 %v10437_v51  ;;  %v11010_v0 = vld [vmem:[%s20279_s1 + $0x14d8] sm:$0xf0]  ;;  %v13295_v1 = vld [vmem:[%s20279_s1 + $0x15cc] sm:$0xf]  ;;  %v11413_v2 = vor.u32 %v13363_v31, %v11410_v35 }
 0x3a6   :  { %7731 = vmatpush.bf16.msra.mxu1 %v10565_v52  ;;  %v11138_v39 = vld [vmem:[%s20279_s1 + $0x15d8] sm:$0xf0]  ;;  %v13327_v23 = vld [vmem:[%s20279_s1 + $0x16cc] sm:$0xf]  ;;  %v11013_v50 = vor.u32 %v13263_v38, %v11010_v0 }
 0x3a7   :  { %7744 = vmatpush.bf16.msra.mxu2 %v10693_v15  ;;  %v11266_v20 = vld [vmem:[%s20279_s1 + $0x16d8] sm:$0xf0]  ;;  %v13359_v41 = vld [vmem:[%s20279_s1 + $0x17cc] sm:$0xf]  ;;  %v11141_v12 = vor.u32 %v13295_v1, %v11138_v39 }
 0x3a8   :  { %7757 = vmatpush.bf16.msra.mxu3 %v10821_v46  ;;  %v11394_v42 = vld [vmem:[%s20279_s1 + $0x17d8] sm:$0xf0]  ;;  %v11269_v51 = vor.u32 %v13327_v23, %v11266_v20  ;;  %v13259_v25 = vld [vmem:[%s20279_s1 + $0x14ac] sm:$0xf] }
 0x3a9   :  { %7719 = vmatpush.bf16.msra.mxu0 %v10421_v48  ;;  %v10994_v52 = vld [vmem:[%s20279_s1 + $0x14b8] sm:$0xf0]  ;;  %v13291_v15 = vld [vmem:[%s20279_s1 + $0x15ac] sm:$0xf]  ;;  %v11397_v16 = vor.u32 %v13359_v41, %v11394_v42 }
 0x3aa   :  { %7732 = vmatpush.bf16.msra.mxu1 %v10549_v56  ;;  %v11122_v44 = vld [vmem:[%s20279_s1 + $0x15b8] sm:$0xf0]  ;;  %v13323_v17 = vld [vmem:[%s20279_s1 + $0x16ac] sm:$0xf]  ;;  %v10997_v57 = vor.u32 %v13259_v25, %v10994_v52 }
 0x3ab   :  { %7745 = vmatpush.bf16.msra.mxu2 %v10677_v28  ;;  %v11250_v46 = vld [vmem:[%s20279_s1 + $0x16b8] sm:$0xf0]  ;;  %v13255_v45 = vld [vmem:[%s20279_s1 + $0x148c] sm:$0xf] }
 0x3ac   :  { %7758 = vmatpush.bf16.msra.mxu3 %v10805_v40  ;;  %v11378_v43 = vld [vmem:[%s20279_s1 + $0x17b8] sm:$0xf0]  ;;  %v13287_v47 = vld [vmem:[%s20279_s1 + $0x158c] sm:$0xf] }
 0x3ad   :  { %7720 = vmatpush.bf16.msra.mxu0 %v10405_v30  ;;  %v10978_v53 = vld [vmem:[%s20279_s1 + $0x1498] sm:$0xf0]  ;;  %v13319_v56 = vld [vmem:[%s20279_s1 + $0x168c] sm:$0xf]  ;;  %v7514_v40 = vpop.f32.mrf.mxu0 }
 0x3ae   :  { %7733 = vmatpush.bf16.msra.mxu1 %v10533_v10  ;;  %v11106_v49 = vld [vmem:[%s20279_s1 + $0x1598] sm:$0xf0]  ;;  %v13351_v29 = vld [vmem:[%s20279_s1 + $0x178c] sm:$0xf]  ;;  %v10981_v59 = vor.u32 %v13255_v45, %v10978_v53  ;;  %v7527_v8 = vpop.f32.mrf.mxu1 }
 0x3af   :  { %7746 = vmatpush.bf16.msra.mxu2 %v10661_v21  ;;  %v11234_v28 = vld [vmem:[%s20279_s1 + $0x1698] sm:$0xf0]  ;;  %v11109_v61 = vor.u32 %v13287_v47, %v11106_v49  ;;  %v13251_v55 = vld [vmem:[%s20279_s1 + $0x146c] sm:$0xf] }
 0x3b0   :  { %7759 = vmatpush.bf16.msra.mxu3 %v10789_v60  ;;  %7721 = vmatmul.bf16.vlgmr.msra.gmra.mxu0 %v14818_v9  ;;  %v13355_v9 = vld [vmem:[%s20279_s1 + $0x17ac] sm:$0xf]  ;;  %v11362_v34 = vld [vmem:[%s20279_s1 + $0x1798] sm:$0xf0]  ;;  %v11237_v62 = vor.u32 %v13319_v56, %v11234_v28 }
 0x3b1   :  { %7765 = vmatpush.bf16.msrb.mxu0 %v11029_v24  ;;  %7734 = vmatmul.bf16.vlgmr.msra.gmra.mxu1 %v14828_v14  ;;  %v11253_v14 = vor.u32 %v13323_v17, %v11250_v46  ;;  %v11381_v27 = vor.u32 %v13355_v9, %v11378_v43  ;;  %v10962_v36 = vld [vmem:[%s20279_s1 + $0x1478] sm:$0xf0]  ;;  %v13283_v63 = vld [vmem:[%s20279_s1 + $0x156c] sm:$0xf]  ;;  %v11365_v19 = vor.u32 %v13351_v29, %v11362_v34 }
 0x3b2   :  { %7778 = vmatpush.bf16.msrb.mxu1 %v11157_v32  ;;  %7747 = vmatmul.bf16.vlgmr.msra.gmra.mxu2 %v14826_v13  ;;  %v11125_v13 = vor.u32 %v13291_v15, %v11122_v44  ;;  %v11090_v30 = vld [vmem:[%s20279_s1 + $0x1578] sm:$0xf0]  ;;  %v13315_v58 = vld [vmem:[%s20279_s1 + $0x166c] sm:$0xf]  ;;  %v10965_v31 = vor.u32 %v13251_v55, %v10962_v36 }
 0x3b3   :  { %7791 = vmatpush.bf16.msrb.mxu2 %v11285_v37  ;;  %7760 = vmatmul.bf16.vlgmr.msra.gmra.mxu3 %v14830_v18  ;;  %v13683_v18 = vld [vmem:[%s20280_s2] sm:$0xf]  ;;  %v11218_v11 = vld [vmem:[%s20279_s1 + $0x1678] sm:$0xf0]  ;;  %v13347_v26 = vld [vmem:[%s20279_s1 + $0x176c] sm:$0xf]  ;;  %v11093_v35 = vor.u32 %v13283_v63, %v11090_v30 }
 0x3b4   :  { %7804 = vmatpush.bf16.msrb.mxu3 %v11413_v2  ;;  %v1060_v48 = vperm.slane %v13683_v18, 3  ;;  %v11346_v10 = vld [vmem:[%s20279_s1 + $0x1778] sm:$0xf0]  ;;  %v11221_v60 = vor.u32 %v13315_v58, %v11218_v11  ;;  %v13247_v24 = vld [vmem:[%s20279_s1 + $0x144c] sm:$0xf] }
 0x3b5   :  { %7766 = vmatpush.bf16.msrb.mxu0 %v11013_v50  ;;  %v10946_v32 = vld [vmem:[%s20279_s1 + $0x1458] sm:$0xf0]  ;;  %v13279_v37 = vld [vmem:[%s20279_s1 + $0x154c] sm:$0xf]  ;;  %v7540_v38 = vpop.f32.mrf.mxu2  ;;  %v11349_v0 = vor.u32 %v13347_v26, %v11346_v10 }
 0x3b6   :  { %7779 = vmatpush.bf16.msrb.mxu1 %v11141_v12  ;;  %v7515_v3 = vadd.f32 %v7514_v40, %v1060_v48  ;;  %v11074_v1 = vld [vmem:[%s20279_s1 + $0x1558] sm:$0xf0]  ;;  %v13311_v2 = vld [vmem:[%s20279_s1 + $0x164c] sm:$0xf]  ;;  %v7553_v20 = vpop.f32.mrf.mxu3  ;;  %v10949_v50 = vor.u32 %v13247_v24, %v10946_v32  ;;  %v7529_v17 = vpop.f32.mrf.mxu1 }
 0x3b7   :  { %7792 = vmatpush.bf16.msrb.mxu2 %v11269_v51  ;;  %v11202_v39 = vld [vmem:[%s20279_s1 + $0x1658] sm:$0xf0]  ;;  %v13343_v41 = vld [vmem:[%s20279_s1 + $0x174c] sm:$0xf]  ;;  %v7516_v51 = vpop.f32.mrf.mxu0  ;;  %v11077_v25 = vor.u32 %v13279_v37, %v11074_v1 }
 0x3b8   :  { %7805 = vmatpush.bf16.msrb.mxu3 %v11397_v16  ;;  %v7528_v21 = vadd.f32 %v7527_v8, %v7515_v3  ;;  %v11330_v42 = vld [vmem:[%s20279_s1 + $0x1758] sm:$0xf0]  ;;  %v11205_v52 = vor.u32 %v13311_v2, %v11202_v39  ;;  %v13243_v15 = vld [vmem:[%s20279_s1 + $0x142c] sm:$0xf] }
 0x3b9   :  { %7767 = vmatpush.bf16.msrb.mxu0 %v10997_v57  ;;  %v10930_v16 = vld [vmem:[%s20279_s1 + $0x1438] sm:$0xf0]  ;;  %v13275_v44 = vld [vmem:[%s20279_s1 + $0x152c] sm:$0xf]  ;;  %v11333_v46 = vor.u32 %v13343_v41, %v11330_v42 }
 0x3ba   :  { %7780 = vmatpush.bf16.msrb.mxu1 %v11125_v13  ;;  %v7541_v23 = vadd.f32 %v7540_v38, %v7528_v21  ;;  %v11058_v9 = vld [vmem:[%s20279_s1 + $0x1538] sm:$0xf0]  ;;  %v13307_v43 = vld [vmem:[%s20279_s1 + $0x162c] sm:$0xf] }
 0x3bb   :  { %7793 = vmatpush.bf16.msrb.mxu2 %v11253_v14  ;;  %v11186_v57 = vld [vmem:[%s20279_s1 + $0x1638] sm:$0xf0]  ;;  %v13339_v45 = vld [vmem:[%s20279_s1 + $0x172c] sm:$0xf]  ;;  %v10933_v14 = vor.u32 %v13243_v15, %v10930_v16  ;;  %v11061_v18 = vor.u32 %v13275_v44, %v11058_v9 }
 0x3bc   :  { %7806 = vmatpush.bf16.msrb.mxu3 %v11381_v27  ;;  %v19701_v12 = vadd.f32 %v7553_v20, %v7541_v23  ;;  %v11314_v13 = vld [vmem:[%s20279_s1 + $0x1738] sm:$0xf0]  ;;  %v13239_v53 = vld [vmem:[%s20279_s1 + $0x140c] sm:$0xf]  ;;  %v11189_v48 = vor.u32 %v13307_v43, %v11186_v57 }
 0x3bd   :  { %7768 = vmatpush.bf16.msrb.mxu0 %v10981_v59  ;;  %v10914_v47 = vld [vmem:[%s20279_s1 + $0x1418] sm:$0xf0]  ;;  %v13271_v27 = vld [vmem:[%s20279_s1 + $0x150c] sm:$0xf]  ;;  %v7542_v28 = vpop.f32.mrf.mxu2  ;;  %v11317_v29 = vor.u32 %v13339_v45, %v11314_v13 }
 0x3be   :  { %7781 = vmatpush.bf16.msrb.mxu1 %v11109_v61  ;;  %v11042_v49 = vld [vmem:[%s20279_s1 + $0x1518] sm:$0xf0]  ;;  %v13303_v56 = vld [vmem:[%s20279_s1 + $0x160c] sm:$0xf]  ;;  %v7555_v61 = vpop.f32.mrf.mxu3  ;;  %v10917_v63 = vor.u32 %v13239_v53, %v10914_v47 }
 0x3bf   :  { %7794 = vmatpush.bf16.msrb.mxu2 %v11237_v62  ;;  %v11170_v34 = vld [vmem:[%s20279_s1 + $0x1618] sm:$0xf0]  ;;  %v13335_v59 = vld [vmem:[%s20279_s1 + $0x170c] sm:$0xf]  ;;  %v11045_v30 = vor.u32 %v13271_v27, %v11042_v49 }
 0x3c0   :  { %7807 = vmatpush.bf16.msrb.mxu3 %v11365_v19  ;;  %v11298_v40 = vld [vmem:[%s20279_s1 + $0x1718] sm:$0xf0]  ;;  %v13395_v62 = vld [vmem:[%s20279_s1 + $0x18ec] sm:$0xf]  ;;  %v11173_v58 = vor.u32 %v13303_v56, %v11170_v34 }
 0x3c1   :  { %7769 = vmatpush.bf16.msrb.mxu0 %v10965_v31  ;;  %v11538_v55 = vld [vmem:[%s20279_s1 + $0x18f8] sm:$0xf0]  ;;  %v13427_v36 = vld [vmem:[%s20279_s1 + $0x19ec] sm:$0xf]  ;;  %v11301_v10 = vor.u32 %v13335_v59, %v11298_v40 }
 0x3c2   :  { %7782 = vmatpush.bf16.msrb.mxu1 %v11093_v35  ;;  %v11666_v3 = vld [vmem:[%s20279_s1 + $0x19f8] sm:$0xf0]  ;;  %v13459_v8 = vld [vmem:[%s20279_s1 + $0x1aec] sm:$0xf]  ;;  %v11541_v21 = vor.u32 %v13395_v62, %v11538_v55 }
 0x3c3   :  { %7795 = vmatpush.bf16.msrb.mxu2 %v11221_v60  ;;  %v11794_v19 = vld [vmem:[%s20279_s1 + $0x1af8] sm:$0xf0]  ;;  %v13491_v11 = vld [vmem:[%s20279_s1 + $0x1bec] sm:$0xf]  ;;  %v11669_v31 = vor.u32 %v13427_v36, %v11666_v3 }
 0x3c4   :  { %7808 = vmatpush.bf16.msrb.mxu3 %v11349_v0  ;;  %v11922_v26 = vld [vmem:[%s20279_s1 + $0x1bf8] sm:$0xf0]  ;;  %v11797_v35 = vor.u32 %v13459_v8, %v11794_v19  ;;  %v13391_v60 = vld [vmem:[%s20279_s1 + $0x18cc] sm:$0xf] }
 0x3c5   :  { %7770 = vmatpush.bf16.msrb.mxu0 %v10949_v50  ;;  %v11522_v24 = vld [vmem:[%s20279_s1 + $0x18d8] sm:$0xf0]  ;;  %v13423_v32 = vld [vmem:[%s20279_s1 + $0x19cc] sm:$0xf]  ;;  %v11925_v37 = vor.u32 %v13491_v11, %v11922_v26 }
 0x3c6   :  { %7783 = vmatpush.bf16.msrb.mxu1 %v11077_v25  ;;  %v11650_v38 = vld [vmem:[%s20279_s1 + $0x19d8] sm:$0xf0]  ;;  %v13455_v0 = vld [vmem:[%s20279_s1 + $0x1acc] sm:$0xf]  ;;  %v11525_v23 = vor.u32 %v13391_v60, %v11522_v24 }
 0x3c7   :  { %7796 = vmatpush.bf16.msrb.mxu2 %v11205_v52  ;;  %v11778_v1 = vld [vmem:[%s20279_s1 + $0x1ad8] sm:$0xf0]  ;;  %v13487_v2 = vld [vmem:[%s20279_s1 + $0x1bcc] sm:$0xf]  ;;  %v11653_v20 = vor.u32 %v13423_v32, %v11650_v38 }
 0x3c8   :  { %7809 = vmatpush.bf16.msrb.mxu3 %v11333_v46  ;;  %v11906_v39 = vld [vmem:[%s20279_s1 + $0x1bd8] sm:$0xf0]  ;;  %v11781_v41 = vor.u32 %v13455_v0, %v11778_v1  ;;  %v13387_v42 = vld [vmem:[%s20279_s1 + $0x18ac] sm:$0xf] }
 0x3c9   :  { %7771 = vmatpush.bf16.msrb.mxu0 %v10933_v14  ;;  %v11506_v50 = vld [vmem:[%s20279_s1 + $0x18b8] sm:$0xf0]  ;;  %v13419_v51 = vld [vmem:[%s20279_s1 + $0x19ac] sm:$0xf]  ;;  %v11909_v25 = vor.u32 %v13487_v2, %v11906_v39 }
 0x3ca   :  { %7784 = vmatpush.bf16.msrb.mxu1 %v11061_v18  ;;  %v11634_v52 = vld [vmem:[%s20279_s1 + $0x19b8] sm:$0xf0]  ;;  %v13451_v15 = vld [vmem:[%s20279_s1 + $0x1aac] sm:$0xf]  ;;  %v11509_v17 = vor.u32 %v13387_v42, %v11506_v50 }
 0x3cb   :  { %7797 = vmatpush.bf16.msrb.mxu2 %v11189_v48  ;;  %v11762_v16 = vld [vmem:[%s20279_s1 + $0x1ab8] sm:$0xf0]  ;;  %v11637_v46 = vor.u32 %v13419_v51, %v11634_v52  ;;  %v13415_v43 = vld [vmem:[%s20279_s1 + $0x198c] sm:$0xf] }
 0x3cc   :  { %7810 = vmatpush.bf16.msrb.mxu3 %v11317_v29  ;;  %v11890_v44 = vld [vmem:[%s20279_s1 + $0x1bb8] sm:$0xf0]  ;;  %v11765_v9 = vor.u32 %v13451_v15, %v11762_v16  ;;  %v13447_v45 = vld [vmem:[%s20279_s1 + $0x1a8c] sm:$0xf] }
 0x3cd   :  { %7772 = vmatpush.bf16.msrb.mxu0 %v10917_v63  ;;  %v11618_v57 = vld [vmem:[%s20279_s1 + $0x1998] sm:$0xf0]  ;;  %v13479_v14 = vld [vmem:[%s20279_s1 + $0x1b8c] sm:$0xf]  ;;  %v7566_v18 = vpop.f32.mrf.mxu0 }
 0x3ce   :  { %7785 = vmatpush.bf16.msrb.mxu1 %v11045_v30  ;;  %v11746_v13 = vld [vmem:[%s20279_s1 + $0x1a98] sm:$0xf0]  ;;  %v11621_v48 = vor.u32 %v13415_v43, %v11618_v57  ;;  %v13379_v49 = vld [vmem:[%s20279_s1 + $0x186c] sm:$0xf]  ;;  %v7567_v29 = vadd.f32 %v7566_v18, %v19701_v12  ;;  %v7579_v34 = vpop.f32.mrf.mxu1 }
 0x3cf   :  { %7798 = vmatpush.bf16.msrb.mxu2 %v11173_v58  ;;  %v11874_v53 = vld [vmem:[%s20279_s1 + $0x1b98] sm:$0xf0]  ;;  %v11749_v27 = vor.u32 %v13447_v45, %v11746_v13  ;;  %v13411_v28 = vld [vmem:[%s20279_s1 + $0x196c] sm:$0xf] }
 0x3d0   :  { %7811 = vmatpush.bf16.msrb.mxu3 %v11301_v10  ;;  %7773 = vmatmul.bf16.vlgmr.msrb.gmra.mxu0 %v14995_v4  ;;  %v13483_v4 = vld [vmem:[%s20279_s1 + $0x1bac] sm:$0xf]  ;;  %v11474_v56 = vld [vmem:[%s20279_s1 + $0x1878] sm:$0xf0]  ;;  %v11877_v59 = vor.u32 %v13479_v14, %v11874_v53  ;;  %v7580_v36 = vadd.f32 %v7579_v34, %v7567_v29 }
 0x3d1   :  { %7817 = vmatpush.bf16.msra.mxu0 %v11541_v21  ;;  %7786 = vmatmul.bf16.vlgmr.msrb.gmra.mxu1 %v14999_v6  ;;  %v11490_v6 = vld [vmem:[%s20279_s1 + $0x1898] sm:$0xf0]  ;;  %v13443_v61 = vld [vmem:[%s20279_s1 + $0x1a6c] sm:$0xf]  ;;  %v11477_v63 = vor.u32 %v13379_v49, %v11474_v56 }
 0x3d2   :  { %7830 = vmatpush.bf16.msra.mxu1 %v11669_v31  ;;  %7799 = vmatmul.bf16.vlgmr.msrb.gmra.mxu2 %v14997_v5  ;;  %v13383_v5 = vld [vmem:[%s20279_s1 + $0x188c] sm:$0xf]  ;;  %v11602_v40 = vld [vmem:[%s20279_s1 + $0x1978] sm:$0xf0] }
 0x3d3   :  { %7843 = vmatpush.bf16.msra.mxu2 %v11797_v35  ;;  %7812 = vmatmul.bf16.vlgmr.msrb.gmra.mxu3 %v15001_v7  ;;  %v11893_v7 = vor.u32 %v13483_v4, %v11890_v44  ;;  %v11493_v47 = vor.u32 %v13383_v5, %v11490_v6  ;;  %v11730_v62 = vld [vmem:[%s20279_s1 + $0x1a78] sm:$0xf0]  ;;  %v13475_v55 = vld [vmem:[%s20279_s1 + $0x1b6c] sm:$0xf]  ;;  %v11605_v3 = vor.u32 %v13411_v28, %v11602_v40 }
 0x3d4   :  { %7856 = vmatpush.bf16.msra.mxu3 %v11925_v37  ;;  %v11858_v12 = vld [vmem:[%s20279_s1 + $0x1b78] sm:$0xf0]  ;;  %v11733_v8 = vor.u32 %v13443_v61, %v11730_v62  ;;  %v13375_v19 = vld [vmem:[%s20279_s1 + $0x184c] sm:$0xf] }
 0x3d5   :  { %7818 = vmatpush.bf16.msra.mxu0 %v11525_v23  ;;  %v11458_v30 = vld [vmem:[%s20279_s1 + $0x1858] sm:$0xf0]  ;;  %v13407_v58 = vld [vmem:[%s20279_s1 + $0x194c] sm:$0xf]  ;;  %v7592_v11 = vpop.f32.mrf.mxu2  ;;  %v11861_v26 = vor.u32 %v13475_v55, %v11858_v12  ;;  %v7568_v0 = vpop.f32.mrf.mxu0 }
 0x3d6   :  { %7831 = vmatpush.bf16.msra.mxu1 %v11653_v20  ;;  %v11586_v10 = vld [vmem:[%s20279_s1 + $0x1958] sm:$0xf0]  ;;  %v13439_v21 = vld [vmem:[%s20279_s1 + $0x1a4c] sm:$0xf]  ;;  %v7593_v35 = vadd.f32 %v7592_v11, %v7580_v36  ;;  %v7605_v60 = vpop.f32.mrf.mxu3  ;;  %v11461_v37 = vor.u32 %v13375_v19, %v11458_v30 }
 0x3d7   :  { %7844 = vmatpush.bf16.msra.mxu2 %v11781_v41  ;;  %v11714_v31 = vld [vmem:[%s20279_s1 + $0x1a58] sm:$0xf0]  ;;  %v13471_v24 = vld [vmem:[%s20279_s1 + $0x1b4c] sm:$0xf]  ;;  %v11589_v1 = vor.u32 %v13407_v58, %v11586_v10  ;;  %v7581_v41 = vpop.f32.mrf.mxu1 }
 0x3d8   :  { %7857 = vmatpush.bf16.msra.mxu3 %v11909_v25  ;;  %v11842_v32 = vld [vmem:[%s20279_s1 + $0x1b58] sm:$0xf0]  ;;  %v19900_v38 = vadd.f32 %v7605_v60, %v7593_v35  ;;  %v11717_v2 = vor.u32 %v13439_v21, %v11714_v31  ;;  %v13371_v39 = vld [vmem:[%s20279_s1 + $0x182c] sm:$0xf] }
 0x3d9   :  { %7819 = vmatpush.bf16.msra.mxu0 %v11509_v17  ;;  %v11442_v23 = vld [vmem:[%s20279_s1 + $0x1838] sm:$0xf0]  ;;  %v13403_v20 = vld [vmem:[%s20279_s1 + $0x192c] sm:$0xf]  ;;  %v11845_v42 = vor.u32 %v13471_v24, %v11842_v32  ;;  %v13684_v24 = vld [vmem:[#allocation1] sm:$0xff] }
 0x3da   :  { %7832 = vmatpush.bf16.msra.mxu1 %v11637_v46  ;;  %v11570_v50 = vld [vmem:[%s20279_s1 + $0x1938] sm:$0xf0]  ;;  %v13435_v51 = vld [vmem:[%s20279_s1 + $0x1a2c] sm:$0xf]  ;;  %v11445_v16 = vor.u32 %v13371_v39, %v11442_v23 }
 0x3db   :  { %7845 = vmatpush.bf16.msra.mxu2 %v11765_v9  ;;  %v11698_v25 = vld [vmem:[%s20279_s1 + $0x1a38] sm:$0xf0]  ;;  %v13467_v52 = vld [vmem:[%s20279_s1 + $0x1b2c] sm:$0xf]  ;;  %v11573_v17 = vor.u32 %v13403_v20, %v11570_v50 }
 0x3dc   :  { %7858 = vmatpush.bf16.msra.mxu3 %v11893_v7  ;;  %v11826_v15 = vld [vmem:[%s20279_s1 + $0x1b38] sm:$0xf0]  ;;  %v13367_v4 = vld [vmem:[%s20279_s1 + $0x180c] sm:$0xf]  ;;  %v11701_v46 = vor.u32 %v13435_v51, %v11698_v25 }
 0x3dd   :  { %7820 = vmatpush.bf16.msra.mxu0 %v11493_v47  ;;  %v11426_v44 = vld [vmem:[%s20279_s1 + $0x1818] sm:$0xf0]  ;;  %v13399_v9 = vld [vmem:[%s20279_s1 + $0x190c] sm:$0xf]  ;;  %v7594_v43 = vpop.f32.mrf.mxu2  ;;  %v11829_v7 = vor.u32 %v13467_v52, %v11826_v15 }
 0x3de   :  { %7833 = vmatpush.bf16.msra.mxu1 %v11621_v48  ;;  %v11554_v5 = vld [vmem:[%s20279_s1 + $0x1918] sm:$0xf0]  ;;  %v13431_v6 = vld [vmem:[%s20279_s1 + $0x1a0c] sm:$0xf]  ;;  %v7607_v14 = vpop.f32.mrf.mxu3  ;;  %v11429_v48 = vor.u32 %v13367_v4, %v11426_v44 }
 0x3df   :  { %7846 = vmatpush.bf16.msra.mxu2 %v11749_v27  ;;  %v11682_v57 = vld [vmem:[%s20279_s1 + $0x1a18] sm:$0xf0]  ;;  %v13463_v45 = vld [vmem:[%s20279_s1 + $0x1b0c] sm:$0xf]  ;;  %v11557_v28 = vor.u32 %v13399_v9, %v11554_v5 }
 0x3e0   :  { %7859 = vmatpush.bf16.msra.mxu3 %v11877_v59  ;;  %v11810_v13 = vld [vmem:[%s20279_s1 + $0x1b18] sm:$0xf0]  ;;  %v13523_v53 = vld [vmem:[%s20279_s1 + $0x1cec] sm:$0xf]  ;;  %v11685_v29 = vor.u32 %v13431_v6, %v11682_v57 }
 0x3e1   :  { %7821 = vmatpush.bf16.msra.mxu0 %v11477_v63  ;;  %v12050_v47 = vld [vmem:[%s20279_s1 + $0x1cf8] sm:$0xf0]  ;;  %v13555_v18 = vld [vmem:[%s20279_s1 + $0x1dec] sm:$0xf]  ;;  %v11813_v40 = vor.u32 %v13463_v45, %v11810_v13 }
 0x3e2   :  { %7834 = vmatpush.bf16.msra.mxu1 %v11605_v3  ;;  %v12178_v27 = vld [vmem:[%s20279_s1 + $0x1df8] sm:$0xf0]  ;;  %v13587_v49 = vld [vmem:[%s20279_s1 + $0x1eec] sm:$0xf]  ;;  %v12053_v61 = vor.u32 %v13523_v53, %v12050_v47 }
 0x3e3   :  { %7847 = vmatpush.bf16.msra.mxu2 %v11733_v8  ;;  %v12306_v56 = vld [vmem:[%s20279_s1 + $0x1ef8] sm:$0xf0]  ;;  %v13619_v34 = vld [vmem:[%s20279_s1 + $0x1fec] sm:$0xf]  ;;  %v12181_v62 = vor.u32 %v13555_v18, %v12178_v27 }
 0x3e4   :  { %7860 = vmatpush.bf16.msra.mxu3 %v11861_v26  ;;  %v12434_v59 = vld [vmem:[%s20279_s1 + $0x1ff8] sm:$0xf0]  ;;  %v12309_v55 = vor.u32 %v13587_v49, %v12306_v56  ;;  %v13519_v12 = vld [vmem:[%s20279_s1 + $0x1ccc] sm:$0xf] }
 0x3e5   :  { %7822 = vmatpush.bf16.msra.mxu0 %v11461_v37  ;;  %v12034_v36 = vld [vmem:[%s20279_s1 + $0x1cd8] sm:$0xf0]  ;;  %v13551_v63 = vld [vmem:[%s20279_s1 + $0x1dcc] sm:$0xf]  ;;  %v12437_v3 = vor.u32 %v13619_v34, %v12434_v59 }
 0x3e6   :  { %7835 = vmatpush.bf16.msra.mxu1 %v11589_v1  ;;  %v12162_v8 = vld [vmem:[%s20279_s1 + $0x1dd8] sm:$0xf0]  ;;  %v13583_v19 = vld [vmem:[%s20279_s1 + $0x1ecc] sm:$0xf]  ;;  %v12037_v26 = vor.u32 %v13519_v12, %v12034_v36 }
 0x3e7   :  { %7848 = vmatpush.bf16.msra.mxu2 %v11717_v2  ;;  %v12290_v30 = vld [vmem:[%s20279_s1 + $0x1ed8] sm:$0xf0]  ;;  %v13615_v58 = vld [vmem:[%s20279_s1 + $0x1fcc] sm:$0xf]  ;;  %v12165_v10 = vor.u32 %v13551_v63, %v12162_v8  ;;  %v13685_v2 = vld [vmem:[#allocation1 + $0x12] sm:$0xff] }
 0x3e8   :  { %7861 = vmatpush.bf16.msra.mxu3 %v11845_v42  ;;  %v12418_v11 = vld [vmem:[%s20279_s1 + $0x1fd8] sm:$0xf0]  ;;  %v12293_v21 = vor.u32 %v13583_v19, %v12290_v30  ;;  %v13515_v31 = vld [vmem:[%s20279_s1 + $0x1cac] sm:$0xf] }
 0x3e9   :  { %7823 = vmatpush.bf16.msra.mxu0 %v11445_v16  ;;  %v12018_v35 = vld [vmem:[%s20279_s1 + $0x1cb8] sm:$0xf0]  ;;  %v13547_v60 = vld [vmem:[%s20279_s1 + $0x1dac] sm:$0xf]  ;;  %v12421_v32 = vor.u32 %v13615_v58, %v12418_v11 }
 0x3ea   :  { %7836 = vmatpush.bf16.msra.mxu1 %v11573_v17  ;;  %v12146_v37 = vld [vmem:[%s20279_s1 + $0x1db8] sm:$0xf0]  ;;  %v13579_v0 = vld [vmem:[%s20279_s1 + $0x1eac] sm:$0xf]  ;;  %v12021_v42 = vor.u32 %v13515_v31, %v12018_v35 }
 0x3eb   :  { %7849 = vmatpush.bf16.msra.mxu2 %v11701_v46  ;;  %v12274_v1 = vld [vmem:[%s20279_s1 + $0x1eb8] sm:$0xf0]  ;;  %v13686_v39 = vld [vmem:[#allocation1 + $0x9] sm:$0xff]  ;;  %v12149_v50 = vor.u32 %v13547_v60, %v12146_v37 }
 0x3ec   :  { %7862 = vmatpush.bf16.msra.mxu3 %v11829_v7  ;;  %v13611_v23 = vld [vmem:[%s20279_s1 + $0x1fac] sm:$0xf]  ;;  %v12402_v20 = vld [vmem:[%s20279_s1 + $0x1fb8] sm:$0xf0]  ;;  %v12277_v51 = vor.u32 %v13579_v0, %v12274_v1 }
 0x3ed   :  { %7824 = vmatpush.bf16.msra.mxu0 %v11429_v48  ;;  %v13687_v41 = vld [vmem:[#allocation1 + $0x1b] sm:$0xff]  ;;  %v13511_v25 = vld [vmem:[%s20279_s1 + $0x1c8c] sm:$0xf]  ;;  %v12405_v16 = vor.u32 %v13611_v23, %v12402_v20  ;;  %v7618_v46 = vpop.f32.mrf.mxu0 }
 0x3ee   :  { %7837 = vmatpush.bf16.msra.mxu1 %v11557_v28  ;;  %v12002_v52 = vld [vmem:[%s20279_s1 + $0x1c98] sm:$0xf0]  ;;  %v13543_v15 = vld [vmem:[%s20279_s1 + $0x1d8c] sm:$0xf]  ;;  %v7619_v6 = vadd.f32 %v7618_v46, %v19900_v38  ;;  %v7631_v7 = vpop.f32.mrf.mxu1 }
 0x3ef   :  { %7850 = vmatpush.bf16.msra.mxu2 %v11685_v29  ;;  %v12130_v4 = vld [vmem:[%s20279_s1 + $0x1d98] sm:$0xf0]  ;;  %v13575_v44 = vld [vmem:[%s20279_s1 + $0x1e8c] sm:$0xf]  ;;  %v12005_v43 = vor.u32 %v13511_v25, %v12002_v52 }
 0x3f0   :  { %7863 = vmatpush.bf16.msra.mxu3 %v11813_v40  ;;  %7825 = vmatmul.bf16.vlgmr.msra.gmra.mxu0 %v13684_v24  ;;  %v12258_v17 = vld [vmem:[%s20279_s1 + $0x1e98] sm:$0xf0]  ;;  %v13607_v9 = vld [vmem:[%s20279_s1 + $0x1f8c] sm:$0xf]  ;;  %v12133_v57 = vor.u32 %v13543_v15, %v12130_v4  ;;  %v7632_v47 = vadd.f32 %v7631_v7, %v7619_v6 }
 0x3f1   :  { %7869 = vmatpush.bf16.msrb.mxu0 %v12053_v61  ;;  %7838 = vmatmul.bf16.vlgmr.msra.gmra.mxu1 %v13686_v39  ;;  %v12386_v5 = vld [vmem:[%s20279_s1 + $0x1f98] sm:$0xf0]  ;;  %v12261_v45 = vor.u32 %v13575_v44, %v12258_v17  ;;  %v13507_v13 = vld [vmem:[%s20279_s1 + $0x1c6c] sm:$0xf] }
 0x3f2   :  { %7882 = vmatpush.bf16.msrb.mxu1 %v12181_v62  ;;  %7851 = vmatmul.bf16.vlgmr.msra.gmra.mxu2 %v13685_v2  ;;  %v11986_v14 = vld [vmem:[%s20279_s1 + $0x1c78] sm:$0xf0]  ;;  %v13539_v53 = vld [vmem:[%s20279_s1 + $0x1d6c] sm:$0xf]  ;;  %v12389_v38 = vor.u32 %v13607_v9, %v12386_v5 }
 0x3f3   :  { %7895 = vmatpush.bf16.msrb.mxu2 %v12309_v55  ;;  %7864 = vmatmul.bf16.vlgmr.msra.gmra.mxu3 %v13687_v41  ;;  %v12114_v18 = vld [vmem:[%s20279_s1 + $0x1d78] sm:$0xf0]  ;;  %v13571_v48 = vld [vmem:[%s20279_s1 + $0x1e6c] sm:$0xf]  ;;  %v11989_v28 = vor.u32 %v13507_v13, %v11986_v14  ;;  %v13628_v13 = vld [vmem:[%s20281_s3 + $0x30] sm:$0xff] }
 0x3f4   :  { %7908 = vmatpush.bf16.msrb.mxu3 %v12437_v3  ;;  %v12242_v27 = vld [vmem:[%s20279_s1 + $0x1e78] sm:$0xf0]  ;;  %v13603_v49 = vld [vmem:[%s20279_s1 + $0x1f6c] sm:$0xf]  ;;  %v12117_v29 = vor.u32 %v13539_v53, %v12114_v18  ;;  %v13636_v14 = vld [vmem:[%s20281_s3 + $0x70] sm:$0xff] }
 0x3f5   :  { %7870 = vmatpush.bf16.msrb.mxu0 %v12037_v26  ;;  %v12370_v56 = vld [vmem:[%s20279_s1 + $0x1f78] sm:$0xf0]  ;;  %v12245_v34 = vor.u32 %v13571_v48, %v12242_v27  ;;  %v13503_v59 = vld [vmem:[%s20279_s1 + $0x1c4c] sm:$0xf]  ;;  %v7644_v55 = vpop.f32.mrf.mxu2  ;;  %v7620_v58 = vpop.f32.mrf.mxu0  ;;  %v13644_v53 = vld [vmem:[%s20281_s3 + $0xb0] sm:$0xff] }
 0x3f6   :  { %7883 = vmatpush.bf16.msrb.mxu1 %v12165_v10  ;;  %v11970_v40 = vld [vmem:[%s20279_s1 + $0x1c58] sm:$0xf0]  ;;  %v13535_v61 = vld [vmem:[%s20279_s1 + $0x1d4c] sm:$0xf]  ;;  %v12373_v62 = vor.u32 %v13603_v49, %v12370_v56  ;;  %v7645_v3 = vadd.f32 %v7644_v55, %v7632_v47  ;;  %v7657_v8 = vpop.f32.mrf.mxu3  ;;  %v7633_v26 = vpop.f32.mrf.mxu1 }
 0x3f7   :  { %7896 = vmatpush.bf16.msrb.mxu2 %v12293_v21  ;;  %v12098_v12 = vld [vmem:[%s20279_s1 + $0x1d58] sm:$0xf0]  ;;  %v13567_v36 = vld [vmem:[%s20279_s1 + $0x1e4c] sm:$0xf]  ;;  %v11973_v11 = vor.u32 %v13503_v59, %v11970_v40  ;;  %v13634_v40 = vld [vmem:[%s20281_s3 + $0x60] sm:$0xff] }
 0x3f8   :  { %7909 = vmatpush.bf16.msrb.mxu3 %v12421_v32  ;;  %v12226_v63 = vld [vmem:[%s20279_s1 + $0x1e58] sm:$0xf0]  ;;  %v13599_v19 = vld [vmem:[%s20279_s1 + $0x1f4c] sm:$0xf]  ;;  %v20095_v10 = vadd.f32 %v7657_v8, %v7645_v3  ;;  %v12101_v21 = vor.u32 %v13535_v61, %v12098_v12  ;;  %v13642_v61 = vld [vmem:[%s20281_s3 + $0xa0] sm:$0xff] }
 0x3f9   :  { %7871 = vmatpush.bf16.msrb.mxu0 %v12021_v42  ;;  %v12354_v30 = vld [vmem:[%s20279_s1 + $0x1f58] sm:$0xf0]  ;;  %v12229_v31 = vor.u32 %v13567_v36, %v12226_v63  ;;  %v13499_v35 = vld [vmem:[%s20279_s1 + $0x1c2c] sm:$0xf]  ;;  %v13632_v26 = vld [vmem:[%s20281_s3 + $0x50] sm:$0xff] }
 0x3fa   :  { %7884 = vmatpush.bf16.msrb.mxu1 %v12149_v50  ;;  %v11954_v60 = vld [vmem:[%s20279_s1 + $0x1c38] sm:$0xf0]  ;;  %v13531_v24 = vld [vmem:[%s20279_s1 + $0x1d2c] sm:$0xf]  ;;  %v12357_v32 = vor.u32 %v13599_v19, %v12354_v30  ;;  %v13624_v30 = vld [vmem:[%s20281_s3 + $0x10] sm:$0xff] }
 0x3fb   :  { %7897 = vmatpush.bf16.msrb.mxu2 %v12277_v51  ;;  %v12082_v37 = vld [vmem:[%s20279_s1 + $0x1d38] sm:$0xf0]  ;;  %v13563_v0 = vld [vmem:[%s20279_s1 + $0x1e2c] sm:$0xf]  ;;  %v11957_v23 = vor.u32 %v13499_v35, %v11954_v60 }
 0x3fc   :  { %7910 = vmatpush.bf16.msrb.mxu3 %v12405_v16  ;;  %v12210_v1 = vld [vmem:[%s20279_s1 + $0x1e38] sm:$0xf0]  ;;  %v13595_v2 = vld [vmem:[%s20279_s1 + $0x1f2c] sm:$0xf]  ;;  %v12085_v20 = vor.u32 %v13531_v24, %v12082_v37  ;;  %v7921_v37 = vmax.f32 %v16328_v54, 0.0 }
 0x3fd   :  { %7872 = vmatpush.bf16.msrb.mxu0 %v12005_v43  ;;  %v12338_v39 = vld [vmem:[%s20279_s1 + $0x1f38] sm:$0xf0]  ;;  %v12213_v41 = vor.u32 %v13563_v0, %v12210_v1  ;;  %v13495_v42 = vld [vmem:[%s20279_s1 + $0x1c0c] sm:$0xf]  ;;  %v7646_v4 = vpop.f32.mrf.mxu2  ;;  %v13630_v0 = vld [vmem:[%s20281_s3 + $0x40] sm:$0xff] }
 0x3fe   :  { %7885 = vmatpush.bf16.msrb.mxu1 %v12133_v57  ;;  %v11938_v50 = vld [vmem:[%s20279_s1 + $0x1c18] sm:$0xf0]  ;;  %v13527_v51 = vld [vmem:[%s20279_s1 + $0x1d0c] sm:$0xf]  ;;  %v12341_v25 = vor.u32 %v13595_v2, %v12338_v39  ;;  %v7659_v46 = vpop.f32.mrf.mxu3  ;;  %v13638_v1 = vld [vmem:[%s20281_s3 + $0x80] sm:$0xff]  ;;  %v7922_v2 = vmax.f32 %v17914_v22, 0.0 }
 0x3ff   :  { %7898 = vmatpush.bf16.msrb.mxu2 %v12261_v45  ;;  %v12066_v52 = vld [vmem:[%s20279_s1 + $0x1d18] sm:$0xf0]  ;;  %v13559_v15 = vld [vmem:[%s20279_s1 + $0x1e0c] sm:$0xf]  ;;  %v11941_v9 = vor.u32 %v13495_v42, %v11938_v50  ;;  %v7923_v39 = vmax.f32 %v19500_v33, 0.0 }
 0x400   :  { %7911 = vmatpush.bf16.msrb.mxu3 %v12389_v38  ;;  %v12194_v16 = vld [vmem:[%s20279_s1 + $0x1e18] sm:$0xf0]  ;;  %v13591_v44 = vld [vmem:[%s20279_s1 + $0x1f0c] sm:$0xf]  ;;  %v12069_v5 = vor.u32 %v13527_v51, %v12066_v52  ;;  %v13688_v38 = vld [vmem:[#allocation1 + $0x24] sm:$0xff] }
 0x401   :  { %7873 = vmatpush.bf16.msrb.mxu0 %v11989_v28  ;;  %v12322_v17 = vld [vmem:[%s20279_s1 + $0x1f18] sm:$0xf0]  ;;  %v12197_v6 = vor.u32 %v13559_v15, %v12194_v16  ;;  %v13689_v47 = vld [vmem:[#allocation1 + $0x2d] sm:$0xff]  ;;  %v7927_v54 = vpack.c.bf16 %v7923_v39, %v7923_v39 }
 0x402   :  { %7886 = vmatpush.bf16.msrb.mxu1 %v12117_v29  ;;  %v12325_v43 = vor.u32 %v13591_v44, %v12322_v17  ;;  %v13629_v7 = vld [vmem:[%s20281_s3 + $0x38] sm:$0xff]  ;;  %v13627_v27 = vld [vmem:[%s20281_s3 + $0x28] sm:$0xff] }
 0x403   :  { %7899 = vmatpush.bf16.msrb.mxu2 %v12245_v34  ;;  %v13637_v57 = vld [vmem:[%s20281_s3 + $0x78] sm:$0xff]  ;;  %v13635_v49 = vld [vmem:[%s20281_s3 + $0x68] sm:$0xff]  ;;  %v13626_v34 = vld [vmem:[%s20281_s3 + $0x20] sm:$0xff] }
 0x404   :  { %7912 = vmatpush.bf16.msrb.mxu3 %v12373_v62  ;;  %v13645_v45 = vld [vmem:[%s20281_s3 + $0xb8] sm:$0xff]  ;;  %v13643_v56 = vld [vmem:[%s20281_s3 + $0xa8] sm:$0xff] }
 0x405   :  { %7874 = vmatpush.bf16.msrb.mxu0 %v11973_v11  ;;  %v13690_v18 = vld [vmem:[#allocation1 + $0x36] sm:$0xff]  ;;  %v13691_v48 = vld [vmem:[#allocation1 + $0x3f] sm:$0xff]  ;;  %v13639_v35 = vld [vmem:[%s20281_s3 + $0x88] sm:$0xff] }
 0x406   :  { %7887 = vmatpush.bf16.msrb.mxu1 %v12101_v21  ;;  %v13625_v55 = vld [vmem:[%s20281_s3 + $0x18] sm:$0xff]  ;;  %v13623_v21 = vld [vmem:[%s20281_s3 + $0x8] sm:$0xff] }
 0x407   :  { %7900 = vmatpush.bf16.msrb.mxu2 %v12229_v31  ;;  %v13633_v12 = vld [vmem:[%s20281_s3 + $0x58] sm:$0xff]  ;;  %v13631_v31 = vld [vmem:[%s20281_s3 + $0x48] sm:$0xff] }
 0x408   :  { %7913 = vmatpush.bf16.msrb.mxu3 %v12357_v32  ;;  %v13641_v36 = vld [vmem:[%s20281_s3 + $0x98] sm:$0xff]  ;;  %v13622_v32 = vld [vmem:[%s20281_s3] sm:$0xff]  ;;  %v13659_v39 = vld [vmem:[%s20283_s5 + $0x28] sm:$0xff] }
 0x409   :  { %7875 = vmatpush.bf16.msrb.mxu0 %v11957_v23  ;;  %v7925_v23 = vpack.c.bf16 %v7921_v37, %v7921_v37 }
 0x40a   :  { %7888 = vmatpush.bf16.msrb.mxu1 %v12085_v20  ;;  %v7926_v20 = vpack.c.bf16 %v7922_v2, %v7922_v2 }
 0x40b   :  { %7901 = vmatpush.bf16.msrb.mxu2 %v12213_v41 }
 0x40c   :  { %7914 = vmatpush.bf16.msrb.mxu3 %v12341_v25 }
 0x40d   :  { %7876 = vmatpush.bf16.msrb.mxu0 %v11941_v9  ;;  %v7670_v28 = vpop.f32.mrf.mxu0 }
 0x40e   :  { %7889 = vmatpush.bf16.msrb.mxu1 %v12069_v5  ;;  %v7671_v29 = vadd.f32 %v7670_v28, %v20095_v10  ;;  %v7683_v59 = vpop.f32.mrf.mxu1  ;;  %v13640_v10 = vld [vmem:[%s20281_s3 + $0x90] sm:$0xff] }
 0x40f   :  { %7902 = vmatpush.bf16.msrb.mxu2 %v12197_v6 }
 0x410   :  { %7915 = vmatpush.bf16.msrb.mxu3 %v12325_v43  ;;  %7877 = vmatmul.bf16.vlgmr.msrb.gmra.mxu0 %v13688_v38  ;;  %v7684_v62 = vadd.f32 %v7683_v59, %v7671_v29  ;;  %v13653_v43 = vld [vmem:[%s20281_s3 + $0xf8] sm:$0xff]  ;;  %v13646_v59 = vld [vmem:[%s20281_s3 + $0xc0] sm:$0xff] }
 0x411   :  { %8189 = vmatpush.bf16.msra.mxu0 %v13629_v7  ;;  %7890 = vmatmul.bf16.vlgmr.msrb.gmra.mxu1 %v13689_v47  ;;  %v13649_v38 = vld [vmem:[%s20281_s3 + $0xd8] sm:$0xff] }
 0x412   :  { %8202 = vmatpush.bf16.msra.mxu1 %v13637_v57  ;;  %7903 = vmatmul.bf16.vlgmr.msrb.gmra.mxu2 %v13690_v18  ;;  %v13652_v57 = vld [vmem:[%s20281_s3 + $0xf0] sm:$0xff] }
 0x413   :  { %8215 = vmatpush.bf16.msra.mxu2 %v13645_v45  ;;  %7916 = vmatmul.bf16.vlgmr.msrb.gmra.mxu3 %v13691_v48  ;;  %v13651_v45 = vld [vmem:[%s20281_s3 + $0xe8] sm:$0xff]  ;;  %v13648_v48 = vld [vmem:[%s20281_s3 + $0xd0] sm:$0xff] }
 0x414   :  { %8228 = vmatpush.bf16.msra.mxu3 %v13653_v43  ;;  %v13664_v43 = vld [vmem:[%s20284_s6] ss:$0 sm:$0xff] }
 0x415   :  { %8190 = vmatpush.bf16.msra.mxu0 %v13628_v13  ;;  %v7696_v63 = vpop.f32.mrf.mxu2  ;;  %v7672_v19 = vpop.f32.mrf.mxu0 }
 0x416   :  { %8203 = vmatpush.bf16.msra.mxu1 %v13636_v14  ;;  %v7697_v3 = vadd.f32 %v7696_v63, %v7684_v62  ;;  %v7709_v8 = vpop.f32.mrf.mxu3  ;;  %v7685_v58 = vpop.f32.mrf.mxu1 }
 0x417   :  { %8216 = vmatpush.bf16.msra.mxu2 %v13644_v53  ;;  %v13650_v53 = vld [vmem:[%s20281_s3 + $0xe0] sm:$0xff] }
 0x418   :  { %v7710_v11 = vadd.f32 %v7709_v8, %v7697_v3  ;;  %8229 = vmatpush.bf16.msra.mxu3 %v13652_v57 }
 0x419   :  { %8191 = vmatpush.bf16.msra.mxu0 %v13627_v27  ;;  %v13647_v27 = vld [vmem:[%s20281_s3 + $0xc8] sm:$0xff] }
 0x41a   :  { %8204 = vmatpush.bf16.msra.mxu1 %v13635_v49 }
 0x41b   :  { %8217 = vmatpush.bf16.msra.mxu2 %v13643_v56 }
 0x41c   :  { %8230 = vmatpush.bf16.msra.mxu3 %v13651_v45 }
 0x41d   :  { %8192 = vmatpush.bf16.msra.mxu0 %v13626_v34  ;;  %v7698_v60 = vpop.f32.mrf.mxu2 }
 0x41e   :  { %8205 = vmatpush.bf16.msra.mxu1 %v13634_v40  ;;  %v7711_v24 = vpop.f32.mrf.mxu3 }
 0x41f   :  { %8218 = vmatpush.bf16.msra.mxu2 %v13642_v61 }
 0x420   :  { %8231 = vmatpush.bf16.msra.mxu3 %v13650_v53 }
 0x421   :  { %8193 = vmatpush.bf16.msra.mxu0 %v13625_v55 }
 0x422   :  { %8206 = vmatpush.bf16.msra.mxu1 %v13633_v12 }
 0x423   :  { %8219 = vmatpush.bf16.msra.mxu2 %v13641_v36 }
 0x424   :  { %8232 = vmatpush.bf16.msra.mxu3 %v13649_v38 }
 0x425   :  { %8194 = vmatpush.bf16.msra.mxu0 %v13624_v30 }
 0x426   :  { %8207 = vmatpush.bf16.msra.mxu1 %v13632_v26 }
 0x427   :  { %8220 = vmatpush.bf16.msra.mxu2 %v13640_v10 }
 0x428   :  { %8233 = vmatpush.bf16.msra.mxu3 %v13648_v48 }
 0x429   :  { %8195 = vmatpush.bf16.msra.mxu0 %v13623_v21 }
 0x42a   :  { %8208 = vmatpush.bf16.msra.mxu1 %v13631_v31 }
 0x42b   :  { %8221 = vmatpush.bf16.msra.mxu2 %v13639_v35 }
 0x42c   :  { %8234 = vmatpush.bf16.msra.mxu3 %v13647_v27 }
 0x42d   :  { %8196 = vmatpush.bf16.msra.mxu0 %v13622_v32  ;;  %v7722_v41 = vpop.f32.mrf.mxu0  ;;  %v13661_v32 = vld [vmem:[%s20283_s5 + $0x38] sm:$0xff] }
 0x42e   :  { %8209 = vmatpush.bf16.msra.mxu1 %v13630_v0  ;;  %v7723_v42 = vadd.f32 %v7722_v41, %v7710_v11  ;;  %v7735_v50 = vpop.f32.mrf.mxu1  ;;  %v13660_v0 = vld [vmem:[%s20283_s5 + $0x30] sm:$0xff] }
 0x42f   :  { %8222 = vmatpush.bf16.msra.mxu2 %v13638_v1 }
 0x430   :  { %8197 = vmatmul.bf16.vlgmr.msra.gmra.mxu0 %v7925_v23  ;;  %v7736_v51 = vadd.f32 %v7735_v50, %v7723_v42  ;;  %8235 = vmatpush.bf16.msra.mxu3 %v13646_v59  ;;  %v13658_v23 = vld [vmem:[%s20283_s5 + $0x20] sm:$0xff] }
 0x431   :  { %8210 = vmatmul.bf16.vlgmr.msra.gmra.mxu1 %v7926_v20  ;;  %8311 = vmatpush.bf16.msrb.mxu0 %v13661_v32  ;;  %v13663_v20 = vld [vmem:[%s20282_s4] ss:$0 sm:$0xff] }
 0x432   :  { %8223 = vmatmul.bf16.vlgmr.msra.gmra.mxu2 %v7927_v54  ;;  %v13657_v54 = vld [vmem:[%s20283_s5 + $0x18] sm:$0xff] }
 0x435   :  { %v7748_v25 = vpop.f32.mrf.mxu2  ;;  %v7724_v16 = vpop.f32.mrf.mxu0  ;;  %8312 = vmatpush.bf16.msrb.mxu0 %v13660_v0 }
 0x436   :  { %v7749_v52 = vadd.f32 %v7748_v25, %v7736_v51  ;;  %v7761_v15 = vpop.f32.mrf.mxu3  ;;  %v7737_v22 = vpop.f32.mrf.mxu1  ;;  %v13656_v51 = vld [vmem:[%s20283_s5 + $0x10] sm:$0xff] }
 0x438   :  { %v7762_v4 = vadd.f32 %v7761_v15, %v7749_v52 }
 0x439   :  { %8313 = vmatpush.bf16.msrb.mxu0 %v13659_v39 }
 0x43d   :  { %v7750_v33 = vpop.f32.mrf.mxu2  ;;  %8314 = vmatpush.bf16.msrb.mxu0 %v13658_v23 }
 0x43e   :  { %v7763_v44 = vpop.f32.mrf.mxu3  ;;  %v13655_v33 = vld [vmem:[%s20283_s5 + $0x8] sm:$0xff] }
 0x43f   :  { %v13654_v44 = vld [vmem:[%s20283_s5] sm:$0xff] }
 0x441   :  { %8315 = vmatpush.bf16.msrb.mxu0 %v13657_v54 }
 0x445   :  { %8316 = vmatpush.bf16.msrb.mxu0 %v13656_v51 }
 0x449   :  { %8317 = vmatpush.bf16.msrb.mxu0 %v13655_v33 }
 0x44d   :  { %v7774_v17 = vpop.f32.mrf.mxu0  ;;  %8318 = vmatpush.bf16.msrb.mxu0 %v13654_v44 }
 0x44e   :  { %v7787_v46 = vpop.f32.mrf.mxu1  ;;  %v7775_v56 = vadd.f32 %v7774_v17, %v7762_v4 }
 0x450   :  { %v7788_v40 = vadd.f32 %v7787_v46, %v7775_v56 }
 0x455   :  { %v7800_v9 = vpop.f32.mrf.mxu2  ;;  %v7776_v6 = vpop.f32.mrf.mxu0 }
 0x456   :  { %v7813_v5 = vpop.f32.mrf.mxu3  ;;  %v7789_v7 = vpop.f32.mrf.mxu1  ;;  %v7801_v61 = vadd.f32 %v7800_v9, %v7788_v40 }
 0x458   :  { %v7814_v12 = vadd.f32 %v7813_v5, %v7801_v61 }
 0x45d   :  { %v7802_v13 = vpop.f32.mrf.mxu2 }
 0x45e   :  { %v7815_v14 = vpop.f32.mrf.mxu3 }
 0x46d   :  { %v7826_v47 = vpop.f32.mrf.mxu0 }
 0x46e   :  { %v7839_v18 = vpop.f32.mrf.mxu1  ;;  %v7827_v36 = vadd.f32 %v7826_v47, %v7814_v12 }
 0x470   :  { %v7840_v63 = vadd.f32 %v7839_v18, %v7827_v36 }
 0x475   :  { %v7852_v49 = vpop.f32.mrf.mxu2  ;;  %v7828_v29 = vpop.f32.mrf.mxu0 }
 0x476   :  { %v7865_v28 = vpop.f32.mrf.mxu3  ;;  %v7841_v34 = vpop.f32.mrf.mxu1  ;;  %v7853_v3 = vadd.f32 %v7852_v49, %v7840_v63 }
 0x478   :  { %v7866_v8 = vadd.f32 %v7865_v28, %v7853_v3 }
 0x47d   :  { %v7854_v62 = vpop.f32.mrf.mxu2 }
 0x47e   :  { %v7867_v55 = vpop.f32.mrf.mxu3 }
 0x48d   :  { %v7878_v19 = vpop.f32.mrf.mxu0 }
 0x48e   :  { %v7891_v30 = vpop.f32.mrf.mxu1  ;;  %v7879_v58 = vadd.f32 %v7878_v19, %v7866_v8 }
 0x490   :  { %v7892_v11 = vadd.f32 %v7891_v30, %v7879_v58 }
 0x495   :  { %v7904_v26 = vpop.f32.mrf.mxu2  ;;  %v7880_v31 = vpop.f32.mrf.mxu0 }
 0x496   :  { %v7917_v10 = vpop.f32.mrf.mxu3  ;;  %v7905_v21 = vadd.f32 %v7904_v26, %v7892_v11  ;;  %v7893_v35 = vpop.f32.mrf.mxu1 }
 0x498   :  { %v7918_v60 = vadd.f32 %v7917_v10, %v7905_v21 }
 0x49a   :  { %v7924_v24 = vmax.f32 %v7918_v60, 0.0 }
 0x49c   :  { %v7928_v37 = vpack.c.bf16 %v7924_v24, %v7924_v24 }
 0x49d   :  { %v7906_v1 = vpop.f32.mrf.mxu2 }
 0x49e   :  { %v7919_v2 = vpop.f32.mrf.mxu3  ;;  %8236 = vmatmul.bf16.vlgmr.msra.gmra.mxu3 %v7928_v37 }
 0x4ad   :  { %v8198_v41 = vpop.f32.mrf.mxu0 }
 0x4ae   :  { %v8199_v42 = vadd.f32 %v13663_v20, %v8198_v41  ;;  %v8211_v50 = vpop.f32.mrf.mxu1 }
 0x4b0   :  { %v8212_v25 = vadd.f32 %v8211_v50, %v8199_v42 }
 0x4b5   :  { %v8224_v52 = vpop.f32.mrf.mxu2  ;;  %v8200_v16 = vpop.f32.mrf.mxu0 }
 0x4b6   :  { %v8225_v15 = vadd.f32 %v8224_v52, %v8212_v25  ;;  %v8213_v22 = vpop.f32.mrf.mxu1 }
 0x4bd   :  { %v8226_v4 = vpop.f32.mrf.mxu2 }
 0x521   :  { %v8237_v17 = vpop.f32.mrf.mxu3 }
 0x522   :  { %v8238_v46 = vadd.f32 %v8237_v17, %v8225_v15 }
 0x524   :  { %v8241_v9 = vmax.f32 %v8238_v46, 0.0 }
 0x526   :  { %v8242_v5 = vpack.c.bf16 %v8241_v9, %v8241_v9 }
 0x528   :  { %8319 = vmatmul.bf16.vlgmr.msrb.gmra.mxu0 %v8242_v5 }
 0x529   :  { %v8239_v6 = vpop.f32.mrf.mxu3 }
 0x5a5   :  { %v8320_v7 = vpop.f32.mrf.mxu0 }
 0x5a6   :  { %v8321_v57 = vadd.f32 %v13664_v43, %v8320_v7 }
 0x5a8   :  { %8325 = vst.msk [vmem:[#allocation2] sm:$0x3] %vm8324_vm0, %v8321_v57 }
 0x5a9   :  { %8336 = dma.vmem_to_hbm [thread:$0]  %s8332_s10, 32, %s8334_s11, [#allocation3]  }
 0x5ad   :  { %v8322_v45 = vpop.f32.mrf.mxu0 }
 0x5ae   :  { %13716 = dma.done.wait [#allocation3], 32  }
 0x5af   :  { %13717 = vsyncadd [#allocation3], 4294967264 }
 0x5b0   :  { %8341 = vsyncpa [#allocation3], 1 }

</bundles_post_ra>
